<compile_context>
chip_gen: v6e
topology: v6e:2x2x1
jax: 0.10.0
libtpu: 0.0.40
codegen_flags: <defaults>
</compile_context>

<pallas_src>
import numpy as np
import jax
import jax.numpy as jnp
from jax.experimental import pallas as pl
from jax.experimental.pallas import tpu as pltpu

_BN_EPS = 1e-5
_SUBLANE_PACK = 16        # bf16 sublane packing grain
_STORE_PACK = 8           # f32 output-channel store grain
_LANE_CHUNK = 256         # output lanes computed per matmul tile inside the kernel


def _round_up(x, m):
    return (x + m - 1) // m * m


# ----------------------------- fused Pallas kernel -----------------------------

def make_fused_conv_kernel(H, W, Mout, Mpad):
    """Fused conv1+BN+ReLU -> VMEM -> conv2+BN+ReLU over flattened (C, (D+2)*(H+2)*W) slabs."""
    Hp = H + 2
    row = Hp * W                                   # lanes per padded d-row
    tap_offsets = tuple(kd * row + kh * W for kd in range(3) for kh in range(3))
    shift = row + W                                # conv1 out (d,h,w) -> conv2 padded-in lane
    chunks = tuple((c0, min(_LANE_CHUNK, Mout - c0)) for c0 in range(0, Mout, _LANE_CHUNK))
    # TODO(synk): at production Mout replace the static chunk loops with lax.fori_loop
    # (pl.ds starts wrapped in pl.multiple_of(c0, 128)) to bound live ranges.

    def kernel(x1_ref, x2_ref, mask_ref, w1a_ref, w1b_ref, b1_ref,
               w2_ref, b2_ref, o_ref, y1_ref):
        Cm = y1_ref.shape[0]
        # Zero ONLY the halo lanes of conv2's padded input: the interior [shift, shift+Mout)
        # is fully overwritten by conv1's masked stores below; the tail is read by conv2's
        # last-D taps and must stay zero.
        y1_ref[:, :shift] = jnp.zeros((Cm, shift), y1_ref.dtype)
        y1_ref[:, shift + Mout:Mpad] = jnp.zeros((Cm, Mpad - shift - Mout), y1_ref.dtype)

        # ---- conv1 (+ folded BN) + ReLU -> padded VMEM scratch (never touches HBM) ----
        # 9 taps x 2 inputs = 18 skinny MXU dots accumulated in f32; no im2col patch copy.
        for c0, ch in chunks:
            acc = jnp.zeros((Cm, ch), jnp.float32)
            for t, off in enumerate(tap_offsets):
                acc += jnp.dot(w1a_ref[t], x1_ref[0, :, c0 + off:c0 + off + ch],
                               preferred_element_type=jnp.float32)
                acc += jnp.dot(w1b_ref[t], x2_ref[0, :, c0 + off:c0 + off + ch],
                               preferred_element_type=jnp.float32)
            # zero the garbage H-pad columns: they land exactly on conv2's zero ring.
            y = jnp.maximum(acc + b1_ref[...], 0.0) * mask_ref[:, c0:c0 + ch]
            y1_ref[:, c0 + shift:c0 + shift + ch] = y.astype(y1_ref.dtype)

        # ---- conv2 (+ folded BN) + ReLU -> lane-dense output (chunks are 128-aligned) ----
        Co = o_ref.shape[1]
        for c0, ch in chunks:
            acc = jnp.zeros((Co, ch), jnp.float32)
            for t, off in enumerate(tap_offsets):
                acc += jnp.dot(w2_ref[t], y1_ref[:, c0 + off:c0 + off + ch],
                               preferred_element_type=jnp.float32)
            o_ref[0, :, c0:c0 + ch] = jnp.maximum(acc + b2_ref[...], 0.0).astype(o_ref.dtype)

    return kernel


# ----------------------------- host-side folding / packing -----------------------------

def _bn_scale_bias(b, gamma, beta, mean, var, eps=_BN_EPS):
    scale = gamma / jnp.sqrt(var + eps)
    bias = (b - mean) * scale + beta
    return scale, bias


def _weight_taps(w, scale, cin_pad, cout_pad):
    """(Cout, Cin, 3, 3, 1) conv weight -> (9, Cout_pad, Cin_pad) bf16 with the per-output
    BN scale folded in (fold done in f32 BEFORE the bf16 cast). Tap order kd-major/kh-minor
    matches the kernel's tap_offsets."""
    cout, cin = w.shape[0], w.shape[1]
    ws = w * scale.reshape(cout, 1, 1, 1, 1)
    wt = jnp.transpose(ws[..., 0], (2, 3, 0, 1))                      # (kd, kh, Cout, Cin)
    wt = jnp.pad(wt, ((0, 0), (0, 0), (0, cout_pad - cout), (0, cin_pad - cin)))
    return wt.reshape(9, cout_pad, cin_pad).astype(jnp.bfloat16)


def _padded_slab(x, c_pad, Mpad):
    """(N, C, D, H, W) f32 -> (N, c_pad, Mpad) bf16: conv 'same' pad (1,1,0), channel pad to
    the bf16 sublane grain, flatten (D+2)(H+2)W onto lanes, tail-pad to a 128 multiple."""
    N, C, D, H, W = x.shape
    Dp, Hp = D + 2, H + 2
    xp = jnp.pad(x, ((0, 0), (0, c_pad - C), (1, 1), (1, 1), (0, 0)))
    xf = xp.reshape(N, c_pad, Dp * Hp * W)
    xf = jnp.pad(xf, ((0, 0), (0, 0), (0, Mpad - Dp * Hp * W)))
    return xf.astype(jnp.bfloat16)


def unet_conv3_fused(x1, x2, params):
    """UnetConv3 applied to cat([x1, x2], dim=1) WITHOUT materializing the concat.
    x1: (N, C1, D, H, W), x2: (N, C2, D, H, W) f32 -> (N, Cout, D, H, W) f32."""
    N, C1, D, H, W = x1.shape
    C2 = x2.shape[1]
    Cout = params['w1'].shape[0]
    Dp, Hp = D + 2, H + 2
    Mout = D * Hp * W                               # flattened output lanes (incl. 2 pad-h cols/row)
    Mpad = _round_up(Dp * Hp * W + 2 * W, 128)      # covers the largest tap-shifted read

    C1_pad = _round_up(C1, _SUBLANE_PACK)
    C2_pad = _round_up(C2, _SUBLANE_PACK)
    Cmid_pad = _round_up(Cout, _SUBLANE_PACK)       # conv1-output / conv2-input channel pad
    Cout_pad = _round_up(Cout, _STORE_PACK)         # conv2-output channel pad (f32 store grain)

    x1f = _padded_slab(x1, C1_pad, Mpad)
    x2f = _padded_slab(x2, C2_pad, Mpad)

    s1, b1 = _bn_scale_bias(params['b1'], params['g1'], params['be1'],
                            params['m1'], params['v1'])
    s2, b2 = _bn_scale_bias(params['b2'], params['g2'], params['be2'],
                            params['m2'], params['v2'])
    # conv1 weight split at the torch.cat boundary: [:C1] sees x1 (skip), [C1:] sees x2 (up).
    w1a = _weight_taps(params['w1'][:, :C1], s1, C1_pad, Cmid_pad)
    w1b = _weight_taps(params['w1'][:, C1:], s1, C2_pad, Cmid_pad)
    w2 = _weight_taps(params['w2'], s2, Cmid_pad, Cout_pad)
    b1c = jnp.pad(b1, (0, Cmid_pad - Cout)).reshape(Cmid_pad, 1).astype(jnp.float32)
    b2c = jnp.pad(b2, (0, Cout_pad - Cout)).reshape(Cout_pad, 1).astype(jnp.float32)

    # lane-validity mask: lane m is a real H column iff (m // W) % Hp < H  (host-precomputed
    # to avoid vector integer div/mod on the VPU).
    m_idx = np.arange(Mout)
    mask = jnp.asarray((((m_idx // W) % Hp) < H).astype(np.float32).reshape(1, Mout))

    kernel = make_fused_conv_kernel(H, W, Mout, Mpad)

    out = pl.pallas_call(
        kernel,
        out_shape=jax.ShapeDtypeStruct((N, Cout_pad, Mout), jnp.float32),
        grid=(N,),
        in_specs=[
            pl.BlockSpec((1, C1_pad, Mpad), lambda n: (n, 0, 0)),
            pl.BlockSpec((1, C2_pad, Mpad), lambda n: (n, 0, 0)),
            pl.BlockSpec((1, Mout), lambda n: (0, 0)),
            pl.BlockSpec((9, Cmid_pad, C1_pad), lambda n: (0, 0, 0)),
            pl.BlockSpec((9, Cmid_pad, C2_pad), lambda n: (0, 0, 0)),
            pl.BlockSpec((Cmid_pad, 1), lambda n: (0, 0)),
            pl.BlockSpec((9, Cout_pad, Cmid_pad), lambda n: (0, 0, 0)),
            pl.BlockSpec((Cout_pad, 1), lambda n: (0, 0)),
        ],
        out_specs=pl.BlockSpec((1, Cout_pad, Mout), lambda n: (n, 0, 0)),
        scratch_shapes=[pltpu.VMEM((Cmid_pad, Mpad), jnp.bfloat16)],
        compiler_params=pltpu.CompilerParams(dimension_semantics=("parallel",)),
    )(x1f, x2f, mask, w1a, w1b, b1c, w2, b2c)

    # NCDHW directly (channels-first kernel layout == PyTorch layout); drop the channel pad
    # and the 2 garbage H-pad columns per d-row.
    # TODO(synk): for production D,H,C tile D with a 1-row halo (giving v7x a second
    # "parallel" grid axis and real pipelining) and set vmem_limit_bytes from the block budget.
    return out.reshape(N, Cout_pad, D, Hp, W)[:, :Cout, :, :H, :]


# ----------------------------- JAX glue (pre-processing) -----------------------------

def _upsample2x_linear(x, axis):
    # PyTorch linear interp, align_corners=False, scale factor 2 along `axis`.
    S = x.shape[axis]
    o = jnp.arange(2 * S, dtype=jnp.float32)
    src = jnp.maximum(o * 0.5 - 0.25, 0.0)
    low = jnp.floor(src).astype(jnp.int32)
    frac = src - low.astype(jnp.float32)
    high = jnp.minimum(low + 1, S - 1)
    xl = jnp.take(x, low, axis=axis)
    xh = jnp.take(x, high, axis=axis)
    shp = [1] * x.ndim
    shp[axis] = 2 * S
    frac = frac.reshape(shp)
    return xl * (1.0 - frac) + xh * frac


def upsample_trilinear_2x2x1(x):
    # nn.Upsample(scale_factor=(2,2,1), mode='trilinear'); W scale is 1 -> identity there.
    x = _upsample2x_linear(x, axis=2)   # D
    x = _upsample2x_linear(x, axis=3)   # H
    return x


def _pad_like_torch(inputs1, a):
    # F.pad(inputs1, 2*[a, a, 0]) on NCDHW: W:(a,a), H:(0,a), D:(a,0)
    if a == 0:
        return inputs1
    if a > 0:
        return jnp.pad(inputs1, ((0, 0), (0, 0), (a, 0), (0, a), (a, a)))
    n, c, d, h, w = inputs1.shape
    return inputs1[:, :, -a:, :h + a, -a:w + a]


def unet_up3_forward(inputs1, inputs2, params):
    """UnetUp3.forward (is_deconv=False, is_batchnorm=True). Inputs/outputs NCDHW."""
    # TODO(synk): the trilinear upsample / skip-pad still run as XLA ops; the fixed 0.25/0.75
    # interp weights could be materialized inside the kernel's input path to remove these
    # remaining HBM passes.
    out2 = upsample_trilinear_2x2x1(inputs2)
    offset = out2.shape[2] - inputs1.shape[2]
    a = offset // 2
    out1 = _pad_like_torch(inputs1, a)
    # channel concat is NOT materialized: the kernel takes both slabs with split conv1 weights.
    return unet_conv3_fused(out1, out2, params)


# ----------------------------- pure-JAX reference -----------------------------

def _conv3d_ref(x, w, b):
    y = jax.lax.conv_general_dilated(
        x, w, window_strides=(1, 1, 1),
        padding=((1, 1), (1, 1), (0, 0)),
        dimension_numbers=('NCDHW', 'OIDHW', 'NCDHW'))
    return y + b.reshape(1, -1, 1, 1, 1)


def _bn_relu_ref(y, gamma, beta, mean, var, eps=_BN_EPS):
    r = lambda v: v.reshape(1, -1, 1, 1, 1)
    y = (y - r(mean)) / jnp.sqrt(r(var) + eps) * r(gamma) + r(beta)
    return jnp.maximum(y, 0.0)


def unet_up3_ref(inputs1, inputs2, p):
    out2 = upsample_trilinear_2x2x1(inputs2)
    a = (out2.shape[2] - inputs1.shape[2]) // 2
    out1 = _pad_like_torch(inputs1, a)
    x = jnp.concatenate([out1, out2], axis=1)
    y = _bn_relu_ref(_conv3d_ref(x, p['w1'], p['b1']), p['g1'], p['be1'], p['m1'], p['v1'])
    y = _bn_relu_ref(_conv3d_ref(y, p['w2'], p['b2']), p['g2'], p['be2'], p['m2'], p['v2'])
    return y


# ----------------------------- params -----------------------------

def init_params(key, in_cat, out_ch):
    # TODO(synk): BatchNorm3d is implemented in eval mode (running stats), not
    # training-mode batch statistics.
    ks = jax.random.split(key, 12)
    p = {}
    p['w1'] = 0.1 * jax.random.normal(ks[0], (out_ch, in_cat, 3, 3, 1), jnp.float32)
    p['b1'] = 0.1 * jax.random.normal(ks[1], (out_ch,), jnp.float32)
    p['g1'] = 1.0 + 0.1 * jax.random.normal(ks[2], (out_ch,), jnp.float32)
    p['be1'] = 0.1 * jax.random.normal(ks[3], (out_ch,), jnp.float32)
    p['m1'] = 0.1 * jax.random.normal(ks[4], (out_ch,), jnp.float32)
    p['v1'] = 0.5 + jax.random.uniform(ks[5], (out_ch,), jnp.float32)
    p['w2'] = 0.1 * jax.random.normal(ks[6], (out_ch, out_ch, 3, 3, 1), jnp.float32)
    p['b2'] = 0.1 * jax.random.normal(ks[7], (out_ch,), jnp.float32)
    p['g2'] = 1.0 + 0.1 * jax.random.normal(ks[8], (out_ch,), jnp.float32)
    p['be2'] = 0.1 * jax.random.normal(ks[9], (out_ch,), jnp.float32)
    p['m2'] = 0.1 * jax.random.normal(ks[10], (out_ch,), jnp.float32)
    p['v2'] = 0.5 + jax.random.uniform(ks[11], (out_ch,), jnp.float32)
    return p


if __name__ == "__main__":
    key = jax.random.PRNGKey(0)
    k1, k2, kp = jax.random.split(key, 3)

    in_size, out_size = 8, 4          # UnetUp3(in_size=8, out_size=4, is_deconv=False)
    N, D, H, W = 2, 16, 16, 4
    inputs1 = jax.random.normal(k1, (N, out_size, D, H, W), jnp.float32)          # skip connection
    inputs2 = jax.random.normal(k2, (N, in_size, D // 2, H // 2, W), jnp.float32)  # coarse features

    params = init_params(kp, in_size + out_size, out_size)

    fwd = jax.jit(unet_up3_forward)
    out = jax.block_until_ready(fwd(inputs1, inputs2, params))
    ref = jax.block_until_ready(unet_up3_ref(inputs1, inputs2, params))

    assert out.shape == (N, out_size, D, H, W), out.shape
    # Pallas path runs activations/weights in bf16 (f32 MXU accumulation, BN scale folded into
    # the bf16 weights); reference is pure f32, hence the relaxed tolerance.
    np.testing.assert_allclose(np.asarray(out), np.asarray(ref), rtol=1e-1, atol=1e-1)
    print("KERNEL_OK")
</pallas_src>

<mosaic_0001>
module attributes {stable_mosaic.version = 11 : i64} {
  func.func @kernel(%arg0: i32, %arg1: memref<1x16x1408xbf16, #tpu.memory_space<vmem>>, %arg2: memref<1x16x1408xbf16, #tpu.memory_space<vmem>>, %arg3: memref<1x1152xf32, #tpu.memory_space<vmem>>, %arg4: memref<9x16x16xbf16, #tpu.memory_space<vmem>>, %arg5: memref<9x16x16xbf16, #tpu.memory_space<vmem>>, %arg6: memref<16x1xf32, #tpu.memory_space<vmem>>, %arg7: memref<9x8x16xbf16, #tpu.memory_space<vmem>>, %arg8: memref<8x1xf32, #tpu.memory_space<vmem>>, %arg9: memref<1x8x1152xf32, #tpu.memory_space<vmem>>, %arg10: memref<16x1408xbf16, #tpu.memory_space<vmem>>) attributes {dimension_semantics = [#tpu.dimension_semantics<parallel>], iteration_bounds = array<i64: 2>, scalar_prefetch = 0 : i64, scratch_operands = 1 : i64, tpu.core_type = #tpu.core_type<tc>, window_params = [{transform_indices = @transform_0, window_bounds = array<i64: 1, 16, 1408>}, {transform_indices = @transform_1, window_bounds = array<i64: 1, 16, 1408>}, {pipeline_mode = #tpu.pipeline_mode<synchronous>, transform_indices = @transform_2, window_bounds = array<i64: 1, 1152>}, {pipeline_mode = #tpu.pipeline_mode<synchronous>, transform_indices = @transform_3, window_bounds = array<i64: 9, 16, 16>}, {pipeline_mode = #tpu.pipeline_mode<synchronous>, transform_indices = @transform_4, window_bounds = array<i64: 9, 16, 16>}, {pipeline_mode = #tpu.pipeline_mode<synchronous>, transform_indices = @transform_5, window_bounds = array<i64: 16, 1>}, {pipeline_mode = #tpu.pipeline_mode<synchronous>, transform_indices = @transform_6, window_bounds = array<i64: 9, 8, 16>}, {pipeline_mode = #tpu.pipeline_mode<synchronous>, transform_indices = @transform_7, window_bounds = array<i64: 8, 1>}, {transform_indices = @transform_8, window_bounds = array<i64: 1, 8, 1152>}]} {
    %cst = arith.constant 0.000000e+00 : bf16
    %0 = vector.broadcast %cst : bf16 to vector<16x76xbf16>
    %c0 = arith.constant 0 : index
    %c0_0 = arith.constant 0 : index
    %1 = vector.load %arg10[%c0, %c0_0] : memref<16x1408xbf16, #tpu.memory_space<vmem>>, vector<16x76xbf16>
    tpu.vector_store %arg10[%c0, %c0_0], %0 {strides = array<i32>} : memref<16x1408xbf16, #tpu.memory_space<vmem>>, vector<16x76xbf16>,
    %cst_1 = arith.constant 0.000000e+00 : bf16
    %2 = vector.broadcast %cst_1 : bf16 to vector<16x180xbf16>
    %c0_2 = arith.constant 0 : index
    %c1228 = arith.constant 1228 : index
    %3 = vector.load %arg10[%c0_2, %c1228] : memref<16x1408xbf16, #tpu.memory_space<vmem>>, vector<16x180xbf16>
    tpu.vector_store %arg10[%c0_2, %c1228], %2 {strides = array<i32>} : memref<16x1408xbf16, #tpu.memory_space<vmem>>, vector<16x180xbf16>,
    %cst_3 = arith.constant 0.000000e+00 : f32
    %4 = vector.broadcast %cst_3 : f32 to vector<16x256xf32>
    %c0_4 = arith.constant 0 : index
    %c0_5 = arith.constant 0 : index
    %c0_6 = arith.constant 0 : index
    %5 = vector.load %arg4[%c0_4, %c0_5, %c0_6] : memref<9x16x16xbf16, #tpu.memory_space<vmem>>, vector<1x16x16xbf16>
    %6 = vector.shape_cast %5 : vector<1x16x16xbf16> to vector<16x16xbf16>
    %c0_7 = arith.constant 0 : index
    %c0_8 = arith.constant 0 : index
    %c0_9 = arith.constant 0 : index
    %7 = vector.load %arg1[%c0_7, %c0_8, %c0_9] : memref<1x16x1408xbf16, #tpu.memory_space<vmem>>, vector<1x16x256xbf16>
    %8 = vector.shape_cast %7 : vector<1x16x256xbf16> to vector<16x256xbf16>
    %cst_10 = arith.constant dense<0.000000e+00> : vector<16x256xf32>
    %9 = tpu.matmul %6, %8, %cst_10 {dimension_numbers = #tpu.dot_dimension_numbers<[1], [0], [0], [1], [0, 0, 1, 1], [], []>} : vector<16x16xbf16>, vector<16x256xbf16>, vector<16x256xf32> -> vector<16x256xf32>
    %10 = arith.addf %4, %9 : vector<16x256xf32>
    %c0_11 = arith.constant 0 : index
    %c0_12 = arith.constant 0 : index
    %c0_13 = arith.constant 0 : index
    %11 = vector.load %arg5[%c0_11, %c0_12, %c0_13] : memref<9x16x16xbf16, #tpu.memory_space<vmem>>, vector<1x16x16xbf16>
    %12 = vector.shape_cast %11 : vector<1x16x16xbf16> to vector<16x16xbf16>
    %c0_14 = arith.constant 0 : index
    %c0_15 = arith.constant 0 : index
    %c0_16 = arith.constant 0 : index
    %13 = vector.load %arg2[%c0_14, %c0_15, %c0_16] : memref<1x16x1408xbf16, #tpu.memory_space<vmem>>, vector<1x16x256xbf16>
    %14 = vector.shape_cast %13 : vector<1x16x256xbf16> to vector<16x256xbf16>
    %cst_17 = arith.constant dense<0.000000e+00> : vector<16x256xf32>
    %15 = tpu.matmul %12, %14, %cst_17 {dimension_numbers = #tpu.dot_dimension_numbers<[1], [0], [0], [1], [0, 0, 1, 1], [], []>} : vector<16x16xbf16>, vector<16x256xbf16>, vector<16x256xf32> -> vector<16x256xf32>
    %16 = arith.addf %10, %15 : vector<16x256xf32>
    %c1 = arith.constant 1 : index
    %c0_18 = arith.constant 0 : index
    %c0_19 = arith.constant 0 : index
    %17 = vector.load %arg4[%c1, %c0_18, %c0_19] : memref<9x16x16xbf16, #tpu.memory_space<vmem>>, vector<1x16x16xbf16>
    %18 = vector.shape_cast %17 : vector<1x16x16xbf16> to vector<16x16xbf16>
    %c0_20 = arith.constant 0 : index
    %c0_21 = arith.constant 0 : index
    %c4 = arith.constant 4 : index
    %19 = vector.load %arg1[%c0_20, %c0_21, %c4] : memref<1x16x1408xbf16, #tpu.memory_space<vmem>>, vector<1x16x256xbf16>
    %20 = vector.shape_cast %19 : vector<1x16x256xbf16> to vector<16x256xbf16>
    %cst_22 = arith.constant dense<0.000000e+00> : vector<16x256xf32>
    %21 = tpu.matmul %18, %20, %cst_22 {dimension_numbers = #tpu.dot_dimension_numbers<[1], [0], [0], [1], [0, 0, 1, 1], [], []>} : vector<16x16xbf16>, vector<16x256xbf16>, vector<16x256xf32> -> vector<16x256xf32>
    %22 = arith.addf %16, %21 : vector<16x256xf32>
    %c1_23 = arith.constant 1 : index
    %c0_24 = arith.constant 0 : index
    %c0_25 = arith.constant 0 : index
    %23 = vector.load %arg5[%c1_23, %c0_24, %c0_25] : memref<9x16x16xbf16, #tpu.memory_space<vmem>>, vector<1x16x16xbf16>
    %24 = vector.shape_cast %23 : vector<1x16x16xbf16> to vector<16x16xbf16>
    %c0_26 = arith.constant 0 : index
    %c0_27 = arith.constant 0 : index
    %c4_28 = arith.constant 4 : index
    %25 = vector.load %arg2[%c0_26, %c0_27, %c4_28] : memref<1x16x1408xbf16, #tpu.memory_space<vmem>>, vector<1x16x256xbf16>
    %26 = vector.shape_cast %25 : vector<1x16x256xbf16> to vector<16x256xbf16>
    %cst_29 = arith.constant dense<0.000000e+00> : vector<16x256xf32>
    %27 = tpu.matmul %24, %26, %cst_29 {dimension_numbers = #tpu.dot_dimension_numbers<[1], [0], [0], [1], [0, 0, 1, 1], [], []>} : vector<16x16xbf16>, vector<16x256xbf16>, vector<16x256xf32> -> vector<16x256xf32>
    %28 = arith.addf %22, %27 : vector<16x256xf32>
    %c2 = arith.constant 2 : index
    %c0_30 = arith.constant 0 : index
    %c0_31 = arith.constant 0 : index
    %29 = vector.load %arg4[%c2, %c0_30, %c0_31] : memref<9x16x16xbf16, #tpu.memory_space<vmem>>, vector<1x16x16xbf16>
    %30 = vector.shape_cast %29 : vector<1x16x16xbf16> to vector<16x16xbf16>
    %c0_32 = arith.constant 0 : index
    %c0_33 = arith.constant 0 : index
    %c8 = arith.constant 8 : index
    %31 = vector.load %arg1[%c0_32, %c0_33, %c8] : memref<1x16x1408xbf16, #tpu.memory_space<vmem>>, vector<1x16x256xbf16>
    %32 = vector.shape_cast %31 : vector<1x16x256xbf16> to vector<16x256xbf16>
    %cst_34 = arith.constant dense<0.000000e+00> : vector<16x256xf32>
    %33 = tpu.matmul %30, %32, %cst_34 {dimension_numbers = #tpu.dot_dimension_numbers<[1], [0], [0], [1], [0, 0, 1, 1], [], []>} : vector<16x16xbf16>, vector<16x256xbf16>, vector<16x256xf32> -> vector<16x256xf32>
    %34 = arith.addf %28, %33 : vector<16x256xf32>
    %c2_35 = arith.constant 2 : index
    %c0_36 = arith.constant 0 : index
    %c0_37 = arith.constant 0 : index
    %35 = vector.load %arg5[%c2_35, %c0_36, %c0_37] : memref<9x16x16xbf16, #tpu.memory_space<vmem>>, vector<1x16x16xbf16>
    %36 = vector.shape_cast %35 : vector<1x16x16xbf16> to vector<16x16xbf16>
    %c0_38 = arith.constant 0 : index
    %c0_39 = arith.constant 0 : index
    %c8_40 = arith.constant 8 : index
    %37 = vector.load %arg2[%c0_38, %c0_39, %c8_40] : memref<1x16x1408xbf16, #tpu.memory_space<vmem>>, vector<1x16x256xbf16>
    %38 = vector.shape_cast %37 : vector<1x16x256xbf16> to vector<16x256xbf16>
    %cst_41 = arith.constant dense<0.000000e+00> : vector<16x256xf32>
    %39 = tpu.matmul %36, %38, %cst_41 {dimension_numbers = #tpu.dot_dimension_numbers<[1], [0], [0], [1], [0, 0, 1, 1], [], []>} : vector<16x16xbf16>, vector<16x256xbf16>, vector<16x256xf32> -> vector<16x256xf32>
    %40 = arith.addf %34, %39 : vector<16x256xf32>
    %c3 = arith.constant 3 : index
    %c0_42 = arith.constant 0 : index
    %c0_43 = arith.constant 0 : index
    %41 = vector.load %arg4[%c3, %c0_42, %c0_43] : memref<9x16x16xbf16, #tpu.memory_space<vmem>>, vector<1x16x16xbf16>
    %42 = vector.shape_cast %41 : vector<1x16x16xbf16> to vector<16x16xbf16>
    %c0_44 = arith.constant 0 : index
    %c0_45 = arith.constant 0 : index
    %c72 = arith.constant 72 : index
    %43 = vector.load %arg1[%c0_44, %c0_45, %c72] : memref<1x16x1408xbf16, #tpu.memory_space<vmem>>, vector<1x16x256xbf16>
    %44 = vector.shape_cast %43 : vector<1x16x256xbf16> to vector<16x256xbf16>
    %cst_46 = arith.constant dense<0.000000e+00> : vector<16x256xf32>
    %45 = tpu.matmul %42, %44, %cst_46 {dimension_numbers = #tpu.dot_dimension_numbers<[1], [0], [0], [1], [0, 0, 1, 1], [], []>} : vector<16x16xbf16>, vector<16x256xbf16>, vector<16x256xf32> -> vector<16x256xf32>
    %46 = arith.addf %40, %45 : vector<16x256xf32>
    %c3_47 = arith.constant 3 : index
    %c0_48 = arith.constant 0 : index
    %c0_49 = arith.constant 0 : index
    %47 = vector.load %arg5[%c3_47, %c0_48, %c0_49] : memref<9x16x16xbf16, #tpu.memory_space<vmem>>, vector<1x16x16xbf16>
    %48 = vector.shape_cast %47 : vector<1x16x16xbf16> to vector<16x16xbf16>
    %c0_50 = arith.constant 0 : index
    %c0_51 = arith.constant 0 : index
    %c72_52 = arith.constant 72 : index
    %49 = vector.load %arg2[%c0_50, %c0_51, %c72_52] : memref<1x16x1408xbf16, #tpu.memory_space<vmem>>, vector<1x16x256xbf16>
    %50 = vector.shape_cast %49 : vector<1x16x256xbf16> to vector<16x256xbf16>
    %cst_53 = arith.constant dense<0.000000e+00> : vector<16x256xf32>
    %51 = tpu.matmul %48, %50, %cst_53 {dimension_numbers = #tpu.dot_dimension_numbers<[1], [0], [0], [1], [0, 0, 1, 1], [], []>} : vector<16x16xbf16>, vector<16x256xbf16>, vector<16x256xf32> -> vector<16x256xf32>
    %52 = arith.addf %46, %51 : vector<16x256xf32>
    %c4_54 = arith.constant 4 : index
    %c0_55 = arith.constant 0 : index
    %c0_56 = arith.constant 0 : index
    %53 = vector.load %arg4[%c4_54, %c0_55, %c0_56] : memref<9x16x16xbf16, #tpu.memory_space<vmem>>, vector<1x16x16xbf16>
    %54 = vector.shape_cast %53 : vector<1x16x16xbf16> to vector<16x16xbf16>
    %c0_57 = arith.constant 0 : index
    %c0_58 = arith.constant 0 : index
    %c76 = arith.constant 76 : index
    %55 = vector.load %arg1[%c0_57, %c0_58, %c76] : memref<1x16x1408xbf16, #tpu.memory_space<vmem>>, vector<1x16x256xbf16>
    %56 = vector.shape_cast %55 : vector<1x16x256xbf16> to vector<16x256xbf16>
    %cst_59 = arith.constant dense<0.000000e+00> : vector<16x256xf32>
    %57 = tpu.matmul %54, %56, %cst_59 {dimension_numbers = #tpu.dot_dimension_numbers<[1], [0], [0], [1], [0, 0, 1, 1], [], []>} : vector<16x16xbf16>, vector<16x256xbf16>, vector<16x256xf32> -> vector<16x256xf32>
    %58 = arith.addf %52, %57 : vector<16x256xf32>
    %c4_60 = arith.constant 4 : index
    %c0_61 = arith.constant 0 : index
    %c0_62 = arith.constant 0 : index
    %59 = vector.load %arg5[%c4_60, %c0_61, %c0_62] : memref<9x16x16xbf16, #tpu.memory_space<vmem>>, vector<1x16x16xbf16>
    %60 = vector.shape_cast %59 : vector<1x16x16xbf16> to vector<16x16xbf16>
    %c0_63 = arith.constant 0 : index
    %c0_64 = arith.constant 0 : index
    %c76_65 = arith.constant 76 : index
    %61 = vector.load %arg2[%c0_63, %c0_64, %c76_65] : memref<1x16x1408xbf16, #tpu.memory_space<vmem>>, vector<1x16x256xbf16>
    %62 = vector.shape_cast %61 : vector<1x16x256xbf16> to vector<16x256xbf16>
    %cst_66 = arith.constant dense<0.000000e+00> : vector<16x256xf32>
    %63 = tpu.matmul %60, %62, %cst_66 {dimension_numbers = #tpu.dot_dimension_numbers<[1], [0], [0], [1], [0, 0, 1, 1], [], []>} : vector<16x16xbf16>, vector<16x256xbf16>, vector<16x256xf32> -> vector<16x256xf32>
    %64 = arith.addf %58, %63 : vector<16x256xf32>
    %c5 = arith.constant 5 : index
    %c0_67 = arith.constant 0 : index
    %c0_68 = arith.constant 0 : index
    %65 = vector.load %arg4[%c5, %c0_67, %c0_68] : memref<9x16x16xbf16, #tpu.memory_space<vmem>>, vector<1x16x16xbf16>
    %66 = vector.shape_cast %65 : vector<1x16x16xbf16> to vector<16x16xbf16>
    %c0_69 = arith.constant 0 : index
    %c0_70 = arith.constant 0 : index
    %c80 = arith.constant 80 : index
    %67 = vector.load %arg1[%c0_69, %c0_70, %c80] : memref<1x16x1408xbf16, #tpu.memory_space<vmem>>, vector<1x16x256xbf16>
    %68 = vector.shape_cast %67 : vector<1x16x256xbf16> to vector<16x256xbf16>
    %cst_71 = arith.constant dense<0.000000e+00> : vector<16x256xf32>
    %69 = tpu.matmul %66, %68, %cst_71 {dimension_numbers = #tpu.dot_dimension_numbers<[1], [0], [0], [1], [0, 0, 1, 1], [], []>} : vector<16x16xbf16>, vector<16x256xbf16>, vector<16x256xf32> -> vector<16x256xf32>
    %70 = arith.addf %64, %69 : vector<16x256xf32>
    %c5_72 = arith.constant 5 : index
    %c0_73 = arith.constant 0 : index
    %c0_74 = arith.constant 0 : index
    %71 = vector.load %arg5[%c5_72, %c0_73, %c0_74] : memref<9x16x16xbf16, #tpu.memory_space<vmem>>, vector<1x16x16xbf16>
    %72 = vector.shape_cast %71 : vector<1x16x16xbf16> to vector<16x16xbf16>
    %c0_75 = arith.constant 0 : index
    %c0_76 = arith.constant 0 : index
    %c80_77 = arith.constant 80 : index
    %73 = vector.load %arg2[%c0_75, %c0_76, %c80_77] : memref<1x16x1408xbf16, #tpu.memory_space<vmem>>, vector<1x16x256xbf16>
    %74 = vector.shape_cast %73 : vector<1x16x256xbf16> to vector<16x256xbf16>
    %cst_78 = arith.constant dense<0.000000e+00> : vector<16x256xf32>
    %75 = tpu.matmul %72, %74, %cst_78 {dimension_numbers = #tpu.dot_dimension_numbers<[1], [0], [0], [1], [0, 0, 1, 1], [], []>} : vector<16x16xbf16>, vector<16x256xbf16>, vector<16x256xf32> -> vector<16x256xf32>
    %76 = arith.addf %70, %75 : vector<16x256xf32>
    %c6 = arith.constant 6 : index
    %c0_79 = arith.constant 0 : index
    %c0_80 = arith.constant 0 : index
    %77 = vector.load %arg4[%c6, %c0_79, %c0_80] : memref<9x16x16xbf16, #tpu.memory_space<vmem>>, vector<1x16x16xbf16>
    %78 = vector.shape_cast %77 : vector<1x16x16xbf16> to vector<16x16xbf16>
    %c0_81 = arith.constant 0 : index
    %c0_82 = arith.constant 0 : index
    %c144 = arith.constant 144 : index
    %79 = vector.load %arg1[%c0_81, %c0_82, %c144] : memref<1x16x1408xbf16, #tpu.memory_space<vmem>>, vector<1x16x256xbf16>
    %80 = vector.shape_cast %79 : vector<1x16x256xbf16> to vector<16x256xbf16>
    %cst_83 = arith.constant dense<0.000000e+00> : vector<16x256xf32>
    %81 = tpu.matmul %78, %80, %cst_83 {dimension_numbers = #tpu.dot_dimension_numbers<[1], [0], [0], [1], [0, 0, 1, 1], [], []>} : vector<16x16xbf16>, vector<16x256xbf16>, vector<16x256xf32> -> vector<16x256xf32>
    %82 = arith.addf %76, %81 : vector<16x256xf32>
    %c6_84 = arith.constant 6 : index
    %c0_85 = arith.constant 0 : index
    %c0_86 = arith.constant 0 : index
    %83 = vector.load %arg5[%c6_84, %c0_85, %c0_86] : memref<9x16x16xbf16, #tpu.memory_space<vmem>>, vector<1x16x16xbf16>
    %84 = vector.shape_cast %83 : vector<1x16x16xbf16> to vector<16x16xbf16>
    %c0_87 = arith.constant 0 : index
    %c0_88 = arith.constant 0 : index
    %c144_89 = arith.constant 144 : index
    %85 = vector.load %arg2[%c0_87, %c0_88, %c144_89] : memref<1x16x1408xbf16, #tpu.memory_space<vmem>>, vector<1x16x256xbf16>
    %86 = vector.shape_cast %85 : vector<1x16x256xbf16> to vector<16x256xbf16>
    %cst_90 = arith.constant dense<0.000000e+00> : vector<16x256xf32>
    %87 = tpu.matmul %84, %86, %cst_90 {dimension_numbers = #tpu.dot_dimension_numbers<[1], [0], [0], [1], [0, 0, 1, 1], [], []>} : vector<16x16xbf16>, vector<16x256xbf16>, vector<16x256xf32> -> vector<16x256xf32>
    %88 = arith.addf %82, %87 : vector<16x256xf32>
    %c7 = arith.constant 7 : index
    %c0_91 = arith.constant 0 : index
    %c0_92 = arith.constant 0 : index
    %89 = vector.load %arg4[%c7, %c0_91, %c0_92] : memref<9x16x16xbf16, #tpu.memory_space<vmem>>, vector<1x16x16xbf16>
    %90 = vector.shape_cast %89 : vector<1x16x16xbf16> to vector<16x16xbf16>
    %c0_93 = arith.constant 0 : index
    %c0_94 = arith.constant 0 : index
    %c148 = arith.constant 148 : index
    %91 = vector.load %arg1[%c0_93, %c0_94, %c148] : memref<1x16x1408xbf16, #tpu.memory_space<vmem>>, vector<1x16x256xbf16>
    %92 = vector.shape_cast %91 : vector<1x16x256xbf16> to vector<16x256xbf16>
    %cst_95 = arith.constant dense<0.000000e+00> : vector<16x256xf32>
    %93 = tpu.matmul %90, %92, %cst_95 {dimension_numbers = #tpu.dot_dimension_numbers<[1], [0], [0], [1], [0, 0, 1, 1], [], []>} : vector<16x16xbf16>, vector<16x256xbf16>, vector<16x256xf32> -> vector<16x256xf32>
    %94 = arith.addf %88, %93 : vector<16x256xf32>
    %c7_96 = arith.constant 7 : index
    %c0_97 = arith.constant 0 : index
    %c0_98 = arith.constant 0 : index
    %95 = vector.load %arg5[%c7_96, %c0_97, %c0_98] : memref<9x16x16xbf16, #tpu.memory_space<vmem>>, vector<1x16x16xbf16>
    %96 = vector.shape_cast %95 : vector<1x16x16xbf16> to vector<16x16xbf16>
    %c0_99 = arith.constant 0 : index
    %c0_100 = arith.constant 0 : index
    %c148_101 = arith.constant 148 : index
    %97 = vector.load %arg2[%c0_99, %c0_100, %c148_101] : memref<1x16x1408xbf16, #tpu.memory_space<vmem>>, vector<1x16x256xbf16>
    %98 = vector.shape_cast %97 : vector<1x16x256xbf16> to vector<16x256xbf16>
    %cst_102 = arith.constant dense<0.000000e+00> : vector<16x256xf32>
    %99 = tpu.matmul %96, %98, %cst_102 {dimension_numbers = #tpu.dot_dimension_numbers<[1], [0], [0], [1], [0, 0, 1, 1], [], []>} : vector<16x16xbf16>, vector<16x256xbf16>, vector<16x256xf32> -> vector<16x256xf32>
    %100 = arith.addf %94, %99 : vector<16x256xf32>
    %c8_103 = arith.constant 8 : index
    %c0_104 = arith.constant 0 : index
    %c0_105 = arith.constant 0 : index
    %101 = vector.load %arg4[%c8_103, %c0_104, %c0_105] : memref<9x16x16xbf16, #tpu.memory_space<vmem>>, vector<1x16x16xbf16>
    %102 = vector.shape_cast %101 : vector<1x16x16xbf16> to vector<16x16xbf16>
    %c0_106 = arith.constant 0 : index
    %c0_107 = arith.constant 0 : index
    %c152 = arith.constant 152 : index
    %103 = vector.load %arg1[%c0_106, %c0_107, %c152] : memref<1x16x1408xbf16, #tpu.memory_space<vmem>>, vector<1x16x256xbf16>
    %104 = vector.shape_cast %103 : vector<1x16x256xbf16> to vector<16x256xbf16>
    %cst_108 = arith.constant dense<0.000000e+00> : vector<16x256xf32>
    %105 = tpu.matmul %102, %104, %cst_108 {dimension_numbers = #tpu.dot_dimension_numbers<[1], [0], [0], [1], [0, 0, 1, 1], [], []>} : vector<16x16xbf16>, vector<16x256xbf16>, vector<16x256xf32> -> vector<16x256xf32>
    %106 = arith.addf %100, %105 : vector<16x256xf32>
    %c8_109 = arith.constant 8 : index
    %c0_110 = arith.constant 0 : index
    %c0_111 = arith.constant 0 : index
    %107 = vector.load %arg5[%c8_109, %c0_110, %c0_111] : memref<9x16x16xbf16, #tpu.memory_space<vmem>>, vector<1x16x16xbf16>
    %108 = vector.shape_cast %107 : vector<1x16x16xbf16> to vector<16x16xbf16>
    %c0_112 = arith.constant 0 : index
    %c0_113 = arith.constant 0 : index
    %c152_114 = arith.constant 152 : index
    %109 = vector.load %arg2[%c0_112, %c0_113, %c152_114] : memref<1x16x1408xbf16, #tpu.memory_space<vmem>>, vector<1x16x256xbf16>
    %110 = vector.shape_cast %109 : vector<1x16x256xbf16> to vector<16x256xbf16>
    %cst_115 = arith.constant dense<0.000000e+00> : vector<16x256xf32>
    %111 = tpu.matmul %108, %110, %cst_115 {dimension_numbers = #tpu.dot_dimension_numbers<[1], [0], [0], [1], [0, 0, 1, 1], [], []>} : vector<16x16xbf16>, vector<16x256xbf16>, vector<16x256xf32> -> vector<16x256xf32>
    %112 = arith.addf %106, %111 : vector<16x256xf32>
    %c0_116 = arith.constant 0 : index
    %c0_117 = arith.constant 0 : index
    %113 = vector.load %arg6[%c0_116, %c0_117] : memref<16x1xf32, #tpu.memory_space<vmem>>, vector<16x1xf32>
    %114 = vector.broadcast %113 : vector<16x1xf32> to vector<16x256xf32>
    %115 = arith.addf %112, %114 : vector<16x256xf32>
    %cst_118 = arith.constant 0.000000e+00 : f32
    %116 = vector.broadcast %cst_118 : f32 to vector<16x256xf32>
    %117 = arith.maximumf %115, %116 : vector<16x256xf32>
    %c0_119 = arith.constant 0 : index
    %c0_120 = arith.constant 0 : index
    %118 = vector.load %arg3[%c0_119, %c0_120] : memref<1x1152xf32, #tpu.memory_space<vmem>>, vector<1x256xf32>
    %119 = vector.broadcast %118 : vector<1x256xf32> to vector<16x256xf32>
    %120 = arith.mulf %117, %119 : vector<16x256xf32>
    %121 = arith.truncf %120 : vector<16x256xf32> to vector<16x256xbf16>
    %c0_121 = arith.constant 0 : index
    %c76_122 = arith.constant 76 : index
    %122 = vector.load %arg10[%c0_121, %c76_122] : memref<16x1408xbf16, #tpu.memory_space<vmem>>, vector<16x256xbf16>
    tpu.vector_store %arg10[%c0_121, %c76_122], %121 {strides = array<i32>} : memref<16x1408xbf16, #tpu.memory_space<vmem>>, vector<16x256xbf16>,
    %cst_123 = arith.constant 0.000000e+00 : f32
    %123 = vector.broadcast %cst_123 : f32 to vector<16x256xf32>
    %c0_124 = arith.constant 0 : index
    %c0_125 = arith.constant 0 : index
    %c0_126 = arith.constant 0 : index
    %124 = vector.load %arg4[%c0_124, %c0_125, %c0_126] : memref<9x16x16xbf16, #tpu.memory_space<vmem>>, vector<1x16x16xbf16>
    %125 = vector.shape_cast %124 : vector<1x16x16xbf16> to vector<16x16xbf16>
    %c0_127 = arith.constant 0 : index
    %c0_128 = arith.constant 0 : index
    %c256 = arith.constant 256 : index
    %126 = vector.load %arg1[%c0_127, %c0_128, %c256] : memref<1x16x1408xbf16, #tpu.memory_space<vmem>>, vector<1x16x256xbf16>
    %127 = vector.shape_cast %126 : vector<1x16x256xbf16> to vector<16x256xbf16>
    %cst_129 = arith.constant dense<0.000000e+00> : vector<16x256xf32>
    %128 = tpu.matmul %125, %127, %cst_129 {dimension_numbers = #tpu.dot_dimension_numbers<[1], [0], [0], [1], [0, 0, 1, 1], [], []>} : vector<16x16xbf16>, vector<16x256xbf16>, vector<16x256xf32> -> vector<16x256xf32>
    %129 = arith.addf %123, %128 : vector<16x256xf32>
    %c0_130 = arith.constant 0 : index
    %c0_131 = arith.constant 0 : index
    %c0_132 = arith.constant 0 : index
    %130 = vector.load %arg5[%c0_130, %c0_131, %c0_132] : memref<9x16x16xbf16, #tpu.memory_space<vmem>>, vector<1x16x16xbf16>
    %131 = vector.shape_cast %130 : vector<1x16x16xbf16> to vector<16x16xbf16>
    %c0_133 = arith.constant 0 : index
    %c0_134 = arith.constant 0 : index
    %c256_135 = arith.constant 256 : index
    %132 = vector.load %arg2[%c0_133, %c0_134, %c256_135] : memref<1x16x1408xbf16, #tpu.memory_space<vmem>>, vector<1x16x256xbf16>
    %133 = vector.shape_cast %132 : vector<1x16x256xbf16> to vector<16x256xbf16>
    %cst_136 = arith.constant dense<0.000000e+00> : vector<16x256xf32>
    %134 = tpu.matmul %131, %133, %cst_136 {dimension_numbers = #tpu.dot_dimension_numbers<[1], [0], [0], [1], [0, 0, 1, 1], [], []>} : vector<16x16xbf16>, vector<16x256xbf16>, vector<16x256xf32> -> vector<16x256xf32>
    %135 = arith.addf %129, %134 : vector<16x256xf32>
    %c1_137 = arith.constant 1 : index
    %c0_138 = arith.constant 0 : index
    %c0_139 = arith.constant 0 : index
    %136 = vector.load %arg4[%c1_137, %c0_138, %c0_139] : memref<9x16x16xbf16, #tpu.memory_space<vmem>>, vector<1x16x16xbf16>
    %137 = vector.shape_cast %136 : vector<1x16x16xbf16> to vector<16x16xbf16>
    %c0_140 = arith.constant 0 : index
    %c0_141 = arith.constant 0 : index
    %c260 = arith.constant 260 : index
    %138 = vector.load %arg1[%c0_140, %c0_141, %c260] : memref<1x16x1408xbf16, #tpu.memory_space<vmem>>, vector<1x16x256xbf16>
    %139 = vector.shape_cast %138 : vector<1x16x256xbf16> to vector<16x256xbf16>
    %cst_142 = arith.constant dense<0.000000e+00> : vector<16x256xf32>
    %140 = tpu.matmul %137, %139, %cst_142 {dimension_numbers = #tpu.dot_dimension_numbers<[1], [0], [0], [1], [0, 0, 1, 1], [], []>} : vector<16x16xbf16>, vector<16x256xbf16>, vector<16x256xf32> -> vector<16x256xf32>
    %141 = arith.addf %135, %140 : vector<16x256xf32>
    %c1_143 = arith.constant 1 : index
    %c0_144 = arith.constant 0 : index
    %c0_145 = arith.constant 0 : index
    %142 = vector.load %arg5[%c1_143, %c0_144, %c0_145] : memref<9x16x16xbf16, #tpu.memory_space<vmem>>, vector<1x16x16xbf16>
    %143 = vector.shape_cast %142 : vector<1x16x16xbf16> to vector<16x16xbf16>
    %c0_146 = arith.constant 0 : index
    %c0_147 = arith.constant 0 : index
    %c260_148 = arith.constant 260 : index
    %144 = vector.load %arg2[%c0_146, %c0_147, %c260_148] : memref<1x16x1408xbf16, #tpu.memory_space<vmem>>, vector<1x16x256xbf16>
    %145 = vector.shape_cast %144 : vector<1x16x256xbf16> to vector<16x256xbf16>
    %cst_149 = arith.constant dense<0.000000e+00> : vector<16x256xf32>
    %146 = tpu.matmul %143, %145, %cst_149 {dimension_numbers = #tpu.dot_dimension_numbers<[1], [0], [0], [1], [0, 0, 1, 1], [], []>} : vector<16x16xbf16>, vector<16x256xbf16>, vector<16x256xf32> -> vector<16x256xf32>
    %147 = arith.addf %141, %146 : vector<16x256xf32>
    %c2_150 = arith.constant 2 : index
    %c0_151 = arith.constant 0 : index
    %c0_152 = arith.constant 0 : index
    %148 = vector.load %arg4[%c2_150, %c0_151, %c0_152] : memref<9x16x16xbf16, #tpu.memory_space<vmem>>, vector<1x16x16xbf16>
    %149 = vector.shape_cast %148 : vector<1x16x16xbf16> to vector<16x16xbf16>
    %c0_153 = arith.constant 0 : index
    %c0_154 = arith.constant 0 : index
    %c264 = arith.constant 264 : index
    %150 = vector.load %arg1[%c0_153, %c0_154, %c264] : memref<1x16x1408xbf16, #tpu.memory_space<vmem>>, vector<1x16x256xbf16>
    %151 = vector.shape_cast %150 : vector<1x16x256xbf16> to vector<16x256xbf16>
    %cst_155 = arith.constant dense<0.000000e+00> : vector<16x256xf32>
    %152 = tpu.matmul %149, %151, %cst_155 {dimension_numbers = #tpu.dot_dimension_numbers<[1], [0], [0], [1], [0, 0, 1, 1], [], []>} : vector<16x16xbf16>, vector<16x256xbf16>, vector<16x256xf32> -> vector<16x256xf32>
    %153 = arith.addf %147, %152 : vector<16x256xf32>
    %c2_156 = arith.constant 2 : index
    %c0_157 = arith.constant 0 : index
    %c0_158 = arith.constant 0 : index
    %154 = vector.load %arg5[%c2_156, %c0_157, %c0_158] : memref<9x16x16xbf16, #tpu.memory_space<vmem>>, vector<1x16x16xbf16>
    %155 = vector.shape_cast %154 : vector<1x16x16xbf16> to vector<16x16xbf16>
    %c0_159 = arith.constant 0 : index
    %c0_160 = arith.constant 0 : index
    %c264_161 = arith.constant 264 : index
    %156 = vector.load %arg2[%c0_159, %c0_160, %c264_161] : memref<1x16x1408xbf16, #tpu.memory_space<vmem>>, vector<1x16x256xbf16>
    %157 = vector.shape_cast %156 : vector<1x16x256xbf16> to vector<16x256xbf16>
    %cst_162 = arith.constant dense<0.000000e+00> : vector<16x256xf32>
    %158 = tpu.matmul %155, %157, %cst_162 {dimension_numbers = #tpu.dot_dimension_numbers<[1], [0], [0], [1], [0, 0, 1, 1], [], []>} : vector<16x16xbf16>, vector<16x256xbf16>, vector<16x256xf32> -> vector<16x256xf32>
    %159 = arith.addf %153, %158 : vector<16x256xf32>
    %c3_163 = arith.constant 3 : index
    %c0_164 = arith.constant 0 : index
    %c0_165 = arith.constant 0 : index
    %160 = vector.load %arg4[%c3_163, %c0_164, %c0_165] : memref<9x16x16xbf16, #tpu.memory_space<vmem>>, vector<1x16x16xbf16>
    %161 = vector.shape_cast %160 : vector<1x16x16xbf16> to vector<16x16xbf16>
    %c0_166 = arith.constant 0 : index
    %c0_167 = arith.constant 0 : index
    %c328 = arith.constant 328 : index
    %162 = vector.load %arg1[%c0_166, %c0_167, %c328] : memref<1x16x1408xbf16, #tpu.memory_space<vmem>>, vector<1x16x256xbf16>
    %163 = vector.shape_cast %162 : vector<1x16x256xbf16> to vector<16x256xbf16>
    %cst_168 = arith.constant dense<0.000000e+00> : vector<16x256xf32>
    %164 = tpu.matmul %161, %163, %cst_168 {dimension_numbers = #tpu.dot_dimension_numbers<[1], [0], [0], [1], [0, 0, 1, 1], [], []>} : vector<16x16xbf16>, vector<16x256xbf16>, vector<16x256xf32> -> vector<16x256xf32>
    %165 = arith.addf %159, %164 : vector<16x256xf32>
    %c3_169 = arith.constant 3 : index
    %c0_170 = arith.constant 0 : index
    %c0_171 = arith.constant 0 : index
    %166 = vector.load %arg5[%c3_169, %c0_170, %c0_171] : memref<9x16x16xbf16, #tpu.memory_space<vmem>>, vector<1x16x16xbf16>
    %167 = vector.shape_cast %166 : vector<1x16x16xbf16> to vector<16x16xbf16>
    %c0_172 = arith.constant 0 : index
    %c0_173 = arith.constant 0 : index
    %c328_174 = arith.constant 328 : index
    %168 = vector.load %arg2[%c0_172, %c0_173, %c328_174] : memref<1x16x1408xbf16, #tpu.memory_space<vmem>>, vector<1x16x256xbf16>
    %169 = vector.shape_cast %168 : vector<1x16x256xbf16> to vector<16x256xbf16>
    %cst_175 = arith.constant dense<0.000000e+00> : vector<16x256xf32>
    %170 = tpu.matmul %167, %169, %cst_175 {dimension_numbers = #tpu.dot_dimension_numbers<[1], [0], [0], [1], [0, 0, 1, 1], [], []>} : vector<16x16xbf16>, vector<16x256xbf16>, vector<16x256xf32> -> vector<16x256xf32>
    %171 = arith.addf %165, %170 : vector<16x256xf32>
    %c4_176 = arith.constant 4 : index
    %c0_177 = arith.constant 0 : index
    %c0_178 = arith.constant 0 : index
    %172 = vector.load %arg4[%c4_176, %c0_177, %c0_178] : memref<9x16x16xbf16, #tpu.memory_space<vmem>>, vector<1x16x16xbf16>
    %173 = vector.shape_cast %172 : vector<1x16x16xbf16> to vector<16x16xbf16>
    %c0_179 = arith.constant 0 : index
    %c0_180 = arith.constant 0 : index
    %c332 = arith.constant 332 : index
    %174 = vector.load %arg1[%c0_179, %c0_180, %c332] : memref<1x16x1408xbf16, #tpu.memory_space<vmem>>, vector<1x16x256xbf16>
    %175 = vector.shape_cast %174 : vector<1x16x256xbf16> to vector<16x256xbf16>
    %cst_181 = arith.constant dense<0.000000e+00> : vector<16x256xf32>
    %176 = tpu.matmul %173, %175, %cst_181 {dimension_numbers = #tpu.dot_dimension_numbers<[1], [0], [0], [1], [0, 0, 1, 1], [], []>} : vector<16x16xbf16>, vector<16x256xbf16>, vector<16x256xf32> -> vector<16x256xf32>
    %177 = arith.addf %171, %176 : vector<16x256xf32>
    %c4_182 = arith.constant 4 : index
    %c0_183 = arith.constant 0 : index
    %c0_184 = arith.constant 0 : index
    %178 = vector.load %arg5[%c4_182, %c0_183, %c0_184] : memref<9x16x16xbf16, #tpu.memory_space<vmem>>, vector<1x16x16xbf16>
    %179 = vector.shape_cast %178 : vector<1x16x16xbf16> to vector<16x16xbf16>
    %c0_185 = arith.constant 0 : index
    %c0_186 = arith.constant 0 : index
    %c332_187 = arith.constant 332 : index
    %180 = vector.load %arg2[%c0_185, %c0_186, %c332_187] : memref<1x16x1408xbf16, #tpu.memory_space<vmem>>, vector<1x16x256xbf16>
    %181 = vector.shape_cast %180 : vector<1x16x256xbf16> to vector<16x256xbf16>
    %cst_188 = arith.constant dense<0.000000e+00> : vector<16x256xf32>
    %182 = tpu.matmul %179, %181, %cst_188 {dimension_numbers = #tpu.dot_dimension_numbers<[1], [0], [0], [1], [0, 0, 1, 1], [], []>} : vector<16x16xbf16>, vector<16x256xbf16>, vector<16x256xf32> -> vector<16x256xf32>
    %183 = arith.addf %177, %182 : vector<16x256xf32>
    %c5_189 = arith.constant 5 : index
    %c0_190 = arith.constant 0 : index
    %c0_191 = arith.constant 0 : index
    %184 = vector.load %arg4[%c5_189, %c0_190, %c0_191] : memref<9x16x16xbf16, #tpu.memory_space<vmem>>, vector<1x16x16xbf16>
    %185 = vector.shape_cast %184 : vector<1x16x16xbf16> to vector<16x16xbf16>
    %c0_192 = arith.constant 0 : index
    %c0_193 = arith.constant 0 : index
    %c336 = arith.constant 336 : index
    %186 = vector.load %arg1[%c0_192, %c0_193, %c336] : memref<1x16x1408xbf16, #tpu.memory_space<vmem>>, vector<1x16x256xbf16>
    %187 = vector.shape_cast %186 : vector<1x16x256xbf16> to vector<16x256xbf16>
    %cst_194 = arith.constant dense<0.000000e+00> : vector<16x256xf32>
    %188 = tpu.matmul %185, %187, %cst_194 {dimension_numbers = #tpu.dot_dimension_numbers<[1], [0], [0], [1], [0, 0, 1, 1], [], []>} : vector<16x16xbf16>, vector<16x256xbf16>, vector<16x256xf32> -> vector<16x256xf32>
    %189 = arith.addf %183, %188 : vector<16x256xf32>
    %c5_195 = arith.constant 5 : index
    %c0_196 = arith.constant 0 : index
    %c0_197 = arith.constant 0 : index
    %190 = vector.load %arg5[%c5_195, %c0_196, %c0_197] : memref<9x16x16xbf16, #tpu.memory_space<vmem>>, vector<1x16x16xbf16>
    %191 = vector.shape_cast %190 : vector<1x16x16xbf16> to vector<16x16xbf16>
    %c0_198 = arith.constant 0 : index
    %c0_199 = arith.constant 0 : index
    %c336_200 = arith.constant 336 : index
    %192 = vector.load %arg2[%c0_198, %c0_199, %c336_200] : memref<1x16x1408xbf16, #tpu.memory_space<vmem>>, vector<1x16x256xbf16>
    %193 = vector.shape_cast %192 : vector<1x16x256xbf16> to vector<16x256xbf16>
    %cst_201 = arith.constant dense<0.000000e+00> : vector<16x256xf32>
    %194 = tpu.matmul %191, %193, %cst_201 {dimension_numbers = #tpu.dot_dimension_numbers<[1], [0], [0], [1], [0, 0, 1, 1], [], []>} : vector<16x16xbf16>, vector<16x256xbf16>, vector<16x256xf32> -> vector<16x256xf32>
    %195 = arith.addf %189, %194 : vector<16x256xf32>
    %c6_202 = arith.constant 6 : index
    %c0_203 = arith.constant 0 : index
    %c0_204 = arith.constant 0 : index
    %196 = vector.load %arg4[%c6_202, %c0_203, %c0_204] : memref<9x16x16xbf16, #tpu.memory_space<vmem>>, vector<1x16x16xbf16>
    %197 = vector.shape_cast %196 : vector<1x16x16xbf16> to vector<16x16xbf16>
    %c0_205 = arith.constant 0 : index
    %c0_206 = arith.constant 0 : index
    %c400 = arith.constant 400 : index
    %198 = vector.load %arg1[%c0_205, %c0_206, %c400] : memref<1x16x1408xbf16, #tpu.memory_space<vmem>>, vector<1x16x256xbf16>
    %199 = vector.shape_cast %198 : vector<1x16x256xbf16> to vector<16x256xbf16>
    %cst_207 = arith.constant dense<0.000000e+00> : vector<16x256xf32>
    %200 = tpu.matmul %197, %199, %cst_207 {dimension_numbers = #tpu.dot_dimension_numbers<[1], [0], [0], [1], [0, 0, 1, 1], [], []>} : vector<16x16xbf16>, vector<16x256xbf16>, vector<16x256xf32> -> vector<16x256xf32>
    %201 = arith.addf %195, %200 : vector<16x256xf32>
    %c6_208 = arith.constant 6 : index
    %c0_209 = arith.constant 0 : index
    %c0_210 = arith.constant 0 : index
    %202 = vector.load %arg5[%c6_208, %c0_209, %c0_210] : memref<9x16x16xbf16, #tpu.memory_space<vmem>>, vector<1x16x16xbf16>
    %203 = vector.shape_cast %202 : vector<1x16x16xbf16> to vector<16x16xbf16>
    %c0_211 = arith.constant 0 : index
    %c0_212 = arith.constant 0 : index
    %c400_213 = arith.constant 400 : index
    %204 = vector.load %arg2[%c0_211, %c0_212, %c400_213] : memref<1x16x1408xbf16, #tpu.memory_space<vmem>>, vector<1x16x256xbf16>
    %205 = vector.shape_cast %204 : vector<1x16x256xbf16> to vector<16x256xbf16>
    %cst_214 = arith.constant dense<0.000000e+00> : vector<16x256xf32>
    %206 = tpu.matmul %203, %205, %cst_214 {dimension_numbers = #tpu.dot_dimension_numbers<[1], [0], [0], [1], [0, 0, 1, 1], [], []>} : vector<16x16xbf16>, vector<16x256xbf16>, vector<16x256xf32> -> vector<16x256xf32>
    %207 = arith.addf %201, %206 : vector<16x256xf32>
    %c7_215 = arith.constant 7 : index
    %c0_216 = arith.constant 0 : index
    %c0_217 = arith.constant 0 : index
    %208 = vector.load %arg4[%c7_215, %c0_216, %c0_217] : memref<9x16x16xbf16, #tpu.memory_space<vmem>>, vector<1x16x16xbf16>
    %209 = vector.shape_cast %208 : vector<1x16x16xbf16> to vector<16x16xbf16>
    %c0_218 = arith.constant 0 : index
    %c0_219 = arith.constant 0 : index
    %c404 = arith.constant 404 : index
    %210 = vector.load %arg1[%c0_218, %c0_219, %c404] : memref<1x16x1408xbf16, #tpu.memory_space<vmem>>, vector<1x16x256xbf16>
    %211 = vector.shape_cast %210 : vector<1x16x256xbf16> to vector<16x256xbf16>
    %cst_220 = arith.constant dense<0.000000e+00> : vector<16x256xf32>
    %212 = tpu.matmul %209, %211, %cst_220 {dimension_numbers = #tpu.dot_dimension_numbers<[1], [0], [0], [1], [0, 0, 1, 1], [], []>} : vector<16x16xbf16>, vector<16x256xbf16>, vector<16x256xf32> -> vector<16x256xf32>
    %213 = arith.addf %207, %212 : vector<16x256xf32>
    %c7_221 = arith.constant 7 : index
    %c0_222 = arith.constant 0 : index
    %c0_223 = arith.constant 0 : index
    %214 = vector.load %arg5[%c7_221, %c0_222, %c0_223] : memref<9x16x16xbf16, #tpu.memory_space<vmem>>, vector<1x16x16xbf16>
    %215 = vector.shape_cast %214 : vector<1x16x16xbf16> to vector<16x16xbf16>
    %c0_224 = arith.constant 0 : index
    %c0_225 = arith.constant 0 : index
    %c404_226 = arith.constant 404 : index
    %216 = vector.load %arg2[%c0_224, %c0_225, %c404_226] : memref<1x16x1408xbf16, #tpu.memory_space<vmem>>, vector<1x16x256xbf16>
    %217 = vector.shape_cast %216 : vector<1x16x256xbf16> to vector<16x256xbf16>
    %cst_227 = arith.constant dense<0.000000e+00> : vector<16x256xf32>
    %218 = tpu.matmul %215, %217, %cst_227 {dimension_numbers = #tpu.dot_dimension_numbers<[1], [0], [0], [1], [0, 0, 1, 1], [], []>} : vector<16x16xbf16>, vector<16x256xbf16>, vector<16x256xf32> -> vector<16x256xf32>
    %219 = arith.addf %213, %218 : vector<16x256xf32>
    %c8_228 = arith.constant 8 : index
    %c0_229 = arith.constant 0 : index
    %c0_230 = arith.constant 0 : index
    %220 = vector.load %arg4[%c8_228, %c0_229, %c0_230] : memref<9x16x16xbf16, #tpu.memory_space<vmem>>, vector<1x16x16xbf16>
    %221 = vector.shape_cast %220 : vector<1x16x16xbf16> to vector<16x16xbf16>
    %c0_231 = arith.constant 0 : index
    %c0_232 = arith.constant 0 : index
    %c408 = arith.constant 408 : index
    %222 = vector.load %arg1[%c0_231, %c0_232, %c408] : memref<1x16x1408xbf16, #tpu.memory_space<vmem>>, vector<1x16x256xbf16>
    %223 = vector.shape_cast %222 : vector<1x16x256xbf16> to vector<16x256xbf16>
    %cst_233 = arith.constant dense<0.000000e+00> : vector<16x256xf32>
    %224 = tpu.matmul %221, %223, %cst_233 {dimension_numbers = #tpu.dot_dimension_numbers<[1], [0], [0], [1], [0, 0, 1, 1], [], []>} : vector<16x16xbf16>, vector<16x256xbf16>, vector<16x256xf32> -> vector<16x256xf32>
    %225 = arith.addf %219, %224 : vector<16x256xf32>
    %c8_234 = arith.constant 8 : index
    %c0_235 = arith.constant 0 : index
    %c0_236 = arith.constant 0 : index
    %226 = vector.load %arg5[%c8_234, %c0_235, %c0_236] : memref<9x16x16xbf16, #tpu.memory_space<vmem>>, vector<1x16x16xbf16>
    %227 = vector.shape_cast %226 : vector<1x16x16xbf16> to vector<16x16xbf16>
    %c0_237 = arith.constant 0 : index
    %c0_238 = arith.constant 0 : index
    %c408_239 = arith.constant 408 : index
    %228 = vector.load %arg2[%c0_237, %c0_238, %c408_239] : memref<1x16x1408xbf16, #tpu.memory_space<vmem>>, vector<1x16x256xbf16>
    %229 = vector.shape_cast %228 : vector<1x16x256xbf16> to vector<16x256xbf16>
    %cst_240 = arith.constant dense<0.000000e+00> : vector<16x256xf32>
    %230 = tpu.matmul %227, %229, %cst_240 {dimension_numbers = #tpu.dot_dimension_numbers<[1], [0], [0], [1], [0, 0, 1, 1], [], []>} : vector<16x16xbf16>, vector<16x256xbf16>, vector<16x256xf32> -> vector<16x256xf32>
    %231 = arith.addf %225, %230 : vector<16x256xf32>
    %c0_241 = arith.constant 0 : index
    %c0_242 = arith.constant 0 : index
    %232 = vector.load %arg6[%c0_241, %c0_242] : memref<16x1xf32, #tpu.memory_space<vmem>>, vector<16x1xf32>
    %233 = vector.broadcast %232 : vector<16x1xf32> to vector<16x256xf32>
    %234 = arith.addf %231, %233 : vector<16x256xf32>
    %cst_243 = arith.constant 0.000000e+00 : f32
    %235 = vector.broadcast %cst_243 : f32 to vector<16x256xf32>
    %236 = arith.maximumf %234, %235 : vector<16x256xf32>
    %c0_244 = arith.constant 0 : index
    %c256_245 = arith.constant 256 : index
    %237 = vector.load %arg3[%c0_244, %c256_245] : memref<1x1152xf32, #tpu.memory_space<vmem>>, vector<1x256xf32>
    %238 = vector.broadcast %237 : vector<1x256xf32> to vector<16x256xf32>
    %239 = arith.mulf %236, %238 : vector<16x256xf32>
    %240 = arith.truncf %239 : vector<16x256xf32> to vector<16x256xbf16>
    %c0_246 = arith.constant 0 : index
    %c332_247 = arith.constant 332 : index
    %241 = vector.load %arg10[%c0_246, %c332_247] : memref<16x1408xbf16, #tpu.memory_space<vmem>>, vector<16x256xbf16>
    tpu.vector_store %arg10[%c0_246, %c332_247], %240 {strides = array<i32>} : memref<16x1408xbf16, #tpu.memory_space<vmem>>, vector<16x256xbf16>,
    %cst_248 = arith.constant 0.000000e+00 : f32
    %242 = vector.broadcast %cst_248 : f32 to vector<16x256xf32>
    %c0_249 = arith.constant 0 : index
    %c0_250 = arith.constant 0 : index
    %c0_251 = arith.constant 0 : index
    %243 = vector.load %arg4[%c0_249, %c0_250, %c0_251] : memref<9x16x16xbf16, #tpu.memory_space<vmem>>, vector<1x16x16xbf16>
    %244 = vector.shape_cast %243 : vector<1x16x16xbf16> to vector<16x16xbf16>
    %c0_252 = arith.constant 0 : index
    %c0_253 = arith.constant 0 : index
    %c512 = arith.constant 512 : index
    %245 = vector.load %arg1[%c0_252, %c0_253, %c512] : memref<1x16x1408xbf16, #tpu.memory_space<vmem>>, vector<1x16x256xbf16>
    %246 = vector.shape_cast %245 : vector<1x16x256xbf16> to vector<16x256xbf16>
    %cst_254 = arith.constant dense<0.000000e+00> : vector<16x256xf32>
    %247 = tpu.matmul %244, %246, %cst_254 {dimension_numbers = #tpu.dot_dimension_numbers<[1], [0], [0], [1], [0, 0, 1, 1], [], []>} : vector<16x16xbf16>, vector<16x256xbf16>, vector<16x256xf32> -> vector<16x256xf32>
    %248 = arith.addf %242, %247 : vector<16x256xf32>
    %c0_255 = arith.constant 0 : index
    %c0_256 = arith.constant 0 : index
    %c0_257 = arith.constant 0 : index
    %249 = vector.load %arg5[%c0_255, %c0_256, %c0_257] : memref<9x16x16xbf16, #tpu.memory_space<vmem>>, vector<1x16x16xbf16>
    %250 = vector.shape_cast %249 : vector<1x16x16xbf16> to vector<16x16xbf16>
    %c0_258 = arith.constant 0 : index
    %c0_259 = arith.constant 0 : index
    %c512_260 = arith.constant 512 : index
    %251 = vector.load %arg2[%c0_258, %c0_259, %c512_260] : memref<1x16x1408xbf16, #tpu.memory_space<vmem>>, vector<1x16x256xbf16>
    %252 = vector.shape_cast %251 : vector<1x16x256xbf16> to vector<16x256xbf16>
    %cst_261 = arith.constant dense<0.000000e+00> : vector<16x256xf32>
    %253 = tpu.matmul %250, %252, %cst_261 {dimension_numbers = #tpu.dot_dimension_numbers<[1], [0], [0], [1], [0, 0, 1, 1], [], []>} : vector<16x16xbf16>, vector<16x256xbf16>, vector<16x256xf32> -> vector<16x256xf32>
    %254 = arith.addf %248, %253 : vector<16x256xf32>
    %c1_262 = arith.constant 1 : index
    %c0_263 = arith.constant 0 : index
    %c0_264 = arith.constant 0 : index
    %255 = vector.load %arg4[%c1_262, %c0_263, %c0_264] : memref<9x16x16xbf16, #tpu.memory_space<vmem>>, vector<1x16x16xbf16>
    %256 = vector.shape_cast %255 : vector<1x16x16xbf16> to vector<16x16xbf16>
    %c0_265 = arith.constant 0 : index
    %c0_266 = arith.constant 0 : index
    %c516 = arith.constant 516 : index
    %257 = vector.load %arg1[%c0_265, %c0_266, %c516] : memref<1x16x1408xbf16, #tpu.memory_space<vmem>>, vector<1x16x256xbf16>
    %258 = vector.shape_cast %257 : vector<1x16x256xbf16> to vector<16x256xbf16>
    %cst_267 = arith.constant dense<0.000000e+00> : vector<16x256xf32>
    %259 = tpu.matmul %256, %258, %cst_267 {dimension_numbers = #tpu.dot_dimension_numbers<[1], [0], [0], [1], [0, 0, 1, 1], [], []>} : vector<16x16xbf16>, vector<16x256xbf16>, vector<16x256xf32> -> vector<16x256xf32>
    %260 = arith.addf %254, %259 : vector<16x256xf32>
    %c1_268 = arith.constant 1 : index
    %c0_269 = arith.constant 0 : index
    %c0_270 = arith.constant 0 : index
    %261 = vector.load %arg5[%c1_268, %c0_269, %c0_270] : memref<9x16x16xbf16, #tpu.memory_space<vmem>>, vector<1x16x16xbf16>
    %262 = vector.shape_cast %261 : vector<1x16x16xbf16> to vector<16x16xbf16>
    %c0_271 = arith.constant 0 : index
    %c0_272 = arith.constant 0 : index
    %c516_273 = arith.constant 516 : index
    %263 = vector.load %arg2[%c0_271, %c0_272, %c516_273] : memref<1x16x1408xbf16, #tpu.memory_space<vmem>>, vector<1x16x256xbf16>
    %264 = vector.shape_cast %263 : vector<1x16x256xbf16> to vector<16x256xbf16>
    %cst_274 = arith.constant dense<0.000000e+00> : vector<16x256xf32>
    %265 = tpu.matmul %262, %264, %cst_274 {dimension_numbers = #tpu.dot_dimension_numbers<[1], [0], [0], [1], [0, 0, 1, 1], [], []>} : vector<16x16xbf16>, vector<16x256xbf16>, vector<16x256xf32> -> vector<16x256xf32>
    %266 = arith.addf %260, %265 : vector<16x256xf32>
    %c2_275 = arith.constant 2 : index
    %c0_276 = arith.constant 0 : index
    %c0_277 = arith.constant 0 : index
    %267 = vector.load %arg4[%c2_275, %c0_276, %c0_277] : memref<9x16x16xbf16, #tpu.memory_space<vmem>>, vector<1x16x16xbf16>
    %268 = vector.shape_cast %267 : vector<1x16x16xbf16> to vector<16x16xbf16>
    %c0_278 = arith.constant 0 : index
    %c0_279 = arith.constant 0 : index
    %c520 = arith.constant 520 : index
    %269 = vector.load %arg1[%c0_278, %c0_279, %c520] : memref<1x16x1408xbf16, #tpu.memory_space<vmem>>, vector<1x16x256xbf16>
    %270 = vector.shape_cast %269 : vector<1x16x256xbf16> to vector<16x256xbf16>
    %cst_280 = arith.constant dense<0.000000e+00> : vector<16x256xf32>
    %271 = tpu.matmul %268, %270, %cst_280 {dimension_numbers = #tpu.dot_dimension_numbers<[1], [0], [0], [1], [0, 0, 1, 1], [], []>} : vector<16x16xbf16>, vector<16x256xbf16>, vector<16x256xf32> -> vector<16x256xf32>
    %272 = arith.addf %266, %271 : vector<16x256xf32>
    %c2_281 = arith.constant 2 : index
    %c0_282 = arith.constant 0 : index
    %c0_283 = arith.constant 0 : index
    %273 = vector.load %arg5[%c2_281, %c0_282, %c0_283] : memref<9x16x16xbf16, #tpu.memory_space<vmem>>, vector<1x16x16xbf16>
    %274 = vector.shape_cast %273 : vector<1x16x16xbf16> to vector<16x16xbf16>
    %c0_284 = arith.constant 0 : index
    %c0_285 = arith.constant 0 : index
    %c520_286 = arith.constant 520 : index
    %275 = vector.load %arg2[%c0_284, %c0_285, %c520_286] : memref<1x16x1408xbf16, #tpu.memory_space<vmem>>, vector<1x16x256xbf16>
    %276 = vector.shape_cast %275 : vector<1x16x256xbf16> to vector<16x256xbf16>
    %cst_287 = arith.constant dense<0.000000e+00> : vector<16x256xf32>
    %277 = tpu.matmul %274, %276, %cst_287 {dimension_numbers = #tpu.dot_dimension_numbers<[1], [0], [0], [1], [0, 0, 1, 1], [], []>} : vector<16x16xbf16>, vector<16x256xbf16>, vector<16x256xf32> -> vector<16x256xf32>
    %278 = arith.addf %272, %277 : vector<16x256xf32>
    %c3_288 = arith.constant 3 : index
    %c0_289 = arith.constant 0 : index
    %c0_290 = arith.constant 0 : index
    %279 = vector.load %arg4[%c3_288, %c0_289, %c0_290] : memref<9x16x16xbf16, #tpu.memory_space<vmem>>, vector<1x16x16xbf16>
    %280 = vector.shape_cast %279 : vector<1x16x16xbf16> to vector<16x16xbf16>
    %c0_291 = arith.constant 0 : index
    %c0_292 = arith.constant 0 : index
    %c584 = arith.constant 584 : index
    %281 = vector.load %arg1[%c0_291, %c0_292, %c584] : memref<1x16x1408xbf16, #tpu.memory_space<vmem>>, vector<1x16x256xbf16>
    %282 = vector.shape_cast %281 : vector<1x16x256xbf16> to vector<16x256xbf16>
    %cst_293 = arith.constant dense<0.000000e+00> : vector<16x256xf32>
    %283 = tpu.matmul %280, %282, %cst_293 {dimension_numbers = #tpu.dot_dimension_numbers<[1], [0], [0], [1], [0, 0, 1, 1], [], []>} : vector<16x16xbf16>, vector<16x256xbf16>, vector<16x256xf32> -> vector<16x256xf32>
    %284 = arith.addf %278, %283 : vector<16x256xf32>
    %c3_294 = arith.constant 3 : index
    %c0_295 = arith.constant 0 : index
    %c0_296 = arith.constant 0 : index
    %285 = vector.load %arg5[%c3_294, %c0_295, %c0_296] : memref<9x16x16xbf16, #tpu.memory_space<vmem>>, vector<1x16x16xbf16>
    %286 = vector.shape_cast %285 : vector<1x16x16xbf16> to vector<16x16xbf16>
    %c0_297 = arith.constant 0 : index
    %c0_298 = arith.constant 0 : index
    %c584_299 = arith.constant 584 : index
    %287 = vector.load %arg2[%c0_297, %c0_298, %c584_299] : memref<1x16x1408xbf16, #tpu.memory_space<vmem>>, vector<1x16x256xbf16>
    %288 = vector.shape_cast %287 : vector<1x16x256xbf16> to vector<16x256xbf16>
    %cst_300 = arith.constant dense<0.000000e+00> : vector<16x256xf32>
    %289 = tpu.matmul %286, %288, %cst_300 {dimension_numbers = #tpu.dot_dimension_numbers<[1], [0], [0], [1], [0, 0, 1, 1], [], []>} : vector<16x16xbf16>, vector<16x256xbf16>, vector<16x256xf32> -> vector<16x256xf32>
    %290 = arith.addf %284, %289 : vector<16x256xf32>
    %c4_301 = arith.constant 4 : index
    %c0_302 = arith.constant 0 : index
    %c0_303 = arith.constant 0 : index
    %291 = vector.load %arg4[%c4_301, %c0_302, %c0_303] : memref<9x16x16xbf16, #tpu.memory_space<vmem>>, vector<1x16x16xbf16>
    %292 = vector.shape_cast %291 : vector<1x16x16xbf16> to vector<16x16xbf16>
    %c0_304 = arith.constant 0 : index
    %c0_305 = arith.constant 0 : index
    %c588 = arith.constant 588 : index
    %293 = vector.load %arg1[%c0_304, %c0_305, %c588] : memref<1x16x1408xbf16, #tpu.memory_space<vmem>>, vector<1x16x256xbf16>
    %294 = vector.shape_cast %293 : vector<1x16x256xbf16> to vector<16x256xbf16>
    %cst_306 = arith.constant dense<0.000000e+00> : vector<16x256xf32>
    %295 = tpu.matmul %292, %294, %cst_306 {dimension_numbers = #tpu.dot_dimension_numbers<[1], [0], [0], [1], [0, 0, 1, 1], [], []>} : vector<16x16xbf16>, vector<16x256xbf16>, vector<16x256xf32> -> vector<16x256xf32>
    %296 = arith.addf %290, %295 : vector<16x256xf32>
    %c4_307 = arith.constant 4 : index
    %c0_308 = arith.constant 0 : index
    %c0_309 = arith.constant 0 : index
    %297 = vector.load %arg5[%c4_307, %c0_308, %c0_309] : memref<9x16x16xbf16, #tpu.memory_space<vmem>>, vector<1x16x16xbf16>
    %298 = vector.shape_cast %297 : vector<1x16x16xbf16> to vector<16x16xbf16>
    %c0_310 = arith.constant 0 : index
    %c0_311 = arith.constant 0 : index
    %c588_312 = arith.constant 588 : index
    %299 = vector.load %arg2[%c0_310, %c0_311, %c588_312] : memref<1x16x1408xbf16, #tpu.memory_space<vmem>>, vector<1x16x256xbf16>
    %300 = vector.shape_cast %299 : vector<1x16x256xbf16> to vector<16x256xbf16>
    %cst_313 = arith.constant dense<0.000000e+00> : vector<16x256xf32>
    %301 = tpu.matmul %298, %300, %cst_313 {dimension_numbers = #tpu.dot_dimension_numbers<[1], [0], [0], [1], [0, 0, 1, 1], [], []>} : vector<16x16xbf16>, vector<16x256xbf16>, vector<16x256xf32> -> vector<16x256xf32>
    %302 = arith.addf %296, %301 : vector<16x256xf32>
    %c5_314 = arith.constant 5 : index
    %c0_315 = arith.constant 0 : index
    %c0_316 = arith.constant 0 : index
    %303 = vector.load %arg4[%c5_314, %c0_315, %c0_316] : memref<9x16x16xbf16, #tpu.memory_space<vmem>>, vector<1x16x16xbf16>
    %304 = vector.shape_cast %303 : vector<1x16x16xbf16> to vector<16x16xbf16>
    %c0_317 = arith.constant 0 : index
    %c0_318 = arith.constant 0 : index
    %c592 = arith.constant 592 : index
    %305 = vector.load %arg1[%c0_317, %c0_318, %c592] : memref<1x16x1408xbf16, #tpu.memory_space<vmem>>, vector<1x16x256xbf16>
    %306 = vector.shape_cast %305 : vector<1x16x256xbf16> to vector<16x256xbf16>
    %cst_319 = arith.constant dense<0.000000e+00> : vector<16x256xf32>
    %307 = tpu.matmul %304, %306, %cst_319 {dimension_numbers = #tpu.dot_dimension_numbers<[1], [0], [0], [1], [0, 0, 1, 1], [], []>} : vector<16x16xbf16>, vector<16x256xbf16>, vector<16x256xf32> -> vector<16x256xf32>
    %308 = arith.addf %302, %307 : vector<16x256xf32>
    %c5_320 = arith.constant 5 : index
    %c0_321 = arith.constant 0 : index
    %c0_322 = arith.constant 0 : index
    %309 = vector.load %arg5[%c5_320, %c0_321, %c0_322] : memref<9x16x16xbf16, #tpu.memory_space<vmem>>, vector<1x16x16xbf16>
    %310 = vector.shape_cast %309 : vector<1x16x16xbf16> to vector<16x16xbf16>
    %c0_323 = arith.constant 0 : index
    %c0_324 = arith.constant 0 : index
    %c592_325 = arith.constant 592 : index
    %311 = vector.load %arg2[%c0_323, %c0_324, %c592_325] : memref<1x16x1408xbf16, #tpu.memory_space<vmem>>, vector<1x16x256xbf16>
    %312 = vector.shape_cast %311 : vector<1x16x256xbf16> to vector<16x256xbf16>
    %cst_326 = arith.constant dense<0.000000e+00> : vector<16x256xf32>
    %313 = tpu.matmul %310, %312, %cst_326 {dimension_numbers = #tpu.dot_dimension_numbers<[1], [0], [0], [1], [0, 0, 1, 1], [], []>} : vector<16x16xbf16>, vector<16x256xbf16>, vector<16x256xf32> -> vector<16x256xf32>
    %314 = arith.addf %308, %313 : vector<16x256xf32>
    %c6_327 = arith.constant 6 : index
    %c0_328 = arith.constant 0 : index
    %c0_329 = arith.constant 0 : index
    %315 = vector.load %arg4[%c6_327, %c0_328, %c0_329] : memref<9x16x16xbf16, #tpu.memory_space<vmem>>, vector<1x16x16xbf16>
    %316 = vector.shape_cast %315 : vector<1x16x16xbf16> to vector<16x16xbf16>
    %c0_330 = arith.constant 0 : index
    %c0_331 = arith.constant 0 : index
    %c656 = arith.constant 656 : index
    %317 = vector.load %arg1[%c0_330, %c0_331, %c656] : memref<1x16x1408xbf16, #tpu.memory_space<vmem>>, vector<1x16x256xbf16>
    %318 = vector.shape_cast %317 : vector<1x16x256xbf16> to vector<16x256xbf16>
    %cst_332 = arith.constant dense<0.000000e+00> : vector<16x256xf32>
    %319 = tpu.matmul %316, %318, %cst_332 {dimension_numbers = #tpu.dot_dimension_numbers<[1], [0], [0], [1], [0, 0, 1, 1], [], []>} : vector<16x16xbf16>, vector<16x256xbf16>, vector<16x256xf32> -> vector<16x256xf32>
    %320 = arith.addf %314, %319 : vector<16x256xf32>
    %c6_333 = arith.constant 6 : index
    %c0_334 = arith.constant 0 : index
    %c0_335 = arith.constant 0 : index
    %321 = vector.load %arg5[%c6_333, %c0_334, %c0_335] : memref<9x16x16xbf16, #tpu.memory_space<vmem>>, vector<1x16x16xbf16>
    %322 = vector.shape_cast %321 : vector<1x16x16xbf16> to vector<16x16xbf16>
    %c0_336 = arith.constant 0 : index
    %c0_337 = arith.constant 0 : index
    %c656_338 = arith.constant 656 : index
    %323 = vector.load %arg2[%c0_336, %c0_337, %c656_338] : memref<1x16x1408xbf16, #tpu.memory_space<vmem>>, vector<1x16x256xbf16>
    %324 = vector.shape_cast %323 : vector<1x16x256xbf16> to vector<16x256xbf16>
    %cst_339 = arith.constant dense<0.000000e+00> : vector<16x256xf32>
    %325 = tpu.matmul %322, %324, %cst_339 {dimension_numbers = #tpu.dot_dimension_numbers<[1], [0], [0], [1], [0, 0, 1, 1], [], []>} : vector<16x16xbf16>, vector<16x256xbf16>, vector<16x256xf32> -> vector<16x256xf32>
    %326 = arith.addf %320, %325 : vector<16x256xf32>
    %c7_340 = arith.constant 7 : index
    %c0_341 = arith.constant 0 : index
    %c0_342 = arith.constant 0 : index
    %327 = vector.load %arg4[%c7_340, %c0_341, %c0_342] : memref<9x16x16xbf16, #tpu.memory_space<vmem>>, vector<1x16x16xbf16>
    %328 = vector.shape_cast %327 : vector<1x16x16xbf16> to vector<16x16xbf16>
    %c0_343 = arith.constant 0 : index
    %c0_344 = arith.constant 0 : index
    %c660 = arith.constant 660 : index
    %329 = vector.load %arg1[%c0_343, %c0_344, %c660] : memref<1x16x1408xbf16, #tpu.memory_space<vmem>>, vector<1x16x256xbf16>
    %330 = vector.shape_cast %329 : vector<1x16x256xbf16> to vector<16x256xbf16>
    %cst_345 = arith.constant dense<0.000000e+00> : vector<16x256xf32>
    %331 = tpu.matmul %328, %330, %cst_345 {dimension_numbers = #tpu.dot_dimension_numbers<[1], [0], [0], [1], [0, 0, 1, 1], [], []>} : vector<16x16xbf16>, vector<16x256xbf16>, vector<16x256xf32> -> vector<16x256xf32>
    %332 = arith.addf %326, %331 : vector<16x256xf32>
    %c7_346 = arith.constant 7 : index
    %c0_347 = arith.constant 0 : index
    %c0_348 = arith.constant 0 : index
    %333 = vector.load %arg5[%c7_346, %c0_347, %c0_348] : memref<9x16x16xbf16, #tpu.memory_space<vmem>>, vector<1x16x16xbf16>
    %334 = vector.shape_cast %333 : vector<1x16x16xbf16> to vector<16x16xbf16>
    %c0_349 = arith.constant 0 : index
    %c0_350 = arith.constant 0 : index
    %c660_351 = arith.constant 660 : index
    %335 = vector.load %arg2[%c0_349, %c0_350, %c660_351] : memref<1x16x1408xbf16, #tpu.memory_space<vmem>>, vector<1x16x256xbf16>
    %336 = vector.shape_cast %335 : vector<1x16x256xbf16> to vector<16x256xbf16>
    %cst_352 = arith.constant dense<0.000000e+00> : vector<16x256xf32>
    %337 = tpu.matmul %334, %336, %cst_352 {dimension_numbers = #tpu.dot_dimension_numbers<[1], [0], [0], [1], [0, 0, 1, 1], [], []>} : vector<16x16xbf16>, vector<16x256xbf16>, vector<16x256xf32> -> vector<16x256xf32>
    %338 = arith.addf %332, %337 : vector<16x256xf32>
    %c8_353 = arith.constant 8 : index
    %c0_354 = arith.constant 0 : index
    %c0_355 = arith.constant 0 : index
    %339 = vector.load %arg4[%c8_353, %c0_354, %c0_355] : memref<9x16x16xbf16, #tpu.memory_space<vmem>>, vector<1x16x16xbf16>
    %340 = vector.shape_cast %339 : vector<1x16x16xbf16> to vector<16x16xbf16>
    %c0_356 = arith.constant 0 : index
    %c0_357 = arith.constant 0 : index
    %c664 = arith.constant 664 : index
    %341 = vector.load %arg1[%c0_356, %c0_357, %c664] : memref<1x16x1408xbf16, #tpu.memory_space<vmem>>, vector<1x16x256xbf16>
    %342 = vector.shape_cast %341 : vector<1x16x256xbf16> to vector<16x256xbf16>
    %cst_358 = arith.constant dense<0.000000e+00> : vector<16x256xf32>
    %343 = tpu.matmul %340, %342, %cst_358 {dimension_numbers = #tpu.dot_dimension_numbers<[1], [0], [0], [1], [0, 0, 1, 1], [], []>} : vector<16x16xbf16>, vector<16x256xbf16>, vector<16x256xf32> -> vector<16x256xf32>
    %344 = arith.addf %338, %343 : vector<16x256xf32>
    %c8_359 = arith.constant 8 : index
    %c0_360 = arith.constant 0 : index
    %c0_361 = arith.constant 0 : index
    %345 = vector.load %arg5[%c8_359, %c0_360, %c0_361] : memref<9x16x16xbf16, #tpu.memory_space<vmem>>, vector<1x16x16xbf16>
    %346 = vector.shape_cast %345 : vector<1x16x16xbf16> to vector<16x16xbf16>
    %c0_362 = arith.constant 0 : index
    %c0_363 = arith.constant 0 : index
    %c664_364 = arith.constant 664 : index
    %347 = vector.load %arg2[%c0_362, %c0_363, %c664_364] : memref<1x16x1408xbf16, #tpu.memory_space<vmem>>, vector<1x16x256xbf16>
    %348 = vector.shape_cast %347 : vector<1x16x256xbf16> to vector<16x256xbf16>
    %cst_365 = arith.constant dense<0.000000e+00> : vector<16x256xf32>
    %349 = tpu.matmul %346, %348, %cst_365 {dimension_numbers = #tpu.dot_dimension_numbers<[1], [0], [0], [1], [0, 0, 1, 1], [], []>} : vector<16x16xbf16>, vector<16x256xbf16>, vector<16x256xf32> -> vector<16x256xf32>
    %350 = arith.addf %344, %349 : vector<16x256xf32>
    %c0_366 = arith.constant 0 : index
    %c0_367 = arith.constant 0 : index
    %351 = vector.load %arg6[%c0_366, %c0_367] : memref<16x1xf32, #tpu.memory_space<vmem>>, vector<16x1xf32>
    %352 = vector.broadcast %351 : vector<16x1xf32> to vector<16x256xf32>
    %353 = arith.addf %350, %352 : vector<16x256xf32>
    %cst_368 = arith.constant 0.000000e+00 : f32
    %354 = vector.broadcast %cst_368 : f32 to vector<16x256xf32>
    %355 = arith.maximumf %353, %354 : vector<16x256xf32>
    %c0_369 = arith.constant 0 : index
    %c512_370 = arith.constant 512 : index
    %356 = vector.load %arg3[%c0_369, %c512_370] : memref<1x1152xf32, #tpu.memory_space<vmem>>, vector<1x256xf32>
    %357 = vector.broadcast %356 : vector<1x256xf32> to vector<16x256xf32>
    %358 = arith.mulf %355, %357 : vector<16x256xf32>
    %359 = arith.truncf %358 : vector<16x256xf32> to vector<16x256xbf16>
    %c0_371 = arith.constant 0 : index
    %c588_372 = arith.constant 588 : index
    %360 = vector.load %arg10[%c0_371, %c588_372] : memref<16x1408xbf16, #tpu.memory_space<vmem>>, vector<16x256xbf16>
    tpu.vector_store %arg10[%c0_371, %c588_372], %359 {strides = array<i32>} : memref<16x1408xbf16, #tpu.memory_space<vmem>>, vector<16x256xbf16>,
    %cst_373 = arith.constant 0.000000e+00 : f32
    %361 = vector.broadcast %cst_373 : f32 to vector<16x256xf32>
    %c0_374 = arith.constant 0 : index
    %c0_375 = arith.constant 0 : index
    %c0_376 = arith.constant 0 : index
    %362 = vector.load %arg4[%c0_374, %c0_375, %c0_376] : memref<9x16x16xbf16, #tpu.memory_space<vmem>>, vector<1x16x16xbf16>
    %363 = vector.shape_cast %362 : vector<1x16x16xbf16> to vector<16x16xbf16>
    %c0_377 = arith.constant 0 : index
    %c0_378 = arith.constant 0 : index
    %c768 = arith.constant 768 : index
    %364 = vector.load %arg1[%c0_377, %c0_378, %c768] : memref<1x16x1408xbf16, #tpu.memory_space<vmem>>, vector<1x16x256xbf16>
    %365 = vector.shape_cast %364 : vector<1x16x256xbf16> to vector<16x256xbf16>
    %cst_379 = arith.constant dense<0.000000e+00> : vector<16x256xf32>
    %366 = tpu.matmul %363, %365, %cst_379 {dimension_numbers = #tpu.dot_dimension_numbers<[1], [0], [0], [1], [0, 0, 1, 1], [], []>} : vector<16x16xbf16>, vector<16x256xbf16>, vector<16x256xf32> -> vector<16x256xf32>
    %367 = arith.addf %361, %366 : vector<16x256xf32>
    %c0_380 = arith.constant 0 : index
    %c0_381 = arith.constant 0 : index
    %c0_382 = arith.constant 0 : index
    %368 = vector.load %arg5[%c0_380, %c0_381, %c0_382] : memref<9x16x16xbf16, #tpu.memory_space<vmem>>, vector<1x16x16xbf16>
    %369 = vector.shape_cast %368 : vector<1x16x16xbf16> to vector<16x16xbf16>
    %c0_383 = arith.constant 0 : index
    %c0_384 = arith.constant 0 : index
    %c768_385 = arith.constant 768 : index
    %370 = vector.load %arg2[%c0_383, %c0_384, %c768_385] : memref<1x16x1408xbf16, #tpu.memory_space<vmem>>, vector<1x16x256xbf16>
    %371 = vector.shape_cast %370 : vector<1x16x256xbf16> to vector<16x256xbf16>
    %cst_386 = arith.constant dense<0.000000e+00> : vector<16x256xf32>
    %372 = tpu.matmul %369, %371, %cst_386 {dimension_numbers = #tpu.dot_dimension_numbers<[1], [0], [0], [1], [0, 0, 1, 1], [], []>} : vector<16x16xbf16>, vector<16x256xbf16>, vector<16x256xf32> -> vector<16x256xf32>
    %373 = arith.addf %367, %372 : vector<16x256xf32>
    %c1_387 = arith.constant 1 : index
    %c0_388 = arith.constant 0 : index
    %c0_389 = arith.constant 0 : index
    %374 = vector.load %arg4[%c1_387, %c0_388, %c0_389] : memref<9x16x16xbf16, #tpu.memory_space<vmem>>, vector<1x16x16xbf16>
    %375 = vector.shape_cast %374 : vector<1x16x16xbf16> to vector<16x16xbf16>
    %c0_390 = arith.constant 0 : index
    %c0_391 = arith.constant 0 : index
    %c772 = arith.constant 772 : index
    %376 = vector.load %arg1[%c0_390, %c0_391, %c772] : memref<1x16x1408xbf16, #tpu.memory_space<vmem>>, vector<1x16x256xbf16>
    %377 = vector.shape_cast %376 : vector<1x16x256xbf16> to vector<16x256xbf16>
    %cst_392 = arith.constant dense<0.000000e+00> : vector<16x256xf32>
    %378 = tpu.matmul %375, %377, %cst_392 {dimension_numbers = #tpu.dot_dimension_numbers<[1], [0], [0], [1], [0, 0, 1, 1], [], []>} : vector<16x16xbf16>, vector<16x256xbf16>, vector<16x256xf32> -> vector<16x256xf32>
    %379 = arith.addf %373, %378 : vector<16x256xf32>
    %c1_393 = arith.constant 1 : index
    %c0_394 = arith.constant 0 : index
    %c0_395 = arith.constant 0 : index
    %380 = vector.load %arg5[%c1_393, %c0_394, %c0_395] : memref<9x16x16xbf16, #tpu.memory_space<vmem>>, vector<1x16x16xbf16>
    %381 = vector.shape_cast %380 : vector<1x16x16xbf16> to vector<16x16xbf16>
    %c0_396 = arith.constant 0 : index
    %c0_397 = arith.constant 0 : index
    %c772_398 = arith.constant 772 : index
    %382 = vector.load %arg2[%c0_396, %c0_397, %c772_398] : memref<1x16x1408xbf16, #tpu.memory_space<vmem>>, vector<1x16x256xbf16>
    %383 = vector.shape_cast %382 : vector<1x16x256xbf16> to vector<16x256xbf16>
    %cst_399 = arith.constant dense<0.000000e+00> : vector<16x256xf32>
    %384 = tpu.matmul %381, %383, %cst_399 {dimension_numbers = #tpu.dot_dimension_numbers<[1], [0], [0], [1], [0, 0, 1, 1], [], []>} : vector<16x16xbf16>, vector<16x256xbf16>, vector<16x256xf32> -> vector<16x256xf32>
    %385 = arith.addf %379, %384 : vector<16x256xf32>
    %c2_400 = arith.constant 2 : index
    %c0_401 = arith.constant 0 : index
    %c0_402 = arith.constant 0 : index
    %386 = vector.load %arg4[%c2_400, %c0_401, %c0_402] : memref<9x16x16xbf16, #tpu.memory_space<vmem>>, vector<1x16x16xbf16>
    %387 = vector.shape_cast %386 : vector<1x16x16xbf16> to vector<16x16xbf16>
    %c0_403 = arith.constant 0 : index
    %c0_404 = arith.constant 0 : index
    %c776 = arith.constant 776 : index
    %388 = vector.load %arg1[%c0_403, %c0_404, %c776] : memref<1x16x1408xbf16, #tpu.memory_space<vmem>>, vector<1x16x256xbf16>
    %389 = vector.shape_cast %388 : vector<1x16x256xbf16> to vector<16x256xbf16>
    %cst_405 = arith.constant dense<0.000000e+00> : vector<16x256xf32>
    %390 = tpu.matmul %387, %389, %cst_405 {dimension_numbers = #tpu.dot_dimension_numbers<[1], [0], [0], [1], [0, 0, 1, 1], [], []>} : vector<16x16xbf16>, vector<16x256xbf16>, vector<16x256xf32> -> vector<16x256xf32>
    %391 = arith.addf %385, %390 : vector<16x256xf32>
    %c2_406 = arith.constant 2 : index
    %c0_407 = arith.constant 0 : index
    %c0_408 = arith.constant 0 : index
    %392 = vector.load %arg5[%c2_406, %c0_407, %c0_408] : memref<9x16x16xbf16, #tpu.memory_space<vmem>>, vector<1x16x16xbf16>
    %393 = vector.shape_cast %392 : vector<1x16x16xbf16> to vector<16x16xbf16>
    %c0_409 = arith.constant 0 : index
    %c0_410 = arith.constant 0 : index
    %c776_411 = arith.constant 776 : index
    %394 = vector.load %arg2[%c0_409, %c0_410, %c776_411] : memref<1x16x1408xbf16, #tpu.memory_space<vmem>>, vector<1x16x256xbf16>
    %395 = vector.shape_cast %394 : vector<1x16x256xbf16> to vector<16x256xbf16>
    %cst_412 = arith.constant dense<0.000000e+00> : vector<16x256xf32>
    %396 = tpu.matmul %393, %395, %cst_412 {dimension_numbers = #tpu.dot_dimension_numbers<[1], [0], [0], [1], [0, 0, 1, 1], [], []>} : vector<16x16xbf16>, vector<16x256xbf16>, vector<16x256xf32> -> vector<16x256xf32>
    %397 = arith.addf %391, %396 : vector<16x256xf32>
    %c3_413 = arith.constant 3 : index
    %c0_414 = arith.constant 0 : index
    %c0_415 = arith.constant 0 : index
    %398 = vector.load %arg4[%c3_413, %c0_414, %c0_415] : memref<9x16x16xbf16, #tpu.memory_space<vmem>>, vector<1x16x16xbf16>
    %399 = vector.shape_cast %398 : vector<1x16x16xbf16> to vector<16x16xbf16>
    %c0_416 = arith.constant 0 : index
    %c0_417 = arith.constant 0 : index
    %c840 = arith.constant 840 : index
    %400 = vector.load %arg1[%c0_416, %c0_417, %c840] : memref<1x16x1408xbf16, #tpu.memory_space<vmem>>, vector<1x16x256xbf16>
    %401 = vector.shape_cast %400 : vector<1x16x256xbf16> to vector<16x256xbf16>
    %cst_418 = arith.constant dense<0.000000e+00> : vector<16x256xf32>
    %402 = tpu.matmul %399, %401, %cst_418 {dimension_numbers = #tpu.dot_dimension_numbers<[1], [0], [0], [1], [0, 0, 1, 1], [], []>} : vector<16x16xbf16>, vector<16x256xbf16>, vector<16x256xf32> -> vector<16x256xf32>
    %403 = arith.addf %397, %402 : vector<16x256xf32>
    %c3_419 = arith.constant 3 : index
    %c0_420 = arith.constant 0 : index
    %c0_421 = arith.constant 0 : index
    %404 = vector.load %arg5[%c3_419, %c0_420, %c0_421] : memref<9x16x16xbf16, #tpu.memory_space<vmem>>, vector<1x16x16xbf16>
    %405 = vector.shape_cast %404 : vector<1x16x16xbf16> to vector<16x16xbf16>
    %c0_422 = arith.constant 0 : index
    %c0_423 = arith.constant 0 : index
    %c840_424 = arith.constant 840 : index
    %406 = vector.load %arg2[%c0_422, %c0_423, %c840_424] : memref<1x16x1408xbf16, #tpu.memory_space<vmem>>, vector<1x16x256xbf16>
    %407 = vector.shape_cast %406 : vector<1x16x256xbf16> to vector<16x256xbf16>
    %cst_425 = arith.constant dense<0.000000e+00> : vector<16x256xf32>
    %408 = tpu.matmul %405, %407, %cst_425 {dimension_numbers = #tpu.dot_dimension_numbers<[1], [0], [0], [1], [0, 0, 1, 1], [], []>} : vector<16x16xbf16>, vector<16x256xbf16>, vector<16x256xf32> -> vector<16x256xf32>
    %409 = arith.addf %403, %408 : vector<16x256xf32>
    %c4_426 = arith.constant 4 : index
    %c0_427 = arith.constant 0 : index
    %c0_428 = arith.constant 0 : index
    %410 = vector.load %arg4[%c4_426, %c0_427, %c0_428] : memref<9x16x16xbf16, #tpu.memory_space<vmem>>, vector<1x16x16xbf16>
    %411 = vector.shape_cast %410 : vector<1x16x16xbf16> to vector<16x16xbf16>
    %c0_429 = arith.constant 0 : index
    %c0_430 = arith.constant 0 : index
    %c844 = arith.constant 844 : index
    %412 = vector.load %arg1[%c0_429, %c0_430, %c844] : memref<1x16x1408xbf16, #tpu.memory_space<vmem>>, vector<1x16x256xbf16>
    %413 = vector.shape_cast %412 : vector<1x16x256xbf16> to vector<16x256xbf16>
    %cst_431 = arith.constant dense<0.000000e+00> : vector<16x256xf32>
    %414 = tpu.matmul %411, %413, %cst_431 {dimension_numbers = #tpu.dot_dimension_numbers<[1], [0], [0], [1], [0, 0, 1, 1], [], []>} : vector<16x16xbf16>, vector<16x256xbf16>, vector<16x256xf32> -> vector<16x256xf32>
    %415 = arith.addf %409, %414 : vector<16x256xf32>
    %c4_432 = arith.constant 4 : index
    %c0_433 = arith.constant 0 : index
    %c0_434 = arith.constant 0 : index
    %416 = vector.load %arg5[%c4_432, %c0_433, %c0_434] : memref<9x16x16xbf16, #tpu.memory_space<vmem>>, vector<1x16x16xbf16>
    %417 = vector.shape_cast %416 : vector<1x16x16xbf16> to vector<16x16xbf16>
    %c0_435 = arith.constant 0 : index
    %c0_436 = arith.constant 0 : index
    %c844_437 = arith.constant 844 : index
    %418 = vector.load %arg2[%c0_435, %c0_436, %c844_437] : memref<1x16x1408xbf16, #tpu.memory_space<vmem>>, vector<1x16x256xbf16>
    %419 = vector.shape_cast %418 : vector<1x16x256xbf16> to vector<16x256xbf16>
    %cst_438 = arith.constant dense<0.000000e+00> : vector<16x256xf32>
    %420 = tpu.matmul %417, %419, %cst_438 {dimension_numbers = #tpu.dot_dimension_numbers<[1], [0], [0], [1], [0, 0, 1, 1], [], []>} : vector<16x16xbf16>, vector<16x256xbf16>, vector<16x256xf32> -> vector<16x256xf32>
    %421 = arith.addf %415, %420 : vector<16x256xf32>
    %c5_439 = arith.constant 5 : index
    %c0_440 = arith.constant 0 : index
    %c0_441 = arith.constant 0 : index
    %422 = vector.load %arg4[%c5_439, %c0_440, %c0_441] : memref<9x16x16xbf16, #tpu.memory_space<vmem>>, vector<1x16x16xbf16>
    %423 = vector.shape_cast %422 : vector<1x16x16xbf16> to vector<16x16xbf16>
    %c0_442 = arith.constant 0 : index
    %c0_443 = arith.constant 0 : index
    %c848 = arith.constant 848 : index
    %424 = vector.load %arg1[%c0_442, %c0_443, %c848] : memref<1x16x1408xbf16, #tpu.memory_space<vmem>>, vector<1x16x256xbf16>
    %425 = vector.shape_cast %424 : vector<1x16x256xbf16> to vector<16x256xbf16>
    %cst_444 = arith.constant dense<0.000000e+00> : vector<16x256xf32>
    %426 = tpu.matmul %423, %425, %cst_444 {dimension_numbers = #tpu.dot_dimension_numbers<[1], [0], [0], [1], [0, 0, 1, 1], [], []>} : vector<16x16xbf16>, vector<16x256xbf16>, vector<16x256xf32> -> vector<16x256xf32>
    %427 = arith.addf %421, %426 : vector<16x256xf32>
    %c5_445 = arith.constant 5 : index
    %c0_446 = arith.constant 0 : index
    %c0_447 = arith.constant 0 : index
    %428 = vector.load %arg5[%c5_445, %c0_446, %c0_447] : memref<9x16x16xbf16, #tpu.memory_space<vmem>>, vector<1x16x16xbf16>
    %429 = vector.shape_cast %428 : vector<1x16x16xbf16> to vector<16x16xbf16>
    %c0_448 = arith.constant 0 : index
    %c0_449 = arith.constant 0 : index
    %c848_450 = arith.constant 848 : index
    %430 = vector.load %arg2[%c0_448, %c0_449, %c848_450] : memref<1x16x1408xbf16, #tpu.memory_space<vmem>>, vector<1x16x256xbf16>
    %431 = vector.shape_cast %430 : vector<1x16x256xbf16> to vector<16x256xbf16>
    %cst_451 = arith.constant dense<0.000000e+00> : vector<16x256xf32>
    %432 = tpu.matmul %429, %431, %cst_451 {dimension_numbers = #tpu.dot_dimension_numbers<[1], [0], [0], [1], [0, 0, 1, 1], [], []>} : vector<16x16xbf16>, vector<16x256xbf16>, vector<16x256xf32> -> vector<16x256xf32>
    %433 = arith.addf %427, %432 : vector<16x256xf32>
    %c6_452 = arith.constant 6 : index
    %c0_453 = arith.constant 0 : index
    %c0_454 = arith.constant 0 : index
    %434 = vector.load %arg4[%c6_452, %c0_453, %c0_454] : memref<9x16x16xbf16, #tpu.memory_space<vmem>>, vector<1x16x16xbf16>
    %435 = vector.shape_cast %434 : vector<1x16x16xbf16> to vector<16x16xbf16>
    %c0_455 = arith.constant 0 : index
    %c0_456 = arith.constant 0 : index
    %c912 = arith.constant 912 : index
    %436 = vector.load %arg1[%c0_455, %c0_456, %c912] : memref<1x16x1408xbf16, #tpu.memory_space<vmem>>, vector<1x16x256xbf16>
    %437 = vector.shape_cast %436 : vector<1x16x256xbf16> to vector<16x256xbf16>
    %cst_457 = arith.constant dense<0.000000e+00> : vector<16x256xf32>
    %438 = tpu.matmul %435, %437, %cst_457 {dimension_numbers = #tpu.dot_dimension_numbers<[1], [0], [0], [1], [0, 0, 1, 1], [], []>} : vector<16x16xbf16>, vector<16x256xbf16>, vector<16x256xf32> -> vector<16x256xf32>
    %439 = arith.addf %433, %438 : vector<16x256xf32>
    %c6_458 = arith.constant 6 : index
    %c0_459 = arith.constant 0 : index
    %c0_460 = arith.constant 0 : index
    %440 = vector.load %arg5[%c6_458, %c0_459, %c0_460] : memref<9x16x16xbf16, #tpu.memory_space<vmem>>, vector<1x16x16xbf16>
    %441 = vector.shape_cast %440 : vector<1x16x16xbf16> to vector<16x16xbf16>
    %c0_461 = arith.constant 0 : index
    %c0_462 = arith.constant 0 : index
    %c912_463 = arith.constant 912 : index
    %442 = vector.load %arg2[%c0_461, %c0_462, %c912_463] : memref<1x16x1408xbf16, #tpu.memory_space<vmem>>, vector<1x16x256xbf16>
    %443 = vector.shape_cast %442 : vector<1x16x256xbf16> to vector<16x256xbf16>
    %cst_464 = arith.constant dense<0.000000e+00> : vector<16x256xf32>
    %444 = tpu.matmul %441, %443, %cst_464 {dimension_numbers = #tpu.dot_dimension_numbers<[1], [0], [0], [1], [0, 0, 1, 1], [], []>} : vector<16x16xbf16>, vector<16x256xbf16>, vector<16x256xf32> -> vector<16x256xf32>
    %445 = arith.addf %439, %444 : vector<16x256xf32>
    %c7_465 = arith.constant 7 : index
    %c0_466 = arith.constant 0 : index
    %c0_467 = arith.constant 0 : index
    %446 = vector.load %arg4[%c7_465, %c0_466, %c0_467] : memref<9x16x16xbf16, #tpu.memory_space<vmem>>, vector<1x16x16xbf16>
    %447 = vector.shape_cast %446 : vector<1x16x16xbf16> to vector<16x16xbf16>
    %c0_468 = arith.constant 0 : index
    %c0_469 = arith.constant 0 : index
    %c916 = arith.constant 916 : index
    %448 = vector.load %arg1[%c0_468, %c0_469, %c916] : memref<1x16x1408xbf16, #tpu.memory_space<vmem>>, vector<1x16x256xbf16>
    %449 = vector.shape_cast %448 : vector<1x16x256xbf16> to vector<16x256xbf16>
    %cst_470 = arith.constant dense<0.000000e+00> : vector<16x256xf32>
    %450 = tpu.matmul %447, %449, %cst_470 {dimension_numbers = #tpu.dot_dimension_numbers<[1], [0], [0], [1], [0, 0, 1, 1], [], []>} : vector<16x16xbf16>, vector<16x256xbf16>, vector<16x256xf32> -> vector<16x256xf32>
    %451 = arith.addf %445, %450 : vector<16x256xf32>
    %c7_471 = arith.constant 7 : index
    %c0_472 = arith.constant 0 : index
    %c0_473 = arith.constant 0 : index
    %452 = vector.load %arg5[%c7_471, %c0_472, %c0_473] : memref<9x16x16xbf16, #tpu.memory_space<vmem>>, vector<1x16x16xbf16>
    %453 = vector.shape_cast %452 : vector<1x16x16xbf16> to vector<16x16xbf16>
    %c0_474 = arith.constant 0 : index
    %c0_475 = arith.constant 0 : index
    %c916_476 = arith.constant 916 : index
    %454 = vector.load %arg2[%c0_474, %c0_475, %c916_476] : memref<1x16x1408xbf16, #tpu.memory_space<vmem>>, vector<1x16x256xbf16>
    %455 = vector.shape_cast %454 : vector<1x16x256xbf16> to vector<16x256xbf16>
    %cst_477 = arith.constant dense<0.000000e+00> : vector<16x256xf32>
    %456 = tpu.matmul %453, %455, %cst_477 {dimension_numbers = #tpu.dot_dimension_numbers<[1], [0], [0], [1], [0, 0, 1, 1], [], []>} : vector<16x16xbf16>, vector<16x256xbf16>, vector<16x256xf32> -> vector<16x256xf32>
    %457 = arith.addf %451, %456 : vector<16x256xf32>
    %c8_478 = arith.constant 8 : index
    %c0_479 = arith.constant 0 : index
    %c0_480 = arith.constant 0 : index
    %458 = vector.load %arg4[%c8_478, %c0_479, %c0_480] : memref<9x16x16xbf16, #tpu.memory_space<vmem>>, vector<1x16x16xbf16>
    %459 = vector.shape_cast %458 : vector<1x16x16xbf16> to vector<16x16xbf16>
    %c0_481 = arith.constant 0 : index
    %c0_482 = arith.constant 0 : index
    %c920 = arith.constant 920 : index
    %460 = vector.load %arg1[%c0_481, %c0_482, %c920] : memref<1x16x1408xbf16, #tpu.memory_space<vmem>>, vector<1x16x256xbf16>
    %461 = vector.shape_cast %460 : vector<1x16x256xbf16> to vector<16x256xbf16>
    %cst_483 = arith.constant dense<0.000000e+00> : vector<16x256xf32>
    %462 = tpu.matmul %459, %461, %cst_483 {dimension_numbers = #tpu.dot_dimension_numbers<[1], [0], [0], [1], [0, 0, 1, 1], [], []>} : vector<16x16xbf16>, vector<16x256xbf16>, vector<16x256xf32> -> vector<16x256xf32>
    %463 = arith.addf %457, %462 : vector<16x256xf32>
    %c8_484 = arith.constant 8 : index
    %c0_485 = arith.constant 0 : index
    %c0_486 = arith.constant 0 : index
    %464 = vector.load %arg5[%c8_484, %c0_485, %c0_486] : memref<9x16x16xbf16, #tpu.memory_space<vmem>>, vector<1x16x16xbf16>
    %465 = vector.shape_cast %464 : vector<1x16x16xbf16> to vector<16x16xbf16>
    %c0_487 = arith.constant 0 : index
    %c0_488 = arith.constant 0 : index
    %c920_489 = arith.constant 920 : index
    %466 = vector.load %arg2[%c0_487, %c0_488, %c920_489] : memref<1x16x1408xbf16, #tpu.memory_space<vmem>>, vector<1x16x256xbf16>
    %467 = vector.shape_cast %466 : vector<1x16x256xbf16> to vector<16x256xbf16>
    %cst_490 = arith.constant dense<0.000000e+00> : vector<16x256xf32>
    %468 = tpu.matmul %465, %467, %cst_490 {dimension_numbers = #tpu.dot_dimension_numbers<[1], [0], [0], [1], [0, 0, 1, 1], [], []>} : vector<16x16xbf16>, vector<16x256xbf16>, vector<16x256xf32> -> vector<16x256xf32>
    %469 = arith.addf %463, %468 : vector<16x256xf32>
    %c0_491 = arith.constant 0 : index
    %c0_492 = arith.constant 0 : index
    %470 = vector.load %arg6[%c0_491, %c0_492] : memref<16x1xf32, #tpu.memory_space<vmem>>, vector<16x1xf32>
    %471 = vector.broadcast %470 : vector<16x1xf32> to vector<16x256xf32>
    %472 = arith.addf %469, %471 : vector<16x256xf32>
    %cst_493 = arith.constant 0.000000e+00 : f32
    %473 = vector.broadcast %cst_493 : f32 to vector<16x256xf32>
    %474 = arith.maximumf %472, %473 : vector<16x256xf32>
    %c0_494 = arith.constant 0 : index
    %c768_495 = arith.constant 768 : index
    %475 = vector.load %arg3[%c0_494, %c768_495] : memref<1x1152xf32, #tpu.memory_space<vmem>>, vector<1x256xf32>
    %476 = vector.broadcast %475 : vector<1x256xf32> to vector<16x256xf32>
    %477 = arith.mulf %474, %476 : vector<16x256xf32>
    %478 = arith.truncf %477 : vector<16x256xf32> to vector<16x256xbf16>
    %c0_496 = arith.constant 0 : index
    %c844_497 = arith.constant 844 : index
    %479 = vector.load %arg10[%c0_496, %c844_497] : memref<16x1408xbf16, #tpu.memory_space<vmem>>, vector<16x256xbf16>
    tpu.vector_store %arg10[%c0_496, %c844_497], %478 {strides = array<i32>} : memref<16x1408xbf16, #tpu.memory_space<vmem>>, vector<16x256xbf16>,
    %cst_498 = arith.constant 0.000000e+00 : f32
    %480 = vector.broadcast %cst_498 : f32 to vector<16x128xf32>
    %c0_499 = arith.constant 0 : index
    %c0_500 = arith.constant 0 : index
    %c0_501 = arith.constant 0 : index
    %481 = vector.load %arg4[%c0_499, %c0_500, %c0_501] : memref<9x16x16xbf16, #tpu.memory_space<vmem>>, vector<1x16x16xbf16>
    %482 = vector.shape_cast %481 : vector<1x16x16xbf16> to vector<16x16xbf16>
    %c0_502 = arith.constant 0 : index
    %c0_503 = arith.constant 0 : index
    %c1024 = arith.constant 1024 : index
    %483 = vector.load %arg1[%c0_502, %c0_503, %c1024] : memref<1x16x1408xbf16, #tpu.memory_space<vmem>>, vector<1x16x128xbf16>
    %484 = vector.shape_cast %483 : vector<1x16x128xbf16> to vector<16x128xbf16>
    %cst_504 = arith.constant dense<0.000000e+00> : vector<16x128xf32>
    %485 = tpu.matmul %482, %484, %cst_504 {dimension_numbers = #tpu.dot_dimension_numbers<[1], [0], [0], [1], [0, 0, 1, 1], [], []>} : vector<16x16xbf16>, vector<16x128xbf16>, vector<16x128xf32> -> vector<16x128xf32>
    %486 = arith.addf %480, %485 : vector<16x128xf32>
    %c0_505 = arith.constant 0 : index
    %c0_506 = arith.constant 0 : index
    %c0_507 = arith.constant 0 : index
    %487 = vector.load %arg5[%c0_505, %c0_506, %c0_507] : memref<9x16x16xbf16, #tpu.memory_space<vmem>>, vector<1x16x16xbf16>
    %488 = vector.shape_cast %487 : vector<1x16x16xbf16> to vector<16x16xbf16>
    %c0_508 = arith.constant 0 : index
    %c0_509 = arith.constant 0 : index
    %c1024_510 = arith.constant 1024 : index
    %489 = vector.load %arg2[%c0_508, %c0_509, %c1024_510] : memref<1x16x1408xbf16, #tpu.memory_space<vmem>>, vector<1x16x128xbf16>
    %490 = vector.shape_cast %489 : vector<1x16x128xbf16> to vector<16x128xbf16>
    %cst_511 = arith.constant dense<0.000000e+00> : vector<16x128xf32>
    %491 = tpu.matmul %488, %490, %cst_511 {dimension_numbers = #tpu.dot_dimension_numbers<[1], [0], [0], [1], [0, 0, 1, 1], [], []>} : vector<16x16xbf16>, vector<16x128xbf16>, vector<16x128xf32> -> vector<16x128xf32>
    %492 = arith.addf %486, %491 : vector<16x128xf32>
    %c1_512 = arith.constant 1 : index
    %c0_513 = arith.constant 0 : index
    %c0_514 = arith.constant 0 : index
    %493 = vector.load %arg4[%c1_512, %c0_513, %c0_514] : memref<9x16x16xbf16, #tpu.memory_space<vmem>>, vector<1x16x16xbf16>
    %494 = vector.shape_cast %493 : vector<1x16x16xbf16> to vector<16x16xbf16>
    %c0_515 = arith.constant 0 : index
    %c0_516 = arith.constant 0 : index
    %c1028 = arith.constant 1028 : index
    %495 = vector.load %arg1[%c0_515, %c0_516, %c1028] : memref<1x16x1408xbf16, #tpu.memory_space<vmem>>, vector<1x16x128xbf16>
    %496 = vector.shape_cast %495 : vector<1x16x128xbf16> to vector<16x128xbf16>
    %cst_517 = arith.constant dense<0.000000e+00> : vector<16x128xf32>
    %497 = tpu.matmul %494, %496, %cst_517 {dimension_numbers = #tpu.dot_dimension_numbers<[1], [0], [0], [1], [0, 0, 1, 1], [], []>} : vector<16x16xbf16>, vector<16x128xbf16>, vector<16x128xf32> -> vector<16x128xf32>
    %498 = arith.addf %492, %497 : vector<16x128xf32>
    %c1_518 = arith.constant 1 : index
    %c0_519 = arith.constant 0 : index
    %c0_520 = arith.constant 0 : index
    %499 = vector.load %arg5[%c1_518, %c0_519, %c0_520] : memref<9x16x16xbf16, #tpu.memory_space<vmem>>, vector<1x16x16xbf16>
    %500 = vector.shape_cast %499 : vector<1x16x16xbf16> to vector<16x16xbf16>
    %c0_521 = arith.constant 0 : index
    %c0_522 = arith.constant 0 : index
    %c1028_523 = arith.constant 1028 : index
    %501 = vector.load %arg2[%c0_521, %c0_522, %c1028_523] : memref<1x16x1408xbf16, #tpu.memory_space<vmem>>, vector<1x16x128xbf16>
    %502 = vector.shape_cast %501 : vector<1x16x128xbf16> to vector<16x128xbf16>
    %cst_524 = arith.constant dense<0.000000e+00> : vector<16x128xf32>
    %503 = tpu.matmul %500, %502, %cst_524 {dimension_numbers = #tpu.dot_dimension_numbers<[1], [0], [0], [1], [0, 0, 1, 1], [], []>} : vector<16x16xbf16>, vector<16x128xbf16>, vector<16x128xf32> -> vector<16x128xf32>
    %504 = arith.addf %498, %503 : vector<16x128xf32>
    %c2_525 = arith.constant 2 : index
    %c0_526 = arith.constant 0 : index
    %c0_527 = arith.constant 0 : index
    %505 = vector.load %arg4[%c2_525, %c0_526, %c0_527] : memref<9x16x16xbf16, #tpu.memory_space<vmem>>, vector<1x16x16xbf16>
    %506 = vector.shape_cast %505 : vector<1x16x16xbf16> to vector<16x16xbf16>
    %c0_528 = arith.constant 0 : index
    %c0_529 = arith.constant 0 : index
    %c1032 = arith.constant 1032 : index
    %507 = vector.load %arg1[%c0_528, %c0_529, %c1032] : memref<1x16x1408xbf16, #tpu.memory_space<vmem>>, vector<1x16x128xbf16>
    %508 = vector.shape_cast %507 : vector<1x16x128xbf16> to vector<16x128xbf16>
    %cst_530 = arith.constant dense<0.000000e+00> : vector<16x128xf32>
    %509 = tpu.matmul %506, %508, %cst_530 {dimension_numbers = #tpu.dot_dimension_numbers<[1], [0], [0], [1], [0, 0, 1, 1], [], []>} : vector<16x16xbf16>, vector<16x128xbf16>, vector<16x128xf32> -> vector<16x128xf32>
    %510 = arith.addf %504, %509 : vector<16x128xf32>
    %c2_531 = arith.constant 2 : index
    %c0_532 = arith.constant 0 : index
    %c0_533 = arith.constant 0 : index
    %511 = vector.load %arg5[%c2_531, %c0_532, %c0_533] : memref<9x16x16xbf16, #tpu.memory_space<vmem>>, vector<1x16x16xbf16>
    %512 = vector.shape_cast %511 : vector<1x16x16xbf16> to vector<16x16xbf16>
    %c0_534 = arith.constant 0 : index
    %c0_535 = arith.constant 0 : index
    %c1032_536 = arith.constant 1032 : index
    %513 = vector.load %arg2[%c0_534, %c0_535, %c1032_536] : memref<1x16x1408xbf16, #tpu.memory_space<vmem>>, vector<1x16x128xbf16>
    %514 = vector.shape_cast %513 : vector<1x16x128xbf16> to vector<16x128xbf16>
    %cst_537 = arith.constant dense<0.000000e+00> : vector<16x128xf32>
    %515 = tpu.matmul %512, %514, %cst_537 {dimension_numbers = #tpu.dot_dimension_numbers<[1], [0], [0], [1], [0, 0, 1, 1], [], []>} : vector<16x16xbf16>, vector<16x128xbf16>, vector<16x128xf32> -> vector<16x128xf32>
    %516 = arith.addf %510, %515 : vector<16x128xf32>
    %c3_538 = arith.constant 3 : index
    %c0_539 = arith.constant 0 : index
    %c0_540 = arith.constant 0 : index
    %517 = vector.load %arg4[%c3_538, %c0_539, %c0_540] : memref<9x16x16xbf16, #tpu.memory_space<vmem>>, vector<1x16x16xbf16>
    %518 = vector.shape_cast %517 : vector<1x16x16xbf16> to vector<16x16xbf16>
    %c0_541 = arith.constant 0 : index
    %c0_542 = arith.constant 0 : index
    %c1096 = arith.constant 1096 : index
    %519 = vector.load %arg1[%c0_541, %c0_542, %c1096] : memref<1x16x1408xbf16, #tpu.memory_space<vmem>>, vector<1x16x128xbf16>
    %520 = vector.shape_cast %519 : vector<1x16x128xbf16> to vector<16x128xbf16>
    %cst_543 = arith.constant dense<0.000000e+00> : vector<16x128xf32>
    %521 = tpu.matmul %518, %520, %cst_543 {dimension_numbers = #tpu.dot_dimension_numbers<[1], [0], [0], [1], [0, 0, 1, 1], [], []>} : vector<16x16xbf16>, vector<16x128xbf16>, vector<16x128xf32> -> vector<16x128xf32>
    %522 = arith.addf %516, %521 : vector<16x128xf32>
    %c3_544 = arith.constant 3 : index
    %c0_545 = arith.constant 0 : index
    %c0_546 = arith.constant 0 : index
    %523 = vector.load %arg5[%c3_544, %c0_545, %c0_546] : memref<9x16x16xbf16, #tpu.memory_space<vmem>>, vector<1x16x16xbf16>
    %524 = vector.shape_cast %523 : vector<1x16x16xbf16> to vector<16x16xbf16>
    %c0_547 = arith.constant 0 : index
    %c0_548 = arith.constant 0 : index
    %c1096_549 = arith.constant 1096 : index
    %525 = vector.load %arg2[%c0_547, %c0_548, %c1096_549] : memref<1x16x1408xbf16, #tpu.memory_space<vmem>>, vector<1x16x128xbf16>
    %526 = vector.shape_cast %525 : vector<1x16x128xbf16> to vector<16x128xbf16>
    %cst_550 = arith.constant dense<0.000000e+00> : vector<16x128xf32>
    %527 = tpu.matmul %524, %526, %cst_550 {dimension_numbers = #tpu.dot_dimension_numbers<[1], [0], [0], [1], [0, 0, 1, 1], [], []>} : vector<16x16xbf16>, vector<16x128xbf16>, vector<16x128xf32> -> vector<16x128xf32>
    %528 = arith.addf %522, %527 : vector<16x128xf32>
    %c4_551 = arith.constant 4 : index
    %c0_552 = arith.constant 0 : index
    %c0_553 = arith.constant 0 : index
    %529 = vector.load %arg4[%c4_551, %c0_552, %c0_553] : memref<9x16x16xbf16, #tpu.memory_space<vmem>>, vector<1x16x16xbf16>
    %530 = vector.shape_cast %529 : vector<1x16x16xbf16> to vector<16x16xbf16>
    %c0_554 = arith.constant 0 : index
    %c0_555 = arith.constant 0 : index
    %c1100 = arith.constant 1100 : index
    %531 = vector.load %arg1[%c0_554, %c0_555, %c1100] : memref<1x16x1408xbf16, #tpu.memory_space<vmem>>, vector<1x16x128xbf16>
    %532 = vector.shape_cast %531 : vector<1x16x128xbf16> to vector<16x128xbf16>
    %cst_556 = arith.constant dense<0.000000e+00> : vector<16x128xf32>
    %533 = tpu.matmul %530, %532, %cst_556 {dimension_numbers = #tpu.dot_dimension_numbers<[1], [0], [0], [1], [0, 0, 1, 1], [], []>} : vector<16x16xbf16>, vector<16x128xbf16>, vector<16x128xf32> -> vector<16x128xf32>
    %534 = arith.addf %528, %533 : vector<16x128xf32>
    %c4_557 = arith.constant 4 : index
    %c0_558 = arith.constant 0 : index
    %c0_559 = arith.constant 0 : index
    %535 = vector.load %arg5[%c4_557, %c0_558, %c0_559] : memref<9x16x16xbf16, #tpu.memory_space<vmem>>, vector<1x16x16xbf16>
    %536 = vector.shape_cast %535 : vector<1x16x16xbf16> to vector<16x16xbf16>
    %c0_560 = arith.constant 0 : index
    %c0_561 = arith.constant 0 : index
    %c1100_562 = arith.constant 1100 : index
    %537 = vector.load %arg2[%c0_560, %c0_561, %c1100_562] : memref<1x16x1408xbf16, #tpu.memory_space<vmem>>, vector<1x16x128xbf16>
    %538 = vector.shape_cast %537 : vector<1x16x128xbf16> to vector<16x128xbf16>
    %cst_563 = arith.constant dense<0.000000e+00> : vector<16x128xf32>
    %539 = tpu.matmul %536, %538, %cst_563 {dimension_numbers = #tpu.dot_dimension_numbers<[1], [0], [0], [1], [0, 0, 1, 1], [], []>} : vector<16x16xbf16>, vector<16x128xbf16>, vector<16x128xf32> -> vector<16x128xf32>
    %540 = arith.addf %534, %539 : vector<16x128xf32>
    %c5_564 = arith.constant 5 : index
    %c0_565 = arith.constant 0 : index
    %c0_566 = arith.constant 0 : index
    %541 = vector.load %arg4[%c5_564, %c0_565, %c0_566] : memref<9x16x16xbf16, #tpu.memory_space<vmem>>, vector<1x16x16xbf16>
    %542 = vector.shape_cast %541 : vector<1x16x16xbf16> to vector<16x16xbf16>
    %c0_567 = arith.constant 0 : index
    %c0_568 = arith.constant 0 : index
    %c1104 = arith.constant 1104 : index
    %543 = vector.load %arg1[%c0_567, %c0_568, %c1104] : memref<1x16x1408xbf16, #tpu.memory_space<vmem>>, vector<1x16x128xbf16>
    %544 = vector.shape_cast %543 : vector<1x16x128xbf16> to vector<16x128xbf16>
    %cst_569 = arith.constant dense<0.000000e+00> : vector<16x128xf32>
    %545 = tpu.matmul %542, %544, %cst_569 {dimension_numbers = #tpu.dot_dimension_numbers<[1], [0], [0], [1], [0, 0, 1, 1], [], []>} : vector<16x16xbf16>, vector<16x128xbf16>, vector<16x128xf32> -> vector<16x128xf32>
    %546 = arith.addf %540, %545 : vector<16x128xf32>
    %c5_570 = arith.constant 5 : index
    %c0_571 = arith.constant 0 : index
    %c0_572 = arith.constant 0 : index
    %547 = vector.load %arg5[%c5_570, %c0_571, %c0_572] : memref<9x16x16xbf16, #tpu.memory_space<vmem>>, vector<1x16x16xbf16>
    %548 = vector.shape_cast %547 : vector<1x16x16xbf16> to vector<16x16xbf16>
    %c0_573 = arith.constant 0 : index
    %c0_574 = arith.constant 0 : index
    %c1104_575 = arith.constant 1104 : index
    %549 = vector.load %arg2[%c0_573, %c0_574, %c1104_575] : memref<1x16x1408xbf16, #tpu.memory_space<vmem>>, vector<1x16x128xbf16>
    %550 = vector.shape_cast %549 : vector<1x16x128xbf16> to vector<16x128xbf16>
    %cst_576 = arith.constant dense<0.000000e+00> : vector<16x128xf32>
    %551 = tpu.matmul %548, %550, %cst_576 {dimension_numbers = #tpu.dot_dimension_numbers<[1], [0], [0], [1], [0, 0, 1, 1], [], []>} : vector<16x16xbf16>, vector<16x128xbf16>, vector<16x128xf32> -> vector<16x128xf32>
    %552 = arith.addf %546, %551 : vector<16x128xf32>
    %c6_577 = arith.constant 6 : index
    %c0_578 = arith.constant 0 : index
    %c0_579 = arith.constant 0 : index
    %553 = vector.load %arg4[%c6_577, %c0_578, %c0_579] : memref<9x16x16xbf16, #tpu.memory_space<vmem>>, vector<1x16x16xbf16>
    %554 = vector.shape_cast %553 : vector<1x16x16xbf16> to vector<16x16xbf16>
    %c0_580 = arith.constant 0 : index
    %c0_581 = arith.constant 0 : index
    %c1168 = arith.constant 1168 : index
    %555 = vector.load %arg1[%c0_580, %c0_581, %c1168] : memref<1x16x1408xbf16, #tpu.memory_space<vmem>>, vector<1x16x128xbf16>
    %556 = vector.shape_cast %555 : vector<1x16x128xbf16> to vector<16x128xbf16>
    %cst_582 = arith.constant dense<0.000000e+00> : vector<16x128xf32>
    %557 = tpu.matmul %554, %556, %cst_582 {dimension_numbers = #tpu.dot_dimension_numbers<[1], [0], [0], [1], [0, 0, 1, 1], [], []>} : vector<16x16xbf16>, vector<16x128xbf16>, vector<16x128xf32> -> vector<16x128xf32>
    %558 = arith.addf %552, %557 : vector<16x128xf32>
    %c6_583 = arith.constant 6 : index
    %c0_584 = arith.constant 0 : index
    %c0_585 = arith.constant 0 : index
    %559 = vector.load %arg5[%c6_583, %c0_584, %c0_585] : memref<9x16x16xbf16, #tpu.memory_space<vmem>>, vector<1x16x16xbf16>
    %560 = vector.shape_cast %559 : vector<1x16x16xbf16> to vector<16x16xbf16>
    %c0_586 = arith.constant 0 : index
    %c0_587 = arith.constant 0 : index
    %c1168_588 = arith.constant 1168 : index
    %561 = vector.load %arg2[%c0_586, %c0_587, %c1168_588] : memref<1x16x1408xbf16, #tpu.memory_space<vmem>>, vector<1x16x128xbf16>
    %562 = vector.shape_cast %561 : vector<1x16x128xbf16> to vector<16x128xbf16>
    %cst_589 = arith.constant dense<0.000000e+00> : vector<16x128xf32>
    %563 = tpu.matmul %560, %562, %cst_589 {dimension_numbers = #tpu.dot_dimension_numbers<[1], [0], [0], [1], [0, 0, 1, 1], [], []>} : vector<16x16xbf16>, vector<16x128xbf16>, vector<16x128xf32> -> vector<16x128xf32>
    %564 = arith.addf %558, %563 : vector<16x128xf32>
    %c7_590 = arith.constant 7 : index
    %c0_591 = arith.constant 0 : index
    %c0_592 = arith.constant 0 : index
    %565 = vector.load %arg4[%c7_590, %c0_591, %c0_592] : memref<9x16x16xbf16, #tpu.memory_space<vmem>>, vector<1x16x16xbf16>
    %566 = vector.shape_cast %565 : vector<1x16x16xbf16> to vector<16x16xbf16>
    %c0_593 = arith.constant 0 : index
    %c0_594 = arith.constant 0 : index
    %c1172 = arith.constant 1172 : index
    %567 = vector.load %arg1[%c0_593, %c0_594, %c1172] : memref<1x16x1408xbf16, #tpu.memory_space<vmem>>, vector<1x16x128xbf16>
    %568 = vector.shape_cast %567 : vector<1x16x128xbf16> to vector<16x128xbf16>
    %cst_595 = arith.constant dense<0.000000e+00> : vector<16x128xf32>
    %569 = tpu.matmul %566, %568, %cst_595 {dimension_numbers = #tpu.dot_dimension_numbers<[1], [0], [0], [1], [0, 0, 1, 1], [], []>} : vector<16x16xbf16>, vector<16x128xbf16>, vector<16x128xf32> -> vector<16x128xf32>
    %570 = arith.addf %564, %569 : vector<16x128xf32>
    %c7_596 = arith.constant 7 : index
    %c0_597 = arith.constant 0 : index
    %c0_598 = arith.constant 0 : index
    %571 = vector.load %arg5[%c7_596, %c0_597, %c0_598] : memref<9x16x16xbf16, #tpu.memory_space<vmem>>, vector<1x16x16xbf16>
    %572 = vector.shape_cast %571 : vector<1x16x16xbf16> to vector<16x16xbf16>
    %c0_599 = arith.constant 0 : index
    %c0_600 = arith.constant 0 : index
    %c1172_601 = arith.constant 1172 : index
    %573 = vector.load %arg2[%c0_599, %c0_600, %c1172_601] : memref<1x16x1408xbf16, #tpu.memory_space<vmem>>, vector<1x16x128xbf16>
    %574 = vector.shape_cast %573 : vector<1x16x128xbf16> to vector<16x128xbf16>
    %cst_602 = arith.constant dense<0.000000e+00> : vector<16x128xf32>
    %575 = tpu.matmul %572, %574, %cst_602 {dimension_numbers = #tpu.dot_dimension_numbers<[1], [0], [0], [1], [0, 0, 1, 1], [], []>} : vector<16x16xbf16>, vector<16x128xbf16>, vector<16x128xf32> -> vector<16x128xf32>
    %576 = arith.addf %570, %575 : vector<16x128xf32>
    %c8_603 = arith.constant 8 : index
    %c0_604 = arith.constant 0 : index
    %c0_605 = arith.constant 0 : index
    %577 = vector.load %arg4[%c8_603, %c0_604, %c0_605] : memref<9x16x16xbf16, #tpu.memory_space<vmem>>, vector<1x16x16xbf16>
    %578 = vector.shape_cast %577 : vector<1x16x16xbf16> to vector<16x16xbf16>
    %c0_606 = arith.constant 0 : index
    %c0_607 = arith.constant 0 : index
    %c1176 = arith.constant 1176 : index
    %579 = vector.load %arg1[%c0_606, %c0_607, %c1176] : memref<1x16x1408xbf16, #tpu.memory_space<vmem>>, vector<1x16x128xbf16>
    %580 = vector.shape_cast %579 : vector<1x16x128xbf16> to vector<16x128xbf16>
    %cst_608 = arith.constant dense<0.000000e+00> : vector<16x128xf32>
    %581 = tpu.matmul %578, %580, %cst_608 {dimension_numbers = #tpu.dot_dimension_numbers<[1], [0], [0], [1], [0, 0, 1, 1], [], []>} : vector<16x16xbf16>, vector<16x128xbf16>, vector<16x128xf32> -> vector<16x128xf32>
    %582 = arith.addf %576, %581 : vector<16x128xf32>
    %c8_609 = arith.constant 8 : index
    %c0_610 = arith.constant 0 : index
    %c0_611 = arith.constant 0 : index
    %583 = vector.load %arg5[%c8_609, %c0_610, %c0_611] : memref<9x16x16xbf16, #tpu.memory_space<vmem>>, vector<1x16x16xbf16>
    %584 = vector.shape_cast %583 : vector<1x16x16xbf16> to vector<16x16xbf16>
    %c0_612 = arith.constant 0 : index
    %c0_613 = arith.constant 0 : index
    %c1176_614 = arith.constant 1176 : index
    %585 = vector.load %arg2[%c0_612, %c0_613, %c1176_614] : memref<1x16x1408xbf16, #tpu.memory_space<vmem>>, vector<1x16x128xbf16>
    %586 = vector.shape_cast %585 : vector<1x16x128xbf16> to vector<16x128xbf16>
    %cst_615 = arith.constant dense<0.000000e+00> : vector<16x128xf32>
    %587 = tpu.matmul %584, %586, %cst_615 {dimension_numbers = #tpu.dot_dimension_numbers<[1], [0], [0], [1], [0, 0, 1, 1], [], []>} : vector<16x16xbf16>, vector<16x128xbf16>, vector<16x128xf32> -> vector<16x128xf32>
    %588 = arith.addf %582, %587 : vector<16x128xf32>
    %c0_616 = arith.constant 0 : index
    %c0_617 = arith.constant 0 : index
    %589 = vector.load %arg6[%c0_616, %c0_617] : memref<16x1xf32, #tpu.memory_space<vmem>>, vector<16x1xf32>
    %590 = vector.broadcast %589 : vector<16x1xf32> to vector<16x128xf32>
    %591 = arith.addf %588, %590 : vector<16x128xf32>
    %cst_618 = arith.constant 0.000000e+00 : f32
    %592 = vector.broadcast %cst_618 : f32 to vector<16x128xf32>
    %593 = arith.maximumf %591, %592 : vector<16x128xf32>
    %c0_619 = arith.constant 0 : index
    %c1024_620 = arith.constant 1024 : index
    %594 = vector.load %arg3[%c0_619, %c1024_620] : memref<1x1152xf32, #tpu.memory_space<vmem>>, vector<1x128xf32>
    %595 = vector.broadcast %594 : vector<1x128xf32> to vector<16x128xf32>
    %596 = arith.mulf %593, %595 : vector<16x128xf32>
    %597 = arith.truncf %596 : vector<16x128xf32> to vector<16x128xbf16>
    %c0_621 = arith.constant 0 : index
    %c1100_622 = arith.constant 1100 : index
    %598 = vector.load %arg10[%c0_621, %c1100_622] : memref<16x1408xbf16, #tpu.memory_space<vmem>>, vector<16x128xbf16>
    tpu.vector_store %arg10[%c0_621, %c1100_622], %597 {strides = array<i32>} : memref<16x1408xbf16, #tpu.memory_space<vmem>>, vector<16x128xbf16>,
    %cst_623 = arith.constant 0.000000e+00 : f32
    %599 = vector.broadcast %cst_623 : f32 to vector<8x256xf32>
    %c0_624 = arith.constant 0 : index
    %c0_625 = arith.constant 0 : index
    %c0_626 = arith.constant 0 : index
    %600 = vector.load %arg7[%c0_624, %c0_625, %c0_626] : memref<9x8x16xbf16, #tpu.memory_space<vmem>>, vector<1x8x16xbf16>
    %601 = vector.shape_cast %600 : vector<1x8x16xbf16> to vector<8x16xbf16>
    %c0_627 = arith.constant 0 : index
    %c0_628 = arith.constant 0 : index
    %602 = vector.load %arg10[%c0_627, %c0_628] : memref<16x1408xbf16, #tpu.memory_space<vmem>>, vector<16x256xbf16>
    %cst_629 = arith.constant dense<0.000000e+00> : vector<8x256xf32>
    %603 = tpu.matmul %601, %602, %cst_629 {dimension_numbers = #tpu.dot_dimension_numbers<[1], [0], [0], [1], [0, 0, 1, 1], [], []>} : vector<8x16xbf16>, vector<16x256xbf16>, vector<8x256xf32> -> vector<8x256xf32>
    %604 = arith.addf %599, %603 : vector<8x256xf32>
    %c1_630 = arith.constant 1 : index
    %c0_631 = arith.constant 0 : index
    %c0_632 = arith.constant 0 : index
    %605 = vector.load %arg7[%c1_630, %c0_631, %c0_632] : memref<9x8x16xbf16, #tpu.memory_space<vmem>>, vector<1x8x16xbf16>
    %606 = vector.shape_cast %605 : vector<1x8x16xbf16> to vector<8x16xbf16>
    %c0_633 = arith.constant 0 : index
    %c4_634 = arith.constant 4 : index
    %607 = vector.load %arg10[%c0_633, %c4_634] : memref<16x1408xbf16, #tpu.memory_space<vmem>>, vector<16x256xbf16>
    %cst_635 = arith.constant dense<0.000000e+00> : vector<8x256xf32>
    %608 = tpu.matmul %606, %607, %cst_635 {dimension_numbers = #tpu.dot_dimension_numbers<[1], [0], [0], [1], [0, 0, 1, 1], [], []>} : vector<8x16xbf16>, vector<16x256xbf16>, vector<8x256xf32> -> vector<8x256xf32>
    %609 = arith.addf %604, %608 : vector<8x256xf32>
    %c2_636 = arith.constant 2 : index
    %c0_637 = arith.constant 0 : index
    %c0_638 = arith.constant 0 : index
    %610 = vector.load %arg7[%c2_636, %c0_637, %c0_638] : memref<9x8x16xbf16, #tpu.memory_space<vmem>>, vector<1x8x16xbf16>
    %611 = vector.shape_cast %610 : vector<1x8x16xbf16> to vector<8x16xbf16>
    %c0_639 = arith.constant 0 : index
    %c8_640 = arith.constant 8 : index
    %612 = vector.load %arg10[%c0_639, %c8_640] : memref<16x1408xbf16, #tpu.memory_space<vmem>>, vector<16x256xbf16>
    %cst_641 = arith.constant dense<0.000000e+00> : vector<8x256xf32>
    %613 = tpu.matmul %611, %612, %cst_641 {dimension_numbers = #tpu.dot_dimension_numbers<[1], [0], [0], [1], [0, 0, 1, 1], [], []>} : vector<8x16xbf16>, vector<16x256xbf16>, vector<8x256xf32> -> vector<8x256xf32>
    %614 = arith.addf %609, %613 : vector<8x256xf32>
    %c3_642 = arith.constant 3 : index
    %c0_643 = arith.constant 0 : index
    %c0_644 = arith.constant 0 : index
    %615 = vector.load %arg7[%c3_642, %c0_643, %c0_644] : memref<9x8x16xbf16, #tpu.memory_space<vmem>>, vector<1x8x16xbf16>
    %616 = vector.shape_cast %615 : vector<1x8x16xbf16> to vector<8x16xbf16>
    %c0_645 = arith.constant 0 : index
    %c72_646 = arith.constant 72 : index
    %617 = vector.load %arg10[%c0_645, %c72_646] : memref<16x1408xbf16, #tpu.memory_space<vmem>>, vector<16x256xbf16>
    %cst_647 = arith.constant dense<0.000000e+00> : vector<8x256xf32>
    %618 = tpu.matmul %616, %617, %cst_647 {dimension_numbers = #tpu.dot_dimension_numbers<[1], [0], [0], [1], [0, 0, 1, 1], [], []>} : vector<8x16xbf16>, vector<16x256xbf16>, vector<8x256xf32> -> vector<8x256xf32>
    %619 = arith.addf %614, %618 : vector<8x256xf32>
    %c4_648 = arith.constant 4 : index
    %c0_649 = arith.constant 0 : index
    %c0_650 = arith.constant 0 : index
    %620 = vector.load %arg7[%c4_648, %c0_649, %c0_650] : memref<9x8x16xbf16, #tpu.memory_space<vmem>>, vector<1x8x16xbf16>
    %621 = vector.shape_cast %620 : vector<1x8x16xbf16> to vector<8x16xbf16>
    %c0_651 = arith.constant 0 : index
    %c76_652 = arith.constant 76 : index
    %622 = vector.load %arg10[%c0_651, %c76_652] : memref<16x1408xbf16, #tpu.memory_space<vmem>>, vector<16x256xbf16>
    %cst_653 = arith.constant dense<0.000000e+00> : vector<8x256xf32>
    %623 = tpu.matmul %621, %622, %cst_653 {dimension_numbers = #tpu.dot_dimension_numbers<[1], [0], [0], [1], [0, 0, 1, 1], [], []>} : vector<8x16xbf16>, vector<16x256xbf16>, vector<8x256xf32> -> vector<8x256xf32>
    %624 = arith.addf %619, %623 : vector<8x256xf32>
    %c5_654 = arith.constant 5 : index
    %c0_655 = arith.constant 0 : index
    %c0_656 = arith.constant 0 : index
    %625 = vector.load %arg7[%c5_654, %c0_655, %c0_656] : memref<9x8x16xbf16, #tpu.memory_space<vmem>>, vector<1x8x16xbf16>
    %626 = vector.shape_cast %625 : vector<1x8x16xbf16> to vector<8x16xbf16>
    %c0_657 = arith.constant 0 : index
    %c80_658 = arith.constant 80 : index
    %627 = vector.load %arg10[%c0_657, %c80_658] : memref<16x1408xbf16, #tpu.memory_space<vmem>>, vector<16x256xbf16>
    %cst_659 = arith.constant dense<0.000000e+00> : vector<8x256xf32>
    %628 = tpu.matmul %626, %627, %cst_659 {dimension_numbers = #tpu.dot_dimension_numbers<[1], [0], [0], [1], [0, 0, 1, 1], [], []>} : vector<8x16xbf16>, vector<16x256xbf16>, vector<8x256xf32> -> vector<8x256xf32>
    %629 = arith.addf %624, %628 : vector<8x256xf32>
    %c6_660 = arith.constant 6 : index
    %c0_661 = arith.constant 0 : index
    %c0_662 = arith.constant 0 : index
    %630 = vector.load %arg7[%c6_660, %c0_661, %c0_662] : memref<9x8x16xbf16, #tpu.memory_space<vmem>>, vector<1x8x16xbf16>
    %631 = vector.shape_cast %630 : vector<1x8x16xbf16> to vector<8x16xbf16>
    %c0_663 = arith.constant 0 : index
    %c144_664 = arith.constant 144 : index
    %632 = vector.load %arg10[%c0_663, %c144_664] : memref<16x1408xbf16, #tpu.memory_space<vmem>>, vector<16x256xbf16>
    %cst_665 = arith.constant dense<0.000000e+00> : vector<8x256xf32>
    %633 = tpu.matmul %631, %632, %cst_665 {dimension_numbers = #tpu.dot_dimension_numbers<[1], [0], [0], [1], [0, 0, 1, 1], [], []>} : vector<8x16xbf16>, vector<16x256xbf16>, vector<8x256xf32> -> vector<8x256xf32>
    %634 = arith.addf %629, %633 : vector<8x256xf32>
    %c7_666 = arith.constant 7 : index
    %c0_667 = arith.constant 0 : index
    %c0_668 = arith.constant 0 : index
    %635 = vector.load %arg7[%c7_666, %c0_667, %c0_668] : memref<9x8x16xbf16, #tpu.memory_space<vmem>>, vector<1x8x16xbf16>
    %636 = vector.shape_cast %635 : vector<1x8x16xbf16> to vector<8x16xbf16>
    %c0_669 = arith.constant 0 : index
    %c148_670 = arith.constant 148 : index
    %637 = vector.load %arg10[%c0_669, %c148_670] : memref<16x1408xbf16, #tpu.memory_space<vmem>>, vector<16x256xbf16>
    %cst_671 = arith.constant dense<0.000000e+00> : vector<8x256xf32>
    %638 = tpu.matmul %636, %637, %cst_671 {dimension_numbers = #tpu.dot_dimension_numbers<[1], [0], [0], [1], [0, 0, 1, 1], [], []>} : vector<8x16xbf16>, vector<16x256xbf16>, vector<8x256xf32> -> vector<8x256xf32>
    %639 = arith.addf %634, %638 : vector<8x256xf32>
    %c8_672 = arith.constant 8 : index
    %c0_673 = arith.constant 0 : index
    %c0_674 = arith.constant 0 : index
    %640 = vector.load %arg7[%c8_672, %c0_673, %c0_674] : memref<9x8x16xbf16, #tpu.memory_space<vmem>>, vector<1x8x16xbf16>
    %641 = vector.shape_cast %640 : vector<1x8x16xbf16> to vector<8x16xbf16>
    %c0_675 = arith.constant 0 : index
    %c152_676 = arith.constant 152 : index
    %642 = vector.load %arg10[%c0_675, %c152_676] : memref<16x1408xbf16, #tpu.memory_space<vmem>>, vector<16x256xbf16>
    %cst_677 = arith.constant dense<0.000000e+00> : vector<8x256xf32>
    %643 = tpu.matmul %641, %642, %cst_677 {dimension_numbers = #tpu.dot_dimension_numbers<[1], [0], [0], [1], [0, 0, 1, 1], [], []>} : vector<8x16xbf16>, vector<16x256xbf16>, vector<8x256xf32> -> vector<8x256xf32>
    %644 = arith.addf %639, %643 : vector<8x256xf32>
    %c0_678 = arith.constant 0 : index
    %c0_679 = arith.constant 0 : index
    %645 = vector.load %arg8[%c0_678, %c0_679] : memref<8x1xf32, #tpu.memory_space<vmem>>, vector<8x1xf32>
    %646 = vector.broadcast %645 : vector<8x1xf32> to vector<8x256xf32>
    %647 = arith.addf %644, %646 : vector<8x256xf32>
    %cst_680 = arith.constant 0.000000e+00 : f32
    %648 = vector.broadcast %cst_680 : f32 to vector<8x256xf32>
    %649 = arith.maximumf %647, %648 : vector<8x256xf32>
    %c0_681 = arith.constant 0 : index
    %c0_682 = arith.constant 0 : index
    %c0_683 = arith.constant 0 : index
    %650 = vector.load %arg9[%c0_681, %c0_682, %c0_683] : memref<1x8x1152xf32, #tpu.memory_space<vmem>>, vector<1x8x256xf32>
    %651 = vector.shape_cast %650 : vector<1x8x256xf32> to vector<8x256xf32>
    %652 = vector.shape_cast %649 : vector<8x256xf32> to vector<1x8x256xf32>
    tpu.vector_store %arg9[%c0_681, %c0_682, %c0_683], %652 {strides = array<i32>} : memref<1x8x1152xf32, #tpu.memory_space<vmem>>, vector<1x8x256xf32>,
    %cst_684 = arith.constant 0.000000e+00 : f32
    %653 = vector.broadcast %cst_684 : f32 to vector<8x256xf32>
    %c0_685 = arith.constant 0 : index
    %c0_686 = arith.constant 0 : index
    %c0_687 = arith.constant 0 : index
    %654 = vector.load %arg7[%c0_685, %c0_686, %c0_687] : memref<9x8x16xbf16, #tpu.memory_space<vmem>>, vector<1x8x16xbf16>
    %655 = vector.shape_cast %654 : vector<1x8x16xbf16> to vector<8x16xbf16>
    %c0_688 = arith.constant 0 : index
    %c256_689 = arith.constant 256 : index
    %656 = vector.load %arg10[%c0_688, %c256_689] : memref<16x1408xbf16, #tpu.memory_space<vmem>>, vector<16x256xbf16>
    %cst_690 = arith.constant dense<0.000000e+00> : vector<8x256xf32>
    %657 = tpu.matmul %655, %656, %cst_690 {dimension_numbers = #tpu.dot_dimension_numbers<[1], [0], [0], [1], [0, 0, 1, 1], [], []>} : vector<8x16xbf16>, vector<16x256xbf16>, vector<8x256xf32> -> vector<8x256xf32>
    %658 = arith.addf %653, %657 : vector<8x256xf32>
    %c1_691 = arith.constant 1 : index
    %c0_692 = arith.constant 0 : index
    %c0_693 = arith.constant 0 : index
    %659 = vector.load %arg7[%c1_691, %c0_692, %c0_693] : memref<9x8x16xbf16, #tpu.memory_space<vmem>>, vector<1x8x16xbf16>
    %660 = vector.shape_cast %659 : vector<1x8x16xbf16> to vector<8x16xbf16>
    %c0_694 = arith.constant 0 : index
    %c260_695 = arith.constant 260 : index
    %661 = vector.load %arg10[%c0_694, %c260_695] : memref<16x1408xbf16, #tpu.memory_space<vmem>>, vector<16x256xbf16>
    %cst_696 = arith.constant dense<0.000000e+00> : vector<8x256xf32>
    %662 = tpu.matmul %660, %661, %cst_696 {dimension_numbers = #tpu.dot_dimension_numbers<[1], [0], [0], [1], [0, 0, 1, 1], [], []>} : vector<8x16xbf16>, vector<16x256xbf16>, vector<8x256xf32> -> vector<8x256xf32>
    %663 = arith.addf %658, %662 : vector<8x256xf32>
    %c2_697 = arith.constant 2 : index
    %c0_698 = arith.constant 0 : index
    %c0_699 = arith.constant 0 : index
    %664 = vector.load %arg7[%c2_697, %c0_698, %c0_699] : memref<9x8x16xbf16, #tpu.memory_space<vmem>>, vector<1x8x16xbf16>
    %665 = vector.shape_cast %664 : vector<1x8x16xbf16> to vector<8x16xbf16>
    %c0_700 = arith.constant 0 : index
    %c264_701 = arith.constant 264 : index
    %666 = vector.load %arg10[%c0_700, %c264_701] : memref<16x1408xbf16, #tpu.memory_space<vmem>>, vector<16x256xbf16>
    %cst_702 = arith.constant dense<0.000000e+00> : vector<8x256xf32>
    %667 = tpu.matmul %665, %666, %cst_702 {dimension_numbers = #tpu.dot_dimension_numbers<[1], [0], [0], [1], [0, 0, 1, 1], [], []>} : vector<8x16xbf16>, vector<16x256xbf16>, vector<8x256xf32> -> vector<8x256xf32>
    %668 = arith.addf %663, %667 : vector<8x256xf32>
    %c3_703 = arith.constant 3 : index
    %c0_704 = arith.constant 0 : index
    %c0_705 = arith.constant 0 : index
    %669 = vector.load %arg7[%c3_703, %c0_704, %c0_705] : memref<9x8x16xbf16, #tpu.memory_space<vmem>>, vector<1x8x16xbf16>
    %670 = vector.shape_cast %669 : vector<1x8x16xbf16> to vector<8x16xbf16>
    %c0_706 = arith.constant 0 : index
    %c328_707 = arith.constant 328 : index
    %671 = vector.load %arg10[%c0_706, %c328_707] : memref<16x1408xbf16, #tpu.memory_space<vmem>>, vector<16x256xbf16>
    %cst_708 = arith.constant dense<0.000000e+00> : vector<8x256xf32>
    %672 = tpu.matmul %670, %671, %cst_708 {dimension_numbers = #tpu.dot_dimension_numbers<[1], [0], [0], [1], [0, 0, 1, 1], [], []>} : vector<8x16xbf16>, vector<16x256xbf16>, vector<8x256xf32> -> vector<8x256xf32>
    %673 = arith.addf %668, %672 : vector<8x256xf32>
    %c4_709 = arith.constant 4 : index
    %c0_710 = arith.constant 0 : index
    %c0_711 = arith.constant 0 : index
    %674 = vector.load %arg7[%c4_709, %c0_710, %c0_711] : memref<9x8x16xbf16, #tpu.memory_space<vmem>>, vector<1x8x16xbf16>
    %675 = vector.shape_cast %674 : vector<1x8x16xbf16> to vector<8x16xbf16>
    %c0_712 = arith.constant 0 : index
    %c332_713 = arith.constant 332 : index
    %676 = vector.load %arg10[%c0_712, %c332_713] : memref<16x1408xbf16, #tpu.memory_space<vmem>>, vector<16x256xbf16>
    %cst_714 = arith.constant dense<0.000000e+00> : vector<8x256xf32>
    %677 = tpu.matmul %675, %676, %cst_714 {dimension_numbers = #tpu.dot_dimension_numbers<[1], [0], [0], [1], [0, 0, 1, 1], [], []>} : vector<8x16xbf16>, vector<16x256xbf16>, vector<8x256xf32> -> vector<8x256xf32>
    %678 = arith.addf %673, %677 : vector<8x256xf32>
    %c5_715 = arith.constant 5 : index
    %c0_716 = arith.constant 0 : index
    %c0_717 = arith.constant 0 : index
    %679 = vector.load %arg7[%c5_715, %c0_716, %c0_717] : memref<9x8x16xbf16, #tpu.memory_space<vmem>>, vector<1x8x16xbf16>
    %680 = vector.shape_cast %679 : vector<1x8x16xbf16> to vector<8x16xbf16>
    %c0_718 = arith.constant 0 : index
    %c336_719 = arith.constant 336 : index
    %681 = vector.load %arg10[%c0_718, %c336_719] : memref<16x1408xbf16, #tpu.memory_space<vmem>>, vector<16x256xbf16>
    %cst_720 = arith.constant dense<0.000000e+00> : vector<8x256xf32>
    %682 = tpu.matmul %680, %681, %cst_720 {dimension_numbers = #tpu.dot_dimension_numbers<[1], [0], [0], [1], [0, 0, 1, 1], [], []>} : vector<8x16xbf16>, vector<16x256xbf16>, vector<8x256xf32> -> vector<8x256xf32>
    %683 = arith.addf %678, %682 : vector<8x256xf32>
    %c6_721 = arith.constant 6 : index
    %c0_722 = arith.constant 0 : index
    %c0_723 = arith.constant 0 : index
    %684 = vector.load %arg7[%c6_721, %c0_722, %c0_723] : memref<9x8x16xbf16, #tpu.memory_space<vmem>>, vector<1x8x16xbf16>
    %685 = vector.shape_cast %684 : vector<1x8x16xbf16> to vector<8x16xbf16>
    %c0_724 = arith.constant 0 : index
    %c400_725 = arith.constant 400 : index
    %686 = vector.load %arg10[%c0_724, %c400_725] : memref<16x1408xbf16, #tpu.memory_space<vmem>>, vector<16x256xbf16>
    %cst_726 = arith.constant dense<0.000000e+00> : vector<8x256xf32>
    %687 = tpu.matmul %685, %686, %cst_726 {dimension_numbers = #tpu.dot_dimension_numbers<[1], [0], [0], [1], [0, 0, 1, 1], [], []>} : vector<8x16xbf16>, vector<16x256xbf16>, vector<8x256xf32> -> vector<8x256xf32>
    %688 = arith.addf %683, %687 : vector<8x256xf32>
    %c7_727 = arith.constant 7 : index
    %c0_728 = arith.constant 0 : index
    %c0_729 = arith.constant 0 : index
    %689 = vector.load %arg7[%c7_727, %c0_728, %c0_729] : memref<9x8x16xbf16, #tpu.memory_space<vmem>>, vector<1x8x16xbf16>
    %690 = vector.shape_cast %689 : vector<1x8x16xbf16> to vector<8x16xbf16>
    %c0_730 = arith.constant 0 : index
    %c404_731 = arith.constant 404 : index
    %691 = vector.load %arg10[%c0_730, %c404_731] : memref<16x1408xbf16, #tpu.memory_space<vmem>>, vector<16x256xbf16>
    %cst_732 = arith.constant dense<0.000000e+00> : vector<8x256xf32>
    %692 = tpu.matmul %690, %691, %cst_732 {dimension_numbers = #tpu.dot_dimension_numbers<[1], [0], [0], [1], [0, 0, 1, 1], [], []>} : vector<8x16xbf16>, vector<16x256xbf16>, vector<8x256xf32> -> vector<8x256xf32>
    %693 = arith.addf %688, %692 : vector<8x256xf32>
    %c8_733 = arith.constant 8 : index
    %c0_734 = arith.constant 0 : index
    %c0_735 = arith.constant 0 : index
    %694 = vector.load %arg7[%c8_733, %c0_734, %c0_735] : memref<9x8x16xbf16, #tpu.memory_space<vmem>>, vector<1x8x16xbf16>
    %695 = vector.shape_cast %694 : vector<1x8x16xbf16> to vector<8x16xbf16>
    %c0_736 = arith.constant 0 : index
    %c408_737 = arith.constant 408 : index
    %696 = vector.load %arg10[%c0_736, %c408_737] : memref<16x1408xbf16, #tpu.memory_space<vmem>>, vector<16x256xbf16>
    %cst_738 = arith.constant dense<0.000000e+00> : vector<8x256xf32>
    %697 = tpu.matmul %695, %696, %cst_738 {dimension_numbers = #tpu.dot_dimension_numbers<[1], [0], [0], [1], [0, 0, 1, 1], [], []>} : vector<8x16xbf16>, vector<16x256xbf16>, vector<8x256xf32> -> vector<8x256xf32>
    %698 = arith.addf %693, %697 : vector<8x256xf32>
    %c0_739 = arith.constant 0 : index
    %c0_740 = arith.constant 0 : index
    %699 = vector.load %arg8[%c0_739, %c0_740] : memref<8x1xf32, #tpu.memory_space<vmem>>, vector<8x1xf32>
    %700 = vector.broadcast %699 : vector<8x1xf32> to vector<8x256xf32>
    %701 = arith.addf %698, %700 : vector<8x256xf32>
    %cst_741 = arith.constant 0.000000e+00 : f32
    %702 = vector.broadcast %cst_741 : f32 to vector<8x256xf32>
    %703 = arith.maximumf %701, %702 : vector<8x256xf32>
    %c0_742 = arith.constant 0 : index
    %c0_743 = arith.constant 0 : index
    %c256_744 = arith.constant 256 : index
    %704 = vector.load %arg9[%c0_742, %c0_743, %c256_744] : memref<1x8x1152xf32, #tpu.memory_space<vmem>>, vector<1x8x256xf32>
    %705 = vector.shape_cast %704 : vector<1x8x256xf32> to vector<8x256xf32>
    %706 = vector.shape_cast %703 : vector<8x256xf32> to vector<1x8x256xf32>
    tpu.vector_store %arg9[%c0_742, %c0_743, %c256_744], %706 {strides = array<i32>} : memref<1x8x1152xf32, #tpu.memory_space<vmem>>, vector<1x8x256xf32>,
    %cst_745 = arith.constant 0.000000e+00 : f32
    %707 = vector.broadcast %cst_745 : f32 to vector<8x256xf32>
    %c0_746 = arith.constant 0 : index
    %c0_747 = arith.constant 0 : index
    %c0_748 = arith.constant 0 : index
    %708 = vector.load %arg7[%c0_746, %c0_747, %c0_748] : memref<9x8x16xbf16, #tpu.memory_space<vmem>>, vector<1x8x16xbf16>
    %709 = vector.shape_cast %708 : vector<1x8x16xbf16> to vector<8x16xbf16>
    %c0_749 = arith.constant 0 : index
    %c512_750 = arith.constant 512 : index
    %710 = vector.load %arg10[%c0_749, %c512_750] : memref<16x1408xbf16, #tpu.memory_space<vmem>>, vector<16x256xbf16>
    %cst_751 = arith.constant dense<0.000000e+00> : vector<8x256xf32>
    %711 = tpu.matmul %709, %710, %cst_751 {dimension_numbers = #tpu.dot_dimension_numbers<[1], [0], [0], [1], [0, 0, 1, 1], [], []>} : vector<8x16xbf16>, vector<16x256xbf16>, vector<8x256xf32> -> vector<8x256xf32>
    %712 = arith.addf %707, %711 : vector<8x256xf32>
    %c1_752 = arith.constant 1 : index
    %c0_753 = arith.constant 0 : index
    %c0_754 = arith.constant 0 : index
    %713 = vector.load %arg7[%c1_752, %c0_753, %c0_754] : memref<9x8x16xbf16, #tpu.memory_space<vmem>>, vector<1x8x16xbf16>
    %714 = vector.shape_cast %713 : vector<1x8x16xbf16> to vector<8x16xbf16>
    %c0_755 = arith.constant 0 : index
    %c516_756 = arith.constant 516 : index
    %715 = vector.load %arg10[%c0_755, %c516_756] : memref<16x1408xbf16, #tpu.memory_space<vmem>>, vector<16x256xbf16>
    %cst_757 = arith.constant dense<0.000000e+00> : vector<8x256xf32>
    %716 = tpu.matmul %714, %715, %cst_757 {dimension_numbers = #tpu.dot_dimension_numbers<[1], [0], [0], [1], [0, 0, 1, 1], [], []>} : vector<8x16xbf16>, vector<16x256xbf16>, vector<8x256xf32> -> vector<8x256xf32>
    %717 = arith.addf %712, %716 : vector<8x256xf32>
    %c2_758 = arith.constant 2 : index
    %c0_759 = arith.constant 0 : index
    %c0_760 = arith.constant 0 : index
    %718 = vector.load %arg7[%c2_758, %c0_759, %c0_760] : memref<9x8x16xbf16, #tpu.memory_space<vmem>>, vector<1x8x16xbf16>
    %719 = vector.shape_cast %718 : vector<1x8x16xbf16> to vector<8x16xbf16>
    %c0_761 = arith.constant 0 : index
    %c520_762 = arith.constant 520 : index
    %720 = vector.load %arg10[%c0_761, %c520_762] : memref<16x1408xbf16, #tpu.memory_space<vmem>>, vector<16x256xbf16>
    %cst_763 = arith.constant dense<0.000000e+00> : vector<8x256xf32>
    %721 = tpu.matmul %719, %720, %cst_763 {dimension_numbers = #tpu.dot_dimension_numbers<[1], [0], [0], [1], [0, 0, 1, 1], [], []>} : vector<8x16xbf16>, vector<16x256xbf16>, vector<8x256xf32> -> vector<8x256xf32>
    %722 = arith.addf %717, %721 : vector<8x256xf32>
    %c3_764 = arith.constant 3 : index
    %c0_765 = arith.constant 0 : index
    %c0_766 = arith.constant 0 : index
    %723 = vector.load %arg7[%c3_764, %c0_765, %c0_766] : memref<9x8x16xbf16, #tpu.memory_space<vmem>>, vector<1x8x16xbf16>
    %724 = vector.shape_cast %723 : vector<1x8x16xbf16> to vector<8x16xbf16>
    %c0_767 = arith.constant 0 : index
    %c584_768 = arith.constant 584 : index
    %725 = vector.load %arg10[%c0_767, %c584_768] : memref<16x1408xbf16, #tpu.memory_space<vmem>>, vector<16x256xbf16>
    %cst_769 = arith.constant dense<0.000000e+00> : vector<8x256xf32>
    %726 = tpu.matmul %724, %725, %cst_769 {dimension_numbers = #tpu.dot_dimension_numbers<[1], [0], [0], [1], [0, 0, 1, 1], [], []>} : vector<8x16xbf16>, vector<16x256xbf16>, vector<8x256xf32> -> vector<8x256xf32>
    %727 = arith.addf %722, %726 : vector<8x256xf32>
    %c4_770 = arith.constant 4 : index
    %c0_771 = arith.constant 0 : index
    %c0_772 = arith.constant 0 : index
    %728 = vector.load %arg7[%c4_770, %c0_771, %c0_772] : memref<9x8x16xbf16, #tpu.memory_space<vmem>>, vector<1x8x16xbf16>
    %729 = vector.shape_cast %728 : vector<1x8x16xbf16> to vector<8x16xbf16>
    %c0_773 = arith.constant 0 : index
    %c588_774 = arith.constant 588 : index
    %730 = vector.load %arg10[%c0_773, %c588_774] : memref<16x1408xbf16, #tpu.memory_space<vmem>>, vector<16x256xbf16>
    %cst_775 = arith.constant dense<0.000000e+00> : vector<8x256xf32>
    %731 = tpu.matmul %729, %730, %cst_775 {dimension_numbers = #tpu.dot_dimension_numbers<[1], [0], [0], [1], [0, 0, 1, 1], [], []>} : vector<8x16xbf16>, vector<16x256xbf16>, vector<8x256xf32> -> vector<8x256xf32>
    %732 = arith.addf %727, %731 : vector<8x256xf32>
    %c5_776 = arith.constant 5 : index
    %c0_777 = arith.constant 0 : index
    %c0_778 = arith.constant 0 : index
    %733 = vector.load %arg7[%c5_776, %c0_777, %c0_778] : memref<9x8x16xbf16, #tpu.memory_space<vmem>>, vector<1x8x16xbf16>
    %734 = vector.shape_cast %733 : vector<1x8x16xbf16> to vector<8x16xbf16>
    %c0_779 = arith.constant 0 : index
    %c592_780 = arith.constant 592 : index
    %735 = vector.load %arg10[%c0_779, %c592_780] : memref<16x1408xbf16, #tpu.memory_space<vmem>>, vector<16x256xbf16>
    %cst_781 = arith.constant dense<0.000000e+00> : vector<8x256xf32>
    %736 = tpu.matmul %734, %735, %cst_781 {dimension_numbers = #tpu.dot_dimension_numbers<[1], [0], [0], [1], [0, 0, 1, 1], [], []>} : vector<8x16xbf16>, vector<16x256xbf16>, vector<8x256xf32> -> vector<8x256xf32>
    %737 = arith.addf %732, %736 : vector<8x256xf32>
    %c6_782 = arith.constant 6 : index
    %c0_783 = arith.constant 0 : index
    %c0_784 = arith.constant 0 : index
    %738 = vector.load %arg7[%c6_782, %c0_783, %c0_784] : memref<9x8x16xbf16, #tpu.memory_space<vmem>>, vector<1x8x16xbf16>
    %739 = vector.shape_cast %738 : vector<1x8x16xbf16> to vector<8x16xbf16>
    %c0_785 = arith.constant 0 : index
    %c656_786 = arith.constant 656 : index
    %740 = vector.load %arg10[%c0_785, %c656_786] : memref<16x1408xbf16, #tpu.memory_space<vmem>>, vector<16x256xbf16>
    %cst_787 = arith.constant dense<0.000000e+00> : vector<8x256xf32>
    %741 = tpu.matmul %739, %740, %cst_787 {dimension_numbers = #tpu.dot_dimension_numbers<[1], [0], [0], [1], [0, 0, 1, 1], [], []>} : vector<8x16xbf16>, vector<16x256xbf16>, vector<8x256xf32> -> vector<8x256xf32>
    %742 = arith.addf %737, %741 : vector<8x256xf32>
    %c7_788 = arith.constant 7 : index
    %c0_789 = arith.constant 0 : index
    %c0_790 = arith.constant 0 : index
    %743 = vector.load %arg7[%c7_788, %c0_789, %c0_790] : memref<9x8x16xbf16, #tpu.memory_space<vmem>>, vector<1x8x16xbf16>
    %744 = vector.shape_cast %743 : vector<1x8x16xbf16> to vector<8x16xbf16>
    %c0_791 = arith.constant 0 : index
    %c660_792 = arith.constant 660 : index
    %745 = vector.load %arg10[%c0_791, %c660_792] : memref<16x1408xbf16, #tpu.memory_space<vmem>>, vector<16x256xbf16>
    %cst_793 = arith.constant dense<0.000000e+00> : vector<8x256xf32>
    %746 = tpu.matmul %744, %745, %cst_793 {dimension_numbers = #tpu.dot_dimension_numbers<[1], [0], [0], [1], [0, 0, 1, 1], [], []>} : vector<8x16xbf16>, vector<16x256xbf16>, vector<8x256xf32> -> vector<8x256xf32>
    %747 = arith.addf %742, %746 : vector<8x256xf32>
    %c8_794 = arith.constant 8 : index
    %c0_795 = arith.constant 0 : index
    %c0_796 = arith.constant 0 : index
    %748 = vector.load %arg7[%c8_794, %c0_795, %c0_796] : memref<9x8x16xbf16, #tpu.memory_space<vmem>>, vector<1x8x16xbf16>
    %749 = vector.shape_cast %748 : vector<1x8x16xbf16> to vector<8x16xbf16>
    %c0_797 = arith.constant 0 : index
    %c664_798 = arith.constant 664 : index
    %750 = vector.load %arg10[%c0_797, %c664_798] : memref<16x1408xbf16, #tpu.memory_space<vmem>>, vector<16x256xbf16>
    %cst_799 = arith.constant dense<0.000000e+00> : vector<8x256xf32>
    %751 = tpu.matmul %749, %750, %cst_799 {dimension_numbers = #tpu.dot_dimension_numbers<[1], [0], [0], [1], [0, 0, 1, 1], [], []>} : vector<8x16xbf16>, vector<16x256xbf16>, vector<8x256xf32> -> vector<8x256xf32>
    %752 = arith.addf %747, %751 : vector<8x256xf32>
    %c0_800 = arith.constant 0 : index
    %c0_801 = arith.constant 0 : index
    %753 = vector.load %arg8[%c0_800, %c0_801] : memref<8x1xf32, #tpu.memory_space<vmem>>, vector<8x1xf32>
    %754 = vector.broadcast %753 : vector<8x1xf32> to vector<8x256xf32>
    %755 = arith.addf %752, %754 : vector<8x256xf32>
    %cst_802 = arith.constant 0.000000e+00 : f32
    %756 = vector.broadcast %cst_802 : f32 to vector<8x256xf32>
    %757 = arith.maximumf %755, %756 : vector<8x256xf32>
    %c0_803 = arith.constant 0 : index
    %c0_804 = arith.constant 0 : index
    %c512_805 = arith.constant 512 : index
    %758 = vector.load %arg9[%c0_803, %c0_804, %c512_805] : memref<1x8x1152xf32, #tpu.memory_space<vmem>>, vector<1x8x256xf32>
    %759 = vector.shape_cast %758 : vector<1x8x256xf32> to vector<8x256xf32>
    %760 = vector.shape_cast %757 : vector<8x256xf32> to vector<1x8x256xf32>
    tpu.vector_store %arg9[%c0_803, %c0_804, %c512_805], %760 {strides = array<i32>} : memref<1x8x1152xf32, #tpu.memory_space<vmem>>, vector<1x8x256xf32>,
    %cst_806 = arith.constant 0.000000e+00 : f32
    %761 = vector.broadcast %cst_806 : f32 to vector<8x256xf32>
    %c0_807 = arith.constant 0 : index
    %c0_808 = arith.constant 0 : index
    %c0_809 = arith.constant 0 : index
    %762 = vector.load %arg7[%c0_807, %c0_808, %c0_809] : memref<9x8x16xbf16, #tpu.memory_space<vmem>>, vector<1x8x16xbf16>
    %763 = vector.shape_cast %762 : vector<1x8x16xbf16> to vector<8x16xbf16>
    %c0_810 = arith.constant 0 : index
    %c768_811 = arith.constant 768 : index
    %764 = vector.load %arg10[%c0_810, %c768_811] : memref<16x1408xbf16, #tpu.memory_space<vmem>>, vector<16x256xbf16>
    %cst_812 = arith.constant dense<0.000000e+00> : vector<8x256xf32>
    %765 = tpu.matmul %763, %764, %cst_812 {dimension_numbers = #tpu.dot_dimension_numbers<[1], [0], [0], [1], [0, 0, 1, 1], [], []>} : vector<8x16xbf16>, vector<16x256xbf16>, vector<8x256xf32> -> vector<8x256xf32>
    %766 = arith.addf %761, %765 : vector<8x256xf32>
    %c1_813 = arith.constant 1 : index
    %c0_814 = arith.constant 0 : index
    %c0_815 = arith.constant 0 : index
    %767 = vector.load %arg7[%c1_813, %c0_814, %c0_815] : memref<9x8x16xbf16, #tpu.memory_space<vmem>>, vector<1x8x16xbf16>
    %768 = vector.shape_cast %767 : vector<1x8x16xbf16> to vector<8x16xbf16>
    %c0_816 = arith.constant 0 : index
    %c772_817 = arith.constant 772 : index
    %769 = vector.load %arg10[%c0_816, %c772_817] : memref<16x1408xbf16, #tpu.memory_space<vmem>>, vector<16x256xbf16>
    %cst_818 = arith.constant dense<0.000000e+00> : vector<8x256xf32>
    %770 = tpu.matmul %768, %769, %cst_818 {dimension_numbers = #tpu.dot_dimension_numbers<[1], [0], [0], [1], [0, 0, 1, 1], [], []>} : vector<8x16xbf16>, vector<16x256xbf16>, vector<8x256xf32> -> vector<8x256xf32>
    %771 = arith.addf %766, %770 : vector<8x256xf32>
    %c2_819 = arith.constant 2 : index
    %c0_820 = arith.constant 0 : index
    %c0_821 = arith.constant 0 : index
    %772 = vector.load %arg7[%c2_819, %c0_820, %c0_821] : memref<9x8x16xbf16, #tpu.memory_space<vmem>>, vector<1x8x16xbf16>
    %773 = vector.shape_cast %772 : vector<1x8x16xbf16> to vector<8x16xbf16>
    %c0_822 = arith.constant 0 : index
    %c776_823 = arith.constant 776 : index
    %774 = vector.load %arg10[%c0_822, %c776_823] : memref<16x1408xbf16, #tpu.memory_space<vmem>>, vector<16x256xbf16>
    %cst_824 = arith.constant dense<0.000000e+00> : vector<8x256xf32>
    %775 = tpu.matmul %773, %774, %cst_824 {dimension_numbers = #tpu.dot_dimension_numbers<[1], [0], [0], [1], [0, 0, 1, 1], [], []>} : vector<8x16xbf16>, vector<16x256xbf16>, vector<8x256xf32> -> vector<8x256xf32>
    %776 = arith.addf %771, %775 : vector<8x256xf32>
    %c3_825 = arith.constant 3 : index
    %c0_826 = arith.constant 0 : index
    %c0_827 = arith.constant 0 : index
    %777 = vector.load %arg7[%c3_825, %c0_826, %c0_827] : memref<9x8x16xbf16, #tpu.memory_space<vmem>>, vector<1x8x16xbf16>
    %778 = vector.shape_cast %777 : vector<1x8x16xbf16> to vector<8x16xbf16>
    %c0_828 = arith.constant 0 : index
    %c840_829 = arith.constant 840 : index
    %779 = vector.load %arg10[%c0_828, %c840_829] : memref<16x1408xbf16, #tpu.memory_space<vmem>>, vector<16x256xbf16>
    %cst_830 = arith.constant dense<0.000000e+00> : vector<8x256xf32>
    %780 = tpu.matmul %778, %779, %cst_830 {dimension_numbers = #tpu.dot_dimension_numbers<[1], [0], [0], [1], [0, 0, 1, 1], [], []>} : vector<8x16xbf16>, vector<16x256xbf16>, vector<8x256xf32> -> vector<8x256xf32>
    %781 = arith.addf %776, %780 : vector<8x256xf32>
    %c4_831 = arith.constant 4 : index
    %c0_832 = arith.constant 0 : index
    %c0_833 = arith.constant 0 : index
    %782 = vector.load %arg7[%c4_831, %c0_832, %c0_833] : memref<9x8x16xbf16, #tpu.memory_space<vmem>>, vector<1x8x16xbf16>
    %783 = vector.shape_cast %782 : vector<1x8x16xbf16> to vector<8x16xbf16>
    %c0_834 = arith.constant 0 : index
    %c844_835 = arith.constant 844 : index
    %784 = vector.load %arg10[%c0_834, %c844_835] : memref<16x1408xbf16, #tpu.memory_space<vmem>>, vector<16x256xbf16>
    %cst_836 = arith.constant dense<0.000000e+00> : vector<8x256xf32>
    %785 = tpu.matmul %783, %784, %cst_836 {dimension_numbers = #tpu.dot_dimension_numbers<[1], [0], [0], [1], [0, 0, 1, 1], [], []>} : vector<8x16xbf16>, vector<16x256xbf16>, vector<8x256xf32> -> vector<8x256xf32>
    %786 = arith.addf %781, %785 : vector<8x256xf32>
    %c5_837 = arith.constant 5 : index
    %c0_838 = arith.constant 0 : index
    %c0_839 = arith.constant 0 : index
    %787 = vector.load %arg7[%c5_837, %c0_838, %c0_839] : memref<9x8x16xbf16, #tpu.memory_space<vmem>>, vector<1x8x16xbf16>
    %788 = vector.shape_cast %787 : vector<1x8x16xbf16> to vector<8x16xbf16>
    %c0_840 = arith.constant 0 : index
    %c848_841 = arith.constant 848 : index
    %789 = vector.load %arg10[%c0_840, %c848_841] : memref<16x1408xbf16, #tpu.memory_space<vmem>>, vector<16x256xbf16>
    %cst_842 = arith.constant dense<0.000000e+00> : vector<8x256xf32>
    %790 = tpu.matmul %788, %789, %cst_842 {dimension_numbers = #tpu.dot_dimension_numbers<[1], [0], [0], [1], [0, 0, 1, 1], [], []>} : vector<8x16xbf16>, vector<16x256xbf16>, vector<8x256xf32> -> vector<8x256xf32>
    %791 = arith.addf %786, %790 : vector<8x256xf32>
    %c6_843 = arith.constant 6 : index
    %c0_844 = arith.constant 0 : index
    %c0_845 = arith.constant 0 : index
    %792 = vector.load %arg7[%c6_843, %c0_844, %c0_845] : memref<9x8x16xbf16, #tpu.memory_space<vmem>>, vector<1x8x16xbf16>
    %793 = vector.shape_cast %792 : vector<1x8x16xbf16> to vector<8x16xbf16>
    %c0_846 = arith.constant 0 : index
    %c912_847 = arith.constant 912 : index
    %794 = vector.load %arg10[%c0_846, %c912_847] : memref<16x1408xbf16, #tpu.memory_space<vmem>>, vector<16x256xbf16>
    %cst_848 = arith.constant dense<0.000000e+00> : vector<8x256xf32>
    %795 = tpu.matmul %793, %794, %cst_848 {dimension_numbers = #tpu.dot_dimension_numbers<[1], [0], [0], [1], [0, 0, 1, 1], [], []>} : vector<8x16xbf16>, vector<16x256xbf16>, vector<8x256xf32> -> vector<8x256xf32>
    %796 = arith.addf %791, %795 : vector<8x256xf32>
    %c7_849 = arith.constant 7 : index
    %c0_850 = arith.constant 0 : index
    %c0_851 = arith.constant 0 : index
    %797 = vector.load %arg7[%c7_849, %c0_850, %c0_851] : memref<9x8x16xbf16, #tpu.memory_space<vmem>>, vector<1x8x16xbf16>
    %798 = vector.shape_cast %797 : vector<1x8x16xbf16> to vector<8x16xbf16>
    %c0_852 = arith.constant 0 : index
    %c916_853 = arith.constant 916 : index
    %799 = vector.load %arg10[%c0_852, %c916_853] : memref<16x1408xbf16, #tpu.memory_space<vmem>>, vector<16x256xbf16>
    %cst_854 = arith.constant dense<0.000000e+00> : vector<8x256xf32>
    %800 = tpu.matmul %798, %799, %cst_854 {dimension_numbers = #tpu.dot_dimension_numbers<[1], [0], [0], [1], [0, 0, 1, 1], [], []>} : vector<8x16xbf16>, vector<16x256xbf16>, vector<8x256xf32> -> vector<8x256xf32>
    %801 = arith.addf %796, %800 : vector<8x256xf32>
    %c8_855 = arith.constant 8 : index
    %c0_856 = arith.constant 0 : index
    %c0_857 = arith.constant 0 : index
    %802 = vector.load %arg7[%c8_855, %c0_856, %c0_857] : memref<9x8x16xbf16, #tpu.memory_space<vmem>>, vector<1x8x16xbf16>
    %803 = vector.shape_cast %802 : vector<1x8x16xbf16> to vector<8x16xbf16>
    %c0_858 = arith.constant 0 : index
    %c920_859 = arith.constant 920 : index
    %804 = vector.load %arg10[%c0_858, %c920_859] : memref<16x1408xbf16, #tpu.memory_space<vmem>>, vector<16x256xbf16>
    %cst_860 = arith.constant dense<0.000000e+00> : vector<8x256xf32>
    %805 = tpu.matmul %803, %804, %cst_860 {dimension_numbers = #tpu.dot_dimension_numbers<[1], [0], [0], [1], [0, 0, 1, 1], [], []>} : vector<8x16xbf16>, vector<16x256xbf16>, vector<8x256xf32> -> vector<8x256xf32>
    %806 = arith.addf %801, %805 : vector<8x256xf32>
    %c0_861 = arith.constant 0 : index
    %c0_862 = arith.constant 0 : index
    %807 = vector.load %arg8[%c0_861, %c0_862] : memref<8x1xf32, #tpu.memory_space<vmem>>, vector<8x1xf32>
    %808 = vector.broadcast %807 : vector<8x1xf32> to vector<8x256xf32>
    %809 = arith.addf %806, %808 : vector<8x256xf32>
    %cst_863 = arith.constant 0.000000e+00 : f32
    %810 = vector.broadcast %cst_863 : f32 to vector<8x256xf32>
    %811 = arith.maximumf %809, %810 : vector<8x256xf32>
    %c0_864 = arith.constant 0 : index
    %c0_865 = arith.constant 0 : index
    %c768_866 = arith.constant 768 : index
    %812 = vector.load %arg9[%c0_864, %c0_865, %c768_866] : memref<1x8x1152xf32, #tpu.memory_space<vmem>>, vector<1x8x256xf32>
    %813 = vector.shape_cast %812 : vector<1x8x256xf32> to vector<8x256xf32>
    %814 = vector.shape_cast %811 : vector<8x256xf32> to vector<1x8x256xf32>
    tpu.vector_store %arg9[%c0_864, %c0_865, %c768_866], %814 {strides = array<i32>} : memref<1x8x1152xf32, #tpu.memory_space<vmem>>, vector<1x8x256xf32>,
    %cst_867 = arith.constant 0.000000e+00 : f32
    %815 = vector.broadcast %cst_867 : f32 to vector<8x128xf32>
    %c0_868 = arith.constant 0 : index
    %c0_869 = arith.constant 0 : index
    %c0_870 = arith.constant 0 : index
    %816 = vector.load %arg7[%c0_868, %c0_869, %c0_870] : memref<9x8x16xbf16, #tpu.memory_space<vmem>>, vector<1x8x16xbf16>
    %817 = vector.shape_cast %816 : vector<1x8x16xbf16> to vector<8x16xbf16>
    %c0_871 = arith.constant 0 : index
    %c1024_872 = arith.constant 1024 : index
    %818 = vector.load %arg10[%c0_871, %c1024_872] : memref<16x1408xbf16, #tpu.memory_space<vmem>>, vector<16x128xbf16>
    %cst_873 = arith.constant dense<0.000000e+00> : vector<8x128xf32>
    %819 = tpu.matmul %817, %818, %cst_873 {dimension_numbers = #tpu.dot_dimension_numbers<[1], [0], [0], [1], [0, 0, 1, 1], [], []>} : vector<8x16xbf16>, vector<16x128xbf16>, vector<8x128xf32> -> vector<8x128xf32>
    %820 = arith.addf %815, %819 : vector<8x128xf32>
    %c1_874 = arith.constant 1 : index
    %c0_875 = arith.constant 0 : index
    %c0_876 = arith.constant 0 : index
    %821 = vector.load %arg7[%c1_874, %c0_875, %c0_876] : memref<9x8x16xbf16, #tpu.memory_space<vmem>>, vector<1x8x16xbf16>
    %822 = vector.shape_cast %821 : vector<1x8x16xbf16> to vector<8x16xbf16>
    %c0_877 = arith.constant 0 : index
    %c1028_878 = arith.constant 1028 : index
    %823 = vector.load %arg10[%c0_877, %c1028_878] : memref<16x1408xbf16, #tpu.memory_space<vmem>>, vector<16x128xbf16>
    %cst_879 = arith.constant dense<0.000000e+00> : vector<8x128xf32>
    %824 = tpu.matmul %822, %823, %cst_879 {dimension_numbers = #tpu.dot_dimension_numbers<[1], [0], [0], [1], [0, 0, 1, 1], [], []>} : vector<8x16xbf16>, vector<16x128xbf16>, vector<8x128xf32> -> vector<8x128xf32>
    %825 = arith.addf %820, %824 : vector<8x128xf32>
    %c2_880 = arith.constant 2 : index
    %c0_881 = arith.constant 0 : index
    %c0_882 = arith.constant 0 : index
    %826 = vector.load %arg7[%c2_880, %c0_881, %c0_882] : memref<9x8x16xbf16, #tpu.memory_space<vmem>>, vector<1x8x16xbf16>
    %827 = vector.shape_cast %826 : vector<1x8x16xbf16> to vector<8x16xbf16>
    %c0_883 = arith.constant 0 : index
    %c1032_884 = arith.constant 1032 : index
    %828 = vector.load %arg10[%c0_883, %c1032_884] : memref<16x1408xbf16, #tpu.memory_space<vmem>>, vector<16x128xbf16>
    %cst_885 = arith.constant dense<0.000000e+00> : vector<8x128xf32>
    %829 = tpu.matmul %827, %828, %cst_885 {dimension_numbers = #tpu.dot_dimension_numbers<[1], [0], [0], [1], [0, 0, 1, 1], [], []>} : vector<8x16xbf16>, vector<16x128xbf16>, vector<8x128xf32> -> vector<8x128xf32>
    %830 = arith.addf %825, %829 : vector<8x128xf32>
    %c3_886 = arith.constant 3 : index
    %c0_887 = arith.constant 0 : index
    %c0_888 = arith.constant 0 : index
    %831 = vector.load %arg7[%c3_886, %c0_887, %c0_888] : memref<9x8x16xbf16, #tpu.memory_space<vmem>>, vector<1x8x16xbf16>
    %832 = vector.shape_cast %831 : vector<1x8x16xbf16> to vector<8x16xbf16>
    %c0_889 = arith.constant 0 : index
    %c1096_890 = arith.constant 1096 : index
    %833 = vector.load %arg10[%c0_889, %c1096_890] : memref<16x1408xbf16, #tpu.memory_space<vmem>>, vector<16x128xbf16>
    %cst_891 = arith.constant dense<0.000000e+00> : vector<8x128xf32>
    %834 = tpu.matmul %832, %833, %cst_891 {dimension_numbers = #tpu.dot_dimension_numbers<[1], [0], [0], [1], [0, 0, 1, 1], [], []>} : vector<8x16xbf16>, vector<16x128xbf16>, vector<8x128xf32> -> vector<8x128xf32>
    %835 = arith.addf %830, %834 : vector<8x128xf32>
    %c4_892 = arith.constant 4 : index
    %c0_893 = arith.constant 0 : index
    %c0_894 = arith.constant 0 : index
    %836 = vector.load %arg7[%c4_892, %c0_893, %c0_894] : memref<9x8x16xbf16, #tpu.memory_space<vmem>>, vector<1x8x16xbf16>
    %837 = vector.shape_cast %836 : vector<1x8x16xbf16> to vector<8x16xbf16>
    %c0_895 = arith.constant 0 : index
    %c1100_896 = arith.constant 1100 : index
    %838 = vector.load %arg10[%c0_895, %c1100_896] : memref<16x1408xbf16, #tpu.memory_space<vmem>>, vector<16x128xbf16>
    %cst_897 = arith.constant dense<0.000000e+00> : vector<8x128xf32>
    %839 = tpu.matmul %837, %838, %cst_897 {dimension_numbers = #tpu.dot_dimension_numbers<[1], [0], [0], [1], [0, 0, 1, 1], [], []>} : vector<8x16xbf16>, vector<16x128xbf16>, vector<8x128xf32> -> vector<8x128xf32>
    %840 = arith.addf %835, %839 : vector<8x128xf32>
    %c5_898 = arith.constant 5 : index
    %c0_899 = arith.constant 0 : index
    %c0_900 = arith.constant 0 : index
    %841 = vector.load %arg7[%c5_898, %c0_899, %c0_900] : memref<9x8x16xbf16, #tpu.memory_space<vmem>>, vector<1x8x16xbf16>
    %842 = vector.shape_cast %841 : vector<1x8x16xbf16> to vector<8x16xbf16>
    %c0_901 = arith.constant 0 : index
    %c1104_902 = arith.constant 1104 : index
    %843 = vector.load %arg10[%c0_901, %c1104_902] : memref<16x1408xbf16, #tpu.memory_space<vmem>>, vector<16x128xbf16>
    %cst_903 = arith.constant dense<0.000000e+00> : vector<8x128xf32>
    %844 = tpu.matmul %842, %843, %cst_903 {dimension_numbers = #tpu.dot_dimension_numbers<[1], [0], [0], [1], [0, 0, 1, 1], [], []>} : vector<8x16xbf16>, vector<16x128xbf16>, vector<8x128xf32> -> vector<8x128xf32>
    %845 = arith.addf %840, %844 : vector<8x128xf32>
    %c6_904 = arith.constant 6 : index
    %c0_905 = arith.constant 0 : index
    %c0_906 = arith.constant 0 : index
    %846 = vector.load %arg7[%c6_904, %c0_905, %c0_906] : memref<9x8x16xbf16, #tpu.memory_space<vmem>>, vector<1x8x16xbf16>
    %847 = vector.shape_cast %846 : vector<1x8x16xbf16> to vector<8x16xbf16>
    %c0_907 = arith.constant 0 : index
    %c1168_908 = arith.constant 1168 : index
    %848 = vector.load %arg10[%c0_907, %c1168_908] : memref<16x1408xbf16, #tpu.memory_space<vmem>>, vector<16x128xbf16>
    %cst_909 = arith.constant dense<0.000000e+00> : vector<8x128xf32>
    %849 = tpu.matmul %847, %848, %cst_909 {dimension_numbers = #tpu.dot_dimension_numbers<[1], [0], [0], [1], [0, 0, 1, 1], [], []>} : vector<8x16xbf16>, vector<16x128xbf16>, vector<8x128xf32> -> vector<8x128xf32>
    %850 = arith.addf %845, %849 : vector<8x128xf32>
    %c7_910 = arith.constant 7 : index
    %c0_911 = arith.constant 0 : index
    %c0_912 = arith.constant 0 : index
    %851 = vector.load %arg7[%c7_910, %c0_911, %c0_912] : memref<9x8x16xbf16, #tpu.memory_space<vmem>>, vector<1x8x16xbf16>
    %852 = vector.shape_cast %851 : vector<1x8x16xbf16> to vector<8x16xbf16>
    %c0_913 = arith.constant 0 : index
    %c1172_914 = arith.constant 1172 : index
    %853 = vector.load %arg10[%c0_913, %c1172_914] : memref<16x1408xbf16, #tpu.memory_space<vmem>>, vector<16x128xbf16>
    %cst_915 = arith.constant dense<0.000000e+00> : vector<8x128xf32>
    %854 = tpu.matmul %852, %853, %cst_915 {dimension_numbers = #tpu.dot_dimension_numbers<[1], [0], [0], [1], [0, 0, 1, 1], [], []>} : vector<8x16xbf16>, vector<16x128xbf16>, vector<8x128xf32> -> vector<8x128xf32>
    %855 = arith.addf %850, %854 : vector<8x128xf32>
    %c8_916 = arith.constant 8 : index
    %c0_917 = arith.constant 0 : index
    %c0_918 = arith.constant 0 : index
    %856 = vector.load %arg7[%c8_916, %c0_917, %c0_918] : memref<9x8x16xbf16, #tpu.memory_space<vmem>>, vector<1x8x16xbf16>
    %857 = vector.shape_cast %856 : vector<1x8x16xbf16> to vector<8x16xbf16>
    %c0_919 = arith.constant 0 : index
    %c1176_920 = arith.constant 1176 : index
    %858 = vector.load %arg10[%c0_919, %c1176_920] : memref<16x1408xbf16, #tpu.memory_space<vmem>>, vector<16x128xbf16>
    %cst_921 = arith.constant dense<0.000000e+00> : vector<8x128xf32>
    %859 = tpu.matmul %857, %858, %cst_921 {dimension_numbers = #tpu.dot_dimension_numbers<[1], [0], [0], [1], [0, 0, 1, 1], [], []>} : vector<8x16xbf16>, vector<16x128xbf16>, vector<8x128xf32> -> vector<8x128xf32>
    %860 = arith.addf %855, %859 : vector<8x128xf32>
    %c0_922 = arith.constant 0 : index
    %c0_923 = arith.constant 0 : index
    %861 = vector.load %arg8[%c0_922, %c0_923] : memref<8x1xf32, #tpu.memory_space<vmem>>, vector<8x1xf32>
    %862 = vector.broadcast %861 : vector<8x1xf32> to vector<8x128xf32>
    %863 = arith.addf %860, %862 : vector<8x128xf32>
    %cst_924 = arith.constant 0.000000e+00 : f32
    %864 = vector.broadcast %cst_924 : f32 to vector<8x128xf32>
    %865 = arith.maximumf %863, %864 : vector<8x128xf32>
    %c0_925 = arith.constant 0 : index
    %c0_926 = arith.constant 0 : index
    %c1024_927 = arith.constant 1024 : index
    %866 = vector.load %arg9[%c0_925, %c0_926, %c1024_927] : memref<1x8x1152xf32, #tpu.memory_space<vmem>>, vector<1x8x128xf32>
    %867 = vector.shape_cast %866 : vector<1x8x128xf32> to vector<8x128xf32>
    %868 = vector.shape_cast %865 : vector<8x128xf32> to vector<1x8x128xf32>
    tpu.vector_store %arg9[%c0_925, %c0_926, %c1024_927], %868 {strides = array<i32>} : memref<1x8x1152xf32, #tpu.memory_space<vmem>>, vector<1x8x128xf32>,
    return
  }
  func.func @transform_0(%arg0: i32) -> (i32, i32, i32) {
    %c0_i32 = arith.constant 0 : i32
    %c0_i32_0 = arith.constant 0 : i32
    %c0_i32_1 = arith.constant 0 : i32
    return %arg0, %c0_i32, %c0_i32_0 : i32, i32, i32
  }
  func.func @transform_1(%arg0: i32) -> (i32, i32, i32) {
    %c0_i32 = arith.constant 0 : i32
    %c0_i32_0 = arith.constant 0 : i32
    %c0_i32_1 = arith.constant 0 : i32
    return %arg0, %c0_i32, %c0_i32_0 : i32, i32, i32
  }
  func.func @transform_2(%arg0: i32) -> (i32, i32) {
    %c0_i32 = arith.constant 0 : i32
    %c0_i32_0 = arith.constant 0 : i32
    %c0_i32_1 = arith.constant 0 : i32
    return %c0_i32, %c0_i32_0 : i32, i32
  }
  func.func @transform_3(%arg0: i32) -> (i32, i32, i32) {
    %c0_i32 = arith.constant 0 : i32
    %c0_i32_0 = arith.constant 0 : i32
    %c0_i32_1 = arith.constant 0 : i32
    %c0_i32_2 = arith.constant 0 : i32
    return %c0_i32, %c0_i32_0, %c0_i32_1 : i32, i32, i32
  }
  func.func @transform_4(%arg0: i32) -> (i32, i32, i32) {
    %c0_i32 = arith.constant 0 : i32
    %c0_i32_0 = arith.constant 0 : i32
    %c0_i32_1 = arith.constant 0 : i32
    %c0_i32_2 = arith.constant 0 : i32
    return %c0_i32, %c0_i32_0, %c0_i32_1 : i32, i32, i32
  }
  func.func @transform_5(%arg0: i32) -> (i32, i32) {
    %c0_i32 = arith.constant 0 : i32
    %c0_i32_0 = arith.constant 0 : i32
    %c0_i32_1 = arith.constant 0 : i32
    return %c0_i32, %c0_i32_0 : i32, i32
  }
  func.func @transform_6(%arg0: i32) -> (i32, i32, i32) {
    %c0_i32 = arith.constant 0 : i32
    %c0_i32_0 = arith.constant 0 : i32
    %c0_i32_1 = arith.constant 0 : i32
    %c0_i32_2 = arith.constant 0 : i32
    return %c0_i32, %c0_i32_0, %c0_i32_1 : i32, i32, i32
  }
  func.func @transform_7(%arg0: i32) -> (i32, i32) {
    %c0_i32 = arith.constant 0 : i32
    %c0_i32_0 = arith.constant 0 : i32
    %c0_i32_1 = arith.constant 0 : i32
    return %c0_i32, %c0_i32_0 : i32, i32
  }
  func.func @transform_8(%arg0: i32) -> (i32, i32, i32) {
    %c0_i32 = arith.constant 0 : i32
    %c0_i32_0 = arith.constant 0 : i32
    %c0_i32_1 = arith.constant 0 : i32
    return %arg0, %c0_i32, %c0_i32_0 : i32, i32, i32
  }
}

</mosaic_0001>

<bundles_post_ra>
// kernel: unet_up3_forward.1
= control target key start
LH: loop header
LB: loop body
LE: loop exit
PB: predicated region body
PF: predicated region fallthrough
CT: control target
= control target key end

     0   :  { %s10658_s27 = smov 0   ;;  %s12957_s0 = inlined_call_operand.vmem [shape: bf16[2,16,1408], index: 0, kind: input, shape index: {}]   ;;  %s12958_s1 = inlined_call_operand.vmem [shape: bf16[2,16,1408], index: 1, kind: input, shape index: {}]   ;;  %s12959_s2 = inlined_call_operand.vmem [shape: f32[1,1152], index: 2, kind: input, shape index: {}]   ;;  %s12960_s3 = inlined_call_operand.vmem [shape: bf16[9,16,16], index: 3, kind: input, shape index: {}]   ;;  %s12961_s4 = inlined_call_operand.vmem [shape: bf16[9,16,16], index: 4, kind: input, shape index: {}]   ;;  %s12962_s5 = inlined_call_operand.vmem [shape: f32[16,1], index: 5, kind: input, shape index: {}]   ;;  %s12963_s6 = inlined_call_operand.vmem [shape: bf16[9,8,16], index: 6, kind: input, shape index: {}]   ;;  %s12964_s7 = inlined_call_operand.vmem [shape: f32[8,1], index: 7, kind: input, shape index: {}]   ;;  %s12965_s8 = inlined_call_operand.vmem [shape: f32[2,8,1152], index: 8, kind: output, shape index: {}]  }
   0x1 LB: > { %s9587_s28 = sadd.s32 4294967295, %s10599_s27   ;;  %p9591_p0 = scmp.ge.s32.totalorder %s10599_s27, 1  ;;  %s10599_s27 = sphi %s10658_s27, %s18_s27  }
   0x2   : > { %p272_p1 = scmp.lt.s32.totalorder %s10599_s27, 3 }
   0x4   : > { %p273_p2 = pnand %p9591_p0, %p272_p1 }
   0x6   : > { %276 = sbr.rel (%p273_p2) target bundleno = 1414 (0x586), region = 52 }
   0xb   : > { %p311_p3 = scmp.lt.s32.totalorder %s9587_s28, 1  ;;  %v12966_v0 = vmov 0   ;;  %v10411_v3 = vld [vmem:[%s12960_s3] sm:$0xff]   ;;  %s10602_s16 = smov 124   ;;  %vm358_vm0 = vcmask 130048   ;;  %vm497_vm1 = vcmask 1014784  }
   0xc   : > { %394 = vmatprep.mubr.bf16.mxu0 %v12966_v0  ;;  %455 = vmatprep.mubr.bf16.mxu1 %v12966_v0  ;;  %v10410_v7 = vld [vmem:[%s12961_s4] sm:$0xff]   ;;  %s10603_s19 = smov 120   ;;  %s10604_s20 = smov 56   ;;  %v10412_v28 = vld [vmem:[%s12960_s3 + $0x8] sm:$0xff]   ;;  %vm651_vm2 = vcmask 982016   ;;  %v10414_v39 = vld [vmem:[%s12960_s3 + $0x10] sm:$0xff]  }
   0xd   : > { %s13067_s28 = smov (!%p311_p3, %s9587_s28), 1  ;;  %10385 = vset.pattern.permute.xlu1 %v12966_v0  ;;  %10384 = vset.pattern.permute.xlu0 %v12966_v0  ;;  %s10605_s21 = smov 52   ;;  %v10413_v32 = vld [vmem:[%s12961_s4 + $0x8] sm:$0xff]   ;;  %v10415_v44 = vld [vmem:[%s12961_s4 + $0x10] sm:$0xff]   ;;  %vm788_vm3 = vcmask 457728   ;;  %v10419_v51 = vld [vmem:[%s12960_s3 + $0x18] sm:$0xff]  }
   0xe   : > { %s10362_s29 = smul.u32 88, %s13067_s28  ;;  %s10606_s22 = smov 48   ;;  %v10423_v56 = vld [vmem:[%s12961_s4 + $0x18] sm:$0xff]   ;;  %vm925_vm4 = vcmask 424960   ;;  %vm1062_vm5 = vcmask 392192   ;;  %vm1216_vm6 = vcmask 916480  }
   0xf   : > { %s10607_s23 = smov 112   ;;  %s10608_s24 = smov 108   ;;  %vm1370_vm7 = vcmask 883712   ;;  %vm1507_vm8 = vcmask 850944   ;;  %vm10611_vm9 = vmmov 0   ;;  %vm327_vm10 = vcmask 617472  }
  0x10   : > { %s10676_s10 = scalar_lea.vmem %s12957_s0, %s10362_s29  ;;  %s10682_s13 = scalar_lea.vmem %s12958_s1, %s10362_s29  ;;  %vm330_vm11 = vcmask 1044064   ;;  %vm331_vm12 = vcmask 1047556   ;;  %vm1682_vm14 = vcmask 621568   ;;  %vm6832_vm15 = vcmask 621572  }
  0x11   : > { %v10386_v1 = vld [vmem:[%s10676_s10 + $0x4] ss:$44 sps:$4 sm:$0xff]   ;;  %v10388_v2 = vld [vmem:[%s10676_s10] ss:$44 sps:$4 sm:$0xff]   ;;  %v10389_v4 = vld [vmem:[%s10676_s10 + $0x8] ss:$44 sps:$4 sm:$0xff]  }
  0x12   : > { %493 = vrot.lane.b32.xlu0 %v10386_v1, %s10602_s16  ;;  %437 = vmatprep.subr.bf16.mxu1 %v10386_v1  ;;  %v10390_v5 = vld [vmem:[%s10682_s13 + $0x4] ss:$44 sps:$4 sm:$0xff]   ;;  %v10393_v6 = vld [vmem:[%s10682_s13] ss:$44 sps:$4 sm:$0xff]   ;;  %v10392_v8 = vld [vmem:[%s10682_s13 + $0x8] ss:$44 sps:$4 sm:$0xff]  }
  0x13   : > { %491 = vrot.lane.b32.xlu1 %v10388_v2, %s10602_s16  ;;  %438 = vmatpush1.bf16.msra.mxu1 %v10388_v2  ;;  %v10394_v9 = vld [vmem:[%s10676_s10 + $0x8] ss:$44 sps:$4 sm:$0xff]   ;;  %v10396_v10 = vld [vmem:[%s10676_s10 + $0xc] ss:$44 sps:$4 sm:$0xff]   ;;  %v10397_v11 = vld [vmem:[%s10676_s10 + $0x4] ss:$44 sps:$4 sm:$0xff]  }
  0x14   : > { %376 = vmatprep.subr.bf16.mxu0 %v10390_v5  ;;  %v10398_v12 = vld [vmem:[%s10682_s13 + $0x8] ss:$44 sps:$4 sm:$0xff]   ;;  %v10400_v13 = vld [vmem:[%s10682_s13 + $0xc] ss:$44 sps:$4 sm:$0xff]   ;;  %v10401_v14 = vld [vmem:[%s10682_s13 + $0x4] ss:$44 sps:$4 sm:$0xff]  }
  0x15   : > { %377 = vmatpush1.bf16.msra.mxu0 %v10393_v6  ;;  %s10609_s25 = smov 104   ;;  %v10752_v15 = vld [vmem:[%s10676_s10 + $0xc] ss:$44 sps:$4 sm:$0xff]   ;;  %v10756_v16 = vld [vmem:[%s10676_s10 + $0x10] ss:$44 sps:$4 sm:$0xff]   ;;  %vm12167_vm13 = vmor %vm331_vm12, %vm330_vm11  ;;  %s10612_s14 = smov 76  }
  0x16   : > { %495 = vrot.lane.b32.xlu0 %v10389_v4, %s10602_s16  ;;  %9602 = vmatmul.mubr.msk.bf16.vlgmr.msra.gmra.mxu1 %vm358_vm0, %v10411_v3  ;;  %v10762_v17 = vld [vmem:[%s10676_s10 + $0x8] ss:$44 sps:$4 sm:$0xff]   ;;  %v10767_v18 = vld [vmem:[%s10682_s13 + $0xc] ss:$44 sps:$4 sm:$0xff]   ;;  %v10772_v19 = vld [vmem:[%s10682_s13 + $0x10] ss:$44 sps:$4 sm:$0xff]  }
  0x17   : > { %579 = vrot.lane.b32.xlu1 %v10390_v5, %s10602_s16  ;;  %622 = vmatprep.mubr.bf16.mxu1 %v12966_v0  ;;  %v10777_v20 = vld [vmem:[%s10682_s13 + $0x8] ss:$44 sps:$4 sm:$0xff]   ;;  %v10871_v60 = vld [vmem:[%s10676_s10 + $0x10] ss:$44 sps:$4 sm:$0xff]   ;;  %v10887_v3 = vld [vmem:[%s10676_s10 + $0xc] ss:$44 sps:$4 sm:$0xff]  }
  0x18   : > { %9598 = vmatmul.mubr.msk.bf16.vlgmr.msra.gmra.mxu0 %vm358_vm0, %v10410_v7  ;;  %v10877_v61 = vld [vmem:[%s10676_s10 + $0x14] ss:$44 sps:$4 sm:$0xff]   ;;  %s10363_s15 = smul.u32 72, %s13067_s28 }
  0x19   : > { %537 = vmatprep.mubr.bf16.mxu0 %v12966_v0 }
  0x1a   : > { %581 = vrot.lane.b32.xlu0 %v10392_v8, %s10602_s16 }
  0x1b   : > { %577 = vrot.lane.b32.xlu1 %v10393_v6, %s10602_s16 }
  0x1e   : > { %647 = vrot.lane.b32.xlu0 %v10386_v1, %s10603_s19 }
  0x1f   : > { %649 = vrot.lane.b32.xlu1 %v10389_v4, %s10603_s19 }
  0x22   : > { %645 = vrot.lane.b32.xlu0 %v10388_v2, %s10603_s19 }
  0x23   : > { %716 = vrot.lane.b32.xlu1 %v10390_v5, %s10603_s19 }
  0x26   : > { %718 = vrot.lane.b32.xlu0 %v10392_v8, %s10603_s19 }
  0x27   : > { %714 = vrot.lane.b32.xlu1 %v10393_v6, %s10603_s19 }
  0x2a   : > { %784 = vrot.lane.b32.xlu0 %v10386_v1, %s10604_s20 }
  0x2b   : > { %786 = vrot.lane.b32.xlu1 %v10389_v4, %s10604_s20 }
  0x2e   : > { %782 = vrot.lane.b32.xlu0 %v10388_v2, %s10604_s20 }
  0x2f   : > { %853 = vrot.lane.b32.xlu1 %v10390_v5, %s10604_s20 }
  0x32   : > { %855 = vrot.lane.b32.xlu0 %v10392_v8, %s10604_s20 }
  0x33   : > { %851 = vrot.lane.b32.xlu1 %v10393_v6, %s10604_s20 }
  0x36   : > { %921 = vrot.lane.b32.xlu0 %v10386_v1, %s10605_s21 }
  0x37   : > { %923 = vrot.lane.b32.xlu1 %v10389_v4, %s10605_s21 }
  0x3a   : > { %919 = vrot.lane.b32.xlu0 %v10388_v2, %s10605_s21 }
  0x3b   : > { %990 = vrot.lane.b32.xlu1 %v10390_v5, %s10605_s21 }
  0x3e   : > { %992 = vrot.lane.b32.xlu0 %v10392_v8, %s10605_s21 }
  0x3f   : > { %988 = vrot.lane.b32.xlu1 %v10393_v6, %s10605_s21 }
  0x42   : > { %1058 = vrot.lane.b32.xlu0 %v10386_v1, %s10606_s22 }
  0x43   : > { %1060 = vrot.lane.b32.xlu1 %v10389_v4, %s10606_s22  ;;  %v10892_v4 = vld [vmem:[%s10682_s13 + $0x10] ss:$44 sps:$4 sm:$0xff]  }
  0x46   : > { %1056 = vrot.lane.b32.xlu0 %v10388_v2, %s10606_s22  ;;  %v10426_v2 = vld [vmem:[%s12960_s3 + $0x20] sm:$0xff]  }
  0x47   : > { %1127 = vrot.lane.b32.xlu1 %v10390_v5, %s10606_s22 }
  0x4a   : > { %1129 = vrot.lane.b32.xlu0 %v10392_v8, %s10606_s22 }
  0x4b   : > { %1125 = vrot.lane.b32.xlu1 %v10393_v6, %s10606_s22 }
  0x4e   : > { %1212 = vrot.lane.b32.xlu0 %v10394_v9, %s10607_s23 }
  0x4f   : > { %1214 = vrot.lane.b32.xlu1 %v10396_v10, %s10607_s23 }
  0x52   : > { %1210 = vrot.lane.b32.xlu0 %v10397_v11, %s10607_s23 }
  0x53   : > { %1298 = vrot.lane.b32.xlu1 %v10398_v12, %s10607_s23 }
  0x56   : > { %1300 = vrot.lane.b32.xlu0 %v10400_v13, %s10607_s23 }
  0x57   : > { %1296 = vrot.lane.b32.xlu1 %v10401_v14, %s10607_s23 }
  0x5a   : > { %1366 = vrot.lane.b32.xlu0 %v10394_v9, %s10608_s24 }
  0x5b   : > { %1368 = vrot.lane.b32.xlu1 %v10396_v10, %s10608_s24 }
  0x5e   : > { %1364 = vrot.lane.b32.xlu0 %v10397_v11, %s10608_s24 }
  0x5f   : > { %1435 = vrot.lane.b32.xlu1 %v10398_v12, %s10608_s24 }
  0x62   : > { %1437 = vrot.lane.b32.xlu0 %v10400_v13, %s10608_s24 }
  0x63   : > { %1433 = vrot.lane.b32.xlu1 %v10401_v14, %s10608_s24 }
  0x66   : > { %1503 = vrot.lane.b32.xlu0 %v10394_v9, %s10609_s25  ;;  %v10424_v9 = vld [vmem:[%s10682_s13 + $0x14] ss:$44 sps:$4 sm:$0xff]  }
  0x67   : > { %1505 = vrot.lane.b32.xlu1 %v10396_v10, %s10609_s25  ;;  %v10427_v10 = vld [vmem:[%s12961_s4 + $0x20] sm:$0xff]  }
  0x6a   : > { %1501 = vrot.lane.b32.xlu0 %v10397_v11, %s10609_s25  ;;  %v10906_v11 = vld [vmem:[%s10682_s13 + $0xc] ss:$44 sps:$4 sm:$0xff]  }
  0x6b   : > { %1572 = vrot.lane.b32.xlu1 %v10398_v12, %s10609_s25 }
  0x6e   : > { %1574 = vrot.lane.b32.xlu0 %v10400_v13, %s10609_s25 }
  0x6f   : > { %1570 = vrot.lane.b32.xlu1 %v10401_v14, %s10609_s25 }
  0x72   : > { %1849 = vrot.lane.b32.xlu0 %v10752_v15, %s10602_s16 }
  0x73   : > { %1851 = vrot.lane.b32.xlu1 %v10756_v16, %s10602_s16 }
  0x76   : > { %1847 = vrot.lane.b32.xlu0 %v10762_v17, %s10602_s16 }
  0x77   : > { %1933 = vrot.lane.b32.xlu1 %v10767_v18, %s10602_s16 }
  0x7a   : > { %1935 = vrot.lane.b32.xlu0 %v10772_v19, %s10602_s16 }
  0x7b   : > { %1931 = vrot.lane.b32.xlu1 %v10777_v20, %s10602_s16 }
  0x7e   : > { %2000 = vrot.lane.b32.xlu0 %v10752_v15, %s10603_s19 }
  0x7f   : > { %2002 = vrot.lane.b32.xlu1 %v10756_v16, %s10603_s19 }
  0x82   : > { %1998 = vrot.lane.b32.xlu0 %v10762_v17, %s10603_s19 }
  0x83   : > { %2067 = vrot.lane.b32.xlu1 %v10767_v18, %s10603_s19 }
  0x84   : > { %v494_v21 = vpop.permute.xlu0 %493 }
  0x85   : > { %v492_v22 = vpop.permute.xlu1 %491 }
  0x86   : > { %2069 = vrot.lane.b32.xlu0 %v10772_v19, %s10603_s19  ;;  %v498_v26 = vsel %vm497_vm1, %v492_v22, %v494_v21  ;;  %v10428_v22 = vld [vmem:[%s12960_s3 + $0x28] sm:$0xff]  }
  0x87   : > { %2065 = vrot.lane.b32.xlu1 %v10777_v20, %s10603_s19 }
  0x88   : > { %v496_v23 = vpop.permute.xlu0 %495 }
  0x89   : > { %v580_v24 = vpop.permute.xlu1 %579  ;;  %v499_v25 = vsel %vm497_vm1, %v494_v21, %v496_v23 }
  0x8a   : > { %519 = vmatprep.subr.bf16.mxu0 %v499_v25  ;;  %2134 = vrot.lane.b32.xlu0 %v10752_v15, %s10604_s20 }
  0x8b   : > { %2136 = vrot.lane.b32.xlu1 %v10756_v16, %s10604_s20  ;;  %520 = vmatpush1.bf16.msra.mxu0 %v498_v26 }
  0x8c   : > { %v582_v27 = vpop.permute.xlu0 %581 }
  0x8d   : > { %v578_v29 = vpop.permute.xlu1 %577  ;;  %v584_v30 = vsel %vm497_vm1, %v580_v24, %v582_v27  ;;  %v10429_v27 = vld [vmem:[%s12961_s4 + $0x28] sm:$0xff]  }
  0x8e   : > { %v583_v31 = vsel %vm497_vm1, %v578_v29, %v580_v24  ;;  %2132 = vrot.lane.b32.xlu0 %v10762_v17, %s10604_s20  ;;  %604 = vmatprep.subr.bf16.mxu1 %v584_v30 }
  0x8f   : > { %2201 = vrot.lane.b32.xlu1 %v10767_v18, %s10604_s20  ;;  %605 = vmatpush1.bf16.msra.mxu1 %v583_v31 }
  0x90   : > { %v648_v33 = vpop.permute.xlu0 %647  ;;  %9609 = vmatmul.mubr.msk.bf16.vlgmr.msra.gmra.mxu0 %vm358_vm0, %v10412_v28 }
  0x91   : > { %v650_v34 = vpop.permute.xlu1 %649  ;;  %691 = vmatprep.mubr.bf16.mxu0 %v12966_v0 }
  0x92   : > { %2203 = vrot.lane.b32.xlu0 %v10772_v19, %s10604_s20  ;;  %v653_v35 = vsel %vm651_vm2, %v648_v33, %v650_v34  ;;  %9616 = vmatmul.mubr.msk.bf16.vlgmr.msra.gmra.mxu1 %vm358_vm0, %v10413_v32  ;;  %v10433_v34 = vld [vmem:[%s12960_s3 + $0x30] sm:$0xff]  }
  0x93   : > { %2199 = vrot.lane.b32.xlu1 %v10777_v20, %s10604_s20  ;;  %673 = vmatprep.subr.bf16.mxu0 %v653_v35 }
  0x94   : > { %v646_v36 = vpop.permute.xlu0 %645  ;;  %759 = vmatprep.mubr.bf16.mxu1 %v12966_v0 }
  0x95   : > { %v652_v37 = vsel %vm651_vm2, %v646_v36, %v648_v33  ;;  %v717_v38 = vpop.permute.xlu1 %716 }
  0x96   : > { %2268 = vrot.lane.b32.xlu0 %v10752_v15, %s10605_s21  ;;  %674 = vmatpush1.bf16.msra.mxu0 %v652_v37 }
  0x97   : > { %2270 = vrot.lane.b32.xlu1 %v10756_v16, %s10605_s21 }
  0x98   : > { %v719_v40 = vpop.permute.xlu0 %718 }
  0x99   : > { %v715_v41 = vpop.permute.xlu1 %714  ;;  %v721_v42 = vsel %vm651_vm2, %v717_v38, %v719_v40  ;;  %9620 = vmatmul.mubr.msk.bf16.vlgmr.msra.gmra.mxu0 %vm358_vm0, %v10414_v39  ;;  %v10437_v39 = vld [vmem:[%s12961_s4 + $0x30] sm:$0xff]  }
  0x9a   : > { %v720_v43 = vsel %vm651_vm2, %v715_v41, %v717_v38  ;;  %2266 = vrot.lane.b32.xlu0 %v10762_v17, %s10605_s21  ;;  %741 = vmatprep.subr.bf16.mxu1 %v721_v42 }
  0x9b   : > { %2335 = vrot.lane.b32.xlu1 %v10767_v18, %s10605_s21  ;;  %742 = vmatpush1.bf16.msra.mxu1 %v720_v43  ;;  %v10962_v43 = vld [vmem:[%s10676_s10 + $0x14] ss:$44 sps:$4 sm:$0xff]  }
  0x9c   : > { %v785_v45 = vpop.permute.xlu0 %784  ;;  %828 = vmatprep.mubr.bf16.mxu0 %v12966_v0 }
  0x9d   : > { %v787_v46 = vpop.permute.xlu1 %786 }
  0x9e   : > { %2337 = vrot.lane.b32.xlu0 %v10772_v19, %s10605_s21  ;;  %v790_v47 = vsel %vm788_vm3, %v785_v45, %v787_v46  ;;  %9624 = vmatmul.mubr.msk.bf16.vlgmr.msra.gmra.mxu1 %vm358_vm0, %v10415_v44  ;;  %v10968_v44 = vld [vmem:[%s10676_s10 + $0x18] ss:$44 sps:$4 sm:$0xff]  }
  0x9f   : > { %2333 = vrot.lane.b32.xlu1 %v10777_v20, %s10605_s21  ;;  %810 = vmatprep.subr.bf16.mxu0 %v790_v47 }
  0xa0   : > { %v783_v48 = vpop.permute.xlu0 %782  ;;  %896 = vmatprep.mubr.bf16.mxu1 %v12966_v0 }
  0xa1   : > { %v789_v49 = vsel %vm788_vm3, %v783_v48, %v785_v45  ;;  %v854_v50 = vpop.permute.xlu1 %853  ;;  %v10440_v48 = vld [vmem:[%s12960_s3 + $0x38] sm:$0xff]  }
  0xa2   : > { %2402 = vrot.lane.b32.xlu0 %v10752_v15, %s10606_s22  ;;  %811 = vmatpush1.bf16.msra.mxu0 %v789_v49  ;;  %v10978_v49 = vld [vmem:[%s10676_s10 + $0x10] ss:$44 sps:$4 sm:$0xff]  }
  0xa3   : > { %2404 = vrot.lane.b32.xlu1 %v10756_v16, %s10606_s22 }
  0xa4   : > { %v856_v52 = vpop.permute.xlu0 %855 }
  0xa5   : > { %v852_v53 = vpop.permute.xlu1 %851  ;;  %v858_v54 = vsel %vm788_vm3, %v854_v50, %v856_v52  ;;  %9628 = vmatmul.mubr.msk.bf16.vlgmr.msra.gmra.mxu0 %vm358_vm0, %v10419_v51 }
  0xa6   : > { %v857_v55 = vsel %vm788_vm3, %v852_v53, %v854_v50  ;;  %2400 = vrot.lane.b32.xlu0 %v10762_v17, %s10606_s22  ;;  %878 = vmatprep.subr.bf16.mxu1 %v858_v54  ;;  %v10983_v50 = vld [vmem:[%s10682_s13 + $0x14] ss:$44 sps:$4 sm:$0xff]  }
  0xa7   : > { %2469 = vrot.lane.b32.xlu1 %v10767_v18, %s10606_s22  ;;  %879 = vmatpush1.bf16.msra.mxu1 %v857_v55  ;;  %v10991_v55 = vld [vmem:[%s10682_s13 + $0x18] ss:$44 sps:$4 sm:$0xff]  }
  0xa8   : > { %v922_v57 = vpop.permute.xlu0 %921  ;;  %965 = vmatprep.mubr.bf16.mxu0 %v12966_v0 }
  0xa9   : > { %v924_v58 = vpop.permute.xlu1 %923 }
  0xaa   : > { %2471 = vrot.lane.b32.xlu0 %v10772_v19, %s10606_s22  ;;  %v927_v59 = vsel %vm925_vm4, %v922_v57, %v924_v58  ;;  %9632 = vmatmul.mubr.msk.bf16.vlgmr.msra.gmra.mxu1 %vm358_vm0, %v10423_v56  ;;  %v10441_v56 = vld [vmem:[%s12961_s4 + $0x38] sm:$0xff]  }
  0xab   : > { %2467 = vrot.lane.b32.xlu1 %v10777_v20, %s10606_s22  ;;  %947 = vmatprep.subr.bf16.mxu0 %v927_v59 }
  0xac   : > { %v920_v62 = vpop.permute.xlu0 %919  ;;  %1033 = vmatprep.mubr.bf16.mxu1 %v12966_v0 }
  0xad   : > { %v926_v63 = vsel %vm925_vm4, %v920_v62, %v922_v57  ;;  %v991_v1 = vpop.permute.xlu1 %990  ;;  %v10999_v57 = vld [vmem:[%s10682_s13 + $0x10] ss:$44 sps:$4 sm:$0xff]  }
  0xae   : > { %2553 = vrot.lane.b32.xlu0 %v10871_v60, %s10607_s23  ;;  %948 = vmatpush1.bf16.msra.mxu0 %v926_v63 }
  0xaf   : > { %2555 = vrot.lane.b32.xlu1 %v10877_v61, %s10607_s23 }
  0xb0   : > { %v993_v5 = vpop.permute.xlu0 %992 }
  0xb1   : > { %v989_v6 = vpop.permute.xlu1 %988  ;;  %v995_v7 = vsel %vm925_vm4, %v991_v1, %v993_v5  ;;  %9636 = vmatmul.mubr.msk.bf16.vlgmr.msra.gmra.mxu0 %vm358_vm0, %v10426_v2 }
  0xb2   : > { %v994_v8 = vsel %vm925_vm4, %v989_v6, %v991_v1  ;;  %2551 = vrot.lane.b32.xlu0 %v10887_v3, %s10607_s23  ;;  %1015 = vmatprep.subr.bf16.mxu1 %v995_v7  ;;  %v10442_v1 = vld [vmem:[%s12960_s3 + $0x40] sm:$0xff]  }
  0xb3   : > { %2637 = vrot.lane.b32.xlu1 %v10892_v4, %s10607_s23  ;;  %1016 = vmatpush1.bf16.msra.mxu1 %v994_v8  ;;  %v10443_v6 = vld [vmem:[%s12961_s4 + $0x40] sm:$0xff]  }
  0xb4   : > { %v1059_v12 = vpop.permute.xlu0 %1058  ;;  %1102 = vmatprep.mubr.bf16.mxu0 %v12966_v0  ;;  %v10444_v8 = vld [vmem:[%s12961_s4] sm:$0xff]  }
  0xb5   : > { %v1061_v13 = vpop.permute.xlu1 %1060 }
  0xb6   : > { %2639 = vrot.lane.b32.xlu0 %v10424_v9, %s10607_s23  ;;  %v1064_v14 = vsel %vm1062_vm5, %v1059_v12, %v1061_v13  ;;  %9640 = vmatmul.mubr.msk.bf16.vlgmr.msra.gmra.mxu1 %vm358_vm0, %v10427_v10 }
  0xb7   : > { %2635 = vrot.lane.b32.xlu1 %v10906_v11, %s10607_s23  ;;  %1084 = vmatprep.subr.bf16.mxu0 %v1064_v14  ;;  %v10446_v14 = vld [vmem:[%s12960_s3 + $0x8] sm:$0xff]  }
  0xb8   : > { %v1057_v16 = vpop.permute.xlu0 %1056  ;;  %1170 = vmatprep.mubr.bf16.mxu1 %v12966_v0 }
  0xb9   : > { %v1063_v19 = vsel %vm1062_vm5, %v1057_v16, %v1059_v12  ;;  %v1128_v21 = vpop.permute.xlu1 %1127 }
  0xba   : > { %2704 = vrot.lane.b32.xlu0 %v10871_v60, %s10608_s24  ;;  %1085 = vmatpush1.bf16.msra.mxu0 %v1063_v19 }
  0xbb   : > { %2706 = vrot.lane.b32.xlu1 %v10877_v61, %s10608_s24 }
  0xbc   : > { %v1130_v23 = vpop.permute.xlu0 %1129 }
  0xbd   : > { %v1126_v24 = vpop.permute.xlu1 %1125  ;;  %v1132_v25 = vsel %vm1062_vm5, %v1128_v21, %v1130_v23  ;;  %9644 = vmatmul.mubr.msk.bf16.vlgmr.msra.gmra.mxu0 %vm358_vm0, %v10428_v22  ;;  %v10447_v23 = vld [vmem:[%s12961_s4 + $0x8] sm:$0xff]  }
  0xbe   : > { %v1131_v26 = vsel %vm1062_vm5, %v1126_v24, %v1128_v21  ;;  %2702 = vrot.lane.b32.xlu0 %v10887_v3, %s10608_s24  ;;  %1152 = vmatprep.subr.bf16.mxu1 %v1132_v25 }
  0xbf   : > { %2771 = vrot.lane.b32.xlu1 %v10892_v4, %s10608_s24  ;;  %1153 = vmatpush1.bf16.msra.mxu1 %v1131_v26 }
  0xc0   : > { %v1213_v28 = vpop.permute.xlu0 %1212  ;;  %1256 = vmatprep.mubr.bf16.mxu0 %v12966_v0 }
  0xc1   : > { %v1215_v29 = vpop.permute.xlu1 %1214 }
  0xc2   : > { %2773 = vrot.lane.b32.xlu0 %v10424_v9, %s10608_s24  ;;  %v1218_v30 = vsel %vm1216_vm6, %v1213_v28, %v1215_v29  ;;  %9648 = vmatmul.mubr.msk.bf16.vlgmr.msra.gmra.mxu1 %vm358_vm0, %v10429_v27  ;;  %v10448_v27 = vld [vmem:[%s12960_s3 + $0x10] sm:$0xff]  }
  0xc3   : > { %2769 = vrot.lane.b32.xlu1 %v10906_v11, %s10608_s24  ;;  %1238 = vmatprep.subr.bf16.mxu0 %v1218_v30 }
  0xc4   : > { %v1211_v31 = vpop.permute.xlu0 %1210  ;;  %1341 = vmatprep.mubr.bf16.mxu1 %v12966_v0 }
  0xc5   : > { %v1217_v32 = vsel %vm1216_vm6, %v1211_v31, %v1213_v28  ;;  %v1299_v33 = vpop.permute.xlu1 %1298 }
  0xc6   : > { %2838 = vrot.lane.b32.xlu0 %v10871_v60, %s10609_s25  ;;  %1239 = vmatpush1.bf16.msra.mxu0 %v1217_v32 }
  0xc7   : > { %2840 = vrot.lane.b32.xlu1 %v10877_v61, %s10609_s25 }
  0xc8   : > { %v1301_v35 = vpop.permute.xlu0 %1300 }
  0xc9   : > { %v1297_v36 = vpop.permute.xlu1 %1296  ;;  %v1303_v37 = vsel %vm1216_vm6, %v1299_v33, %v1301_v35  ;;  %9655 = vmatmul.mubr.msk.bf16.vlgmr.msra.gmra.mxu0 %vm358_vm0, %v10433_v34 }
  0xca   : > { %v1302_v38 = vsel %vm1216_vm6, %v1297_v36, %v1299_v33  ;;  %2836 = vrot.lane.b32.xlu0 %v10887_v3, %s10609_s25  ;;  %1323 = vmatprep.subr.bf16.mxu1 %v1303_v37  ;;  %v10449_v33 = vld [vmem:[%s12961_s4 + $0x10] sm:$0xff]  }
  0xcb   : > { %2905 = vrot.lane.b32.xlu1 %v10892_v4, %s10609_s25  ;;  %1324 = vmatpush1.bf16.msra.mxu1 %v1302_v38 }
  0xcc   : > { %v1367_v40 = vpop.permute.xlu0 %1366  ;;  %1410 = vmatprep.mubr.bf16.mxu0 %v12966_v0 }
  0xcd   : > { %v1369_v41 = vpop.permute.xlu1 %1368 }
  0xce   : > { %2907 = vrot.lane.b32.xlu0 %v10424_v9, %s10609_s25  ;;  %v1372_v42 = vsel %vm1370_vm7, %v1367_v40, %v1369_v41  ;;  %9662 = vmatmul.mubr.msk.bf16.vlgmr.msra.gmra.mxu1 %vm358_vm0, %v10437_v39  ;;  %v10453_v39 = vld [vmem:[%s12960_s3 + $0x18] sm:$0xff]  }
  0xcf   : > { %2903 = vrot.lane.b32.xlu1 %v10906_v11, %s10609_s25  ;;  %1392 = vmatprep.subr.bf16.mxu0 %v1372_v42 }
  0xd0   : > { %v1365_v45 = vpop.permute.xlu0 %1364  ;;  %1478 = vmatprep.mubr.bf16.mxu1 %v12966_v0 }
  0xd1   : > { %v1371_v46 = vsel %vm1370_vm7, %v1365_v45, %v1367_v40  ;;  %v1436_v47 = vpop.permute.xlu1 %1435 }
  0xd2   : > { %3181 = vrot.lane.b32.xlu0 %v10962_v43, %s10602_s16  ;;  %1393 = vmatpush1.bf16.msra.mxu0 %v1371_v46  ;;  %v10457_v46 = vld [vmem:[%s12961_s4 + $0x18] sm:$0xff]  }
  0xd3   : > { %3183 = vrot.lane.b32.xlu1 %v10968_v44, %s10602_s16 }
  0xd4   : > { %v1438_v51 = vpop.permute.xlu0 %1437 }
  0xd5   : > { %v1434_v52 = vpop.permute.xlu1 %1433  ;;  %v1440_v53 = vsel %vm1370_vm7, %v1436_v47, %v1438_v51  ;;  %9666 = vmatmul.mubr.msk.bf16.vlgmr.msra.gmra.mxu0 %vm358_vm0, %v10440_v48  ;;  %v11124_v51 = vld [vmem:[%s10676_s10 + $0x18] ss:$44 sps:$4 sm:$0xff]  }
  0xd6   : > { %v1439_v54 = vsel %vm1370_vm7, %v1434_v52, %v1436_v47  ;;  %3179 = vrot.lane.b32.xlu0 %v10978_v49, %s10602_s16  ;;  %1460 = vmatprep.subr.bf16.mxu1 %v1440_v53  ;;  %v11130_v52 = vld [vmem:[%s10676_s10 + $0x1c] ss:$44 sps:$4 sm:$0xff]  }
  0xd7   : > { %3265 = vrot.lane.b32.xlu1 %v10983_v50, %s10602_s16  ;;  %1461 = vmatpush1.bf16.msra.mxu1 %v1439_v54 }
  0xd8   : > { %v1504_v58 = vpop.permute.xlu0 %1503  ;;  %1547 = vmatprep.mubr.bf16.mxu0 %v12966_v0 }
  0xd9   : > { %v1506_v59 = vpop.permute.xlu1 %1505 }
  0xda   : > { %3267 = vrot.lane.b32.xlu0 %v10991_v55, %s10602_s16  ;;  %v1509_v60 = vsel %vm1507_vm8, %v1504_v58, %v1506_v59  ;;  %9670 = vmatmul.mubr.msk.bf16.vlgmr.msra.gmra.mxu1 %vm358_vm0, %v10441_v56  ;;  %v10460_v56 = vld [vmem:[%s12960_s3 + $0x20] sm:$0xff]  }
  0xdb   : > { %3263 = vrot.lane.b32.xlu1 %v10999_v57, %s10602_s16  ;;  %1529 = vmatprep.subr.bf16.mxu0 %v1509_v60  ;;  %v11145_v59 = vld [vmem:[%s10682_s13 + $0x18] ss:$44 sps:$4 sm:$0xff]  }
  0xdc   : > { %v1502_v61 = vpop.permute.xlu0 %1501  ;;  %1615 = vmatprep.mubr.bf16.mxu1 %v12966_v0 }
  0xdd   : > { %v1508_v62 = vsel %vm1507_vm8, %v1502_v61, %v1504_v58  ;;  %v1573_v63 = vpop.permute.xlu1 %1572  ;;  %v11140_v58 = vld [vmem:[%s10676_s10 + $0x14] ss:$44 sps:$4 sm:$0xff]  }
  0xde   : > { %3332 = vrot.lane.b32.xlu0 %v10962_v43, %s10603_s19  ;;  %1530 = vmatpush1.bf16.msra.mxu0 %v1508_v62 }
  0xdf   : > { %3334 = vrot.lane.b32.xlu1 %v10968_v44, %s10603_s19  ;;  %1733 = vmatprep.subr.bf16.mxu0 %v10767_v18 }
  0xe0   : > { %v1575_v2 = vpop.permute.xlu0 %1574 }
  0xe1   : > { %v1571_v3 = vpop.permute.xlu1 %1570  ;;  %9674 = vmatmul.mubr.msk.bf16.vlgmr.msra.gmra.mxu0 %vm358_vm0, %v10442_v1  ;;  %v1577_v4 = vsel %vm1507_vm8, %v1573_v63, %v1575_v2  ;;  %v11153_v1 = vld [vmem:[%s10682_s13 + $0x1c] ss:$44 sps:$4 sm:$0xff]   ;;  %v10461_v2 = vld [vmem:[%s12961_s4 + $0x20] sm:$0xff]  }
  0xe2   : > { %v1576_v5 = vsel %vm1507_vm8, %v1571_v3, %v1573_v63  ;;  %3330 = vrot.lane.b32.xlu0 %v10978_v49, %s10603_s19  ;;  %1597 = vmatprep.subr.bf16.mxu1 %v1577_v4  ;;  %v11161_v3 = vld [vmem:[%s10682_s13 + $0x14] ss:$44 sps:$4 sm:$0xff]   ;;  %v396_v4 = vpop.f32.mrf.mxu0 }
  0xe3   : > { %3399 = vrot.lane.b32.xlu1 %v10983_v50, %s10603_s19  ;;  %1598 = vmatpush1.bf16.msra.mxu1 %v1576_v5 }
  0xe4   : > { %v1850_v18 = vpop.permute.xlu0 %1849  ;;  %1734 = vmatpush1.bf16.msra.mxu0 %v10777_v20  ;;  %1751 = vmatprep.mubr.bf16.mxu0 %v12966_v0 }
  0xe5   : > { %v1852_v7 = vpop.permute.xlu1 %1851  ;;  %1794 = vmatprep.subr.bf16.mxu1 %v10752_v15  ;;  %v10445_v15 = vld [vmem:[%s12960_s3] sm:$0xff]  }
  0xe6   : > { %3401 = vrot.lane.b32.xlu0 %v10991_v55, %s10603_s19  ;;  %v1854_v9 = vsel %vm497_vm1, %v1850_v18, %v1852_v7  ;;  %9678 = vmatmul.mubr.msk.bf16.vlgmr.msra.gmra.mxu1 %vm358_vm0, %v10443_v6  ;;  %v398_v7 = vpop.f32.mrf.mxu0 }
  0xe7   : > { %3397 = vrot.lane.b32.xlu1 %v10999_v57, %s10603_s19  ;;  %1874 = vmatprep.subr.bf16.mxu0 %v1854_v9 }
  0xe8   : > { %v1848_v20 = vpop.permute.xlu0 %1847  ;;  %1795 = vmatpush1.bf16.msra.mxu1 %v10762_v17  ;;  %1812 = vmatprep.mubr.bf16.mxu1 %v12966_v0 }
  0xe9   : > { %v1853_v10 = vsel %vm497_vm1, %v1848_v20, %v1850_v18  ;;  %v1934_v11 = vpop.permute.xlu1 %1933  ;;  %9684 = vmatmul.mubr.msk.bf16.vlgmr.msra.gmra.mxu0 %vm358_vm0, %v10444_v8  ;;  %v457_v8 = vpop.f32.mrf.mxu1 }
  0xea   : > { %3466 = vrot.lane.b32.xlu0 %v10962_v43, %s10604_s20  ;;  %1875 = vmatpush1.bf16.msra.mxu0 %v1853_v10  ;;  %v11171_v20 = vadd.f32 %v457_v8, %v396_v4  ;;  %v10478_v8 = vld [vmem:[%s12961_s4] sm:$0xff]  }
  0xeb   : > { %3468 = vrot.lane.b32.xlu1 %v10968_v44, %s10604_s20  ;;  %1892 = vmatprep.mubr.bf16.mxu0 %v12966_v0 }
  0xec   : > { %v1936_v17 = vpop.permute.xlu0 %1935 }
  0xed   : > { %v1932_v12 = vpop.permute.xlu1 %1931  ;;  %v1938_v13 = vsel %vm497_vm1, %v1934_v11, %v1936_v17  ;;  %v459_v17 = vpop.f32.mrf.mxu1 }
  0xee   : > { %v1937_v16 = vsel %vm497_vm1, %v1932_v12, %v1934_v11  ;;  %3464 = vrot.lane.b32.xlu0 %v10978_v49, %s10604_s20  ;;  %1958 = vmatprep.subr.bf16.mxu1 %v1938_v13  ;;  %v11179_v12 = vadd.f32 %v459_v17, %v398_v7  ;;  %v400_v13 = vpop.f32.mrf.mxu0 }
  0xef   : > { %3533 = vrot.lane.b32.xlu1 %v10983_v50, %s10604_s20  ;;  %9688 = vmatmul.mubr.msk.bf16.vlgmr.msra.gmra.mxu1 %vm358_vm0, %v10445_v15  ;;  %v10462_v15 = vld [vmem:[%s12960_s3 + $0x28] sm:$0xff]  }
  0xf0   : > { %1959 = vmatpush1.bf16.msra.mxu1 %v1937_v16  ;;  %v2001_v19 = vpop.permute.xlu0 %2000  ;;  %1976 = vmatprep.mubr.bf16.mxu1 %v12966_v0 }
  0xf1   : > { %v2003_v21 = vpop.permute.xlu1 %2002  ;;  %9695 = vmatmul.mubr.msk.bf16.vlgmr.msra.gmra.mxu0 %vm358_vm0, %v10446_v14  ;;  %v461_v14 = vpop.f32.mrf.mxu1 }
  0xf2   : > { %3535 = vrot.lane.b32.xlu0 %v10991_v55, %s10604_s20  ;;  %v2005_v22 = vsel %vm651_vm2, %v2001_v19, %v2003_v21  ;;  %2043 = vmatprep.mubr.bf16.mxu0 %v12966_v0 }
  0xf3   : > { %3531 = vrot.lane.b32.xlu1 %v10999_v57, %s10604_s20  ;;  %2025 = vmatprep.subr.bf16.mxu0 %v2005_v22 }
  0xf4   : > { %v1999_v24 = vpop.permute.xlu0 %1998 }
  0xf5   : > { %v2004_v25 = vsel %vm651_vm2, %v1999_v24, %v2001_v19  ;;  %v2068_v26 = vpop.permute.xlu1 %2067  ;;  %v11183_v19 = vadd.f32 %v461_v14, %v400_v13  ;;  %v10463_v24 = vld [vmem:[%s12961_s4 + $0x28] sm:$0xff]  }
  0xf6   : > { %3600 = vrot.lane.b32.xlu0 %v10962_v43, %s10605_s21  ;;  %2026 = vmatpush1.bf16.msra.mxu0 %v2004_v25  ;;  %v10480_v14 = vld [vmem:[%s12960_s3 + $0x8] sm:$0xff]  }
  0xf7   : > { %3602 = vrot.lane.b32.xlu1 %v10968_v44, %s10605_s21  ;;  %9702 = vmatmul.mubr.msk.bf16.vlgmr.msra.gmra.mxu1 %vm358_vm0, %v10447_v23 }
  0xf8   : > { %v2070_v28 = vpop.permute.xlu0 %2069  ;;  %2110 = vmatprep.mubr.bf16.mxu1 %v12966_v0 }
  0xf9   : > { %v2066_v29 = vpop.permute.xlu1 %2065  ;;  %v2072_v30 = vsel %vm651_vm2, %v2068_v26, %v2070_v28  ;;  %9706 = vmatmul.mubr.msk.bf16.vlgmr.msra.gmra.mxu0 %vm358_vm0, %v10448_v27 }
  0xfa   : > { %v2071_v31 = vsel %vm651_vm2, %v2066_v29, %v2068_v26  ;;  %3598 = vrot.lane.b32.xlu0 %v10978_v49, %s10605_s21  ;;  %2092 = vmatprep.subr.bf16.mxu1 %v2072_v30 }
  0xfb   : > { %3667 = vrot.lane.b32.xlu1 %v10983_v50, %s10605_s21  ;;  %2093 = vmatpush1.bf16.msra.mxu1 %v2071_v31  ;;  %v10467_v31 = vld [vmem:[%s12960_s3 + $0x30] sm:$0xff]  }
  0xfc   : > { %v2135_v32 = vpop.permute.xlu0 %2134  ;;  %2177 = vmatprep.mubr.bf16.mxu0 %v12966_v0 }
  0xfd   : > { %v2137_v34 = vpop.permute.xlu1 %2136 }
  0xfe   : > { %3669 = vrot.lane.b32.xlu0 %v10991_v55, %s10605_s21  ;;  %v2139_v35 = vsel %vm788_vm3, %v2135_v32, %v2137_v34 }
  0xff   : > { %3665 = vrot.lane.b32.xlu1 %v10999_v57, %s10605_s21  ;;  %2159 = vmatprep.subr.bf16.mxu0 %v2139_v35 }
 0x100   : > { %v2133_v36 = vpop.permute.xlu0 %2132  ;;  %9710 = vmatmul.mubr.msk.bf16.vlgmr.msra.gmra.mxu1 %vm358_vm0, %v10449_v33 }
 0x101   : > { %v2138_v37 = vsel %vm788_vm3, %v2133_v36, %v2135_v32  ;;  %v2202_v38 = vpop.permute.xlu1 %2201  ;;  %2244 = vmatprep.mubr.bf16.mxu1 %v12966_v0  ;;  %v10471_v36 = vld [vmem:[%s12961_s4 + $0x30] sm:$0xff]  }
 0x102   : > { %3734 = vrot.lane.b32.xlu0 %v10962_v43, %s10606_s22  ;;  %2160 = vmatpush1.bf16.msra.mxu0 %v2138_v37 }
 0x103   : > { %3736 = vrot.lane.b32.xlu1 %v10968_v44, %s10606_s22 }
 0x104   : > { %v2204_v40 = vpop.permute.xlu0 %2203 }
 0x105   : > { %v2200_v41 = vpop.permute.xlu1 %2199  ;;  %v2206_v42 = vsel %vm788_vm3, %v2202_v38, %v2204_v40  ;;  %9714 = vmatmul.mubr.msk.bf16.vlgmr.msra.gmra.mxu0 %vm358_vm0, %v10453_v39  ;;  %v11226_v40 = vld [vmem:[%s10676_s10 + $0x1c] ss:$44 sps:$4 sm:$0xff]  }
 0x106   : > { %v2205_v45 = vsel %vm788_vm3, %v2200_v41, %v2202_v38  ;;  %3732 = vrot.lane.b32.xlu0 %v10978_v49, %s10606_s22  ;;  %2226 = vmatprep.subr.bf16.mxu1 %v2206_v42  ;;  %v11232_v41 = vld [vmem:[%s10676_s10 + $0x20] ss:$44 sps:$4 sm:$0xff]  }
 0x107   : > { %3801 = vrot.lane.b32.xlu1 %v10983_v50, %s10606_s22  ;;  %2227 = vmatpush1.bf16.msra.mxu1 %v2205_v45 }
 0x108   : > { %v2269_v44 = vpop.permute.xlu0 %2268  ;;  %2311 = vmatprep.mubr.bf16.mxu0 %v12966_v0 }
 0x109   : > { %v2271_v47 = vpop.permute.xlu1 %2270 }
 0x10a   : > { %3803 = vrot.lane.b32.xlu0 %v10991_v55, %s10606_s22  ;;  %v2273_v48 = vsel %vm925_vm4, %v2269_v44, %v2271_v47  ;;  %9718 = vmatmul.mubr.msk.bf16.vlgmr.msra.gmra.mxu1 %vm358_vm0, %v10457_v46  ;;  %v11242_v47 = vld [vmem:[%s10676_s10 + $0x18] ss:$44 sps:$4 sm:$0xff]  }
 0x10b   : > { %3799 = vrot.lane.b32.xlu1 %v10999_v57, %s10606_s22  ;;  %2293 = vmatprep.subr.bf16.mxu0 %v2273_v48  ;;  %v11247_v48 = vld [vmem:[%s10682_s13 + $0x1c] ss:$44 sps:$4 sm:$0xff]  }
 0x10c   : > { %v2267_v53 = vpop.permute.xlu0 %2266  ;;  %2378 = vmatprep.mubr.bf16.mxu1 %v12966_v0 }
 0x10d   : > { %v2272_v54 = vsel %vm925_vm4, %v2267_v53, %v2269_v44  ;;  %v2336_v55 = vpop.permute.xlu1 %2335  ;;  %v10474_v44 = vld [vmem:[%s12960_s3 + $0x38] sm:$0xff]  }
 0x10e   : > { %3885 = vrot.lane.b32.xlu0 %v11124_v51, %s10607_s23  ;;  %2294 = vmatpush1.bf16.msra.mxu0 %v2272_v54 }
 0x10f   : > { %3887 = vrot.lane.b32.xlu1 %v11130_v52, %s10607_s23 }
 0x110   : > { %v2338_v60 = vpop.permute.xlu0 %2337 }
 0x111   : > { %v2334_v61 = vpop.permute.xlu1 %2333  ;;  %v2340_v62 = vsel %vm925_vm4, %v2336_v55, %v2338_v60  ;;  %9722 = vmatmul.mubr.msk.bf16.vlgmr.msra.gmra.mxu0 %vm358_vm0, %v10460_v56  ;;  %v10475_v56 = vld [vmem:[%s12961_s4 + $0x38] sm:$0xff]  }
 0x112   : > { %v2339_v63 = vsel %vm925_vm4, %v2334_v61, %v2336_v55  ;;  %3883 = vrot.lane.b32.xlu0 %v11140_v58, %s10607_s23  ;;  %2360 = vmatprep.subr.bf16.mxu1 %v2340_v62  ;;  %v11255_v55 = vld [vmem:[%s10682_s13 + $0x20] ss:$44 sps:$4 sm:$0xff]  }
 0x113   : > { %3969 = vrot.lane.b32.xlu1 %v11145_v59, %s10607_s23  ;;  %2361 = vmatpush1.bf16.msra.mxu1 %v2339_v63 }
 0x114   : > { %v2403_v5 = vpop.permute.xlu0 %2402  ;;  %2445 = vmatprep.mubr.bf16.mxu0 %v12966_v0 }
 0x115   : > { %v2405_v6 = vpop.permute.xlu1 %2404 }
 0x116   : > { %3971 = vrot.lane.b32.xlu0 %v11153_v1, %s10607_s23  ;;  %v2407_v18 = vsel %vm1062_vm5, %v2403_v5, %v2405_v6  ;;  %9726 = vmatmul.mubr.msk.bf16.vlgmr.msra.gmra.mxu1 %vm358_vm0, %v10461_v2  ;;  %v10476_v2 = vld [vmem:[%s12960_s3 + $0x40] sm:$0xff]  }
 0x117   : > { %3967 = vrot.lane.b32.xlu1 %v11161_v3, %s10607_s23  ;;  %2427 = vmatprep.subr.bf16.mxu0 %v2407_v18  ;;  %v10477_v18 = vld [vmem:[%s12961_s4 + $0x40] sm:$0xff]  }
 0x118   : > { %v2401_v9 = vpop.permute.xlu0 %2400  ;;  %2512 = vmatprep.mubr.bf16.mxu1 %v12966_v0 }
 0x119   : > { %v2406_v10 = vsel %vm1062_vm5, %v2401_v9, %v2403_v5  ;;  %v2470_v11 = vpop.permute.xlu1 %2469 }
 0x11a   : > { %4036 = vrot.lane.b32.xlu0 %v11124_v51, %s10608_s24  ;;  %2428 = vmatpush1.bf16.msra.mxu0 %v2406_v10 }
 0x11b   : > { %4038 = vrot.lane.b32.xlu1 %v11130_v52, %s10608_s24 }
 0x11c   : > { %v2472_v16 = vpop.permute.xlu0 %2471 }
 0x11d   : > { %v2468_v21 = vpop.permute.xlu1 %2467  ;;  %v2474_v22 = vsel %vm1062_vm5, %v2470_v11, %v2472_v16  ;;  %9730 = vmatmul.mubr.msk.bf16.vlgmr.msra.gmra.mxu0 %vm358_vm0, %v10462_v15  ;;  %v11316_v15 = vpop.f32.mrf.mxu0 }
 0x11e   : > { %v2473_v23 = vsel %vm1062_vm5, %v2468_v21, %v2470_v11  ;;  %4034 = vrot.lane.b32.xlu0 %v11140_v58, %s10608_s24  ;;  %2494 = vmatprep.subr.bf16.mxu1 %v2474_v22  ;;  %v11325_v21 = vpop.f32.mrf.mxu1 }
 0x11f   : > { %4103 = vrot.lane.b32.xlu1 %v11145_v59, %s10608_s24  ;;  %2495 = vmatpush1.bf16.msra.mxu1 %v2473_v23 }
 0x120   : > { %v2554_v25 = vpop.permute.xlu0 %2553  ;;  %2596 = vmatprep.mubr.bf16.mxu0 %v12966_v0 }
 0x121   : > { %v2556_v26 = vpop.permute.xlu1 %2555 }
 0x122   : > { %4105 = vrot.lane.b32.xlu0 %v11153_v1, %s10608_s24  ;;  %v2558_v27 = vsel %vm1216_vm6, %v2554_v25, %v2556_v26  ;;  %9734 = vmatmul.mubr.msk.bf16.vlgmr.msra.gmra.mxu1 %vm358_vm0, %v10463_v24 }
 0x123   : > { %4101 = vrot.lane.b32.xlu1 %v11161_v3, %s10608_s24  ;;  %2578 = vmatprep.subr.bf16.mxu0 %v2558_v27 }
 0x124   : > { %v2552_v28 = vpop.permute.xlu0 %2551  ;;  %2680 = vmatprep.mubr.bf16.mxu1 %v12966_v0 }
 0x125   : > { %v2557_v29 = vsel %vm1216_vm6, %v2552_v28, %v2554_v25  ;;  %v2638_v30 = vpop.permute.xlu1 %2637 }
 0x126   : > { %4170 = vrot.lane.b32.xlu0 %v11124_v51, %s10609_s25  ;;  %2579 = vmatpush1.bf16.msra.mxu0 %v2557_v29  ;;  %v10481_v29 = vld [vmem:[%s12961_s4 + $0x8] sm:$0xff]  }
 0x127   : > { %4172 = vrot.lane.b32.xlu1 %v11130_v52, %s10609_s25 }
 0x128   : > { %v2640_v32 = vpop.permute.xlu0 %2639 }
 0x129   : > { %v2636_v33 = vpop.permute.xlu1 %2635  ;;  %v2642_v34 = vsel %vm1216_vm6, %v2638_v30, %v2640_v32  ;;  %9741 = vmatmul.mubr.msk.bf16.vlgmr.msra.gmra.mxu0 %vm358_vm0, %v10467_v31 }
 0x12a   : > { %v2641_v35 = vsel %vm1216_vm6, %v2636_v33, %v2638_v30  ;;  %4168 = vrot.lane.b32.xlu0 %v11140_v58, %s10609_s25  ;;  %2662 = vmatprep.subr.bf16.mxu1 %v2642_v34  ;;  %v11263_v58 = vld [vmem:[%s10682_s13 + $0x18] ss:$44 sps:$4 sm:$0xff]  }
 0x12b   : > { %4237 = vrot.lane.b32.xlu1 %v11145_v59, %s10609_s25  ;;  %2663 = vmatpush1.bf16.msra.mxu1 %v2641_v35  ;;  %v10482_v35 = vld [vmem:[%s12960_s3 + $0x10] sm:$0xff]  }
 0x12c   : > { %v2705_v37 = vpop.permute.xlu0 %2704  ;;  %2747 = vmatprep.mubr.bf16.mxu0 %v12966_v0 }
 0x12d   : > { %v2707_v38 = vpop.permute.xlu1 %2706 }
 0x12e   : > { %4239 = vrot.lane.b32.xlu0 %v11153_v1, %s10609_s25  ;;  %v2709_v39 = vsel %vm1370_vm7, %v2705_v37, %v2707_v38  ;;  %9748 = vmatmul.mubr.msk.bf16.vlgmr.msra.gmra.mxu1 %vm358_vm0, %v10471_v36 }
 0x12f   : > { %4235 = vrot.lane.b32.xlu1 %v11161_v3, %s10609_s25  ;;  %2729 = vmatprep.subr.bf16.mxu0 %v2709_v39 }
 0x130   : > { %v2703_v42 = vpop.permute.xlu0 %2702  ;;  %2814 = vmatprep.mubr.bf16.mxu1 %v12966_v0 }
 0x131   : > { %v2708_v45 = vsel %vm1370_vm7, %v2703_v42, %v2705_v37  ;;  %v2772_v46 = vpop.permute.xlu1 %2771 }
 0x132   : > { %4513 = vrot.lane.b32.xlu0 %v11226_v40, %s10602_s16  ;;  %2730 = vmatpush1.bf16.msra.mxu0 %v2708_v45 }
 0x133   : > { %4515 = vrot.lane.b32.xlu1 %v11232_v41, %s10602_s16 }
 0x134   : > { %v2774_v51 = vpop.permute.xlu0 %2773 }
 0x135   : > { %v2770_v52 = vpop.permute.xlu1 %2769  ;;  %v2776_v53 = vsel %vm1370_vm7, %v2772_v46, %v2774_v51  ;;  %9752 = vmatmul.mubr.msk.bf16.vlgmr.msra.gmra.mxu0 %vm358_vm0, %v10474_v44 }
 0x136   : > { %v2775_v54 = vsel %vm1370_vm7, %v2770_v52, %v2772_v46  ;;  %4511 = vrot.lane.b32.xlu0 %v11242_v47, %s10602_s16  ;;  %2796 = vmatprep.subr.bf16.mxu1 %v2776_v53 }
 0x137   : > { %4597 = vrot.lane.b32.xlu1 %v11247_v48, %s10602_s16  ;;  %2797 = vmatpush1.bf16.msra.mxu1 %v2775_v54 }
 0x138   : > { %v2839_v59 = vpop.permute.xlu0 %2838  ;;  %2881 = vmatprep.mubr.bf16.mxu0 %v12966_v0 }
 0x139   : > { %v2841_v60 = vpop.permute.xlu1 %2840 }
 0x13a   : > { %4599 = vrot.lane.b32.xlu0 %v11255_v55, %s10602_s16  ;;  %v2843_v61 = vsel %vm1507_vm8, %v2839_v59, %v2841_v60  ;;  %9756 = vmatmul.mubr.msk.bf16.vlgmr.msra.gmra.mxu1 %vm358_vm0, %v10475_v56 }
 0x13b   : > { %4595 = vrot.lane.b32.xlu1 %v11263_v58, %s10602_s16  ;;  %2863 = vmatprep.subr.bf16.mxu0 %v2843_v61 }
 0x13c   : > { %v2837_v62 = vpop.permute.xlu0 %2836  ;;  %2948 = vmatprep.mubr.bf16.mxu1 %v12966_v0 }
 0x13d   : > { %v2842_v63 = vsel %vm1507_vm8, %v2837_v62, %v2839_v59  ;;  %v2906_v1 = vpop.permute.xlu1 %2905  ;;  %v10483_v59 = vld [vmem:[%s12961_s4 + $0x10] sm:$0xff]  }
 0x13e   : > { %4664 = vrot.lane.b32.xlu0 %v11226_v40, %s10603_s19  ;;  %2864 = vmatpush1.bf16.msra.mxu0 %v2842_v63 }
 0x13f   : > { %4666 = vrot.lane.b32.xlu1 %v11232_v41, %s10603_s19  ;;  %3065 = vmatprep.subr.bf16.mxu0 %v10983_v50 }
 0x140   : > { %v2908_v3 = vpop.permute.xlu0 %2907 }
 0x141   : > { %v2904_v4 = vpop.permute.xlu1 %2903  ;;  %9760 = vmatmul.mubr.msk.bf16.vlgmr.msra.gmra.mxu0 %vm358_vm0, %v10476_v2  ;;  %v2910_v5 = vsel %vm1507_vm8, %v2906_v1, %v2908_v3 }
 0x142   : > { %v2909_v6 = vsel %vm1507_vm8, %v2904_v4, %v2906_v1  ;;  %4662 = vrot.lane.b32.xlu0 %v11242_v47, %s10603_s19  ;;  %2930 = vmatprep.subr.bf16.mxu1 %v2910_v5 }
 0x143   : > { %4731 = vrot.lane.b32.xlu1 %v11247_v48, %s10603_s19  ;;  %2931 = vmatpush1.bf16.msra.mxu1 %v2909_v6 }
 0x144   : > { %v3182_v50 = vpop.permute.xlu0 %3181  ;;  %3066 = vmatpush1.bf16.msra.mxu0 %v10999_v57  ;;  %3083 = vmatprep.mubr.bf16.mxu0 %v12966_v0 }
 0x145   : > { %v3184_v7 = vpop.permute.xlu1 %3183  ;;  %3126 = vmatprep.subr.bf16.mxu1 %v10962_v43  ;;  %v10479_v43 = vld [vmem:[%s12960_s3] sm:$0xff]  }
 0x146   : > { %4733 = vrot.lane.b32.xlu0 %v11255_v55, %s10603_s19  ;;  %v3186_v9 = vsel %vm497_vm1, %v3182_v50, %v3184_v7  ;;  %9764 = vmatmul.mubr.msk.bf16.vlgmr.msra.gmra.mxu1 %vm358_vm0, %v10477_v18 }
 0x147   : > { %4729 = vrot.lane.b32.xlu1 %v11263_v58, %s10603_s19  ;;  %3206 = vmatprep.subr.bf16.mxu0 %v3186_v9 }
 0x148   : > { %v3180_v57 = vpop.permute.xlu0 %3179  ;;  %3127 = vmatpush1.bf16.msra.mxu1 %v10978_v49  ;;  %3144 = vmatprep.mubr.bf16.mxu1 %v12966_v0 }
 0x149   : > { %v3185_v10 = vsel %vm497_vm1, %v3180_v57, %v3182_v50  ;;  %v3266_v11 = vpop.permute.xlu1 %3265  ;;  %9770 = vmatmul.mubr.msk.bf16.vlgmr.msra.gmra.mxu0 %vm358_vm0, %v10478_v8  ;;  %v10487_v50 = vld [vmem:[%s12960_s3 + $0x18] sm:$0xff]  }
 0x14a   : > { %4798 = vrot.lane.b32.xlu0 %v11226_v40, %s10604_s20  ;;  %3207 = vmatpush1.bf16.msra.mxu0 %v3185_v10 }
 0x14b   : > { %4800 = vrot.lane.b32.xlu1 %v11232_v41, %s10604_s20  ;;  %3224 = vmatprep.mubr.bf16.mxu0 %v12966_v0 }
 0x14c   : > { %v3268_v49 = vpop.permute.xlu0 %3267 }
 0x14d   : > { %v3264_v17 = vpop.permute.xlu1 %3263  ;;  %v3270_v13 = vsel %vm497_vm1, %v3266_v11, %v3268_v49 }
 0x14e   : > { %v3269_v16 = vsel %vm497_vm1, %v3264_v17, %v3266_v11  ;;  %4796 = vrot.lane.b32.xlu0 %v11242_v47, %s10604_s20  ;;  %3290 = vmatprep.subr.bf16.mxu1 %v3270_v13  ;;  %v10491_v13 = vld [vmem:[%s12961_s4 + $0x18] sm:$0xff]  }
 0x14f   : > { %4865 = vrot.lane.b32.xlu1 %v11247_v48, %s10604_s20  ;;  %9774 = vmatmul.mubr.msk.bf16.vlgmr.msra.gmra.mxu1 %vm358_vm0, %v10479_v43 }
 0x150   : > { %3291 = vmatpush1.bf16.msra.mxu1 %v3269_v16  ;;  %v3333_v22 = vpop.permute.xlu0 %3332  ;;  %3308 = vmatprep.mubr.bf16.mxu1 %v12966_v0  ;;  %v539_v23 = vpop.f32.mrf.mxu0 }
 0x151   : > { %v3335_v24 = vpop.permute.xlu1 %3334  ;;  %9781 = vmatmul.mubr.msk.bf16.vlgmr.msra.gmra.mxu0 %vm358_vm0, %v10480_v14  ;;  %v548_v25 = vadd.f32 %v539_v23, %v11171_v20 }
 0x152   : > { %4867 = vrot.lane.b32.xlu0 %v11255_v55, %s10604_s20  ;;  %v3337_v26 = vsel %vm651_vm2, %v3333_v22, %v3335_v24  ;;  %3375 = vmatprep.mubr.bf16.mxu0 %v12966_v0  ;;  %v541_v27 = vpop.f32.mrf.mxu0  ;;  %v624_v28 = vpop.f32.mrf.mxu1 }
 0x153   : > { %4863 = vrot.lane.b32.xlu1 %v11263_v58, %s10604_s20  ;;  %3357 = vmatprep.subr.bf16.mxu0 %v3337_v26  ;;  %v549_v30 = vadd.f32 %v541_v27, %v11179_v12  ;;  %v633_v20 = vadd.f32 %v624_v28, %v548_v25  ;;  %v11403_v27 = vld [vmem:[%s10676_s10 + $0x20] ss:$44 sps:$4 sm:$0xff]  }
 0x154   : > { %v3331_v31 = vpop.permute.xlu0 %3330  ;;  %v543_v32 = vpop.f32.mrf.mxu0 }
 0x155   : > { %v3336_v33 = vsel %vm651_vm2, %v3331_v31, %v3333_v22  ;;  %v3400_v34 = vpop.permute.xlu1 %3399  ;;  %v550_v36 = vadd.f32 %v543_v32, %v11183_v19  ;;  %v626_v37 = vpop.f32.mrf.mxu1 }
 0x156   : > { %4932 = vrot.lane.b32.xlu0 %v11226_v40, %s10605_s21  ;;  %3358 = vmatpush1.bf16.msra.mxu0 %v3336_v33  ;;  %v634_v38 = vadd.f32 %v626_v37, %v549_v30  ;;  %v11350_v39 = vpop.f32.mrf.mxu0  ;;  %v11409_v30 = vld [vmem:[%s10676_s10 + $0x24] ss:$44 sps:$4 sm:$0xff]   ;;  %v11421_v37 = vld [vmem:[%s10676_s10 + $0x1c] ss:$44 sps:$4 sm:$0xff]  }
 0x157   : > { %4934 = vrot.lane.b32.xlu1 %v11232_v41, %s10605_s21  ;;  %9788 = vmatmul.mubr.msk.bf16.vlgmr.msra.gmra.mxu1 %vm358_vm0, %v10481_v29  ;;  %v628_v12 = vpop.f32.mrf.mxu1 }
 0x158   : > { %v3402_v42 = vpop.permute.xlu0 %3401  ;;  %3442 = vmatprep.mubr.bf16.mxu1 %v12966_v0  ;;  %v635_v45 = vadd.f32 %v628_v12, %v550_v36  ;;  %v11426_v12 = vld [vmem:[%s10682_s13 + $0x20] ss:$44 sps:$4 sm:$0xff]  }
 0x159   : > { %v3398_v46 = vpop.permute.xlu1 %3397  ;;  %v3404_v19 = vsel %vm651_vm2, %v3400_v34, %v3402_v42  ;;  %9792 = vmatmul.mubr.msk.bf16.vlgmr.msra.gmra.mxu0 %vm358_vm0, %v10482_v35  ;;  %v693_v44 = vpop.f32.mrf.mxu0 }
 0x15a   : > { %v3403_v51 = vsel %vm651_vm2, %v3398_v46, %v3400_v34  ;;  %4930 = vrot.lane.b32.xlu0 %v11242_v47, %s10605_s21  ;;  %3424 = vmatprep.subr.bf16.mxu1 %v3404_v19  ;;  %v702_v52 = vadd.f32 %v693_v44, %v633_v20  ;;  %v11361_v53 = vpop.f32.mrf.mxu1  ;;  %v10494_v34 = vld [vmem:[%s12960_s3 + $0x20] sm:$0xff]  }
 0x15b   : > { %4999 = vrot.lane.b32.xlu1 %v11247_v48, %s10605_s21  ;;  %3425 = vmatpush1.bf16.msra.mxu1 %v3403_v51  ;;  %v695_v54 = vpop.f32.mrf.mxu0 }
 0x15c   : > { %v3467_v56 = vpop.permute.xlu0 %3466  ;;  %3509 = vmatprep.mubr.bf16.mxu0 %v12966_v0  ;;  %v703_v60 = vadd.f32 %v695_v54, %v634_v38  ;;  %v10495_v54 = vld [vmem:[%s12961_s4 + $0x20] sm:$0xff]  }
 0x15d   : > { %v3469_v61 = vpop.permute.xlu1 %3468  ;;  %v697_v62 = vpop.f32.mrf.mxu0 }
 0x15e   : > { %5001 = vrot.lane.b32.xlu0 %v11255_v55, %s10605_s21  ;;  %v3471_v63 = vsel %vm788_vm3, %v3467_v56, %v3469_v61  ;;  %v761_v1 = vpop.f32.mrf.mxu1  ;;  %v704_v2 = vadd.f32 %v697_v62, %v635_v45 }
 0x15f   : > { %4997 = vrot.lane.b32.xlu1 %v11263_v58, %s10605_s21  ;;  %3491 = vmatprep.subr.bf16.mxu0 %v3471_v63  ;;  %v770_v3 = vadd.f32 %v761_v1, %v702_v52  ;;  %v11380_v8 = vpop.f32.mrf.mxu0  ;;  %v11434_v52 = vld [vmem:[%s10682_s13 + $0x24] ss:$44 sps:$4 sm:$0xff]  }
 0x160   : > { %v3465_v4 = vpop.permute.xlu0 %3464  ;;  %9796 = vmatmul.mubr.msk.bf16.vlgmr.msra.gmra.mxu1 %vm358_vm0, %v10483_v59  ;;  %v763_v5 = vpop.f32.mrf.mxu1 }
 0x161   : > { %v3470_v6 = vsel %vm788_vm3, %v3465_v4, %v3467_v56  ;;  %v3534_v18 = vpop.permute.xlu1 %3533  ;;  %3576 = vmatprep.mubr.bf16.mxu1 %v12966_v0  ;;  %v771_v7 = vadd.f32 %v763_v5, %v703_v60  ;;  %v11444_v60 = vld [vmem:[%s10682_s13 + $0x1c] ss:$44 sps:$4 sm:$0xff]  }
 0x162   : > { %5066 = vrot.lane.b32.xlu0 %v11226_v40, %s10606_s22  ;;  %3492 = vmatpush1.bf16.msra.mxu0 %v3470_v6  ;;  %v765_v9 = vpop.f32.mrf.mxu1 }
 0x163   : > { %5068 = vrot.lane.b32.xlu1 %v11232_v41, %s10606_s22  ;;  %v772_v57 = vadd.f32 %v765_v9, %v704_v2 }
 0x164   : > { %v3536_v10 = vpop.permute.xlu0 %3535  ;;  %v11394_v14 = vpop.f32.mrf.mxu1 }
 0x165   : > { %v3532_v11 = vpop.permute.xlu1 %3531  ;;  %v3538_v43 = vsel %vm788_vm3, %v3534_v18, %v3536_v10  ;;  %9800 = vmatmul.mubr.msk.bf16.vlgmr.msra.gmra.mxu0 %vm358_vm0, %v10487_v50  ;;  %v830_v49 = vpop.f32.mrf.mxu0 }
 0x166   : > { %v3537_v17 = vsel %vm788_vm3, %v3532_v11, %v3534_v18  ;;  %5064 = vrot.lane.b32.xlu0 %v11242_v47, %s10606_s22  ;;  %3558 = vmatprep.subr.bf16.mxu1 %v3538_v43  ;;  %v839_v41 = vadd.f32 %v830_v49, %v770_v3 }
 0x167   : > { %5133 = vrot.lane.b32.xlu1 %v11247_v48, %s10606_s22  ;;  %3559 = vmatpush1.bf16.msra.mxu1 %v3537_v17  ;;  %v832_v16 = vpop.f32.mrf.mxu0 }
 0x168   : > { %v3601_v22 = vpop.permute.xlu0 %3600  ;;  %3643 = vmatprep.mubr.bf16.mxu0 %v12966_v0  ;;  %v840_v23 = vadd.f32 %v832_v16, %v771_v7 }
 0x169   : > { %v3603_v24 = vpop.permute.xlu1 %3602  ;;  %v834_v25 = vpop.f32.mrf.mxu0 }
 0x16a   : > { %5135 = vrot.lane.b32.xlu0 %v11255_v55, %s10606_s22  ;;  %v3605_v26 = vsel %vm925_vm4, %v3601_v22, %v3603_v24  ;;  %9804 = vmatmul.mubr.msk.bf16.vlgmr.msra.gmra.mxu1 %vm358_vm0, %v10491_v13  ;;  %v898_v28 = vpop.f32.mrf.mxu1  ;;  %v841_v29 = vadd.f32 %v834_v25, %v772_v57  ;;  %v10496_v57 = vld [vmem:[%s12960_s3 + $0x28] sm:$0xff]  }
 0x16b   : > { %5131 = vrot.lane.b32.xlu1 %v11263_v58, %s10606_s22  ;;  %3625 = vmatprep.subr.bf16.mxu0 %v3605_v26  ;;  %v907_v20 = vadd.f32 %v898_v28, %v839_v41  ;;  %v11416_v36 = vpop.f32.mrf.mxu0 }
 0x16c   : > { %v3599_v31 = vpop.permute.xlu0 %3598  ;;  %3710 = vmatprep.mubr.bf16.mxu1 %v12966_v0  ;;  %v900_v55 = vpop.f32.mrf.mxu1 }
 0x16d   : > { %v3604_v32 = vsel %vm925_vm4, %v3599_v31, %v3601_v22  ;;  %v3668_v33 = vpop.permute.xlu1 %3667  ;;  %v908_v35 = vadd.f32 %v900_v55, %v840_v23  ;;  %v10497_v23 = vld [vmem:[%s12961_s4 + $0x28] sm:$0xff]  }
 0x16e   : > { %5217 = vrot.lane.b32.xlu0 %v11403_v27, %s10607_s23  ;;  %3626 = vmatpush1.bf16.msra.mxu0 %v3604_v32  ;;  %v902_v38 = vpop.f32.mrf.mxu1 }
 0x16f   : > { %5219 = vrot.lane.b32.xlu1 %v11409_v30, %s10607_s23  ;;  %v909_v42 = vadd.f32 %v902_v38, %v841_v29 }
 0x170   : > { %v3670_v45 = vpop.permute.xlu0 %3669  ;;  %v11439_v59 = vpop.f32.mrf.mxu1 }
 0x171   : > { %v3666_v46 = vpop.permute.xlu1 %3665  ;;  %v3672_v19 = vsel %vm925_vm4, %v3668_v33, %v3670_v45  ;;  %9808 = vmatmul.mubr.msk.bf16.vlgmr.msra.gmra.mxu0 %vm358_vm0, %v10494_v34  ;;  %v967_v44 = vpop.f32.mrf.mxu0 }
 0x172   : > { %v3671_v51 = vsel %vm925_vm4, %v3666_v46, %v3668_v33  ;;  %5215 = vrot.lane.b32.xlu0 %v11421_v37, %s10607_s23  ;;  %3692 = vmatprep.subr.bf16.mxu1 %v3672_v19  ;;  %v976_v56 = vadd.f32 %v967_v44, %v907_v20  ;;  %v10501_v46 = vld [vmem:[%s12960_s3 + $0x30] sm:$0xff]  }
 0x173   : > { %5301 = vrot.lane.b32.xlu1 %v11426_v12, %s10607_s23  ;;  %3693 = vmatpush1.bf16.msra.mxu1 %v3671_v51  ;;  %v969_v61 = vpop.f32.mrf.mxu0 }
 0x174   : > { %v3735_v62 = vpop.permute.xlu0 %3734  ;;  %3777 = vmatprep.mubr.bf16.mxu0 %v12966_v0  ;;  %v977_v63 = vadd.f32 %v969_v61, %v908_v35 }
 0x175   : > { %v3737_v1 = vpop.permute.xlu1 %3736  ;;  %v971_v2 = vpop.f32.mrf.mxu0 }
 0x176   : > { %5303 = vrot.lane.b32.xlu0 %v11434_v52, %s10607_s23  ;;  %v3739_v3 = vsel %vm1062_vm5, %v3735_v62, %v3737_v1  ;;  %9812 = vmatmul.mubr.msk.bf16.vlgmr.msra.gmra.mxu1 %vm358_vm0, %v10495_v54  ;;  %v1035_v4 = vpop.f32.mrf.mxu1  ;;  %v978_v5 = vadd.f32 %v971_v2, %v909_v42 }
 0x177   : > { %5299 = vrot.lane.b32.xlu1 %v11444_v60, %s10607_s23  ;;  %3759 = vmatprep.subr.bf16.mxu0 %v3739_v3  ;;  %v1044_v6 = vadd.f32 %v1035_v4, %v976_v56  ;;  %v11458_v11 = vpop.f32.mrf.mxu0 }
 0x178   : > { %v3733_v18 = vpop.permute.xlu0 %3732  ;;  %3844 = vmatprep.mubr.bf16.mxu1 %v12966_v0  ;;  %v1037_v50 = vpop.f32.mrf.mxu1 }
 0x179   : > { %v3738_v7 = vsel %vm1062_vm5, %v3733_v18, %v3735_v62  ;;  %v3802_v9 = vpop.permute.xlu1 %3801  ;;  %v1045_v10 = vadd.f32 %v1037_v50, %v977_v63  ;;  %v11511_v50 = vld [vmem:[%s10676_s10 + $0x20] ss:$44 sps:$4 sm:$0xff]  }
 0x17a   : > { %5368 = vrot.lane.b32.xlu0 %v11403_v27, %s10608_s24  ;;  %3760 = vmatpush1.bf16.msra.mxu0 %v3738_v7  ;;  %v1039_v43 = vpop.f32.mrf.mxu1 }
 0x17b   : > { %5370 = vrot.lane.b32.xlu1 %v11409_v30, %s10608_s24  ;;  %v1046_v49 = vadd.f32 %v1039_v43, %v978_v5 }
 0x17c   : > { %v3804_v17 = vpop.permute.xlu0 %3803  ;;  %v11472_v25 = vpop.f32.mrf.mxu1 }
 0x17d   : > { %v3800_v13 = vpop.permute.xlu1 %3799  ;;  %v3806_v41 = vsel %vm1062_vm5, %v3802_v9, %v3804_v17  ;;  %9816 = vmatmul.mubr.msk.bf16.vlgmr.msra.gmra.mxu0 %vm358_vm0, %v10496_v57  ;;  %v1104_v16 = vpop.f32.mrf.mxu0  ;;  %v10506_v17 = vld [vmem:[%s12960_s3 + $0x38] sm:$0xff]  }
 0x17e   : > { %v3805_v22 = vsel %vm1062_vm5, %v3800_v13, %v3802_v9  ;;  %5366 = vrot.lane.b32.xlu0 %v11421_v37, %s10608_s24  ;;  %3826 = vmatprep.subr.bf16.mxu1 %v3806_v41  ;;  %v1113_v24 = vadd.f32 %v1104_v16, %v1044_v6  ;;  %v11517_v9 = vld [vmem:[%s10676_s10 + $0x24] ss:$44 sps:$4 sm:$0xff]  }
 0x17f   : > { %5435 = vrot.lane.b32.xlu1 %v11426_v12, %s10608_s24  ;;  %3827 = vmatpush1.bf16.msra.mxu1 %v3805_v22  ;;  %v1106_v26 = vpop.f32.mrf.mxu0  ;;  %v11534_v22 = vld [vmem:[%s10682_s13 + $0x24] ss:$44 sps:$4 sm:$0xff]  }
 0x180   : > { %v3886_v28 = vpop.permute.xlu0 %3885  ;;  %3928 = vmatprep.mubr.bf16.mxu0 %v12966_v0  ;;  %v1114_v29 = vadd.f32 %v1106_v26, %v1045_v10 }
 0x181   : > { %v3888_v20 = vpop.permute.xlu1 %3887  ;;  %v1108_v31 = vpop.f32.mrf.mxu0 }
 0x182   : > { %5437 = vrot.lane.b32.xlu0 %v11434_v52, %s10608_s24  ;;  %v3890_v55 = vsel %vm1216_vm6, %v3886_v28, %v3888_v20  ;;  %9820 = vmatmul.mubr.msk.bf16.vlgmr.msra.gmra.mxu1 %vm358_vm0, %v10497_v23  ;;  %v1172_v32 = vpop.f32.mrf.mxu1  ;;  %v1115_v33 = vadd.f32 %v1108_v31, %v1046_v49  ;;  %v10507_v31 = vld [vmem:[%s12961_s4 + $0x38] sm:$0xff]  }
 0x183   : > { %5433 = vrot.lane.b32.xlu1 %v11444_v60, %s10608_s24  ;;  %3910 = vmatprep.subr.bf16.mxu0 %v3890_v55  ;;  %v1181_v34 = vadd.f32 %v1172_v32, %v1113_v24  ;;  %v11488_v44 = vpop.f32.mrf.mxu0 }
 0x184   : > { %v3884_v35 = vpop.permute.xlu0 %3883  ;;  %4012 = vmatprep.mubr.bf16.mxu1 %v12966_v0  ;;  %v1174_v38 = vpop.f32.mrf.mxu1  ;;  %12971 = vst [vmem:[#allocation3_spill] sm:$0xff] %v11488_v44 }
 0x185   : > { %v3889_v42 = vsel %vm1216_vm6, %v3884_v35, %v3886_v28  ;;  %v3970_v45 = vpop.permute.xlu1 %3969  ;;  %v1182_v19 = vadd.f32 %v1174_v38, %v1114_v29 }
 0x186   : > { %5502 = vrot.lane.b32.xlu0 %v11403_v27, %s10609_s25  ;;  %3911 = vmatpush1.bf16.msra.mxu0 %v3889_v42  ;;  %v1176_v51 = vpop.f32.mrf.mxu1  ;;  %v10505_v27 = vld [vmem:[%s12961_s4 + $0x30] sm:$0xff]  }
 0x187   : > { %5504 = vrot.lane.b32.xlu1 %v11409_v30, %s10609_s25  ;;  %v1183_v54 = vadd.f32 %v1176_v51, %v1115_v33 }
 0x188   : > { %v3972_v56 = vpop.permute.xlu0 %3971  ;;  %v11502_v2 = vpop.f32.mrf.mxu1 }
 0x189   : > { %v3968_v61 = vpop.permute.xlu1 %3967  ;;  %v3974_v62 = vsel %vm1216_vm6, %v3970_v45, %v3972_v56  ;;  %9827 = vmatmul.mubr.msk.bf16.vlgmr.msra.gmra.mxu0 %vm358_vm0, %v10501_v46  ;;  %v1258_v63 = vpop.f32.mrf.mxu0  ;;  %12972 = vst [vmem:[#allocation4_spill] sm:$0xff] %v11502_v2 }
 0x18a   : > { %v3973_v1 = vsel %vm1216_vm6, %v3968_v61, %v3970_v45  ;;  %5500 = vrot.lane.b32.xlu0 %v11421_v37, %s10609_s25  ;;  %3994 = vmatprep.subr.bf16.mxu1 %v3974_v62  ;;  %v1267_v30 = vadd.f32 %v1258_v63, %v1181_v34  ;;  %v10508_v63 = vld [vmem:[%s12960_s3 + $0x40] sm:$0xff]  }
 0x18b   : > { %5569 = vrot.lane.b32.xlu1 %v11426_v12, %s10609_s25  ;;  %3995 = vmatpush1.bf16.msra.mxu1 %v3973_v1  ;;  %v1260_v3 = vpop.f32.mrf.mxu0 }
 0x18c   : > { %v4037_v4 = vpop.permute.xlu0 %4036  ;;  %4079 = vmatprep.mubr.bf16.mxu0 %v12966_v0  ;;  %v1268_v5 = vadd.f32 %v1260_v3, %v1182_v19 }
 0x18d   : > { %v4039_v6 = vpop.permute.xlu1 %4038  ;;  %v1262_v37 = vpop.f32.mrf.mxu0 }
 0x18e   : > { %5571 = vrot.lane.b32.xlu0 %v11434_v52, %s10609_s25  ;;  %v4041_v18 = vsel %vm1370_vm7, %v4037_v4, %v4039_v6  ;;  %9834 = vmatmul.mubr.msk.bf16.vlgmr.msra.gmra.mxu1 %vm358_vm0, %v10505_v27  ;;  %v1343_v7 = vpop.f32.mrf.mxu1  ;;  %v1269_v12 = vadd.f32 %v1262_v37, %v1183_v54 }
 0x18f   : > { %5567 = vrot.lane.b32.xlu1 %v11444_v60, %s10609_s25  ;;  %4061 = vmatprep.subr.bf16.mxu0 %v4041_v18  ;;  %v1352_v57 = vadd.f32 %v1343_v7, %v1267_v30  ;;  %v11524_v41 = vpop.f32.mrf.mxu0  ;;  %v11529_v60 = vld [vmem:[%s10682_s13 + $0x20] ss:$44 sps:$4 sm:$0xff]  }
 0x190   : > { %v4035_v10 = vpop.permute.xlu0 %4034  ;;  %4146 = vmatprep.mubr.bf16.mxu1 %v12966_v0  ;;  %v1345_v52 = vpop.f32.mrf.mxu1  ;;  %12973 = vst [vmem:[#allocation5_spill] sm:$0xff] %v11524_v41  ;;  %v10509_v7 = vld [vmem:[%s12961_s4 + $0x40] sm:$0xff]  }
 0x191   : > { %v4040_v43 = vsel %vm1370_vm7, %v4035_v10, %v4037_v4  ;;  %v4104_v49 = vpop.permute.xlu1 %4103  ;;  %v1353_v13 = vadd.f32 %v1345_v52, %v1268_v5 }
 0x192   : > { %5824 = vrot.lane.b32.xlu0 %v11511_v50, %s10602_s16  ;;  %4062 = vmatpush1.bf16.msra.mxu0 %v4040_v43  ;;  %v1347_v16 = vpop.f32.mrf.mxu1 }
 0x193   : > { %5826 = vrot.lane.b32.xlu1 %v11517_v9, %s10602_s16  ;;  %v1354_v23 = vadd.f32 %v1347_v16, %v1269_v12 }
 0x194   : > { %v4106_v24 = vpop.permute.xlu0 %4105  ;;  %v11544_v32 = vpop.f32.mrf.mxu1 }
 0x195   : > { %v4102_v26 = vpop.permute.xlu1 %4101  ;;  %v4108_v28 = vsel %vm1370_vm7, %v4104_v49, %v4106_v24  ;;  %9838 = vmatmul.mubr.msk.bf16.vlgmr.msra.gmra.mxu0 %vm358_vm0, %v10506_v17  ;;  %v1412_v29 = vpop.f32.mrf.mxu0  ;;  %12974 = vst [vmem:[#allocation6_spill] sm:$0xff] %v11544_v32 }
 0x196   : > { %v4107_v20 = vsel %vm1370_vm7, %v4102_v26, %v4104_v49  ;;  %5893 = vrot.lane.b32.xlu0 %v11529_v60, %s10602_s16  ;;  %4128 = vmatprep.subr.bf16.mxu1 %v4108_v28  ;;  %v1421_v55 = vadd.f32 %v1412_v29, %v1352_v57  ;;  %v10510_v49 = vld [vmem:[%s12961_s4] sm:$0xff]  }
 0x197   : > { %5895 = vrot.lane.b32.xlu1 %v11534_v22, %s10602_s16  ;;  %4129 = vmatpush1.bf16.msra.mxu1 %v4107_v20  ;;  %v1414_v33 = vpop.f32.mrf.mxu0 }
 0x198   : > { %v4171_v34 = vpop.permute.xlu0 %4170  ;;  %4213 = vmatprep.mubr.bf16.mxu0 %v12966_v0  ;;  %v1422_v35 = vadd.f32 %v1414_v33, %v1353_v13 }
 0x199   : > { %v4173_v38 = vpop.permute.xlu1 %4172  ;;  %v1416_v42 = vpop.f32.mrf.mxu0 }
 0x19a   : > { %5952 = vrot.lane.b32.xlu0 %v11511_v50, %s10603_s19  ;;  %v4175_v45 = vsel %vm1507_vm8, %v4171_v34, %v4173_v38  ;;  %9842 = vmatmul.mubr.msk.bf16.vlgmr.msra.gmra.mxu1 %vm358_vm0, %v10507_v31  ;;  %v1480_v46 = vpop.f32.mrf.mxu1  ;;  %v1423_v19 = vadd.f32 %v1416_v42, %v1354_v23 }
 0x19b   : > { %5954 = vrot.lane.b32.xlu1 %v11517_v9, %s10603_s19  ;;  %4195 = vmatprep.subr.bf16.mxu0 %v4175_v45  ;;  %v1489_v51 = vadd.f32 %v1480_v46, %v1421_v55  ;;  %v11560_v27 = vpop.f32.mrf.mxu0  ;;  %v10512_v46 = vld [vmem:[%s12960_s3 + $0x8] sm:$0xff]  }
 0x19c   : > { %v4169_v54 = vpop.permute.xlu0 %4168  ;;  %4280 = vmatprep.mubr.bf16.mxu1 %v12966_v0  ;;  %v1482_v56 = vpop.f32.mrf.mxu1  ;;  %12975 = vst [vmem:[#allocation7_spill] sm:$0xff] %v11560_v27 }
 0x19d   : > { %v4174_v61 = vsel %vm1507_vm8, %v4169_v54, %v4171_v34  ;;  %v4238_v62 = vpop.permute.xlu1 %4237  ;;  %v1490_v1 = vadd.f32 %v1482_v56, %v1422_v35 }
 0x19e   : > { %6011 = vrot.lane.b32.xlu0 %v11529_v60, %s10603_s19  ;;  %4196 = vmatpush1.bf16.msra.mxu0 %v4174_v61  ;;  %v1484_v30 = vpop.f32.mrf.mxu1 }
 0x19f   : > { %6013 = vrot.lane.b32.xlu1 %v11534_v22, %s10603_s19  ;;  %4397 = vmatprep.subr.bf16.mxu0 %v11247_v48  ;;  %v1491_v3 = vadd.f32 %v1484_v30, %v1423_v19 }
 0x1a0   : > { %v4240_v4 = vpop.permute.xlu0 %4239  ;;  %v11575_v48 = vpop.f32.mrf.mxu1 }
 0x1a1   : > { %v4236_v5 = vpop.permute.xlu1 %4235  ;;  %9846 = vmatmul.mubr.msk.bf16.vlgmr.msra.gmra.mxu0 %vm358_vm0, %v10508_v63  ;;  %v4242_v6 = vsel %vm1507_vm8, %v4238_v62, %v4240_v4  ;;  %v1549_v37 = vpop.f32.mrf.mxu0  ;;  %12976 = vst [vmem:[#allocation8_spill] sm:$0xff] %v11575_v48 }
 0x1a2   : > { %v4241_v18 = vsel %vm1507_vm8, %v4236_v5, %v4238_v62  ;;  %6070 = vrot.lane.b32.xlu0 %v11511_v50, %s10604_s20  ;;  %4262 = vmatprep.subr.bf16.mxu1 %v4242_v6  ;;  %v1558_v12 = vadd.f32 %v1549_v37, %v1489_v51 }
 0x1a3   : > { %6072 = vrot.lane.b32.xlu1 %v11517_v9, %s10604_s20  ;;  %4263 = vmatpush1.bf16.msra.mxu1 %v4241_v18  ;;  %v1551_v57 = vpop.f32.mrf.mxu0  ;;  %v10520_v18 = vld [vmem:[%s12960_s3 + $0x10] sm:$0xff]  }
 0x1a4   : > { %v4514_v10 = vpop.permute.xlu0 %4513  ;;  %4398 = vmatpush1.bf16.msra.mxu0 %v11263_v58  ;;  %4415 = vmatprep.mubr.bf16.mxu0 %v12966_v0  ;;  %v1559_v52 = vadd.f32 %v1551_v57, %v1490_v1  ;;  %v11666_v57 = vld [vmem:[%s10676_s10 + $0x28] ss:$44 sps:$4 sm:$0xff]  }
 0x1a5   : > { %v4516_v43 = vpop.permute.xlu1 %4515  ;;  %4458 = vmatprep.subr.bf16.mxu1 %v11226_v40  ;;  %v1553_v17 = vpop.f32.mrf.mxu0 }
 0x1a6   : > { %6129 = vrot.lane.b32.xlu0 %v11529_v60, %s10604_s20  ;;  %9850 = vmatmul.mubr.msk.bf16.vlgmr.msra.gmra.mxu1 %vm358_vm0, %v10509_v7  ;;  %v4518_v13 = vsel %vm497_vm1, %v4514_v10, %v4516_v43  ;;  %v1617_v16 = vpop.f32.mrf.mxu1  ;;  %v1560_v58 = vadd.f32 %v1553_v17, %v1491_v3  ;;  %v10516_v3 = vld [vmem:[%s12961_s4 + $0x8] sm:$0xff]  }
 0x1a7   : > { %6131 = vrot.lane.b32.xlu1 %v11534_v22, %s10604_s20  ;;  %4538 = vmatprep.subr.bf16.mxu0 %v4518_v13  ;;  %v11591_v23 = vadd.f32 %v1617_v16, %v1558_v12  ;;  %v11593_v24 = vpop.f32.mrf.mxu0  ;;  %v10517_v13 = vld [vmem:[%s10682_s13 + $0x24] ss:$44 sps:$4 sm:$0xff]  }
 0x1a8   : > { %12978 = vst [vmem:[#allocation10_spill] sm:$0xff] %v11593_v24  ;;  %v4512_v26 = vpop.permute.xlu0 %4511  ;;  %4459 = vmatpush1.bf16.msra.mxu1 %v11242_v47  ;;  %4476 = vmatprep.mubr.bf16.mxu1 %v12966_v0  ;;  %v1619_v40 = vpop.f32.mrf.mxu1  ;;  %v10511_v47 = vld [vmem:[%s12960_s3] sm:$0xff]   ;;  %v10526_v24 = vld [vmem:[%s12960_s3 + $0x28] sm:$0xff]  }
 0x1a9   : > { %12977 = vst [vmem:[#allocation9_spill] sm:$0xff] %v11591_v23  ;;  %v4517_v28 = vsel %vm497_vm1, %v4512_v26, %v4514_v10  ;;  %v4598_v29 = vpop.permute.xlu1 %4597  ;;  %9856 = vmatmul.mubr.msk.bf16.vlgmr.msra.gmra.mxu0 %vm358_vm0, %v10510_v49  ;;  %v11599_v20 = vadd.f32 %v1619_v40, %v1559_v52  ;;  %v11601_v31 = vpop.f32.mrf.mxu0 }
 0x1aa   : > { %6188 = vrot.lane.b32.xlu0 %v11511_v50, %s10605_s21  ;;  %4539 = vmatpush1.bf16.msra.mxu0 %v4517_v28  ;;  %v1621_v55 = vpop.f32.mrf.mxu1  ;;  %v10521_v28 = vld [vmem:[%s12961_s4 + $0x10] sm:$0xff]  }
 0x1ab   : > { %12979 = vst [vmem:[#allocation11_spill] sm:$0xff] %v11599_v20  ;;  %6190 = vrot.lane.b32.xlu1 %v11517_v9, %s10605_s21  ;;  %4556 = vmatprep.mubr.bf16.mxu0 %v12966_v0  ;;  %v11611_v33 = vadd.f32 %v1621_v55, %v1560_v58  ;;  %v11613_v34 = vpop.f32.mrf.mxu0  ;;  %v10519_v58 = vld [vmem:[%s10682_s13 + $0x28] ss:$44 sps:$4 sm:$0xff]  }
 0x1ac   : > { %v4600_v35 = vpop.permute.xlu0 %4599  ;;  %v11615_v38 = vpop.f32.mrf.mxu1 }
 0x1ad   : > { %12980 = vst [vmem:[#allocation12_spill] sm:$0xff] %v11611_v33  ;;  %12981 = vst [vmem:[#allocation13_spill] sm:$0xff] %v11615_v38  ;;  %v4596_v42 = vpop.permute.xlu1 %4595  ;;  %v4602_v45 = vsel %vm497_vm1, %v4598_v29, %v4600_v35  ;;  %v11621_v19 = vpop.f32.mrf.mxu0 }
 0x1ae   : > { %v4601_v51 = vsel %vm497_vm1, %v4596_v42, %v4598_v29  ;;  %6247 = vrot.lane.b32.xlu0 %v11529_v60, %s10605_s21  ;;  %4622 = vmatprep.subr.bf16.mxu1 %v4602_v45 }
 0x1af   : > { %6249 = vrot.lane.b32.xlu1 %v11534_v22, %s10605_s21  ;;  %9860 = vmatmul.mubr.msk.bf16.vlgmr.msra.gmra.mxu1 %vm358_vm0, %v10511_v47  ;;  %v11629_v54 = vpop.f32.mrf.mxu1  ;;  %v11631_v56 = vpop.f32.mrf.mxu0 }
 0x1b0   : > { %4623 = vmatpush1.bf16.msra.mxu1 %v4601_v51  ;;  %v4665_v61 = vpop.permute.xlu0 %4664  ;;  %4640 = vmatprep.mubr.bf16.mxu1 %v12966_v0 }
 0x1b1   : > { %v4667_v62 = vpop.permute.xlu1 %4666  ;;  %9867 = vmatmul.mubr.msk.bf16.vlgmr.msra.gmra.mxu0 %vm358_vm0, %v10512_v46  ;;  %v11635_v63 = vpop.f32.mrf.mxu1 }
 0x1b2   : > { %6306 = vrot.lane.b32.xlu0 %v11511_v50, %s10606_s22  ;;  %v4669_v1 = vsel %vm651_vm2, %v4665_v61, %v4667_v62  ;;  %4707 = vmatprep.mubr.bf16.mxu0 %v12966_v0  ;;  %v11641_v30 = vpop.f32.mrf.mxu0  ;;  %v10522_v62 = vld [vmem:[%s12960_s3 + $0x18] sm:$0xff]  }
 0x1b3   : > { %6308 = vrot.lane.b32.xlu1 %v11517_v9, %s10606_s22  ;;  %4689 = vmatprep.subr.bf16.mxu0 %v4669_v1  ;;  %v11648_v4 = vpop.f32.mrf.mxu1  ;;  %v10513_v9 = vld [vmem:[%s10676_s10 + $0x24] ss:$44 sps:$4 sm:$0xff]  }
 0x1b4   : > { %v4663_v5 = vpop.permute.xlu0 %4662  ;;  %v11650_v50 = vpop.f32.mrf.mxu0 }
 0x1b5   : > { %v4668_v6 = vsel %vm651_vm2, %v4663_v5, %v4665_v61  ;;  %v4732_v37 = vpop.permute.xlu1 %4731  ;;  %v11656_v7 = vpop.f32.mrf.mxu1 }
 0x1b6   : > { %6365 = vrot.lane.b32.xlu0 %v11529_v60, %s10606_s22  ;;  %4690 = vmatpush1.bf16.msra.mxu0 %v4668_v6  ;;  %v11661_v12 = vpop.f32.mrf.mxu0 }
 0x1b7   : > { %6367 = vrot.lane.b32.xlu1 %v11534_v22, %s10606_s22  ;;  %9874 = vmatmul.mubr.msk.bf16.vlgmr.msra.gmra.mxu1 %vm358_vm0, %v10516_v3  ;;  %v11669_v10 = vpop.f32.mrf.mxu1 }
 0x1b8   : > { %v4734_v52 = vpop.permute.xlu0 %4733  ;;  %4774 = vmatprep.mubr.bf16.mxu1 %v12966_v0  ;;  %v11672_v43 = vpop.f32.mrf.mxu0 }
 0x1b9   : > { %v4730_v60 = vpop.permute.xlu1 %4729  ;;  %v4736_v49 = vsel %vm651_vm2, %v4732_v37, %v4734_v52  ;;  %9878 = vmatmul.mubr.msk.bf16.vlgmr.msra.gmra.mxu0 %vm358_vm0, %v10520_v18  ;;  %v11676_v17 = vpop.f32.mrf.mxu1 }
 0x1ba   : > { %v4735_v22 = vsel %vm651_vm2, %v4730_v60, %v4732_v37  ;;  %6434 = vrot.lane.b32.xlu0 %v10513_v9, %s10607_s23  ;;  %4756 = vmatprep.subr.bf16.mxu1 %v4736_v49  ;;  %v11681_v16 = vpop.f32.mrf.mxu0  ;;  %v10523_v49 = vld [vmem:[%s12961_s4 + $0x18] sm:$0xff]  }
 0x1bb   : > { %6436 = vrot.lane.b32.xlu1 %v11666_v57, %s10607_s23  ;;  %4757 = vmatpush1.bf16.msra.mxu1 %v4735_v22  ;;  %v11686_v26 = vpop.f32.mrf.mxu1 }
 0x1bc   : > { %v4799_v40 = vpop.permute.xlu0 %4798  ;;  %4841 = vmatprep.mubr.bf16.mxu0 %v12966_v0  ;;  %v11692_v29 = vpop.f32.mrf.mxu0 }
 0x1bd   : > { %v4801_v55 = vpop.permute.xlu1 %4800  ;;  %v11694_v47 = vpop.f32.mrf.mxu1 }
 0x1be   : > { %6503 = vrot.lane.b32.xlu0 %v10517_v13, %s10607_s23  ;;  %v4803_v35 = vsel %vm788_vm3, %v4799_v40, %v4801_v55  ;;  %v11698_v42 = vpop.f32.mrf.mxu0 }
 0x1bf   : > { %6505 = vrot.lane.b32.xlu1 %v10519_v58, %s10607_s23  ;;  %4823 = vmatprep.subr.bf16.mxu0 %v4803_v35 }
 0x1c0   : > { %v4797_v45 = vpop.permute.xlu0 %4796  ;;  %9882 = vmatmul.mubr.msk.bf16.vlgmr.msra.gmra.mxu1 %vm358_vm0, %v10521_v28  ;;  %v11702_v46 = vpop.f32.mrf.mxu1 }
 0x1c1   : > { %v4802_v51 = vsel %vm788_vm3, %v4797_v45, %v4799_v40  ;;  %v4866_v61 = vpop.permute.xlu1 %4865  ;;  %4908 = vmatprep.mubr.bf16.mxu1 %v12966_v0  ;;  %v11709_v1 = vpop.f32.mrf.mxu0 }
 0x1c2   : > { %6562 = vrot.lane.b32.xlu0 %v10513_v9, %s10608_s24  ;;  %4824 = vmatpush1.bf16.msra.mxu0 %v4802_v51  ;;  %v11712_v3 = vpop.f32.mrf.mxu1 }
 0x1c3   : > { %6564 = vrot.lane.b32.xlu1 %v11666_v57, %s10608_s24 }
 0x1c4   : > { %v4868_v5 = vpop.permute.xlu0 %4867  ;;  %v11716_v6 = vpop.f32.mrf.mxu1 }
 0x1c5   : > { %v4864_v37 = vpop.permute.xlu1 %4863  ;;  %v4870_v18 = vsel %vm788_vm3, %v4866_v61, %v4868_v5  ;;  %9886 = vmatmul.mubr.msk.bf16.vlgmr.msra.gmra.mxu0 %vm358_vm0, %v10522_v62  ;;  %v11720_v52 = vpop.f32.mrf.mxu0 }
 0x1c6   : > { %v4869_v60 = vsel %vm788_vm3, %v4864_v37, %v4866_v61  ;;  %6621 = vrot.lane.b32.xlu0 %v10517_v13, %s10608_s24  ;;  %4890 = vmatprep.subr.bf16.mxu1 %v4870_v18  ;;  %v11727_v22 = vpop.f32.mrf.mxu1 }
 0x1c7   : > { %6623 = vrot.lane.b32.xlu1 %v10519_v58, %s10608_s24  ;;  %4891 = vmatpush1.bf16.msra.mxu1 %v4869_v60  ;;  %v11730_v40 = vpop.f32.mrf.mxu0 }
 0x1c8   : > { %v4933_v28 = vpop.permute.xlu0 %4932  ;;  %4975 = vmatprep.mubr.bf16.mxu0 %v12966_v0 }
 0x1c9   : > { %v4935_v55 = vpop.permute.xlu1 %4934  ;;  %v11733_v35 = vpop.f32.mrf.mxu0 }
 0x1ca   : > { %6680 = vrot.lane.b32.xlu0 %v10513_v9, %s10609_s25  ;;  %v4937_v45 = vsel %vm925_vm4, %v4933_v28, %v4935_v55  ;;  %9890 = vmatmul.mubr.msk.bf16.vlgmr.msra.gmra.mxu1 %vm358_vm0, %v10523_v49  ;;  %v11738_v51 = vpop.f32.mrf.mxu1  ;;  %v10524_v9 = vld [vmem:[%s12960_s3 + $0x20] sm:$0xff]  }
 0x1cb   : > { %6682 = vrot.lane.b32.xlu1 %v11666_v57, %s10609_s25  ;;  %4957 = vmatprep.subr.bf16.mxu0 %v4937_v45  ;;  %v11749_v18 = vpop.f32.mrf.mxu0  ;;  %v1630_v57 = vld [vmem:[%s12962_s5] sm:$0xff] }
 0x1cc   : > { %v4931_v61 = vpop.permute.xlu0 %4930  ;;  %5042 = vmatprep.mubr.bf16.mxu1 %v12966_v0  ;;  %v11743_v62 = vpop.f32.mrf.mxu1 }
 0x1cd   : > { %v4936_v5 = vsel %vm925_vm4, %v4931_v61, %v4933_v28  ;;  %v5000_v37 = vpop.permute.xlu1 %4999  ;;  %v1631_v28 = vld [vmem:[%s12962_s5 + $0x8] sm:$0xff] }
 0x1ce   : > { %6739 = vrot.lane.b32.xlu0 %v10517_v13, %s10609_s25  ;;  %4958 = vmatpush1.bf16.msra.mxu0 %v4936_v5  ;;  %v11752_v60 = vpop.f32.mrf.mxu1 }
 0x1cf   : > { %6741 = vrot.lane.b32.xlu1 %v10519_v58, %s10609_s25  ;;  %v10525_v58 = vld [vmem:[%s12961_s4 + $0x20] sm:$0xff]  }
 0x1d0   : > { %v5002_v49 = vpop.permute.xlu0 %5001  ;;  %v11769_v5 = vpop.f32.mrf.mxu1 }
 0x1d1   : > { %v4998_v55 = vpop.permute.xlu1 %4997  ;;  %v5004_v45 = vsel %vm925_vm4, %v5000_v37, %v5002_v49  ;;  %9894 = vmatmul.mubr.msk.bf16.vlgmr.msra.gmra.mxu0 %vm358_vm0, %v10524_v9  ;;  %v11763_v13 = vpop.f32.mrf.mxu0  ;;  %v12982_v49 = vmov 0  }
 0x1d2   : > { %v5003_v61 = vsel %vm925_vm4, %v4998_v55, %v5000_v37  ;;  %1634 = vperm.xlu0 %10384, %v1630_v57   ;;  %5024 = vmatprep.subr.bf16.mxu1 %v5004_v45 }
 0x1d3   : > { %1639 = vperm.xlu1 %10385, %v1631_v28   ;;  %5025 = vmatpush1.bf16.msra.mxu1 %v5003_v61  ;;  %v11771_v0 = vpop.f32.mrf.mxu0 }
 0x1d4   : > { %v5067_v33 = vpop.permute.xlu0 %5066  ;;  %5109 = vmatprep.mubr.bf16.mxu0 %v12982_v49 }
 0x1d5   : > { %v5069_v9 = vpop.permute.xlu1 %5068  ;;  %v11774_v20 = vpop.f32.mrf.mxu0 }
 0x1d6   : > { %2972 = vperm.xlu0 %10384, %v1631_v28   ;;  %v5071_v37 = vsel %vm1062_vm5, %v5067_v33, %v5069_v9  ;;  %9898 = vmatmul.mubr.msk.bf16.vlgmr.msra.gmra.mxu1 %vm358_vm0, %v10525_v58  ;;  %v11778_v55 = vpop.f32.mrf.mxu1 }
 0x1d7   : > { %2967 = vperm.xlu1 %10385, %v1630_v57   ;;  %5091 = vmatprep.subr.bf16.mxu0 %v5071_v37  ;;  %v11787_v48 = vpop.f32.mrf.mxu0 }
 0x1d8   : > { %v5065_v45 = vpop.permute.xlu0 %5064  ;;  %5176 = vmatprep.mubr.bf16.mxu1 %v12982_v49  ;;  %v11781_v61 = vpop.f32.mrf.mxu1 }
 0x1d9   : > { %12983 = vst [vmem:[#allocation14_spill] sm:$0xff] %v11781_v61  ;;  %v5070_v23 = vsel %vm1062_vm5, %v5065_v45, %v5067_v33  ;;  %v5134_v38 = vpop.permute.xlu1 %5133  ;;  %v10527_v45 = vld [vmem:[%s12961_s4 + $0x28] sm:$0xff]  }
 0x1da   : > { %4304 = vperm.xlu0 %10384, %v1631_v28   ;;  %5092 = vmatpush1.bf16.msra.mxu0 %v5070_v23  ;;  %v11789_v58 = vpop.f32.mrf.mxu1 }
 0x1db   : > { %4299 = vperm.xlu1 %10385, %v1630_v57  }
 0x1dc   : > { %v5136_v9 = vpop.permute.xlu0 %5135  ;;  %v11800_v23 = vpop.f32.mrf.mxu1 }
 0x1dd   : > { %v5132_v37 = vpop.permute.xlu1 %5131  ;;  %v5138_v27 = vsel %vm1062_vm5, %v5134_v38, %v5136_v9  ;;  %9902 = vmatmul.mubr.msk.bf16.vlgmr.msra.gmra.mxu0 %vm358_vm0, %v10526_v24  ;;  %v11793_v32 = vpop.f32.mrf.mxu0 }
 0x1de   : > { %12984 = vst [vmem:[#allocation15_spill] sm:$0xff] %v11793_v32  ;;  %v5137_v33 = vsel %vm1062_vm5, %v5132_v37, %v5134_v38  ;;  %5158 = vmatprep.subr.bf16.mxu1 %v5138_v27  ;;  %5260 = vmatprep.mubr.bf16.mxu0 %v12982_v49 }
 0x1df   : > { %5159 = vmatpush1.bf16.msra.mxu1 %v5137_v33  ;;  %v11802_v57 = vpop.f32.mrf.mxu0 }
 0x1e0   : > { %12985 = vst [vmem:[#allocation16_spill] sm:$0xff] %v11802_v57  ;;  %v5218_v28 = vpop.permute.xlu0 %5217  ;;  %v10528_v57 = vld [vmem:[%s12960_s3 + $0x30] sm:$0xff]  }
 0x1e1   : > { %v5220_v9 = vpop.permute.xlu1 %5219  ;;  %v11804_v41 = vpop.f32.mrf.mxu0 }
 0x1e2   : > { %12986 = vst [vmem:[#allocation17_spill] sm:$0xff] %v11804_v41  ;;  %v5222_v24 = vsel %vm1216_vm6, %v5218_v28, %v5220_v9  ;;  %9906 = vmatmul.mubr.msk.bf16.vlgmr.msra.gmra.mxu1 %vm358_vm0, %v10527_v45  ;;  %v11808_v27 = vpop.f32.mrf.mxu1 }
 0x1e3   : > { %12987 = vst [vmem:[#allocation18_spill] sm:$0xff] %v11808_v27  ;;  %5242 = vmatprep.subr.bf16.mxu0 %v5222_v24  ;;  %5344 = vmatprep.mubr.bf16.mxu1 %v12982_v49  ;;  %v11817_v41 = vpop.f32.mrf.mxu0 }
 0x1e4   : > { %v5216_v38 = vpop.permute.xlu0 %5215  ;;  %v11811_v37 = vpop.f32.mrf.mxu1  ;;  %12989 = vst [vmem:[#allocation20_spill] sm:$0xff] %v11817_v41 }
 0x1e5   : > { %12988 = vst [vmem:[#allocation19_spill] sm:$0xff] %v11811_v37  ;;  %v5221_v33 = vsel %vm1216_vm6, %v5216_v38, %v5218_v28  ;;  %v5302_v2 = vpop.permute.xlu1 %5301  ;;  %v10529_v38 = vld [vmem:[%s12961_s4 + $0x30] sm:$0xff]  }
 0x1e6   : > { %5243 = vmatpush1.bf16.msra.mxu0 %v5221_v33  ;;  %v11819_v9 = vpop.f32.mrf.mxu1 }
 0x1e7   : > { %12990 = vst [vmem:[#allocation21_spill] sm:$0xff] %v11819_v9 }
 0x1e8   : > { %v5304_v45 = vpop.permute.xlu0 %5303  ;;  %v11830_v33 = vpop.f32.mrf.mxu1 }
 0x1e9   : > { %v5300_v27 = vpop.permute.xlu1 %5299  ;;  %v5306_v24 = vsel %vm1216_vm6, %v5302_v2, %v5304_v45  ;;  %9913 = vmatmul.mubr.msk.bf16.vlgmr.msra.gmra.mxu0 %vm358_vm0, %v10528_v57  ;;  %v11823_v32 = vpop.f32.mrf.mxu0  ;;  %12992 = vst [vmem:[#allocation23_spill] sm:$0xff] %v11830_v33 }
 0x1ea   : > { %12991 = vst [vmem:[#allocation22_spill] sm:$0xff] %v11823_v32  ;;  %v5305_v28 = vsel %vm1216_vm6, %v5300_v27, %v5302_v2  ;;  %5326 = vmatprep.subr.bf16.mxu1 %v5306_v24  ;;  %5411 = vmatprep.mubr.bf16.mxu0 %v12982_v49 }
 0x1eb   : > { %5327 = vmatpush1.bf16.msra.mxu1 %v5305_v28  ;;  %v11832_v37 = vpop.f32.mrf.mxu0 }
 0x1ec   : > { %12993 = vst [vmem:[#allocation24_spill] sm:$0xff] %v11832_v37  ;;  %v5369_v9 = vpop.permute.xlu0 %5368  ;;  %v10530_v37 = vld [vmem:[%s12960_s3 + $0x38] sm:$0xff]  }
 0x1ed   : > { %v5371_v45 = vpop.permute.xlu1 %5370  ;;  %v11834_v41 = vpop.f32.mrf.mxu0 }
 0x1ee   : > { %12994 = vst [vmem:[#allocation25_spill] sm:$0xff] %v11834_v41  ;;  %v5373_v57 = vsel %vm1370_vm7, %v5369_v9, %v5371_v45  ;;  %9920 = vmatmul.mubr.msk.bf16.vlgmr.msra.gmra.mxu1 %vm358_vm0, %v10529_v38  ;;  %v11838_v2 = vpop.f32.mrf.mxu1 }
 0x1ef   : > { %12995 = vst [vmem:[#allocation26_spill] sm:$0xff] %v11838_v2  ;;  %5393 = vmatprep.subr.bf16.mxu0 %v5373_v57  ;;  %5478 = vmatprep.mubr.bf16.mxu1 %v12982_v49  ;;  %v11847_v41 = vpop.f32.mrf.mxu0 }
 0x1f0   : > { %v5367_v27 = vpop.permute.xlu0 %5366  ;;  %v11841_v24 = vpop.f32.mrf.mxu1  ;;  %12997 = vst [vmem:[#allocation28_spill] sm:$0xff] %v11847_v41 }
 0x1f1   : > { %12996 = vst [vmem:[#allocation27_spill] sm:$0xff] %v11841_v24  ;;  %v5372_v28 = vsel %vm1370_vm7, %v5367_v27, %v5369_v9  ;;  %v5436_v32 = vpop.permute.xlu1 %5435  ;;  %v10531_v27 = vld [vmem:[%s12961_s4 + $0x38] sm:$0xff]  }
 0x1f2   : > { %5394 = vmatpush1.bf16.msra.mxu0 %v5372_v28  ;;  %v11849_v45 = vpop.f32.mrf.mxu1 }
 0x1f3   : > { %12998 = vst [vmem:[#allocation29_spill] sm:$0xff] %v11849_v45 }
 0x1f4   : > { %v5438_v38 = vpop.permute.xlu0 %5437  ;;  %v11860_v28 = vpop.f32.mrf.mxu1 }
 0x1f5   : > { %v5434_v2 = vpop.permute.xlu1 %5433  ;;  %v5440_v57 = vsel %vm1370_vm7, %v5436_v32, %v5438_v38  ;;  %9924 = vmatmul.mubr.msk.bf16.vlgmr.msra.gmra.mxu0 %vm358_vm0, %v10530_v37  ;;  %v11853_v33 = vpop.f32.mrf.mxu0  ;;  %13000 = vst [vmem:[#allocation31_spill] sm:$0xff] %v11860_v28  ;;  %v10532_v28 = vld [vmem:[%s12960_s3 + $0x40] sm:$0xff]  }
 0x1f6   : > { %12999 = vst [vmem:[#allocation30_spill] sm:$0xff] %v11853_v33  ;;  %v5439_v9 = vsel %vm1370_vm7, %v5434_v2, %v5436_v32  ;;  %5460 = vmatprep.subr.bf16.mxu1 %v5440_v57  ;;  %5545 = vmatprep.mubr.bf16.mxu0 %v12982_v49 }
 0x1f7   : > { %5461 = vmatpush1.bf16.msra.mxu1 %v5439_v9  ;;  %v11862_v24 = vpop.f32.mrf.mxu0 }
 0x1f8   : > { %13001 = vst [vmem:[#allocation32_spill] sm:$0xff] %v11862_v24  ;;  %v5503_v38 = vpop.permute.xlu0 %5502 }
 0x1f9   : > { %v5505_v45 = vpop.permute.xlu1 %5504  ;;  %v11864_v37 = vpop.f32.mrf.mxu0 }
 0x1fa   : > { %13002 = vst [vmem:[#allocation33_spill] sm:$0xff] %v11864_v37  ;;  %v5507_v33 = vsel %vm1507_vm8, %v5503_v38, %v5505_v45  ;;  %9928 = vmatmul.mubr.msk.bf16.vlgmr.msra.gmra.mxu1 %vm358_vm0, %v10531_v27  ;;  %v11868_v32 = vpop.f32.mrf.mxu1  ;;  %v10533_v45 = vld [vmem:[%s10682_s13 + $0x20] ss:$44 sps:$4 sm:$0xff]  }
 0x1fb   : > { %13003 = vst [vmem:[#allocation34_spill] sm:$0xff] %v11868_v32  ;;  %5527 = vmatprep.subr.bf16.mxu0 %v5507_v33  ;;  %5612 = vmatprep.mubr.bf16.mxu1 %v12982_v49  ;;  %v11877_v37 = vpop.f32.mrf.mxu0  ;;  %v12969_v33 = vmov 0.0  }
 0x1fc   : > { %v5501_v2 = vpop.permute.xlu0 %5500  ;;  %v11871_v57 = vpop.f32.mrf.mxu1  ;;  %13005 = vst [vmem:[#allocation36_spill] sm:$0xff] %v11877_v37 }
 0x1fd   : > { %13004 = vst [vmem:[#allocation35_spill] sm:$0xff] %v11871_v57  ;;  %v5506_v9 = vsel %vm1507_vm8, %v5501_v2, %v5503_v38  ;;  %v5570_v24 = vpop.permute.xlu1 %5569 }
 0x1fe   : > { %5528 = vmatpush1.bf16.msra.mxu0 %v5506_v9  ;;  %v11880_v27 = vpop.f32.mrf.mxu1  ;;  %v10534_v9 = vld [vmem:[%s12961_s4 + $0x40] sm:$0xff]  }
 0x1ff   : > { %13006 = vst [vmem:[#allocation37_spill] sm:$0xff] %v11880_v27  ;;  %10200 = vmatprep.subr.bf16.mxu0 %v12969_v33 }
 0x200   : > { %v5572_v49 = vpop.permute.xlu0 %5571  ;;  %v11891_v27 = vpop.f32.mrf.mxu1 }
 0x201   : > { %v5568_v32 = vpop.permute.xlu1 %5567  ;;  %9932 = vmatmul.mubr.msk.bf16.vlgmr.msra.gmra.mxu0 %vm358_vm0, %v10532_v28  ;;  %v5574_v38 = vsel %vm1507_vm8, %v5570_v24, %v5572_v49  ;;  %v11885_v2 = vpop.f32.mrf.mxu0  ;;  %13008 = vst [vmem:[#allocation39_spill] sm:$0xff] %v11891_v27  ;;  %v10536_v28 = vld [vmem:[%s10676_s10 + $0x20] ss:$44 sps:$4 sm:$0xff]  }
 0x202   : > { %13007 = vst [vmem:[#allocation38_spill] sm:$0xff] %v11885_v2  ;;  %v5573_v57 = vsel %vm1507_vm8, %v5568_v32, %v5570_v24  ;;  %5594 = vmatprep.subr.bf16.mxu1 %v5574_v38  ;;  %10201 = vmatpush3.bf16.msra.mxu0 %v10533_v45  ;;  %v10535_v32 = vld [vmem:[%s12961_s4] sm:$0xff]  }
 0x203   : > { %5595 = vmatpush1.bf16.msra.mxu1 %v5573_v57  ;;  %10202 = vmatprep.mubr.msk.bf16.mxu0 %vm10611_vm9, %v12969_v33  ;;  %v11896_v37 = vpop.f32.mrf.mxu0 }
 0x204   : > { %13009 = vst [vmem:[#allocation40_spill] sm:$0xff] %v11896_v37  ;;  %v5825_v49 = vpop.permute.xlu0 %5824  ;;  %10212 = vmatprep.subr.bf16.mxu0 %v12969_v33  ;;  %10206 = vmatprep.subr.bf16.mxu1 %v12969_v33 }
 0x205   : > { %v5827_v24 = vpop.permute.xlu1 %5826  ;;  %v11903_v45 = vpop.f32.mrf.mxu0 }
 0x206   : > { %13010 = vst [vmem:[#allocation41_spill] sm:$0xff] %v11903_v45  ;;  %9936 = vmatmul.mubr.msk.bf16.vlgmr.msra.gmra.mxu1 %vm358_vm0, %v10534_v9  ;;  %v11906_v57 = vpop.f32.mrf.mxu1  ;;  %v5828_v27 = vsel %vm497_vm1, %v5825_v49, %v5827_v24  ;;  %v10537_v9 = vld [vmem:[%s12960_s3] sm:$0xff]   ;;  %v464_v49 = vadd.f32 %v11325_v21, %v11316_v15  ;;  %v1815_v24 = vadd.f32 %v11629_v54, %v11601_v31  ;;  %v13016_v31 = vmov 0.0  }
 0x207   : > { %13011 = vst [vmem:[#allocation42_spill] sm:$0xff] %v11906_v57  ;;  %10207 = vmatpush3.bf16.msra.mxu1 %v10536_v28  ;;  %10208 = vmatprep.mubr.msk.bf16.mxu1 %vm10611_vm9, %v12969_v33  ;;  %v11910_v38 = vpop.f32.mrf.mxu0  ;;  %v1817_v21 = vadd.f32 %v11635_v63, %v11613_v34 }
 0x208   : > { %13012 = vst [vmem:[#allocation43_spill] sm:$0xff] %v11910_v38  ;;  %v5894_v37 = vpop.permute.xlu0 %5893  ;;  %10218 = vmatprep.subr.bf16.mxu1 %v12969_v33  ;;  %v11913_v2 = vpop.f32.mrf.mxu1 }
 0x209   : > { %13013 = vst [vmem:[#allocation44_spill] sm:$0xff] %v11913_v2  ;;  %v5896_v41 = vpop.permute.xlu1 %5895  ;;  %10203 = vmatmul.mubr.msk.bf16.vlgmr.msra.gmra.mxu0 %vm358_vm0, %v10535_v32  ;;  %v3085_v45 = vpop.f32.mrf.mxu0  ;;  %v1819_v2 = vadd.f32 %v11648_v4, %v11621_v19  ;;  %v551_v4 = vadd.f32 %v11350_v39, %v464_v49  ;;  %v10539_v39 = vld [vmem:[%s12961_s4 + $0x8] sm:$0xff]  }
 0x20a   : > { %10213 = vmatpush3.bf16.msra.mxu0 %v5828_v27  ;;  %10214 = vmatprep.mubr.msk.bf16.mxu0 %vm10611_vm9, %v12969_v33  ;;  %v11922_v28 = vpop.f32.mrf.mxu1  ;;  %v5897_v15 = vsel %vm497_vm1, %v5894_v37, %v5896_v41 }
 0x20b   : > { %13014 = vst [vmem:[#allocation45_spill] sm:$0xff] %v11922_v28  ;;  %10224 = vmatprep.subr.bf16.mxu0 %v12969_v33  ;;  %v3087_v57 = vpop.f32.mrf.mxu0  ;;  %v10538_v28 = vld [vmem:[%s12960_s3 + $0x8] sm:$0xff]   ;;  %v1821_v33 = vadd.f32 %v11656_v7, %v11631_v56  ;;  %v1905_v56 = vadd.f32 %v11661_v12, %v1819_v2  ;;  %v1904_v12 = vadd.f32 %v11650_v50, %v1817_v21 }
 0x20c   : > { %v5953_v32 = vpop.permute.xlu0 %5952  ;;  %v11929_v27 = vpop.f32.mrf.mxu1 }
 0x20d   : > { %13015 = vst [vmem:[#allocation46_spill] sm:$0xff] %v11929_v27  ;;  %v5955_v38 = vpop.permute.xlu1 %5954  ;;  %v3089_v44 = vpop.f32.mrf.mxu0  ;;  %v1903_v27 = vadd.f32 %v11641_v30, %v1815_v24  ;;  %v1906_v37 = vadd.f32 %v11672_v43, %v1821_v33  ;;  %v1989_v24 = vadd.f32 %v11686_v26, %v1905_v56 }
 0x20e   : > { %10209 = vmatmul.mubr.msk.bf16.vlgmr.msra.gmra.mxu1 %vm358_vm0, %v10537_v9  ;;  %v5956_v7 = vsel %vm651_vm2, %v5953_v32, %v5955_v38  ;;  %v636_v9 = vadd.f32 %v11361_v53, %v551_v4 }
 0x20f   : > { %10219 = vmatpush3.bf16.msra.mxu1 %v5897_v15  ;;  %10220 = vmatprep.mubr.msk.bf16.mxu1 %vm10611_vm9, %v13016_v31  ;;  %v3146_v19 = vpop.f32.mrf.mxu1  ;;  %v11944_v54 = vpop.f32.mrf.mxu0  ;;  %v1987_v43 = vadd.f32 %v11669_v10, %v1903_v27  ;;  %v1990_v21 = vadd.f32 %v11694_v47, %v1906_v37  ;;  %v2056_v56 = vadd.f32 %v11698_v42, %v1989_v24 }
 0x210   : > { %v6012_v61 = vpop.permute.xlu0 %6011  ;;  %10230 = vmatprep.subr.bf16.mxu1 %v13016_v31  ;;  %v3147_v41 = vadd.f32 %v3146_v19, %v3085_v45  ;;  %v705_v27 = vadd.f32 %v11380_v8, %v636_v9  ;;  %v10541_v8 = vld [vmem:[%s12961_s4 + $0x10] sm:$0xff]  }
 0x211   : > { %v6014_v34 = vpop.permute.xlu1 %6013  ;;  %10215 = vmatmul.mubr.msk.bf16.vlgmr.msra.gmra.mxu0 %vm358_vm0, %v10538_v28  ;;  %v3148_v63 = vpop.f32.mrf.mxu1  ;;  %v2054_v4 = vadd.f32 %v11681_v16, %v1987_v43  ;;  %v2123_v9 = vadd.f32 %v11716_v6, %v2056_v56 }
 0x212   : > { %10225 = vmatpush3.bf16.msra.mxu0 %v5956_v7  ;;  %10226 = vmatprep.mubr.msk.bf16.mxu0 %vm10611_vm9, %v13016_v31  ;;  %v3149_v30 = vadd.f32 %v3148_v63, %v3087_v57  ;;  %v3226_v45 = vpop.f32.mrf.mxu0  ;;  %v10540_v57 = vld [vmem:[%s12960_s3 + $0x10] sm:$0xff]   ;;  %v6015_v19 = vsel %vm651_vm2, %v6012_v61, %v6014_v34  ;;  %v2057_v63 = vadd.f32 %v11709_v1, %v1990_v21 }
 0x213   : > { %10236 = vmatprep.subr.bf16.mxu0 %v13016_v31  ;;  %v3150_v2 = vpop.f32.mrf.mxu1  ;;  %v3235_v38 = vadd.f32 %v3226_v45, %v3147_v41  ;;  %v773_v45 = vadd.f32 %v11394_v14, %v705_v27  ;;  %v2121_v1 = vadd.f32 %v11702_v46, %v2054_v4  ;;  %v2190_v21 = vadd.f32 %v11733_v35, %v2123_v9 }
 0x214   : > { %v6071_v33 = vpop.permute.xlu0 %6070  ;;  %v3151_v28 = vadd.f32 %v3150_v2, %v3089_v44  ;;  %v3228_v49 = vpop.f32.mrf.mxu0  ;;  %v1988_v44 = vadd.f32 %v11676_v17, %v1904_v12 }
 0x215   : > { %v6073_v32 = vpop.permute.xlu1 %6072  ;;  %v11966_v15 = vpop.f32.mrf.mxu1  ;;  %v3236_v50 = vadd.f32 %v3228_v49, %v3149_v30  ;;  %v2124_v49 = vadd.f32 %v11727_v22, %v2057_v63 }
 0x216   : > { %10221 = vmatmul.mubr.msk.bf16.vlgmr.msra.gmra.mxu1 %vm358_vm0, %v10539_v39  ;;  %v3230_v53 = vpop.f32.mrf.mxu0  ;;  %v6074_v17 = vsel %vm788_vm3, %v6071_v33, %v6073_v32  ;;  %v2055_v42 = vadd.f32 %v11692_v29, %v1988_v44  ;;  %v10542_v33 = vld [vmem:[%s12960_s3 + $0x18] sm:$0xff]   ;;  %v842_v32 = vadd.f32 %v11416_v36, %v773_v45 }
 0x217   : > { %10231 = vmatpush3.bf16.msra.mxu1 %v6015_v19  ;;  %10232 = vmatprep.mubr.msk.bf16.mxu1 %vm10611_vm9, %v13016_v31  ;;  %v3310_v10 = vpop.f32.mrf.mxu1  ;;  %v3237_v26 = vadd.f32 %v3230_v53, %v3151_v28  ;;  %v10543_v36 = vld [vmem:[%s12961_s4 + $0x18] sm:$0xff]  }
 0x218   : > { %v6130_v41 = vpop.permute.xlu0 %6129  ;;  %10242 = vmatprep.subr.bf16.mxu1 %v13016_v31  ;;  %v3319_v47 = vadd.f32 %v3310_v10, %v3235_v38  ;;  %v11977_v61 = vpop.f32.mrf.mxu0  ;;  %v2122_v46 = vadd.f32 %v11712_v3, %v2055_v42  ;;  %v2191_v10 = vadd.f32 %v11749_v18, %v2124_v49  ;;  %v910_v27 = vadd.f32 %v11439_v59, %v842_v32  ;;  %v10546_v49 = vld [vmem:[%s12960_s3 + $0x28] sm:$0xff]   ;;  %v13018_v32 = vld [vmem:[#allocation3_spill] sm:$0xff] }
 0x219   : > { %v6132_v7 = vpop.permute.xlu1 %6131  ;;  %10227 = vmatmul.mubr.msk.bf16.vlgmr.msra.gmra.mxu0 %vm358_vm0, %v10540_v57  ;;  %v3312_v34 = vpop.f32.mrf.mxu1  ;;  %v2188_v57 = vadd.f32 %v11720_v52, %v2121_v1 }
 0x21a   : > { %10237 = vmatpush3.bf16.msra.mxu0 %v6074_v17  ;;  %10238 = vmatprep.mubr.msk.bf16.mxu0 %vm10611_vm9, %v13016_v31  ;;  %v3320_v16 = vadd.f32 %v3312_v34, %v3236_v50  ;;  %v3377_v37 = vpop.f32.mrf.mxu0  ;;  %v6133_v24 = vsel %vm788_vm3, %v6130_v41, %v6132_v7  ;;  %v2189_v35 = vadd.f32 %v11730_v40, %v2122_v46  ;;  %v10544_v17 = vld [vmem:[%s12960_s3 + $0x20] sm:$0xff]  }
 0x21b   : > { %10248 = vmatprep.subr.bf16.mxu0 %v13016_v31  ;;  %v3314_v39 = vpop.f32.mrf.mxu1  ;;  %v3386_v30 = vadd.f32 %v3377_v37, %v3319_v47  ;;  %v2255_v4 = vadd.f32 %v11738_v51, %v2188_v57  ;;  %v2257_v47 = vadd.f32 %v11752_v60, %v2190_v21  ;;  %v2258_v40 = vadd.f32 %v11769_v5, %v2191_v10 }
 0x21c   : > { %v6189_v12 = vpop.permute.xlu0 %6188  ;;  %v3321_v2 = vadd.f32 %v3314_v39, %v3237_v26  ;;  %v3379_v38 = vpop.f32.mrf.mxu0  ;;  %v2256_v51 = vadd.f32 %v11743_v62, %v2189_v35  ;;  %v10547_v35 = vld [vmem:[%s12961_s4 + $0x28] sm:$0xff]  }
 0x21d   : > { %v6191_v43 = vpop.permute.xlu1 %6190  ;;  %v11996_v28 = vpop.f32.mrf.mxu1  ;;  %v3387_v29 = vadd.f32 %v3379_v38, %v3320_v16  ;;  %v979_v16 = vadd.f32 %v11458_v11, %v910_v27  ;;  %v2322_v37 = vadd.f32 %v11763_v13, %v2255_v4  ;;  %v2324_v39 = vadd.f32 %v11774_v20, %v2257_v47  ;;  %v10545_v11 = vld [vmem:[%s12961_s4 + $0x20] sm:$0xff]  }
 0x21e   : > { %10233 = vmatmul.mubr.msk.bf16.vlgmr.msra.gmra.mxu1 %vm358_vm0, %v10541_v8  ;;  %v3381_v14 = vpop.f32.mrf.mxu0  ;;  %v6192_v19 = vsel %vm925_vm4, %v6189_v12, %v6191_v43  ;;  %v2325_v1 = vadd.f32 %v11787_v48, %v2258_v40  ;;  %v2323_v20 = vadd.f32 %v11771_v0, %v2256_v51  ;;  %v13022_v4 = vld [vmem:[#allocation16_spill] sm:$0xff] }
 0x21f   : > { %10243 = vmatpush3.bf16.msra.mxu1 %v6133_v24  ;;  %10244 = vmatprep.mubr.msk.bf16.mxu1 %vm10611_vm9, %v13016_v31  ;;  %v3388_v6 = vadd.f32 %v3381_v14, %v3321_v2  ;;  %v1047_v38 = vadd.f32 %v11472_v25, %v979_v16  ;;  %v2389_v9 = vadd.f32 %v11778_v55, %v2322_v37  ;;  %v13017_v55 = vld [vmem:[#allocation14_spill] sm:$0xff]  ;;  %v13023_v47 = vld [vmem:[#allocation4_spill] sm:$0xff]  ;;  %v13026_v37 = vld [vmem:[#allocation23_spill] sm:$0xff] }
 0x220   : > { %v6248_v50 = vpop.permute.xlu0 %6247  ;;  %10254 = vmatprep.subr.bf16.mxu1 %v13016_v31  ;;  %v3444_v22 = vpop.f32.mrf.mxu1  ;;  %v2392_v0 = vadd.f32 %v11800_v23, %v2325_v1  ;;  %v13020_v23 = vld [vmem:[#allocation17_spill] sm:$0xff] }
 0x221   : > { %v6250_v53 = vpop.permute.xlu1 %6249  ;;  %10239 = vmatmul.mubr.msk.bf16.vlgmr.msra.gmra.mxu0 %vm358_vm0, %v10542_v33  ;;  %v3453_v3 = vadd.f32 %v3444_v22, %v3386_v30  ;;  %v12010_v44 = vpop.f32.mrf.mxu0  ;;  %v2391_v33 = vadd.f32 %v11789_v58, %v2324_v39  ;;  %v1116_v57 = vadd.f32 %v13018_v32, %v1047_v38  ;;  %v13033_v32 = vld [vmem:[#allocation6_spill] sm:$0xff] }
 0x222   : > { %10249 = vmatpush3.bf16.msra.mxu0 %v6192_v19  ;;  %10250 = vmatprep.mubr.msk.bf16.mxu0 %vm10611_vm9, %v13016_v31  ;;  %v3446_v52 = vpop.f32.mrf.mxu1  ;;  %v6251_v63 = vsel %vm925_vm4, %v6248_v50, %v6250_v53  ;;  %v13019_v50 = vld [vmem:[#allocation15_spill] sm:$0xff] }
 0x223   : > { %10260 = vmatprep.subr.bf16.mxu0 %v13016_v31  ;;  %v3454_v26 = vadd.f32 %v3446_v52, %v3387_v29  ;;  %v2456_v22 = vadd.f32 %v13019_v50, %v2389_v9  ;;  %v2458_v19 = vadd.f32 %v13020_v23, %v2391_v33  ;;  %v13030_v9 = vld [vmem:[#allocation25_spill] sm:$0xff]  ;;  %v13034_v50 = vld [vmem:[#allocation26_spill] sm:$0xff] }
 0x224   : > { %v6307_v41 = vpop.permute.xlu0 %6306  ;;  %v3448_v18 = vpop.f32.mrf.mxu1  ;;  %v13035_v23 = vld [vmem:[#allocation29_spill] sm:$0xff] }
 0x225   : > { %v6309_v56 = vpop.permute.xlu1 %6308  ;;  %v3455_v7 = vadd.f32 %v3448_v18, %v3388_v6  ;;  %v3511_v34 = vpop.f32.mrf.mxu0  ;;  %v2390_v6 = vadd.f32 %v13017_v55, %v2323_v20  ;;  %v13032_v55 = vld [vmem:[#allocation24_spill] sm:$0xff] }
 0x226   : > { %10245 = vmatmul.mubr.msk.bf16.vlgmr.msra.gmra.mxu1 %vm358_vm0, %v10543_v36  ;;  %v3520_v59 = vadd.f32 %v3511_v34, %v3453_v3  ;;  %v12029_v8 = vpop.f32.mrf.mxu1  ;;  %v6310_v30 = vsel %vm1062_vm5, %v6307_v41, %v6309_v56  ;;  %v13021_v36 = vld [vmem:[#allocation20_spill] sm:$0xff]  ;;  %v1184_v56 = vadd.f32 %v13023_v47, %v1116_v57 }
 0x227   : > { %10255 = vmatpush3.bf16.msra.mxu1 %v6251_v63  ;;  %10256 = vmatprep.mubr.msk.bf16.mxu1 %vm10611_vm9, %v13016_v31  ;;  %v3513_v60 = vpop.f32.mrf.mxu0  ;;  %v2459_v52 = vadd.f32 %v13021_v36, %v2392_v0  ;;  %v2457_v41 = vadd.f32 %v13022_v4, %v2390_v6  ;;  %v13025_v63 = vld [vmem:[#allocation21_spill] sm:$0xff]  ;;  %v13036_v36 = vld [vmem:[#allocation31_spill] sm:$0xff] }
 0x228   : > { %v6366_v42 = vpop.permute.xlu0 %6365  ;;  %10266 = vmatprep.subr.bf16.mxu1 %v13016_v31  ;;  %v3521_v5 = vadd.f32 %v3513_v60, %v3454_v26  ;;  %v10548_v60 = vld [vmem:[%s12960_s3 + $0x30] sm:$0xff]  }
 0x229   : > { %v6368_v45 = vpop.permute.xlu1 %6367  ;;  %10251 = vmatmul.mubr.msk.bf16.vlgmr.msra.gmra.mxu0 %vm358_vm0, %v10544_v17  ;;  %v3515_v62 = vpop.f32.mrf.mxu0  ;;  %v13024_v17 = vld [vmem:[#allocation18_spill] sm:$0xff] }
 0x22a   : > { %10261 = vmatpush3.bf16.msra.mxu0 %v6310_v30  ;;  %10262 = vmatprep.mubr.msk.bf16.mxu0 %vm10611_vm9, %v13016_v31  ;;  %v3578_v13 = vpop.f32.mrf.mxu1  ;;  %v3522_v12 = vadd.f32 %v3515_v62, %v3455_v7  ;;  %v6369_v46 = vsel %vm1062_vm5, %v6366_v42, %v6368_v45  ;;  %v2523_v7 = vadd.f32 %v13024_v17, %v2456_v22  ;;  %v13027_v45 = vld [vmem:[#allocation19_spill] sm:$0xff] }
 0x22b   : > { %10272 = vmatprep.subr.bf16.mxu0 %v13016_v31  ;;  %v3587_v2 = vadd.f32 %v3578_v13, %v3520_v59  ;;  %v12054_v14 = vpop.f32.mrf.mxu0  ;;  %v2525_v59 = vadd.f32 %v13025_v63, %v2458_v19  ;;  %v2526_v42 = vadd.f32 %v13026_v37, %v2459_v52  ;;  %v2524_v62 = vadd.f32 %v13027_v45, %v2457_v41  ;;  %v13037_v41 = vld [vmem:[#allocation27_spill] sm:$0xff]  ;;  %v13041_v37 = vld [vmem:[#allocation36_spill] sm:$0xff] }
 0x22c   : > { %v6435_v48 = vpop.permute.xlu0 %6434  ;;  %v3580_v43 = vpop.f32.mrf.mxu1  ;;  %v13042_v45 = vld [vmem:[#allocation32_spill] sm:$0xff] }
 0x22d   : > { %v6437_v29 = vpop.permute.xlu1 %6436  ;;  %v3588_v24 = vadd.f32 %v3580_v43, %v3521_v5  ;;  %v2608_v6 = vadd.f32 %v13032_v55, %v2524_v62 }
 0x22e   : > { %10257 = vmatmul.mubr.msk.bf16.vlgmr.msra.gmra.mxu1 %vm358_vm0, %v10545_v11  ;;  %v3582_v25 = vpop.f32.mrf.mxu1  ;;  %v6438_v53 = vsel %vm1216_vm6, %v6435_v48, %v6437_v29  ;;  %v13028_v11 = vld [vmem:[#allocation5_spill] sm:$0xff]  ;;  %v2609_v48 = vadd.f32 %v13030_v9, %v2525_v59 }
 0x22f   : > { %10267 = vmatpush3.bf16.msra.mxu1 %v6369_v46  ;;  %10268 = vmatprep.mubr.msk.bf16.mxu1 %vm10611_vm9, %v13016_v31  ;;  %v3589_v58 = vadd.f32 %v3582_v25, %v3522_v12  ;;  %v1270_v13 = vadd.f32 %v13028_v11, %v1184_v56  ;;  %v13029_v12 = vld [vmem:[#allocation22_spill] sm:$0xff]  ;;  %v13038_v56 = vld [vmem:[#allocation7_spill] sm:$0xff]  ;;  %v13040_v59 = vld [vmem:[#allocation33_spill] sm:$0xff] }
 0x230   : > { %v6504_v21 = vpop.permute.xlu0 %6503  ;;  %10278 = vmatprep.subr.bf16.mxu1 %v13016_v31  ;;  %v12074_v26 = vpop.f32.mrf.mxu1  ;;  %v2607_v20 = vadd.f32 %v13029_v12, %v2523_v7  ;;  %v10549_v46 = vld [vmem:[%s12961_s4 + $0x30] sm:$0xff]   ;;  %v2693_v19 = vadd.f32 %v13035_v23, %v2609_v48  ;;  %v13043_v12 = vld [vmem:[#allocation8_spill] sm:$0xff] }
 0x231   : > { %v6506_v3 = vpop.permute.xlu1 %6505  ;;  %10263 = vmatmul.mubr.msk.bf16.vlgmr.msra.gmra.mxu0 %vm358_vm0, %v10546_v49  ;;  %v3645_v10 = vpop.f32.mrf.mxu0  ;;  %v1355_v57 = vadd.f32 %v13033_v32, %v1270_v13  ;;  %v13039_v7 = vld [vmem:[#allocation30_spill] sm:$0xff] }
 0x232   : > { %10273 = vmatpush3.bf16.msra.mxu0 %v6438_v53  ;;  %10274 = vmatprep.mubr.msk.bf16.mxu0 %vm10611_vm9, %v13016_v31  ;;  %v3654_v27 = vadd.f32 %v3645_v10, %v3587_v2  ;;  %v6507_v5 = vsel %vm1216_vm6, %v6504_v21, %v6506_v3  ;;  %v2691_v22 = vadd.f32 %v13034_v50, %v2607_v20  ;;  %v10550_v3 = vld [vmem:[%s12960_s3 + $0x38] sm:$0xff]   ;;  %v13048_v50 = vld [vmem:[#allocation10_spill] sm:$0xff] }
 0x233   : > { %10284 = vmatprep.subr.bf16.mxu0 %v13016_v31  ;;  %v3647_v18 = vpop.f32.mrf.mxu0  ;;  %v1424_v17 = vadd.f32 %v13038_v56, %v1355_v57  ;;  %v13052_v56 = vmov 0  }
 0x234   : > { %v6563_v34 = vpop.permute.xlu0 %6562  ;;  %v3655_v40 = vadd.f32 %v3647_v18, %v3588_v24  ;;  %v13031_v24 = vld [vmem:[#allocation28_spill] sm:$0xff]  ;;  %v2692_v18 = vadd.f32 %v13037_v41, %v2608_v6  ;;  %329 = vst.msk [vmem:[#allocation2 + $0x2c] sm:$0xf] %vm327_vm10, %v13052_v56  ;;  %328 = vst.msk [vmem:[#allocation2] sm:$0xf] %vm327_vm10, %v13052_v56 }
 0x235   : > { %v6565_v51 = vpop.permute.xlu1 %6564  ;;  %v3649_v16 = vpop.f32.mrf.mxu0  ;;  %v2610_v0 = vadd.f32 %v13031_v24, %v2526_v42  ;;  %v1492_v20 = vadd.f32 %v13043_v12, %v1424_v17  ;;  %v10553_v41 = vld [vmem:[%s12961_s4 + $0x40] sm:$0xff]   ;;  %333 = vst.msk [vmem:[#allocation2 + $0x24] sm:$0xff] %vm12167_vm13, %v13052_v56  ;;  %334 = vst.msk [vmem:[#allocation2 + $0x50] sm:$0xff] %vm12167_vm13, %v13052_v56 }
 0x236   : > { %10269 = vmatmul.mubr.msk.bf16.vlgmr.msra.gmra.mxu1 %vm358_vm0, %v10547_v35  ;;  %v3712_v39 = vpop.f32.mrf.mxu1  ;;  %v3656_v30 = vadd.f32 %v3649_v16, %v3589_v58  ;;  %v6566_v43 = vsel %vm1370_vm7, %v6563_v34, %v6565_v51  ;;  %v2758_v34 = vadd.f32 %v13039_v7, %v2691_v22  ;;  %v2760_v51 = vadd.f32 %v13040_v59, %v2693_v19  ;;  %v13055_v7 = vld [vmem:[#allocation40_spill] sm:$0xff] }
 0x237   : > { %10279 = vmatpush3.bf16.msra.mxu1 %v6507_v5  ;;  %10280 = vmatprep.mubr.msk.bf16.mxu1 %vm10611_vm9, %v13016_v31  ;;  %v3721_v1 = vadd.f32 %v3712_v39, %v3654_v27  ;;  %v12096_v49 = vpop.f32.mrf.mxu0  ;;  %v2694_v52 = vadd.f32 %v13036_v36, %v2610_v0  ;;  %v10551_v5 = vld [vmem:[%s12961_s4 + $0x38] sm:$0xff]   ;;  %v2759_v62 = vadd.f32 %v13042_v45, %v2692_v18  ;;  %v2983_v45 = vld [vmem:[%s12959_s2 + $0x2] sm:$0x3] }
 0x238   : > { %v6622_v2 = vpop.permute.xlu0 %6621  ;;  %10290 = vmatprep.subr.bf16.mxu1 %v13016_v31  ;;  %v3714_v38 = vpop.f32.mrf.mxu1  ;;  %v1561_v22 = vadd.f32 %v13048_v50, %v1492_v20  ;;  %v13061_v20 = vld [vmem:[#allocation11_spill] sm:$0xff] }
 0x239   : > { %v6624_v33 = vpop.permute.xlu1 %6623  ;;  %10275 = vmatmul.mubr.msk.bf16.vlgmr.msra.gmra.mxu0 %vm358_vm0, %v10548_v60  ;;  %v3722_v29 = vadd.f32 %v3714_v38, %v3655_v40  ;;  %v1652_v40 = vlaneseq  ;;  %v2761_v42 = vadd.f32 %v13041_v37, %v2694_v52  ;;  %v13051_v52 = vld [vmem:[#allocation43_spill] sm:$0xff]  ;;  %v13058_v37 = vld [vmem:[#allocation45_spill] sm:$0xff] }
 0x23a   : > { %10285 = vmatpush3.bf16.msra.mxu0 %v6566_v43  ;;  %10286 = vmatprep.mubr.msk.bf16.mxu0 %vm10611_vm9, %v13016_v31  ;;  %v3716_v25 = vpop.f32.mrf.mxu1  ;;  %v6625_v35 = vsel %vm1370_vm7, %v6622_v2, %v6624_v33  ;;  %v13044_v2 = vld [vmem:[#allocation34_spill] sm:$0xff]  ;;  %v13045_v43 = vld [vmem:[#allocation37_spill] sm:$0xff] }
 0x23b   : > { %10296 = vmatprep.subr.bf16.mxu0 %v13016_v31  ;;  %v3723_v58 = vadd.f32 %v3716_v25, %v3656_v30  ;;  %v2825_v38 = vadd.f32 %v13044_v2, %v2758_v34  ;;  %v1653_v9 = vshrl.u32 %v1652_v40, 7  ;;  %v2827_v33 = vadd.f32 %v13045_v43, %v2760_v51  ;;  %v13062_v43 = vld [vmem:[#allocation44_spill] sm:$0xff] }
 0x23c   : > { %v6681_v21 = vpop.permute.xlu0 %6680  ;;  %v12115_v27 = vpop.f32.mrf.mxu1 }
 0x23d   : > { %v6683_v53 = vpop.permute.xlu1 %6682  ;;  %v3779_v10 = vpop.f32.mrf.mxu0  ;;  %v12149_v19 = vsub.s32 0, %v1653_v9 }
 0x23e   : > { %10281 = vmatmul.mubr.msk.bf16.vlgmr.msra.gmra.mxu1 %vm358_vm0, %v10549_v46  ;;  %v3788_v4 = vadd.f32 %v3779_v10, %v3721_v1  ;;  %v6684_v60 = vsel %vm1507_vm8, %v6681_v21, %v6683_v53  ;;  %v13046_v46 = vld [vmem:[#allocation39_spill] sm:$0xff]  ;;  %v13049_v21 = vld [vmem:[#allocation38_spill] sm:$0xff]  ;;  %v12151_v53 = vsub.s32 1, %v1653_v9 }
 0x23f   : > { %10291 = vmatpush3.bf16.msra.mxu1 %v6625_v35  ;;  %10292 = vmatprep.mubr.msk.bf16.mxu1 %vm10611_vm9, %v13016_v31  ;;  %v3781_v47 = vpop.f32.mrf.mxu0  ;;  %v2828_v25 = vadd.f32 %v13046_v46, %v2761_v42  ;;  %v2892_v23 = vadd.f32 %v13049_v21, %v2825_v38 }
 0x240   : > { %10302 = vmatprep.subr.bf16.mxu1 %v13016_v31  ;;  %v3789_v63 = vadd.f32 %v3781_v47, %v3722_v29  ;;  %v6740_v1 = vpop.permute.xlu0 %6739  ;;  %v10552_v29 = vld [vmem:[%s12960_s3 + $0x40] sm:$0xff]   ;;  %v2992_v21 = vrot.slane %v2983_v45, %v12151_v53 }
 0x241   : > { %10287 = vmatmul.mubr.msk.bf16.vlgmr.msra.gmra.mxu0 %vm358_vm0, %v10550_v3  ;;  %v3783_v16 = vpop.f32.mrf.mxu0  ;;  %v6742_v11 = vpop.permute.xlu1 %6741  ;;  %v13050_v3 = vld [vmem:[#allocation41_spill] sm:$0xff]  ;;  %v2895_v35 = vadd.f32 %v13051_v52, %v2828_v25 }
 0x242   : > { %10297 = vmatpush3.bf16.msra.mxu0 %v6684_v60  ;;  %10298 = vmatprep.mubr.msk.bf16.mxu0 %vm10611_vm9, %v13016_v31  ;;  %v3846_v39 = vpop.f32.mrf.mxu1  ;;  %v3790_v30 = vadd.f32 %v3783_v16, %v3723_v58  ;;  %v6743_v55 = vsel %vm1507_vm8, %v6740_v1, %v6742_v11  ;;  %v13047_v58 = vld [vmem:[#allocation35_spill] sm:$0xff]  ;;  %v2894_v10 = vadd.f32 %v13050_v3, %v2827_v33  ;;  %v13057_v60 = vld [vmem:[#allocation42_spill] sm:$0xff] }
 0x243   : > { %v3855_v13 = vadd.f32 %v3846_v39, %v3788_v4  ;;  %v12139_v0 = vpop.f32.mrf.mxu0  ;;  %v2826_v32 = vadd.f32 %v13047_v58, %v2759_v62  ;;  %v1650_v4 = vld [vmem:[%s12959_s2] sm:$0x3]  ;;  %v2959_v16 = vadd.f32 %v13057_v60, %v2892_v23  ;;  %v13059_v1 = vld [vmem:[#allocation46_spill] sm:$0xff]  ;;  %v2988_v58 = vrot.slane %v2983_v45, %v12149_v19 }
 0x244   : > { %v3848_v48 = vpop.f32.mrf.mxu1  ;;  %v2961_v42 = vadd.f32 %v13058_v37, %v2894_v10  ;;  %v1659_v39 = vrot.slane %v1650_v4, %v12151_v53  ;;  %v2962_v11 = vadd.f32 %v13059_v1, %v2895_v35 }
 0x245   : > { %v3856_v24 = vadd.f32 %v3848_v48, %v3789_v63  ;;  %v2893_v34 = vadd.f32 %v13055_v7, %v2826_v32  ;;  %v13056_v63 = vld [vmem:[#allocation13_spill] sm:$0xff] }
 0x246   : > { %10293 = vmatmul.mubr.msk.bf16.vlgmr.msra.gmra.mxu1 %vm358_vm0, %v10551_v5  ;;  %v3850_v6 = vpop.f32.mrf.mxu1  ;;  %v1629_v59 = vadd.f32 %v13056_v63, %v1561_v22  ;;  %v1655_v5 = vrot.slane %v1650_v4, %v12149_v19 }
 0x247   : > { %10303 = vmatpush3.bf16.msra.mxu1 %v6743_v55  ;;  %10304 = vmatprep.mubr.msk.bf16.mxu1 %vm10611_vm9, %v13016_v31  ;;  %v3857_v57 = vadd.f32 %v3850_v6, %v3790_v30  ;;  %v2960_v33 = vadd.f32 %v13062_v43, %v2893_v34 }
 0x248   : > { %v12162_v18 = vpop.f32.mrf.mxu1 }
 0x249   : > { %10299 = vmatmul.mubr.msk.bf16.vlgmr.msra.gmra.mxu0 %vm358_vm0, %v10552_v29  ;;  %v3930_v36 = vpop.f32.mrf.mxu0  ;;  %v13063_v29 = vld [vmem:[#allocation12_spill] sm:$0xff] }
 0x24a   : > { %v3939_v47 = vadd.f32 %v3930_v36, %v3855_v13  ;;  %6901 = vmatprep.mubr.bf16.mxu0 %v13052_v56  ;;  %v13060_v13 = vld [vmem:[#allocation9_spill] sm:$0xff] }
 0x24b   : > { %v3932_v40 = vpop.f32.mrf.mxu0 }
 0x24c   : > { %v3940_v51 = vadd.f32 %v3932_v40, %v3856_v24 }
 0x24d   : > { %v1635_v30 = vpop.permute.xlu0 %1634  ;;  %v3934_v62 = vpop.f32.mrf.mxu0 }
 0x24e   : > { %v1642_v12 = vadd.f32 %v1635_v30, %v13060_v13  ;;  %v1643_v2 = vadd.f32 %v1635_v30, %v13061_v20  ;;  %v1640_v38 = vpop.permute.xlu1 %1639  ;;  %10305 = vmatmul.mubr.msk.bf16.vlgmr.msra.gmra.mxu1 %vm358_vm0, %v10553_v41  ;;  %v4014_v9 = vpop.f32.mrf.mxu1  ;;  %v3941_v48 = vadd.f32 %v3934_v62, %v3857_v57 }
 0x24f   : > { %v1644_v24 = vadd.f32 %v1640_v38, %v13063_v29  ;;  %v1645_v46 = vadd.f32 %v1640_v38, %v1629_v59  ;;  %v4023_v25 = vadd.f32 %v4014_v9, %v3939_v47  ;;  %6947 = vmatprep.mubr.bf16.mxu1 %v13052_v56  ;;  %v12198_v57 = vpop.f32.mrf.mxu0  ;;  %v5627_v29 = vld [vmem:[%s12962_s5] sm:$0xff] }
 0x250   : > { %v1646_v55 = vmax.f32 %v1642_v12, 0.0  ;;  %v1647_v6 = vmax.f32 %v1643_v2, 0.0  ;;  %v4016_v32 = vpop.f32.mrf.mxu1 }
 0x251   : > { %v1648_v50 = vmax.f32 %v1644_v24, 0.0  ;;  %v1649_v22 = vmax.f32 %v1645_v46, 0.0  ;;  %v2973_v23 = vpop.permute.xlu0 %2972  ;;  %v4024_v3 = vadd.f32 %v4016_v32, %v3940_v51 }
 0x252   : > { %v1662_v10 = vmul.f32 %v1655_v5, %v1646_v55  ;;  %v1663_v36 = vmul.f32 %v1659_v39, %v1647_v6  ;;  %v2977_v52 = vadd.f32 %v2973_v23, %v2961_v42  ;;  %v2978_v35 = vadd.f32 %v2973_v23, %v2962_v11  ;;  %v2968_v4 = vpop.permute.xlu1 %2967  ;;  %v4018_v41 = vpop.f32.mrf.mxu1 }
 0x253   : > { %v1664_v47 = vmul.f32 %v1655_v5, %v1648_v50  ;;  %v1665_v7 = vmul.f32 %v1659_v39, %v1649_v22  ;;  %v2975_v34 = vadd.f32 %v2968_v4, %v2959_v16  ;;  %v2976_v40 = vadd.f32 %v2968_v4, %v2960_v33  ;;  %v5628_v33 = vld [vmem:[%s12962_s5 + $0x8] sm:$0xff] }
 0x254   : > { %v2981_v63 = vmax.f32 %v2977_v52, 0.0  ;;  %v2982_v59 = vmax.f32 %v2978_v35, 0.0  ;;  %v10136_v60 = vpack.c.bf16 %v1663_v36, %v1662_v10  ;;  %v4025_v37 = vadd.f32 %v4018_v41, %v3941_v48  ;;  %v12201_v42 = vpop.f32.mrf.mxu1  ;;  %v4315_v52 = vld [vmem:[%s12959_s2 + $0x4] sm:$0x3] }
 0x255   : > { %v2979_v30 = vmax.f32 %v2975_v34, 0.0  ;;  %v2980_v45 = vmax.f32 %v2976_v40, 0.0  ;;  %v10137_v62 = vpack.c.bf16 %v1665_v7, %v1664_v47  ;;  %v4081_v51 = vpop.f32.mrf.mxu0  ;;  %v12222_v40 = vrot.slane %v4315_v52, %v12149_v19 }
 0x256   : > { %v2997_v1 = vmul.f32 %v2988_v58, %v2981_v63  ;;  %v2998_v13 = vmul.f32 %v2992_v21, %v2982_v59  ;;  %1676 = vrot.lane.b32.xlu1 %v10136_v60, %s10612_s14  ;;  %v4090_v11 = vadd.f32 %v4081_v51, %v4023_v25  ;;  %v4300_v4 = vpop.permute.xlu1 %4299 }
 0x257   : > { %v2995_v5 = vmul.f32 %v2988_v58, %v2979_v30  ;;  %v2996_v39 = vmul.f32 %v2992_v21, %v2980_v45  ;;  %1678 = vrot.lane.b32.xlu0 %v10137_v62, %s10612_s14  ;;  %v4083_v16 = vpop.f32.mrf.mxu0 }
 0x258   : > { %v10139_v12 = vpack.c.bf16 %v2998_v13, %v2997_v1  ;;  %v4091_v20 = vadd.f32 %v4083_v16, %v4024_v3 }
 0x259   : > { %v10138_v2 = vpack.c.bf16 %v2996_v39, %v2995_v5  ;;  %v4085_v38 = vpop.f32.mrf.mxu0 }
 0x25a   : > { %v4148_v9 = vpop.f32.mrf.mxu1  ;;  %v4092_v48 = vadd.f32 %v4085_v38, %v4025_v37  ;;  %v12225_v37 = vrot.slane %v4315_v52, %v12151_v53 }
 0x25b   : > { %3011 = vrot.lane.b32.xlu0 %v10139_v12, %s10612_s14  ;;  %3009 = vrot.lane.b32.xlu1 %v10138_v2, %s10612_s14  ;;  %v4157_v43 = vadd.f32 %v4148_v9, %v4090_v11  ;;  %v12212_v25 = vpop.f32.mrf.mxu0 }
 0x25c   : > { %v4150_v24 = vpop.f32.mrf.mxu1 }
 0x25d   : > { %v4158_v46 = vadd.f32 %v4150_v24, %v4091_v20 }
 0x25e   : > { %v4152_v55 = vpop.f32.mrf.mxu1 }
 0x25f   : > { %5636 = vperm.xlu0 %10384, %v5628_v33   ;;  %5631 = vperm.xlu1 %10385, %v5627_v29   ;;  %v4159_v6 = vadd.f32 %v4152_v55, %v4092_v48 }
 0x260   : > { %v12214_v32 = vpop.f32.mrf.mxu1 }
 0x261   : > { %v4215_v58 = vpop.f32.mrf.mxu0 }
 0x262   : > { %v4224_v50 = vadd.f32 %v4215_v58, %v4157_v43 }
 0x263   : > { %6800 = vperm.xlu0 %10384, %v5628_v33   ;;  %6795 = vperm.xlu1 %10385, %v5627_v29   ;;  %v4217_v22 = vpop.f32.mrf.mxu0 }
 0x264   : > { %v4225_v21 = vadd.f32 %v4217_v22, %v4158_v46 }
 0x265   : > { %v4219_v23 = vpop.f32.mrf.mxu0 }
 0x266   : > { %v4282_v3 = vpop.f32.mrf.mxu1  ;;  %v4226_v10 = vadd.f32 %v4219_v23, %v4159_v6 }
 0x267   : > { %v4291_v36 = vadd.f32 %v4282_v3, %v4224_v50  ;;  %v12219_v35 = vpop.f32.mrf.mxu0 }
 0x268   : > { %v4284_v41 = vpop.f32.mrf.mxu1 }
 0x269   : > { %v4307_v47 = vadd.f32 %v4300_v4, %v4291_v36  ;;  %v4292_v7 = vadd.f32 %v4284_v41, %v4225_v21  ;;  %v4417_v34 = vpop.f32.mrf.mxu0 }
 0x26a   : > { %v4286_v63 = vpop.f32.mrf.mxu1 }
 0x26b   : > { %v4311_v59 = vmax.f32 %v4307_v47, 0.0  ;;  %v4308_v60 = vadd.f32 %v4300_v4, %v4292_v7  ;;  %v12227_v30 = vadd.f32 %v4286_v63, %v4226_v10  ;;  %v4419_v45 = vpop.f32.mrf.mxu0 }
 0x26c   : > { %v12229_v51 = vpop.f32.mrf.mxu1 }
 0x26d   : > { %v4312_v62 = vmax.f32 %v4308_v60, 0.0  ;;  %v4421_v1 = vpop.f32.mrf.mxu0  ;;  %v12232_v13 = vmul.f32 %v12222_v40, %v4311_v59 }
 0x26f   : > { %v12235_v11 = vmul.f32 %v12225_v37, %v4312_v62  ;;  %v4478_v5 = vpop.f32.mrf.mxu1  ;;  %v12237_v39 = vpop.f32.mrf.mxu0 }
 0x270   : > { %v4479_v16 = vadd.f32 %v4478_v5, %v4417_v34 }
 0x271   : > { %v10140_v12 = vpack.c.bf16 %v12235_v11, %v12232_v13  ;;  %v4480_v20 = vpop.f32.mrf.mxu1  ;;  %v4558_v2 = vpop.f32.mrf.mxu0 }
 0x272   : > { %v4481_v38 = vadd.f32 %v4480_v20, %v4419_v45  ;;  %v4567_v9 = vadd.f32 %v4558_v2, %v4479_v16 }
 0x273   : > { %v4482_v48 = vpop.f32.mrf.mxu1  ;;  %v4560_v43 = vpop.f32.mrf.mxu0 }
 0x274   : > { %v4483_v33 = vadd.f32 %v4482_v48, %v4421_v1  ;;  %v4568_v29 = vadd.f32 %v4560_v43, %v4481_v38 }
 0x275   : > { %v12241_v24 = vpop.f32.mrf.mxu1  ;;  %v4562_v46 = vpop.f32.mrf.mxu0 }
 0x276   : > { %v4569_v55 = vadd.f32 %v4562_v46, %v4483_v33 }
 0x277   : > { %v4642_v6 = vpop.f32.mrf.mxu1  ;;  %v12243_v58 = vpop.f32.mrf.mxu0 }
 0x278   : > { %v4651_v50 = vadd.f32 %v4642_v6, %v4567_v9 }
 0x279   : > { %v4644_v22 = vpop.f32.mrf.mxu1  ;;  %v4709_v21 = vpop.f32.mrf.mxu0 }
 0x27a   : > { %v4652_v23 = vadd.f32 %v4644_v22, %v4568_v29  ;;  %v4718_v3 = vadd.f32 %v4709_v21, %v4651_v50 }
 0x27b   : > { %v4646_v10 = vpop.f32.mrf.mxu1  ;;  %v4711_v36 = vpop.f32.mrf.mxu0 }
 0x27c   : > { %v4653_v52 = vadd.f32 %v4646_v10, %v4569_v55  ;;  %v4719_v4 = vadd.f32 %v4711_v36, %v4652_v23  ;;  %v3153_v10 = vadd.f32 %v11966_v15, %v11944_v54 }
 0x27d   : > { %v12245_v41 = vpop.f32.mrf.mxu1  ;;  %v4713_v47 = vpop.f32.mrf.mxu0 }
 0x27e   : > { %v4720_v7 = vadd.f32 %v4713_v47, %v4653_v52 }
 0x27f   : > { %v12247_v59 = vpop.f32.mrf.mxu0 }
 0x280   : > { %v4776_v34 = vpop.f32.mrf.mxu1 }
 0x281   : > { %v4785_v63 = vadd.f32 %v4776_v34, %v4718_v3  ;;  %v3238_v34 = vadd.f32 %v11977_v61, %v3153_v10 }
 0x282   : > { %v4778_v60 = vpop.f32.mrf.mxu1 }
 0x283   : > { %v4786_v45 = vadd.f32 %v4778_v60, %v4719_v4 }
 0x284   : > { %v4780_v62 = vpop.f32.mrf.mxu1 }
 0x285   : > { %v4787_v1 = vadd.f32 %v4780_v62, %v4720_v7  ;;  %v4843_v5 = vpop.f32.mrf.mxu0 }
 0x286   : > { %v12249_v16 = vpop.f32.mrf.mxu1  ;;  %v4852_v20 = vadd.f32 %v4843_v5, %v4785_v63  ;;  %v3322_v5 = vadd.f32 %v11996_v28, %v3238_v34 }
 0x287   : > { %v4845_v2 = vpop.f32.mrf.mxu0 }
 0x288   : > { %v4853_v38 = vadd.f32 %v4845_v2, %v4786_v45  ;;  %v3389_v15 = vadd.f32 %v12010_v44, %v3322_v5 }
 0x289   : > { %v4847_v9 = vpop.f32.mrf.mxu0 }
 0x28a   : > { %v4910_v48 = vpop.f32.mrf.mxu1  ;;  %v4854_v43 = vadd.f32 %v4847_v9, %v4787_v1 }
 0x28b   : > { %v4919_v33 = vadd.f32 %v4910_v48, %v4852_v20  ;;  %v12251_v55 = vpop.f32.mrf.mxu0 }
 0x28c   : > { %v4912_v29 = vpop.f32.mrf.mxu1 }
 0x28d   : > { %v4920_v46 = vadd.f32 %v4912_v29, %v4853_v38  ;;  %v3456_v29 = vadd.f32 %v12029_v8, %v3389_v15 }
 0x28e   : > { %v4914_v6 = vpop.f32.mrf.mxu1 }
 0x28f   : > { %v4921_v50 = vadd.f32 %v4914_v6, %v4854_v43 }
 0x290   : > { %v12253_v21 = vpop.f32.mrf.mxu1 }
 0x291   : > { %v4977_v22 = vpop.f32.mrf.mxu0 }
 0x292   : > { %v4986_v23 = vadd.f32 %v4977_v22, %v4919_v33 }
 0x293   : > { %v4979_v3 = vpop.f32.mrf.mxu0 }
 0x294   : > { %v4987_v36 = vadd.f32 %v4979_v3, %v4920_v46 }
 0x295   : > { %v4981_v52 = vpop.f32.mrf.mxu0 }
 0x296   : > { %v5044_v4 = vpop.f32.mrf.mxu1  ;;  %v4988_v47 = vadd.f32 %v4981_v52, %v4921_v50 }
 0x297   : > { %v5053_v7 = vadd.f32 %v5044_v4, %v4986_v23  ;;  %v12258_v45 = vpop.f32.mrf.mxu0  ;;  %v3523_v23 = vadd.f32 %v12054_v14, %v3456_v29 }
 0x298   : > { %v5046_v63 = vpop.f32.mrf.mxu1 }
 0x299   : > { %v5054_v60 = vadd.f32 %v5046_v63, %v4987_v36  ;;  %v3590_v52 = vadd.f32 %v12074_v26, %v3523_v23 }
 0x29a   : > { %v5048_v62 = vpop.f32.mrf.mxu1 }
 0x29b   : > { %v5055_v1 = vadd.f32 %v5048_v62, %v4988_v47  ;;  %v3657_v63 = vadd.f32 %v12096_v49, %v3590_v52 }
 0x29c   : > { %v12261_v2 = vpop.f32.mrf.mxu1 }
 0x29d   : > { %v5111_v20 = vpop.f32.mrf.mxu0 }
 0x29e   : > { %v5120_v38 = vadd.f32 %v5111_v20, %v5053_v7  ;;  %v3724_v20 = vadd.f32 %v12115_v27, %v3657_v63 }
 0x29f   : > { %v5113_v54 = vpop.f32.mrf.mxu0 }
 0x2a0   : > { %v5121_v9 = vadd.f32 %v5113_v54, %v5054_v60 }
 0x2a1   : > { %v5115_v48 = vpop.f32.mrf.mxu0 }
 0x2a2   : > { %v5178_v43 = vpop.f32.mrf.mxu1  ;;  %v5122_v33 = vadd.f32 %v5115_v48, %v5055_v1 }
 0x2a3   : > { %v5187_v61 = vadd.f32 %v5178_v43, %v5120_v38  ;;  %v12265_v50 = vpop.f32.mrf.mxu0 }
 0x2a4   : > { %v5180_v46 = vpop.f32.mrf.mxu1 }
 0x2a5   : > { %v5188_v6 = vadd.f32 %v5180_v46, %v5121_v9  ;;  %v3791_v9 = vadd.f32 %v12139_v0, %v3724_v20 }
 0x2a6   : > { %v5182_v22 = vpop.f32.mrf.mxu1 }
 0x2a7   : > { %v5189_v28 = vadd.f32 %v5182_v22, %v5122_v33  ;;  %v3858_v29 = vadd.f32 %v12162_v18, %v3791_v9 }
 0x2a8   : > { %v12268_v10 = vpop.f32.mrf.mxu1 }
 0x2a9   : > { %v5262_v3 = vpop.f32.mrf.mxu0  ;;  %v3942_v23 = vadd.f32 %v12198_v57, %v3858_v29 }
 0x2aa   : > { %v5271_v36 = vadd.f32 %v5262_v3, %v5187_v61  ;;  %v4485_v3 = vadd.f32 %v12241_v24, %v12237_v39 }
 0x2ab   : > { %v5264_v44 = vpop.f32.mrf.mxu0 }
 0x2ac   : > { %v5272_v4 = vadd.f32 %v5264_v44, %v5188_v6  ;;  %v4570_v18 = vadd.f32 %v12243_v58, %v4485_v3 }
 0x2ad   : > { %v5266_v47 = vpop.f32.mrf.mxu0 }
 0x2ae   : > { %v5346_v7 = vpop.f32.mrf.mxu1  ;;  %v5273_v34 = vadd.f32 %v5266_v47, %v5189_v28  ;;  %v4654_v24 = vadd.f32 %v12245_v41, %v4570_v18 }
 0x2af   : > { %v5355_v8 = vadd.f32 %v5346_v7, %v5271_v36  ;;  %v12272_v1 = vpop.f32.mrf.mxu0  ;;  %v12288_v7 = vpop.permute.xlu0 %4304 }
 0x2b0   : > { %v5348_v60 = vpop.f32.mrf.mxu1 }
 0x2b1   : > { %v5356_v62 = vadd.f32 %v5348_v60, %v5272_v4  ;;  %v4026_v4 = vadd.f32 %v12201_v42, %v3942_v23 }
 0x2b2   : > { %v5350_v5 = vpop.f32.mrf.mxu1 }
 0x2b3   : > { %v5357_v14 = vadd.f32 %v5350_v5, %v5273_v34  ;;  %v4093_v39 = vadd.f32 %v12212_v25, %v4026_v4  ;;  %v4721_v25 = vadd.f32 %v12247_v59, %v4654_v24 }
 0x2b4   : > { %v12275_v54 = vpop.f32.mrf.mxu1 }
 0x2b5   : > { %v5413_v38 = vpop.f32.mrf.mxu0  ;;  %v4160_v9 = vadd.f32 %v12214_v32, %v4093_v39 }
 0x2b6   : > { %v5422_v15 = vadd.f32 %v5413_v38, %v5355_v8 }
 0x2b7   : > { %v5415_v26 = vpop.f32.mrf.mxu0  ;;  %v4227_v59 = vadd.f32 %v12219_v35, %v4160_v9  ;;  %v4309_v9 = vadd.f32 %v12288_v7, %v12227_v30 }
 0x2b8   : > { %v5423_v48 = vadd.f32 %v5415_v26, %v5356_v62 }
 0x2b9   : > { %v5417_v43 = vpop.f32.mrf.mxu0 }
 0x2ba   : > { %v5480_v33 = vpop.f32.mrf.mxu1  ;;  %v5424_v61 = vadd.f32 %v5417_v43, %v5357_v14 }
 0x2bb   : > { %v5489_v49 = vadd.f32 %v5480_v33, %v5422_v15  ;;  %v12279_v22 = vpop.f32.mrf.mxu0 }
 0x2bc   : > { %v5482_v46 = vpop.f32.mrf.mxu1 }
 0x2bd   : > { %v5490_v6 = vadd.f32 %v5482_v46, %v5423_v48 }
 0x2be   : > { %v5484_v28 = vpop.f32.mrf.mxu1 }
 0x2bf   : > { %v5491_v27 = vadd.f32 %v5484_v28, %v5424_v61 }
 0x2c0   : > { %v12284_v0 = vpop.f32.mrf.mxu1 }
 0x2c1   : > { %v5547_v36 = vpop.f32.mrf.mxu0 }
 0x2c2   : > { %v5556_v44 = vadd.f32 %v5547_v36, %v5489_v49 }
 0x2c3   : > { %v5549_v52 = vpop.f32.mrf.mxu0 }
 0x2c4   : > { %v5557_v47 = vadd.f32 %v5549_v52, %v5490_v6  ;;  %v4788_v6 = vadd.f32 %v12249_v16, %v4721_v25  ;;  %v4294_v52 = vadd.f32 %v12229_v51, %v4227_v59 }
 0x2c5   : > { %v5551_v34 = vpop.f32.mrf.mxu0 }
 0x2c6   : > { %v5614_v8 = vpop.f32.mrf.mxu1  ;;  %v12290_v63 = vadd.f32 %v5551_v34, %v5491_v27  ;;  %v4855_v4 = vadd.f32 %v12251_v55, %v4788_v6  ;;  %v4313_v6 = vmax.f32 %v4309_v9, 0.0 }
 0x2c7   : > { %v12292_v57 = vadd.f32 %v5614_v8, %v5556_v44  ;;  %v12294_v60 = vpop.f32.mrf.mxu0 }
 0x2c8   : > { %v5616_v62 = vpop.f32.mrf.mxu1  ;;  %v1677_v42 = vpop.permute.xlu1 %1676  ;;  %v4922_v51 = vadd.f32 %v12253_v21, %v4855_v4 }
 0x2c9   : > { %v1679_v5 = vpop.permute.xlu0 %1678  ;;  %v1680_v58 = vrot.slane %v1677_v42, 4  ;;  %v5745_v14 = vpop.f32.mrf.mxu0 }
 0x2ca   : > { %v1681_v20 = vrot.slane %v1679_v5, 4  ;;  %v12298_v38 = vpop.f32.mrf.mxu1  ;;  %v4989_v30 = vadd.f32 %v12258_v45, %v4922_v51  ;;  %v6836_v45 = vld [vmem:[%s12963_s6] sm:$0xf] }
 0x2cb   : > { %v1683_v15 = vsel %vm1682_vm14, %v1680_v58, %v1677_v42  ;;  %1690 = vst.msk [vmem:[#allocation2 + $0x8] sm:$0xf] %vm327_vm10, %v1680_v58  ;;  %v10204_v26 = vpop.f32.mrf.mxu0 }
 0x2cc   : > { %v1684_v41 = vsel %vm1682_vm14, %v1681_v20, %v1679_v5  ;;  %1692 = vst.msk [vmem:[#allocation2 + $0x34] sm:$0xf] %vm327_vm10, %v1681_v20  ;;  %v12308_v48 = vpop.f32.mrf.mxu1  ;;  %v5624_v5 = vadd.f32 %v5616_v62, %v5557_v47  ;;  %v4310_v20 = vadd.f32 %v12288_v7, %v4294_v52  ;;  %v4329_v52 = vmul.f32 %v12222_v40, %v4313_v6 }
 0x2cd   : > { %1689 = vst.msk [vmem:[#allocation2] sm:$0xff] %vm12167_vm13, %v1683_v15  ;;  %1691 = vst.msk [vmem:[#allocation2 + $0x2c] sm:$0xff] %vm12167_vm13, %v1684_v41  ;;  %v3012_v43 = vpop.permute.xlu0 %3011  ;;  %v3010_v33 = vpop.permute.xlu1 %3009  ;;  %v5647_v15 = vld [vmem:[%s12959_s2 + $0x6] sm:$0x3] }
 0x2ce   : > { %v3014_v61 = vrot.slane %v3012_v43, 4  ;;  %v3013_v49 = vrot.slane %v3010_v33, 4  ;;  %v5800_v29 = vpop.f32.mrf.mxu1  ;;  %v5748_v32 = vpop.f32.mrf.mxu0  ;;  %v12341_v21 = vrot.slane %v5647_v15, %v12149_v19  ;;  %v12344_v47 = vrot.slane %v5647_v15, %v12151_v53 }
 0x2cf   : > { %v5801_v46 = vadd.f32 %v5800_v29, %v5745_v14 }
 0x2d0   : > { %v3016_v28 = vsel %vm1682_vm14, %v3014_v61, %v3012_v43  ;;  %3024 = vst.msk [vmem:[#allocation2 + $0x3c] sm:$0xf] %vm327_vm10, %v3014_v61  ;;  %v3015_v27 = vsel %vm1682_vm14, %v3013_v49, %v3010_v33  ;;  %3022 = vst.msk [vmem:[#allocation2 + $0x10] sm:$0xf] %vm327_vm10, %v3013_v49  ;;  %v10210_v23 = vpop.f32.mrf.mxu1  ;;  %v10205_v3 = vpop.f32.mrf.mxu0  ;;  %v4314_v61 = vmax.f32 %v4310_v20, 0.0 }
 0x2d1   : > { %3023 = vst.msk [vmem:[#allocation2 + $0x34] sm:$0xff] %vm12167_vm13, %v3016_v28  ;;  %3021 = vst.msk [vmem:[#allocation2 + $0x8] sm:$0xff] %vm12167_vm13, %v3015_v27  ;;  %v5056_v23 = vadd.f32 %v12261_v2, %v4989_v30 }
 0x2d2   : > { %v5803_v36 = vpop.f32.mrf.mxu1  ;;  %v5867_v35 = vpop.f32.mrf.mxu0  ;;  %v4330_v27 = vmul.f32 %v12225_v37, %v4314_v61 }
 0x2d3   : > { %v5804_v44 = vadd.f32 %v5803_v36, %v5748_v32  ;;  %v5874_v16 = vadd.f32 %v5867_v35, %v5801_v46  ;;  %v5123_v4 = vadd.f32 %v12265_v50, %v5056_v23 }
 0x2d4   : > { %v10211_v18 = vpop.f32.mrf.mxu1  ;;  %v10216_v34 = vpop.f32.mrf.mxu0  ;;  %v10554_v8 = vld [vmem:[#allocation2 + $0x4] ss:$44 sps:$4 sm:$0xff]   ;;  %v12324_v39 = vld [vmem:[#allocation2] ss:$44 sps:$4 sm:$0xff]  }
 0x2d5   : > { %6960 = vrot.lane.b32.xlu0 %v10554_v8, %s10603_s19  ;;  %6858 = vrot.lane.b32.xlu1 %v10554_v8, %s10602_s16  ;;  %v10561_v23 = vld [vmem:[#allocation2 + $0x4] ss:$44 sps:$4 sm:$0xff]  }
 0x2d6   : > { %v5936_v24 = vpop.f32.mrf.mxu1  ;;  %v5870_v42 = vpop.f32.mrf.mxu0  ;;  %6929 = vmatprep.subr.bf16.mxu1 %v10554_v8 }
 0x2d7   : > { %v5943_v58 = vadd.f32 %v5936_v24, %v5874_v16  ;;  %v5875_v14 = vadd.f32 %v5870_v42, %v5804_v44  ;;  %6930 = vmatpush1.bf16.msra.mxu1 %v12324_v39  ;;  %v10141_v24 = vpack.c.bf16 %v4330_v27, %v4329_v52 }
 0x2d8   : > { %v10222_v55 = vpop.f32.mrf.mxu1  ;;  %v10217_v26 = vpop.f32.mrf.mxu0  ;;  %v10560_v27 = vld [vmem:[#allocation2 + $0xc] ss:$44 sps:$4 sm:$0xff]  }
 0x2d9   : > { %6958 = vrot.lane.b32.xlu0 %v12324_v39, %s10603_s19  ;;  %6856 = vrot.lane.b32.xlu1 %v12324_v39, %s10602_s16  ;;  %v10557_v55 = vld [vmem:[#allocation2 + $0x8] ss:$44 sps:$4 sm:$0xff]  }
 0x2da   : > { %v5632_v25 = vpop.permute.xlu1 %5631  ;;  %v5939_v43 = vpop.f32.mrf.mxu1  ;;  %10025 = vmatmul.mubr.msk.bf16.vlgmr.msra.gmra.mxu1 %vm358_vm0, %v6836_v45 }
 0x2db   : > { %v5639_v62 = vadd.f32 %v5632_v25, %v12292_v57  ;;  %v5640_v41 = vadd.f32 %v5632_v25, %v5624_v5  ;;  %v5995_v33 = vpop.f32.mrf.mxu0  ;;  %v5944_v7 = vadd.f32 %v5939_v43, %v5875_v14  ;;  %7061 = vmatprep.mubr.bf16.mxu1 %v13052_v56  ;;  %v5190_v14 = vadd.f32 %v12268_v10, %v5123_v4 }
 0x2dc   : > { %v6002_v49 = vadd.f32 %v5995_v33, %v5943_v58  ;;  %v10223_v46 = vpop.f32.mrf.mxu1 }
 0x2dd   : > { %v5643_v29 = vmax.f32 %v5639_v62, 0.0  ;;  %v5644_v32 = vmax.f32 %v5640_v41, 0.0  ;;  %v10228_v59 = vpop.f32.mrf.mxu0  ;;  %7076 = vrot.lane.b32.xlu0 %v10554_v8, %s10605_s21  ;;  %7018 = vrot.lane.b32.xlu1 %v10554_v8, %s10604_s20  ;;  %v5274_v25 = vadd.f32 %v12272_v1, %v5190_v14 }
 0x2de   : > { %v6054_v57 = vpop.f32.mrf.mxu1 }
 0x2df   : > { %v12351_v19 = vmul.f32 %v12341_v21, %v5643_v29  ;;  %v12354_v53 = vmul.f32 %v12344_v47, %v5644_v32  ;;  %v5998_v28 = vpop.f32.mrf.mxu0  ;;  %v6061_v3 = vadd.f32 %v6054_v57, %v6002_v49 }
 0x2e0   : > { %v6003_v36 = vadd.f32 %v5998_v28, %v5944_v7  ;;  %v10234_v35 = vpop.f32.mrf.mxu1 }
 0x2e1   : > { %v10229_v44 = vpop.f32.mrf.mxu0  ;;  %v10142_v16 = vpack.c.bf16 %v12354_v53, %v12351_v19  ;;  %7074 = vrot.lane.b32.xlu0 %v12324_v39, %s10605_s21  ;;  %7016 = vrot.lane.b32.xlu1 %v12324_v39, %s10604_s20  ;;  %v12439_v53 = vpop.permute.xlu1 %6795 }
 0x2e2   : > { %v6057_v37 = vpop.f32.mrf.mxu1 }
 0x2e3   : > { %v6113_v2 = vpop.f32.mrf.mxu0  ;;  %v6062_v18 = vadd.f32 %v6057_v37, %v6003_v36 }
 0x2e4   : > { %v6120_v34 = vadd.f32 %v6113_v2, %v6061_v3  ;;  %v10235_v42 = vpop.f32.mrf.mxu1 }
 0x2e5   : > { %v10240_v5 = vpop.f32.mrf.mxu0  ;;  %4343 = vrot.lane.b32.xlu0 %v10141_v24, %s10612_s14  ;;  %7134 = vrot.lane.b32.xlu1 %v10554_v8, %s10606_s22  ;;  %v5637_v42 = vpop.permute.xlu0 %5636 }
 0x2e6   : > { %v6172_v40 = vpop.f32.mrf.mxu1 }
 0x2e7   : > { %v6116_v58 = vpop.f32.mrf.mxu0  ;;  %v6179_v20 = vadd.f32 %v6172_v40, %v6120_v34  ;;  %v5625_v34 = vadd.f32 %v12298_v38, %v12290_v63 }
 0x2e8   : > { %v6121_v51 = vadd.f32 %v6116_v58, %v6062_v18  ;;  %v10246_v15 = vpop.f32.mrf.mxu1 }
 0x2e9   : > { %v10241_v26 = vpop.f32.mrf.mxu0  ;;  %7132 = vrot.lane.b32.xlu1 %v12324_v39, %s10606_s22  ;;  %6860 = vrot.lane.b32.xlu0 %v10557_v55, %s10602_s16  ;;  %v5358_v39 = vadd.f32 %v12275_v54, %v5274_v25  ;;  %v12437_v19 = vpop.permute.xlu0 %6800 }
 0x2ea   : > { %v6175_v50 = vpop.f32.mrf.mxu1 }
 0x2eb   : > { %v6231_v9 = vpop.f32.mrf.mxu0  ;;  %v6180_v62 = vadd.f32 %v6175_v50, %v6121_v51  ;;  %v5425_v32 = vadd.f32 %v12279_v22, %v5358_v39  ;;  %v5641_v51 = vadd.f32 %v5637_v42, %v5625_v34  ;;  %v10020_v34 = vld [vmem:[%s12963_s6 + $0x4] sm:$0xf] }
 0x2ec   : > { %v6238_v8 = vadd.f32 %v6231_v9, %v6179_v20  ;;  %v10247_v41 = vpop.f32.mrf.mxu1 }
 0x2ed   : > { %v10252_v43 = vpop.f32.mrf.mxu0  ;;  %4341 = vrot.lane.b32.xlu1 %v10140_v12, %s10612_s14  ;;  %7020 = vrot.lane.b32.xlu0 %v10557_v55, %s10604_s20  ;;  %v10558_v12 = vld [vmem:[#allocation2 + $0x8] ss:$44 sps:$4 sm:$0xff]   ;;  %v5492_v57 = vadd.f32 %v12284_v0, %v5425_v32  ;;  %v12402_v41 = vld [vmem:[#allocation2 + $0xc] ss:$44 sps:$4 sm:$0xff]  }
 0x2ee   : > { %v6290_v10 = vpop.f32.mrf.mxu1 }
 0x2ef   : > { %v6234_v33 = vpop.f32.mrf.mxu0  ;;  %v6297_v61 = vadd.f32 %v6290_v10, %v6238_v8  ;;  %v5559_v44 = vadd.f32 %v12294_v60, %v5492_v57 }
 0x2f0   : > { %v6239_v30 = vadd.f32 %v6234_v33, %v6180_v62  ;;  %v10258_v7 = vpop.f32.mrf.mxu1 }
 0x2f1   : > { %v10253_v49 = vpop.f32.mrf.mxu0  ;;  %6962 = vrot.lane.b32.xlu1 %v10557_v55, %s10603_s19  ;;  %7136 = vrot.lane.b32.xlu0 %v10557_v55, %s10606_s22  ;;  %v5626_v24 = vadd.f32 %v12308_v48, %v5559_v44  ;;  %v5645_v48 = vmax.f32 %v5641_v51, 0.0  ;;  %v10028_v51 = vld [vmem:[%s12963_s6 + $0xc] sm:$0xf] }
 0x2f2   : > { %v6293_v1 = vpop.f32.mrf.mxu1 }
 0x2f3   : > { %v6349_v29 = vpop.f32.mrf.mxu0  ;;  %v6298_v13 = vadd.f32 %v6293_v1, %v6239_v30  ;;  %v12410_v1 = vld [vmem:[#allocation2 + $0x8] ss:$44 sps:$4 sm:$0xff]  }
 0x2f4   : > { %v6356_v11 = vadd.f32 %v6349_v29, %v6297_v61  ;;  %v10259_v46 = vpop.f32.mrf.mxu1  ;;  %v5661_v61 = vmul.f32 %v12341_v21, %v5645_v48 }
 0x2f5   : > { %v10264_v59 = vpop.f32.mrf.mxu0  ;;  %7078 = vrot.lane.b32.xlu1 %v10557_v55, %s10605_s21  ;;  %7209 = vrot.lane.b32.xlu0 %v10558_v12, %s10607_s23  ;;  %v5642_v55 = vadd.f32 %v5637_v42, %v5626_v24 }
 0x2f6   : > { %v6408_v54 = vpop.f32.mrf.mxu1 }
 0x2f7   : > { %v6352_v6 = vpop.f32.mrf.mxu0  ;;  %v6415_v28 = vadd.f32 %v6408_v54, %v6356_v11  ;;  %v5646_v25 = vmax.f32 %v5642_v55, 0.0 }
 0x2f8   : > { %v6357_v45 = vadd.f32 %v6352_v6, %v6298_v13  ;;  %v10270_v3 = vpop.f32.mrf.mxu1 }
 0x2f9   : > { %v10265_v36 = vpop.f32.mrf.mxu0  ;;  %7211 = vrot.lane.b32.xlu1 %v10560_v27, %s10607_s23  ;;  %7207 = vrot.lane.b32.xlu0 %v10561_v23, %s10607_s23  ;;  %v5662_v30 = vmul.f32 %v12344_v47, %v5646_v25 }
 0x2fa   : > { %v6411_v22 = vpop.f32.mrf.mxu1 }
 0x2fb   : > { %v6477_v35 = vpop.f32.mrf.mxu0  ;;  %v6416_v52 = vadd.f32 %v6411_v22, %v6357_v45  ;;  %v10143_v21 = vpack.c.bf16 %v5662_v30, %v5661_v61  ;;  %v10030_v61 = vld [vmem:[%s12963_s6 + $0x10] sm:$0xf] }
 0x2fc   : > { %v6484_v37 = vadd.f32 %v6477_v35, %v6415_v28  ;;  %v10271_v2 = vpop.f32.mrf.mxu1 }
 0x2fd   : > { %v10276_v4 = vpop.f32.mrf.mxu0  ;;  %7267 = vrot.lane.b32.xlu1 %v10558_v12, %s10608_s24  ;;  %7269 = vrot.lane.b32.xlu0 %v10560_v27, %s10608_s24 }
 0x2fe   : > { %v6546_v0 = vpop.f32.mrf.mxu1 }
 0x2ff   : > { %v6480_v18 = vpop.f32.mrf.mxu0  ;;  %v6553_v5 = vadd.f32 %v6546_v0, %v6484_v37 }
 0x300   : > { %v6485_v40 = vadd.f32 %v6480_v18, %v6416_v52  ;;  %v10282_v58 = vpop.f32.mrf.mxu1 }
 0x301   : > { %v10277_v60 = vpop.f32.mrf.mxu0  ;;  %7265 = vrot.lane.b32.xlu1 %v10561_v23, %s10608_s24  ;;  %7325 = vrot.lane.b32.xlu0 %v10558_v12, %s10609_s25 }
 0x302   : > { %v6549_v14 = vpop.f32.mrf.mxu1 }
 0x303   : > { %v6605_v20 = vpop.f32.mrf.mxu0  ;;  %v6554_v15 = vadd.f32 %v6549_v14, %v6485_v40 }
 0x304   : > { %v6612_v26 = vadd.f32 %v6605_v20, %v6553_v5  ;;  %v10283_v50 = vpop.f32.mrf.mxu1 }
 0x305   : > { %v10288_v9 = vpop.f32.mrf.mxu0  ;;  %7327 = vrot.lane.b32.xlu1 %v10560_v27, %s10609_s25  ;;  %7323 = vrot.lane.b32.xlu0 %v10561_v23, %s10609_s25 }
 0x306   : > { %v6664_v63 = vpop.f32.mrf.mxu1  ;;  %v10026_v9 = vld [vmem:[%s12963_s6 + $0x8] sm:$0xf] }
 0x307   : > { %v6608_v38 = vpop.f32.mrf.mxu0  ;;  %v6671_v62 = vadd.f32 %v6664_v63, %v6612_v26 }
 0x308   : > { %v6613_v8 = vadd.f32 %v6608_v38, %v6554_v15  ;;  %v10294_v43 = vpop.f32.mrf.mxu1 }
 0x309   : > { %v10289_v10 = vpop.f32.mrf.mxu0  ;;  %7412 = vrot.lane.b32.xlu1 %v12402_v41, %s10602_s16  ;;  %7513 = vrot.lane.b32.xlu0 %v12402_v41, %s10603_s19 }
 0x30a   : > { %v6667_v33 = vpop.f32.mrf.mxu1  ;;  %v10032_v10 = vld [vmem:[%s12963_s6 + $0x14] sm:$0xf] }
 0x30b   : > { %v6723_v39 = vpop.f32.mrf.mxu0  ;;  %v6672_v7 = vadd.f32 %v6667_v33, %v6613_v8 }
 0x30c   : > { %v6730_v49 = vadd.f32 %v6723_v39, %v6671_v62  ;;  %v10295_v29 = vpop.f32.mrf.mxu1 }
 0x30d   : > { %v10300_v32 = vpop.f32.mrf.mxu0  ;;  %7410 = vrot.lane.b32.xlu1 %v12410_v1, %s10602_s16  ;;  %7511 = vrot.lane.b32.xlu0 %v12410_v1, %s10603_s19 }
 0x30e   : > { %v6782_v13 = vpop.f32.mrf.mxu1 }
 0x30f   : > { %v6726_v11 = vpop.f32.mrf.mxu0  ;;  %v12416_v12 = vadd.f32 %v6782_v13, %v6730_v49 }
 0x310   : > { %v6731_v46 = vadd.f32 %v6726_v11, %v6672_v7  ;;  %v10306_v59 = vpop.f32.mrf.mxu1  ;;  %v10017_v11 = vld [vmem:[%s12959_s2 + $0x8] ss:$0 sm:$0xff] }
 0x311   : > { %v10301_v47 = vpop.f32.mrf.mxu0  ;;  %5675 = vrot.lane.b32.xlu0 %v10143_v21, %s10612_s14  ;;  %5673 = vrot.lane.b32.xlu1 %v10142_v16, %s10612_s14  ;;  %v6803_v39 = vadd.f32 %v12439_v53, %v12416_v12 }
 0x312   : > { %v6785_v54 = vpop.f32.mrf.mxu1 }
 0x313   : > { %v12423_v6 = vadd.f32 %v6785_v54, %v6731_v46  ;;  %v6805_v32 = vmax.f32 %v6803_v39, 0.0 }
 0x314   : > { %v10307_v57 = vpop.f32.mrf.mxu1 }
 0x315   : > { %7627 = vrot.lane.b32.xlu0 %v12402_v41, %s10605_s21  ;;  %7570 = vrot.lane.b32.xlu1 %v12402_v41, %s10604_s20  ;;  %v6814_v59 = vmul.f32 %v10017_v11, %v6805_v32  ;;  %v6804_v47 = vadd.f32 %v12437_v19, %v12423_v6  ;;  %v10034_v57 = vld [vmem:[%s12963_s6 + $0x18] sm:$0xf] }
 0x317   : > { %v10144_v6 = vpack.c.bf16 %v6814_v59, %v6814_v59  ;;  %v6806_v19 = vmax.f32 %v6804_v47, 0.0  ;;  %v10055_v59 = vld [vmem:[%s12963_s6 + $0x14] sm:$0xf] }
 0x319   : > { %7625 = vrot.lane.b32.xlu0 %v12410_v1, %s10605_s21  ;;  %7568 = vrot.lane.b32.xlu1 %v12410_v1, %s10604_s20 }
 0x31d   : > { %7684 = vrot.lane.b32.xlu1 %v12402_v41, %s10606_s22 }
 0x321   : > { %7682 = vrot.lane.b32.xlu1 %v12410_v1, %s10606_s22 }
 0x347   : > { %v6961_v16 = vpop.permute.xlu0 %6960  ;;  %v6859_v28 = vpop.permute.xlu1 %6858 }
 0x34b   : > { %v6959_v45 = vpop.permute.xlu0 %6958  ;;  %v6857_v27 = vpop.permute.xlu1 %6856 }
 0x34c   : > { %v6862_v18 = vsel %vm497_vm1, %v6857_v27, %v6859_v28  ;;  %v6964_v26 = vsel %vm651_vm2, %v6959_v45, %v6961_v16  ;;  %v10039_v27 = vld [vmem:[%s12963_s6 + $0x1c] sm:$0xf] }
 0x34f   : > { %v7077_v23 = vpop.permute.xlu0 %7076  ;;  %v7019_v3 = vpop.permute.xlu1 %7018 }
 0x353   : > { %v7075_v36 = vpop.permute.xlu0 %7074  ;;  %v7017_v22 = vpop.permute.xlu1 %7016 }
 0x354   : > { %v7022_v58 = vsel %vm788_vm3, %v7017_v22, %v7019_v3  ;;  %v7080_v25 = vsel %vm925_vm4, %v7075_v36, %v7077_v23  ;;  %v6815_v22 = vmul.f32 %v10017_v11, %v6806_v19 }
 0x357   : > { %v4344_v35 = vpop.permute.xlu0 %4343  ;;  %v7135_v44 = vpop.permute.xlu1 %7134 }
 0x358   : > { %v4346_v52 = vrot.slane %v4344_v35, 4 }
 0x35a   : > { %v4348_v37 = vsel %vm1682_vm14, %v4346_v52, %v4344_v35  ;;  %4356 = vst.msk [vmem:[#allocation2 + $0x44] sm:$0xf] %vm327_vm10, %v4346_v52  ;;  %v10041_v35 = vld [vmem:[%s12963_s6 + $0x20] sm:$0xf] }
 0x35b   : > { %4355 = vst.msk [vmem:[#allocation2 + $0x3c] sm:$0xff] %vm12167_vm13, %v4348_v37  ;;  %v6861_v2 = vpop.permute.xlu0 %6860  ;;  %v7133_v4 = vpop.permute.xlu1 %7132 }
 0x35c   : > { %v6863_v0 = vsel %vm497_vm1, %v6859_v28, %v6861_v2  ;;  %v7138_v50 = vsel %vm1062_vm5, %v7133_v4, %v7135_v44 }
 0x35d   : > { %6883 = vmatprep.subr.bf16.mxu0 %v6863_v0 }
 0x35e   : > { %6884 = vmatpush1.bf16.msra.mxu0 %v6862_v18 }
 0x35f   : > { %v7021_v24 = vpop.permute.xlu0 %7020  ;;  %v4342_v42 = vpop.permute.xlu1 %4341 }
 0x360   : > { %v4345_v5 = vrot.slane %v4342_v42, 4  ;;  %v7023_v40 = vsel %vm788_vm3, %v7019_v3, %v7021_v24 }
 0x361   : > { %10024 = vmatmul.mubr.msk.bf16.vlgmr.msra.gmra.mxu0 %vm358_vm0, %v10020_v34  ;;  %7043 = vmatprep.subr.bf16.mxu1 %v7023_v40 }
 0x362   : > { %v4347_v60 = vsel %vm1682_vm14, %v4345_v5, %v4342_v42  ;;  %4354 = vst.msk [vmem:[#allocation2 + $0x18] sm:$0xf] %vm327_vm10, %v4345_v5  ;;  %7044 = vmatpush1.bf16.msra.mxu1 %v7022_v58  ;;  %7003 = vmatprep.mubr.bf16.mxu0 %v13052_v56 }
 0x363   : > { %4353 = vst.msk [vmem:[#allocation2 + $0x10] sm:$0xff] %vm12167_vm13, %v4347_v60  ;;  %v7137_v14 = vpop.permute.xlu0 %7136  ;;  %v6963_v20 = vpop.permute.xlu1 %6962 }
 0x364   : > { %v6965_v55 = vsel %vm651_vm2, %v6961_v16, %v6963_v20  ;;  %v7139_v15 = vsel %vm1062_vm5, %v7135_v44, %v7137_v14 }
 0x365   : > { %6985 = vmatprep.subr.bf16.mxu0 %v6965_v55  ;;  %7159 = vmatprep.subr.bf16.mxu1 %v7139_v15 }
 0x366   : > { %6986 = vmatpush1.bf16.msra.mxu0 %v6964_v26  ;;  %10029 = vmatmul.mubr.msk.bf16.vlgmr.msra.gmra.mxu1 %vm358_vm0, %v10028_v51 }
 0x367   : > { %7160 = vmatpush1.bf16.msra.mxu1 %v7138_v50  ;;  %v7210_v63 = vpop.permute.xlu0 %7209  ;;  %v7079_v38 = vpop.permute.xlu1 %7078  ;;  %7177 = vmatprep.mubr.bf16.mxu1 %v13052_v56 }
 0x368   : > { %v7081_v48 = vsel %vm925_vm4, %v7077_v23, %v7079_v38  ;;  %v10569_v23 = vld [vmem:[#allocation2 + $0xc] ss:$44 sps:$4 sm:$0xff]  }
 0x369   : > { %10027 = vmatmul.mubr.msk.bf16.vlgmr.msra.gmra.mxu0 %vm358_vm0, %v10026_v9  ;;  %7101 = vmatprep.subr.bf16.mxu0 %v7081_v48 }
 0x36a   : > { %7102 = vmatpush1.bf16.msra.mxu0 %v7080_v25  ;;  %v10565_v62 = vld [vmem:[#allocation2 + $0x10] ss:$44 sps:$4 sm:$0xff]   ;;  %7119 = vmatprep.mubr.bf16.mxu0 %v13052_v56  ;;  %v10566_v13 = vld [vmem:[#allocation2 + $0x14] ss:$44 sps:$4 sm:$0xff]  }
 0x36b   : > { %v7208_v8 = vpop.permute.xlu0 %7207  ;;  %v7212_v43 = vpop.permute.xlu1 %7211  ;;  %7515 = vrot.lane.b32.xlu1 %v10565_v62, %s10603_s19  ;;  %7414 = vrot.lane.b32.xlu0 %v10565_v62, %s10602_s16  ;;  %v10567_v54 = vld [vmem:[#allocation2 + $0x10] ss:$44 sps:$4 sm:$0xff]   ;;  %v12540_v24 = vld [vmem:[#allocation2 + $0x14] ss:$44 sps:$4 sm:$0xff]  }
 0x36c   : > { %v7214_v33 = vsel %vm1216_vm6, %v7210_v63, %v7212_v43  ;;  %v7213_v29 = vsel %vm1216_vm6, %v7208_v8, %v7210_v63  ;;  %v12553_v42 = vld [vmem:[#allocation2 + $0x10] ss:$44 sps:$4 sm:$0xff]   ;;  %v10577_v58 = vld [vmem:[#allocation2 + $0x14] ss:$44 sps:$4 sm:$0xff]  }
 0x36d   : > { %7234 = vmatprep.subr.bf16.mxu0 %v7214_v33 }
 0x36e   : > { %10033 = vmatmul.mubr.msk.bf16.vlgmr.msra.gmra.mxu1 %vm358_vm0, %v10032_v10 }
 0x36f   : > { %v7270_v30 = vpop.permute.xlu0 %7269  ;;  %v7268_v7 = vpop.permute.xlu1 %7267  ;;  %7310 = vmatprep.mubr.bf16.mxu1 %v13052_v56  ;;  %7629 = vrot.lane.b32.xlu1 %v10565_v62, %s10605_s21 }
 0x370   : > { %7572 = vrot.lane.b32.xlu0 %v10565_v62, %s10604_s20  ;;  %v7272_v49 = vsel %vm1370_vm7, %v7268_v7, %v7270_v30  ;;  %v10051_v30 = vld [vmem:[%s12963_s6 + $0xc] sm:$0xf] }
 0x371   : > { %10031 = vmatmul.mubr.msk.bf16.vlgmr.msra.gmra.mxu0 %vm358_vm0, %v10030_v61  ;;  %7292 = vmatprep.subr.bf16.mxu1 %v7272_v49 }
 0x372   : > { %7235 = vmatpush1.bf16.msra.mxu0 %v7213_v29  ;;  %7252 = vmatprep.mubr.bf16.mxu0 %v13052_v56 }
 0x373   : > { %v7326_v12 = vpop.permute.xlu0 %7325  ;;  %v7266_v46 = vpop.permute.xlu1 %7265  ;;  %7760 = vrot.lane.b32.xlu1 %v10566_v13, %s10607_s23 }
 0x374   : > { %v7271_v21 = vsel %vm1370_vm7, %v7266_v46, %v7268_v7  ;;  %7686 = vrot.lane.b32.xlu0 %v10565_v62, %s10606_s22  ;;  %v10043_v62 = vld [vmem:[%s12963_s6 + $0x4] sm:$0xf] }
 0x375   : > { %7293 = vmatpush1.bf16.msra.mxu1 %v7271_v21 }
 0x377   : > { %v7324_v53 = vpop.permute.xlu0 %7323  ;;  %v7328_v16 = vpop.permute.xlu1 %7327  ;;  %7815 = vrot.lane.b32.xlu1 %v10567_v54, %s10608_s24 }
 0x378   : > { %v7329_v28 = vsel %vm1507_vm8, %v7324_v53, %v7326_v12  ;;  %7758 = vrot.lane.b32.xlu0 %v10567_v54, %s10607_s23  ;;  %v7330_v45 = vsel %vm1507_vm8, %v7326_v12, %v7328_v16  ;;  %10040 = vmatmul.mubr.msk.bf16.vlgmr.msra.gmra.mxu1 %vm358_vm0, %v10039_v27 }
 0x379   : > { %10038 = vmatmul.mubr.msk.bf16.vlgmr.msra.gmra.mxu0 %vm358_vm0, %v10034_v57  ;;  %7350 = vmatprep.subr.bf16.mxu0 %v7330_v45 }
 0x37a   : > { %7351 = vmatpush1.bf16.msra.mxu0 %v7329_v28  ;;  %7368 = vmatprep.mubr.bf16.mxu0 %v13052_v56  ;;  %v10053_v28 = vld [vmem:[%s12963_s6 + $0x10] sm:$0xf] }
 0x37b   : > { %v12513_v3 = vpop.permute.xlu0 %7513  ;;  %7483 = vmatprep.subr.bf16.mxu0 %v12402_v41  ;;  %v12516_v36 = vpop.permute.xlu1 %7412  ;;  %6822 = vrot.lane.b32.xlu1 %v10144_v6, %s10612_s14  ;;  %v10145_v41 = vpack.c.bf16 %v6815_v22, %v6815_v22 }
 0x37c   : > { %7756 = vrot.lane.b32.xlu0 %v10569_v23, %s10607_s23  ;;  %7455 = vmatprep.mubr.bf16.mxu1 %v13052_v56 }
 0x37f   : > { %v12525_v44 = vpop.permute.xlu0 %7511  ;;  %v12527_v52 = vpop.permute.xlu1 %7410  ;;  %7813 = vrot.lane.b32.xlu1 %v10569_v23, %s10608_s24 }
 0x380   : > { %7817 = vrot.lane.b32.xlu0 %v10566_v13, %s10608_s24  ;;  %v7416_v48 = vsel %vm497_vm1, %v12527_v52, %v12516_v36  ;;  %v7517_v33 = vsel %vm651_vm2, %v12525_v44, %v12513_v3  ;;  %v10057_v44 = vld [vmem:[%s12963_s6 + $0x18] sm:$0xf] }
 0x381   : > { %10042 = vmatmul.mubr.msk.bf16.vlgmr.msra.gmra.mxu0 %vm358_vm0, %v10041_v35 }
 0x382   : > { %7484 = vmatpush1.bf16.msra.mxu0 %v12410_v1  ;;  %7501 = vmatprep.mubr.bf16.mxu0 %v13052_v56  ;;  %v7391_v1 = vld [vmem:[%s12963_s6] sm:$0xf] }
 0x383   : > { %v5676_v37 = vpop.permute.xlu0 %5675  ;;  %v5674_v2 = vpop.permute.xlu1 %5673  ;;  %7874 = vrot.lane.b32.xlu1 %v10566_v13, %s10609_s25  ;;  %v10049_v13 = vld [vmem:[%s12963_s6 + $0x8] sm:$0xf] }
 0x384   : > { %v5678_v4 = vrot.slane %v5676_v37, 4  ;;  %v5677_v0 = vrot.slane %v5674_v2, 4  ;;  %6824 = vrot.lane.b32.xlu0 %v10145_v41, %s10612_s14 }
 0x386   : > { %v5680_v18 = vsel %vm1682_vm14, %v5678_v4, %v5676_v37  ;;  %5688 = vst.msk [vmem:[#allocation2 + $0x4c] sm:$0xf] %vm327_vm10, %v5678_v4  ;;  %v5679_v34 = vsel %vm1682_vm14, %v5677_v0, %v5674_v2  ;;  %5686 = vst.msk [vmem:[#allocation2 + $0x20] sm:$0xf] %vm327_vm10, %v5677_v0 }
 0x387   : > { %5687 = vst.msk [vmem:[#allocation2 + $0x44] sm:$0xff] %vm12167_vm13, %v5680_v18  ;;  %5685 = vst.msk [vmem:[#allocation2 + $0x18] sm:$0xff] %vm12167_vm13, %v5679_v34  ;;  %7959 = vrot.lane.b32.xlu1 %v12540_v24, %s10602_s16  ;;  %v7571_v20 = vpop.permute.xlu1 %7570  ;;  %v7628_v55 = vpop.permute.xlu0 %7627  ;;  %v10064_v34 = vld [vmem:[%s12963_s6 + $0x20] sm:$0xf] }
 0x388   : > { %7872 = vrot.lane.b32.xlu0 %v10567_v54, %s10609_s25  ;;  %vm12645_vm10 = vmor %vm6832_vm15, %vm330_vm11 }
 0x389   : > { %10048 = vmatmul.mubr.msk.bf16.vlgmr.msra.gmra.mxu0 %vm358_vm0, %v7391_v1 }
 0x38a   : > { %7613 = vmatprep.mubr.bf16.mxu0 %v13052_v56 }
 0x38b   : > { %7957 = vrot.lane.b32.xlu1 %v12553_v42, %s10602_s16  ;;  %v7569_v51 = vpop.permute.xlu1 %7568  ;;  %v7626_v26 = vpop.permute.xlu0 %7625 }
 0x38c   : > { %7870 = vrot.lane.b32.xlu0 %v10569_v23, %s10609_s25  ;;  %v7574_v39 = vsel %vm788_vm3, %v7569_v51, %v7571_v20  ;;  %v7631_v21 = vsel %vm925_vm4, %v7626_v26, %v7628_v55 }
 0x38e   : > { %v10573_v17 = vld [vmem:[#allocation2 + $0x18] ss:$44 sps:$4 sm:$0xff]   ;;  %v10574_v5 = vld [vmem:[#allocation2 + $0x1c] ss:$44 sps:$4 sm:$0xff]  }
 0x38f   : > { %8117 = vrot.lane.b32.xlu1 %v12540_v24, %s10604_s20  ;;  %v10575_v40 = vld [vmem:[#allocation2 + $0x18] ss:$44 sps:$4 sm:$0xff]   ;;  %v12587_v60 = vld [vmem:[#allocation2 + $0x1c] ss:$44 sps:$4 sm:$0xff]   ;;  %v7685_v15 = vpop.permute.xlu1 %7684 }
 0x390   : > { %8060 = vrot.lane.b32.xlu0 %v12540_v24, %s10603_s19  ;;  %v12592_v14 = vld [vmem:[#allocation2 + $0x18] ss:$44 sps:$4 sm:$0xff]  }
 0x393   : > { %8115 = vrot.lane.b32.xlu1 %v12553_v42, %s10604_s20  ;;  %v7683_v50 = vpop.permute.xlu1 %7682 }
 0x394   : > { %8058 = vrot.lane.b32.xlu0 %v12553_v42, %s10603_s19  ;;  %v7688_v32 = vsel %vm1062_vm5, %v7683_v50, %v7685_v15 }
 0x397   : > { %8231 = vrot.lane.b32.xlu1 %v12540_v24, %s10606_s22 }
 0x398   : > { %8174 = vrot.lane.b32.xlu0 %v12540_v24, %s10605_s21 }
 0x39b   : > { %8229 = vrot.lane.b32.xlu1 %v12553_v42, %s10606_s22 }
 0x39c   : > { %8172 = vrot.lane.b32.xlu0 %v12553_v42, %s10605_s21 }
 0x39f   : > { %8062 = vrot.lane.b32.xlu1 %v10573_v17, %s10603_s19 }
 0x3a0   : > { %7961 = vrot.lane.b32.xlu0 %v10573_v17, %s10602_s16 }
 0x3a3   : > { %8176 = vrot.lane.b32.xlu1 %v10573_v17, %s10605_s21 }
 0x3a4   : > { %8119 = vrot.lane.b32.xlu0 %v10573_v17, %s10604_s20 }
 0x3a7   : > { %8307 = vrot.lane.b32.xlu1 %v10574_v5, %s10607_s23 }
 0x3a8   : > { %8233 = vrot.lane.b32.xlu0 %v10573_v17, %s10606_s22  ;;  %v12681_v17 = vpop.f32.mrf.mxu1 }
 0x3ab   : > { %8362 = vrot.lane.b32.xlu1 %v10575_v40, %s10608_s24 }
 0x3ac   : > { %8305 = vrot.lane.b32.xlu0 %v10575_v40, %s10607_s23 }
 0x3af   : > { %8360 = vrot.lane.b32.xlu1 %v10577_v58, %s10608_s24 }
 0x3b0   : > { %8303 = vrot.lane.b32.xlu0 %v10577_v58, %s10607_s23 }
 0x3b3   : > { %8421 = vrot.lane.b32.xlu1 %v10574_v5, %s10609_s25 }
 0x3b4   : > { %8364 = vrot.lane.b32.xlu0 %v10574_v5, %s10608_s24 }
 0x3b7   : > { %8506 = vrot.lane.b32.xlu1 %v12587_v60, %s10602_s16 }
 0x3b8   : > { %8419 = vrot.lane.b32.xlu0 %v10575_v40, %s10609_s25 }
 0x3bb   : > { %8504 = vrot.lane.b32.xlu1 %v12592_v14, %s10602_s16 }
 0x3bc   : > { %8417 = vrot.lane.b32.xlu0 %v10577_v58, %s10609_s25  ;;  %v12688_v58 = vpop.f32.mrf.mxu1 }
 0x3bf   : > { %8664 = vrot.lane.b32.xlu1 %v12587_v60, %s10604_s20 }
 0x3c0   : > { %8607 = vrot.lane.b32.xlu0 %v12587_v60, %s10603_s19 }
 0x3c3   : > { %8662 = vrot.lane.b32.xlu1 %v12592_v14, %s10604_s20 }
 0x3c4   : > { %8605 = vrot.lane.b32.xlu0 %v12592_v14, %s10603_s19 }
 0x3c7   : > { %8778 = vrot.lane.b32.xlu1 %v12587_v60, %s10606_s22 }
 0x3c8   : > { %8721 = vrot.lane.b32.xlu0 %v12587_v60, %s10605_s21 }
 0x3dd   : > { %v7415_v9 = vpop.permute.xlu0 %7414  ;;  %v7516_v63 = vpop.permute.xlu1 %7515 }
 0x3de   : > { %v7417_v38 = vsel %vm497_vm1, %v12516_v36, %v7415_v9  ;;  %v7518_v25 = vsel %vm651_vm2, %v12513_v3, %v7516_v63  ;;  %v10062_v3 = vld [vmem:[%s12963_s6 + $0x1c] sm:$0xf] }
 0x3df   : > { %7437 = vmatprep.subr.bf16.mxu1 %v7417_v38 }
 0x3e0   : > { %7438 = vmatpush1.bf16.msra.mxu1 %v7416_v48 }
 0x3e1   : > { %7538 = vmatprep.subr.bf16.mxu1 %v7518_v25  ;;  %v7630_v43 = vpop.permute.xlu1 %7629 }
 0x3e2   : > { %v7573_v8 = vpop.permute.xlu0 %7572  ;;  %v7632_v61 = vsel %vm925_vm4, %v7628_v55, %v7630_v43  ;;  %v7938_v55 = vld [vmem:[%s12963_s6] sm:$0xf] }
 0x3e3   : > { %v7575_v10 = vsel %vm788_vm3, %v7571_v20, %v7573_v8  ;;  %10047 = vmatmul.mubr.msk.bf16.vlgmr.msra.gmra.mxu1 %vm358_vm0, %v10043_v62 }
 0x3e4   : > { %7595 = vmatprep.subr.bf16.mxu0 %v7575_v10  ;;  %7539 = vmatpush1.bf16.msra.mxu1 %v7517_v33  ;;  %v10585_v10 = vld [vmem:[#allocation2 + $0x1c] ss:$44 sps:$4 sm:$0xff]   ;;  %v10066_v33 = vld [vmem:[%s12963_s6 + $0x4] sm:$0xf] }
 0x3e5   : > { %7596 = vmatpush1.bf16.msra.mxu0 %v7574_v39  ;;  %7652 = vmatprep.subr.bf16.mxu1 %v7632_v61  ;;  %v7761_v49 = vpop.permute.xlu1 %7760 }
 0x3e6   : > { %v7687_v7 = vpop.permute.xlu0 %7686  ;;  %7556 = vmatprep.mubr.bf16.mxu1 %v13052_v56 }
 0x3e7   : > { %v7689_v29 = vsel %vm1062_vm5, %v7685_v15, %v7687_v7 }
 0x3e8   : > { %7709 = vmatprep.subr.bf16.mxu0 %v7689_v29  ;;  %10052 = vmatmul.mubr.msk.bf16.vlgmr.msra.gmra.mxu0 %vm358_vm0, %v10051_v30 }
 0x3e9   : > { %7710 = vmatpush1.bf16.msra.mxu0 %v7688_v32  ;;  %7727 = vmatprep.mubr.bf16.mxu0 %v13052_v56  ;;  %v7816_v12 = vpop.permute.xlu1 %7815  ;;  %v10074_v32 = vld [vmem:[%s12963_s6 + $0xc] sm:$0xf] }
 0x3ea   : > { %v7759_v11 = vpop.permute.xlu0 %7758 }
 0x3eb   : > { %v7763_v46 = vsel %vm1216_vm6, %v7759_v11, %v7761_v49  ;;  %10050 = vmatmul.mubr.msk.bf16.vlgmr.msra.gmra.mxu1 %vm358_vm0, %v10049_v13 }
 0x3ec   : > { %7653 = vmatpush1.bf16.msra.mxu1 %v7631_v21  ;;  %7670 = vmatprep.mubr.bf16.mxu1 %v13052_v56 }
 0x3ed   : > { %7783 = vmatprep.subr.bf16.mxu1 %v7763_v46  ;;  %v6823_v54 = vpop.permute.xlu1 %6822 }
 0x3ee   : > { %v7757_v47 = vpop.permute.xlu0 %7756  ;;  %v6826_v53 = vrot.slane %v6823_v54, 4 }
 0x3ef   : > { %v7762_v23 = vsel %vm1216_vm6, %v7757_v47, %v7759_v11 }
 0x3f0   : > { %10056 = vmatmul.mubr.msk.bf16.vlgmr.msra.gmra.mxu0 %vm358_vm0, %v10055_v59  ;;  %v6828_v16 = vsel %vm1682_vm14, %v6826_v53, %v6823_v54  ;;  %v10072_v59 = vld [vmem:[%s12963_s6 + $0x8] sm:$0xf] }
 0x3f1   : > { %7858 = vmatprep.mubr.bf16.mxu0 %v13052_v56  ;;  %6834 = vst.msk [vmem:[#allocation2 + $0x20] sm:$0xff] %vm12645_vm10, %v6828_v16  ;;  %v7814_v27 = vpop.permute.xlu1 %7813  ;;  %v10078_v16 = vld [vmem:[%s12963_s6 + $0x14] sm:$0xf] }
 0x3f2   : > { %v7818_v45 = vpop.permute.xlu0 %7817  ;;  %v7819_v6 = vsel %vm1370_vm7, %v7814_v27, %v7816_v12 }
 0x3f3   : > { %v7820_v19 = vsel %vm1370_vm7, %v7816_v12, %v7818_v45  ;;  %10054 = vmatmul.mubr.msk.bf16.vlgmr.msra.gmra.mxu1 %vm358_vm0, %v10053_v28 }
 0x3f4   : > { %7840 = vmatprep.subr.bf16.mxu0 %v7820_v19  ;;  %7784 = vmatpush1.bf16.msra.mxu1 %v7762_v23 }
 0x3f5   : > { %7841 = vmatpush1.bf16.msra.mxu0 %v7819_v6  ;;  %v7875_v22 = vpop.permute.xlu1 %7874  ;;  %7801 = vmatprep.mubr.bf16.mxu1 %v13052_v56 }
 0x3f6   : > { %v6825_v36 = vpop.permute.xlu0 %6824 }
 0x3f7   : > { %v6827_v35 = vrot.slane %v6825_v36, 4 }
 0x3f8   : > { %10063 = vmatmul.mubr.msk.bf16.vlgmr.msra.gmra.mxu0 %vm358_vm0, %v10062_v3 }
 0x3f9   : > { %v6829_v52 = vsel %vm1682_vm14, %v6827_v35, %v6825_v36  ;;  %8002 = vmatprep.mubr.bf16.mxu0 %v13052_v56  ;;  %v7960_v37 = vpop.permute.xlu1 %7959  ;;  %v10076_v36 = vld [vmem:[%s12963_s6 + $0x10] sm:$0xf] }
 0x3fa   : > { %6835 = vst.msk [vmem:[#allocation2 + $0x4c] sm:$0xff] %vm12645_vm10, %v6829_v52  ;;  %v7873_v41 = vpop.permute.xlu0 %7872 }
 0x3fb   : > { %v7877_v2 = vsel %vm1507_vm8, %v7873_v41, %v7875_v22  ;;  %10061 = vmatmul.mubr.msk.bf16.vlgmr.msra.gmra.mxu1 %vm358_vm0, %v10057_v44 }
 0x3fc   : > { %7897 = vmatprep.subr.bf16.mxu1 %v7877_v2  ;;  %7915 = vmatprep.mubr.bf16.mxu1 %v13052_v56 }
 0x3fd   : > { %v7958_v0 = vpop.permute.xlu1 %7957 }
 0x3fe   : > { %v7871_v4 = vpop.permute.xlu0 %7870  ;;  %v7963_v8 = vsel %vm497_vm1, %v7958_v0, %v7960_v37 }
 0x3ff   : > { %v7876_v18 = vsel %vm1507_vm8, %v7871_v4, %v7873_v41  ;;  %v10085_v4 = vld [vmem:[%s12963_s6 + $0x1c] sm:$0xf] }
 0x400   : > { %7898 = vmatpush1.bf16.msra.mxu1 %v7876_v18 }
 0x401   : > { %8030 = vmatprep.subr.bf16.mxu1 %v12540_v24  ;;  %v10581_v1 = vld [vmem:[#allocation2 + $0x20] ss:$44 sps:$4 sm:$0xff]   ;;  %v8118_v40 = vpop.permute.xlu1 %8117  ;;  %v6953_v24 = vpop.f32.mrf.mxu1  ;;  %v10582_v50 = vld [vmem:[#allocation2 + $0x24] ss:$44 sps:$4 sm:$0xff]  }
 0x402   : > { %v8061_v5 = vpop.permute.xlu0 %8060  ;;  %8609 = vrot.lane.b32.xlu1 %v10581_v1, %s10603_s19  ;;  %8508 = vrot.lane.b32.xlu0 %v10581_v1, %s10602_s16  ;;  %v10583_v38 = vld [vmem:[#allocation2 + $0x20] ss:$44 sps:$4 sm:$0xff]   ;;  %v10588_v3 = vld [vmem:[#allocation2 + $0x24] ss:$44 sps:$4 sm:$0xff]   ;;  %v10080_v24 = vld [vmem:[%s12963_s6 + $0x18] sm:$0xf] }
 0x403   : > { %10065 = vmatmul.mubr.msk.bf16.vlgmr.msra.gmra.mxu1 %vm358_vm0, %v10064_v34  ;;  %v6954_v15 = vpop.f32.mrf.mxu1  ;;  %v12727_v21 = vld [vmem:[#allocation2 + $0x20] ss:$44 sps:$4 sm:$0xff]  }
 0x404   : > { %8031 = vmatpush1.bf16.msra.mxu1 %v12553_v42  ;;  %8048 = vmatprep.mubr.bf16.mxu1 %v13052_v56 }
 0x405   : > { %v8116_v51 = vpop.permute.xlu1 %8115 }
 0x406   : > { %v8059_v20 = vpop.permute.xlu0 %8058  ;;  %8776 = vrot.lane.b32.xlu1 %v12592_v14, %s10606_s22  ;;  %8719 = vrot.lane.b32.xlu0 %v12592_v14, %s10605_s21  ;;  %v8121_v49 = vsel %vm788_vm3, %v8116_v51, %v8118_v40 }
 0x407   : > { %v8064_v7 = vsel %vm651_vm2, %v8059_v20, %v8061_v5 }
 0x409   : > { %v8232_v42 = vpop.permute.xlu1 %8231 }
 0x40a   : > { %v8175_v26 = vpop.permute.xlu0 %8174  ;;  %8723 = vrot.lane.b32.xlu1 %v10581_v1, %s10605_s21  ;;  %8666 = vrot.lane.b32.xlu0 %v10581_v1, %s10604_s20 }
 0x40b   : > { %10071 = vmatmul.mubr.msk.bf16.vlgmr.msra.gmra.mxu1 %vm358_vm0, %v7938_v55 }
 0x40c   : > { %8160 = vmatprep.mubr.bf16.mxu1 %v13052_v56 }
 0x40d   : > { %v8230_v63 = vpop.permute.xlu1 %8229 }
 0x40e   : > { %v8173_v9 = vpop.permute.xlu0 %8172  ;;  %8854 = vrot.lane.b32.xlu1 %v10582_v50, %s10607_s23  ;;  %8780 = vrot.lane.b32.xlu0 %v10581_v1, %s10606_s22  ;;  %v8235_v46 = vsel %vm1062_vm5, %v8230_v63, %v8232_v42 }
 0x40f   : > { %v8178_v53 = vsel %vm925_vm4, %v8173_v9, %v8175_v26 }
 0x411   : > { %v8063_v25 = vpop.permute.xlu1 %8062 }
 0x412   : > { %v7962_v48 = vpop.permute.xlu0 %7961  ;;  %8909 = vrot.lane.b32.xlu1 %v10583_v38, %s10608_s24  ;;  %8852 = vrot.lane.b32.xlu0 %v10583_v38, %s10607_s23  ;;  %v8065_v43 = vsel %vm651_vm2, %v8061_v5, %v8063_v25 }
 0x413   : > { %v7964_v62 = vsel %vm497_vm1, %v7960_v37, %v7962_v48 }
 0x414   : > { %7984 = vmatprep.subr.bf16.mxu0 %v7964_v62 }
 0x415   : > { %7985 = vmatpush1.bf16.msra.mxu0 %v7963_v8  ;;  %v8177_v61 = vpop.permute.xlu1 %8176 }
 0x416   : > { %v8120_v39 = vpop.permute.xlu0 %8119  ;;  %8085 = vmatprep.subr.bf16.mxu0 %v8065_v43  ;;  %8907 = vrot.lane.b32.xlu1 %v10585_v10, %s10608_s24  ;;  %v8179_v29 = vsel %vm925_vm4, %v8175_v26, %v8177_v61 }
 0x417   : > { %8850 = vrot.lane.b32.xlu0 %v10585_v10, %s10607_s23  ;;  %v8122_v30 = vsel %vm788_vm3, %v8118_v40, %v8120_v39  ;;  %v10087_v39 = vld [vmem:[%s12963_s6 + $0x20] sm:$0xf] }
 0x418   : > { %10070 = vmatmul.mubr.msk.bf16.vlgmr.msra.gmra.mxu0 %vm358_vm0, %v10066_v33  ;;  %8142 = vmatprep.subr.bf16.mxu1 %v8122_v30 }
 0x419   : > { %8086 = vmatpush1.bf16.msra.mxu0 %v8064_v7  ;;  %8143 = vmatpush1.bf16.msra.mxu1 %v8121_v49  ;;  %v8308_v11 = vpop.permute.xlu1 %8307  ;;  %v10591_v49 = vld [vmem:[#allocation2 + $0x28] ss:$44 sps:$4 sm:$0xff]  }
 0x41a   : > { %v8234_v13 = vpop.permute.xlu0 %8233  ;;  %8199 = vmatprep.subr.bf16.mxu0 %v8179_v29  ;;  %8103 = vmatprep.mubr.bf16.mxu0 %v13052_v56 }
 0x41b   : > { %8968 = vrot.lane.b32.xlu1 %v10582_v50, %s10609_s25  ;;  %8911 = vrot.lane.b32.xlu0 %v10582_v50, %s10608_s24  ;;  %v8236_v12 = vsel %vm1062_vm5, %v8232_v42, %v8234_v13 }
 0x41c   : > { %8256 = vmatprep.subr.bf16.mxu1 %v8236_v12  ;;  %10075 = vmatmul.mubr.msk.bf16.vlgmr.msra.gmra.mxu1 %vm358_vm0, %v10074_v32  ;;  %v7379_v12 = vld [vmem:[%s12964_s7] sm:$0xff] }
 0x41d   : > { %8257 = vmatpush1.bf16.msra.mxu1 %v8235_v46  ;;  %8274 = vmatprep.mubr.bf16.mxu1 %v13052_v56  ;;  %v8363_v54 = vpop.permute.xlu1 %8362 }
 0x41e   : > { %v8306_v47 = vpop.permute.xlu0 %8305 }
 0x41f   : > { %9046 = vrot.lane.b32.xlu1 %v12727_v21, %s10602_s16  ;;  %8966 = vrot.lane.b32.xlu0 %v10583_v38, %s10609_s25  ;;  %v8310_v57 = vsel %vm1216_vm6, %v8306_v47, %v8308_v11  ;;  %v10589_v38 = vld [vmem:[#allocation2 + $0x24] ss:$44 sps:$4 sm:$0xff]  }
 0x420   : > { %10073 = vmatmul.mubr.msk.bf16.vlgmr.msra.gmra.mxu0 %vm358_vm0, %v10072_v59 }
 0x421   : > { %8200 = vmatpush1.bf16.msra.mxu0 %v8178_v53  ;;  %8217 = vmatprep.mubr.bf16.mxu0 %v13052_v56  ;;  %v6903_v28 = vpop.f32.mrf.mxu0  ;;  %v8361_v19 = vpop.permute.xlu1 %8360 }
 0x422   : > { %8330 = vmatprep.subr.bf16.mxu0 %v8310_v57  ;;  %v8304_v45 = vpop.permute.xlu0 %8303  ;;  %v6950_v27 = vadd.f32 %v12681_v17, %v6903_v28  ;;  %v8366_v2 = vsel %vm1370_vm7, %v8361_v19, %v8363_v54 }
 0x423   : > { %9145 = vrot.lane.b32.xlu1 %v12727_v21, %s10603_s19  ;;  %8964 = vrot.lane.b32.xlu0 %v10585_v10, %s10609_s25  ;;  %v6905_v6 = vpop.f32.mrf.mxu0  ;;  %v8309_v37 = vsel %vm1216_vm6, %v8304_v45, %v8306_v47 }
 0x424   : > { %10079 = vmatmul.mubr.msk.bf16.vlgmr.msra.gmra.mxu1 %vm358_vm0, %v10078_v16  ;;  %v6952_v23 = vadd.f32 %v12688_v58, %v6905_v6 }
 0x425   : > { %8405 = vmatprep.mubr.bf16.mxu1 %v13052_v56  ;;  %v6907_v22 = vpop.f32.mrf.mxu0  ;;  %v8422_v34 = vpop.permute.xlu1 %8421 }
 0x426   : > { %v8365_v35 = vpop.permute.xlu0 %8364  ;;  %v7063_v41 = vpop.f32.mrf.mxu1 }
 0x427   : > { %9196 = vrot.lane.b32.xlu1 %v12727_v21, %s10604_s20  ;;  %9048 = vrot.lane.b32.xlu0 %v10588_v3, %s10602_s16  ;;  %v8367_v44 = vsel %vm1370_vm7, %v8363_v54, %v8365_v35  ;;  %v6908_v52 = vpop.f32.mrf.mxu0 }
 0x428   : > { %10077 = vmatmul.mubr.msk.bf16.vlgmr.msra.gmra.mxu0 %vm358_vm0, %v10076_v36  ;;  %8387 = vmatprep.subr.bf16.mxu1 %v8367_v44  ;;  %v7065_v18 = vpop.f32.mrf.mxu1 }
 0x429   : > { %8331 = vmatpush1.bf16.msra.mxu0 %v8309_v37  ;;  %8388 = vmatpush1.bf16.msra.mxu1 %v8366_v2  ;;  %v7005_v0 = vpop.f32.mrf.mxu0  ;;  %v8507_v44 = vpop.permute.xlu1 %8506 }
 0x42a   : > { %v8420_v1 = vpop.permute.xlu0 %8419  ;;  %8348 = vmatprep.mubr.bf16.mxu0 %v13052_v56  ;;  %v7012_v17 = vadd.f32 %v7005_v0, %v6950_v27  ;;  %v7067_v58 = vpop.f32.mrf.mxu1 }
 0x42b   : > { %9247 = vrot.lane.b32.xlu1 %v12727_v21, %s10605_s21  ;;  %9147 = vrot.lane.b32.xlu0 %v10588_v3, %s10603_s19  ;;  %v8424_v5 = vsel %vm1507_vm8, %v8420_v1, %v8422_v34  ;;  %v7007_v40 = vpop.f32.mrf.mxu0  ;;  %v10089_v58 = vld [vmem:[%s12963_s6 + $0x4] sm:$0xf] }
 0x42c   : > { %8444 = vmatprep.subr.bf16.mxu0 %v8424_v5  ;;  %10086 = vmatmul.mubr.msk.bf16.vlgmr.msra.gmra.mxu1 %vm358_vm0, %v10085_v4  ;;  %v7013_v20 = vadd.f32 %v7007_v40, %v6952_v23  ;;  %v7070_v51 = vadd.f32 %v7063_v41, %v7012_v17  ;;  %v7068_v15 = vpop.f32.mrf.mxu1 }
 0x42d   : > { %8549 = vmatprep.mubr.bf16.mxu1 %v13052_v56  ;;  %v7009_v55 = vpop.f32.mrf.mxu0  ;;  %v8505_v52 = vpop.permute.xlu1 %8504 }
 0x42e   : > { %v8418_v26 = vpop.permute.xlu0 %8417  ;;  %v7071_v42 = vadd.f32 %v7065_v18, %v7013_v20  ;;  %v7179_v63 = vpop.f32.mrf.mxu1  ;;  %v8510_v5 = vsel %vm497_vm1, %v8505_v52, %v8507_v44 }
 0x42f   : > { %v8423_v50 = vsel %vm1507_vm8, %v8418_v26, %v8420_v1  ;;  %9298 = vrot.lane.b32.xlu1 %v12727_v21, %s10606_s22  ;;  %9198 = vrot.lane.b32.xlu0 %v10588_v3, %s10604_s20  ;;  %v7010_v9 = vpop.f32.mrf.mxu0 }
 0x430   : > { %10084 = vmatmul.mubr.msk.bf16.vlgmr.msra.gmra.mxu0 %vm358_vm0, %v10080_v24  ;;  %v7181_v25 = vpop.f32.mrf.mxu1  ;;  %v10095_v9 = vld [vmem:[%s12963_s6 + $0x8] sm:$0xf] }
 0x431   : > { %8445 = vmatpush1.bf16.msra.mxu0 %v8423_v50  ;;  %8462 = vmatprep.mubr.bf16.mxu0 %v13052_v56  ;;  %v7121_v48 = vpop.f32.mrf.mxu0  ;;  %v8665_v37 = vpop.permute.xlu1 %8664 }
 0x432   : > { %8577 = vmatprep.subr.bf16.mxu0 %v12587_v60  ;;  %v7128_v62 = vadd.f32 %v7121_v48, %v7070_v51  ;;  %v7183_v43 = vpop.f32.mrf.mxu1  ;;  %v8608_v41 = vpop.permute.xlu0 %8607  ;;  %v10097_v48 = vld [vmem:[%s12963_s6 + $0xc] sm:$0xf] }
 0x433   : > { %9359 = vrot.lane.b32.xlu1 %v10589_v38, %s10607_s23  ;;  %9249 = vrot.lane.b32.xlu0 %v10588_v3, %s10605_s21  ;;  %v7123_v8 = vpop.f32.mrf.mxu0  ;;  %s12942_s21 = scalar_lea.vmem %s12965_s8, %s10363_s15 }
 0x434   : > { %v7129_v10 = vadd.f32 %v7123_v8, %v7071_v42  ;;  %v7186_v33 = vadd.f32 %v7179_v63, %v7128_v62  ;;  %v7184_v30 = vpop.f32.mrf.mxu1 }
 0x435   : > { %v7125_v61 = vpop.f32.mrf.mxu0  ;;  %v8663_v4 = vpop.permute.xlu1 %8662 }
 0x436   : > { %v7187_v7 = vadd.f32 %v7181_v25, %v7129_v10  ;;  %v8606_v2 = vpop.permute.xlu0 %8605  ;;  %v8668_v50 = vsel %vm788_vm3, %v8663_v4, %v8665_v37 }
 0x437   : > { %9410 = vrot.lane.b32.xlu1 %v10589_v38, %s10608_s24  ;;  %9300 = vrot.lane.b32.xlu0 %v10588_v3, %s10606_s22  ;;  %v7126_v60 = vpop.f32.mrf.mxu0  ;;  %v8611_v24 = vsel %vm651_vm2, %v8606_v2, %v8608_v41 }
 0x438   : > { %10088 = vmatmul.mubr.msk.bf16.vlgmr.msra.gmra.mxu0 %vm358_vm0, %v10087_v39  ;;  %v7312_v11 = vpop.f32.mrf.mxu1  ;;  %v10099_v39 = vld [vmem:[%s12963_s6 + $0x10] sm:$0xf] }
 0x439   : > { %8578 = vmatpush1.bf16.msra.mxu0 %v12592_v14  ;;  %8595 = vmatprep.mubr.bf16.mxu0 %v13052_v56  ;;  %v7254_v29 = vpop.f32.mrf.mxu0  ;;  %v8485_v14 = vld [vmem:[%s12963_s6] sm:$0xf]  ;;  %v8779_v18 = vpop.permute.xlu1 %8778 }
 0x43a   : > { %v7261_v32 = vadd.f32 %v7254_v29, %v7186_v33  ;;  %v7314_v47 = vpop.f32.mrf.mxu1  ;;  %v8722_v0 = vpop.permute.xlu0 %8721 }
 0x43b   : > { %9461 = vrot.lane.b32.xlu1 %v10589_v38, %s10609_s25  ;;  %9361 = vrot.lane.b32.xlu0 %v10591_v49, %s10607_s23  ;;  %v7256_v13 = vpop.f32.mrf.mxu0 }
 0x43c   : > { %v7262_v46 = vadd.f32 %v7256_v13, %v7187_v7  ;;  %v7319_v21 = vadd.f32 %v7312_v11, %v7261_v32  ;;  %v7316_v53 = vpop.f32.mrf.mxu1  ;;  %v10101_v7 = vld [vmem:[%s12963_s6 + $0x14] sm:$0xf]  ;;  %v10103_v11 = vld [vmem:[%s12963_s6 + $0x18] sm:$0xf] }
 0x43d   : > { %v7258_v59 = vpop.f32.mrf.mxu0 }
 0x43e   : > { %v7320_v54 = vadd.f32 %v7314_v47, %v7262_v46  ;;  %v7317_v16 = vpop.f32.mrf.mxu1 }
 0x43f   : > { %7382 = vperm.xlu1 %10385, %v7379_v12   ;;  %9412 = vrot.lane.b32.xlu0 %v10591_v49, %s10608_s24  ;;  %v7259_v57 = vpop.f32.mrf.mxu0 }
 0x440   : > { %10094 = vmatmul.mubr.msk.bf16.vlgmr.msra.gmra.mxu0 %vm358_vm0, %v8485_v14  ;;  %v10110_v57 = vld [vmem:[%s12963_s6 + $0x20] sm:$0xf] }
 0x441   : > { %8707 = vmatprep.mubr.bf16.mxu0 %v13052_v56  ;;  %v7370_v28 = vpop.f32.mrf.mxu0 }
 0x442   : > { %v12801_v45 = vadd.f32 %v7370_v28, %v7319_v21  ;;  %v10108_v21 = vld [vmem:[%s12963_s6 + $0x1c] sm:$0xf] }
 0x443   : > { %8476 = vperm.xlu1 %10385, %v7379_v12   ;;  %9463 = vrot.lane.b32.xlu0 %v10591_v49, %s10609_s25  ;;  %v7372_v27 = vpop.f32.mrf.mxu0 }
 0x444   : > { %v12804_v6 = vadd.f32 %v7372_v27, %v7320_v54  ;;  %v10592_v27 = vld [vmem:[#allocation2 + $0x20] ss:$44 sps:$4 sm:$0xff]  }
 0x445   : > { %v7374_v19 = vpop.f32.mrf.mxu0 }
 0x447   : > { %9514 = vperm.xlu1 %10385, %v7379_v12   ;;  %7929 = vperm.xlu0 %10384, %v7379_v12   ;;  %v7375_v23 = vpop.f32.mrf.mxu0 }
 0x449   : > { %v12806_v3 = vpop.f32.mrf.mxu0 }
 0x44b   : > { %9023 = vperm.xlu0 %10384, %v7379_v12   ;;  %v12808_v36 = vpop.f32.mrf.mxu0 }
 0x44d   : > { %v7507_v22 = vpop.f32.mrf.mxu0 }
 0x44f   : > { %v7508_v35 = vpop.f32.mrf.mxu0 }
 0x450   : > { %v9032_v35 = vld [vmem:[%s12963_s6] sm:$0xf] }
 0x474   : > { %v8509_v34 = vpop.permute.xlu0 %8508  ;;  %v8610_v1 = vpop.permute.xlu1 %8609 }
 0x475   : > { %v8511_v17 = vsel %vm497_vm1, %v8507_v44, %v8509_v34  ;;  %v8612_v40 = vsel %vm651_vm2, %v8608_v41, %v8610_v1  ;;  %v10120_v1 = vld [vmem:[%s12963_s6 + $0xc] sm:$0xf] }
 0x476   : > { %8531 = vmatprep.subr.bf16.mxu1 %v8511_v17 }
 0x477   : > { %8532 = vmatpush1.bf16.msra.mxu1 %v8510_v5 }
 0x478   : > { %v8720_v20 = vpop.permute.xlu0 %8719  ;;  %8632 = vmatprep.subr.bf16.mxu1 %v8612_v40  ;;  %v8777_v51 = vpop.permute.xlu1 %8776 }
 0x479   : > { %v8725_v62 = vsel %vm925_vm4, %v8720_v20, %v8722_v0  ;;  %v8782_v8 = vsel %vm1062_vm5, %v8777_v51, %v8779_v18 }
 0x47a   : > { %10093 = vmatmul.mubr.msk.bf16.vlgmr.msra.gmra.mxu1 %vm358_vm0, %v10089_v58 }
 0x47b   : > { %8633 = vmatpush1.bf16.msra.mxu1 %v8611_v24  ;;  %8650 = vmatprep.mubr.bf16.mxu1 %v13052_v56 }
 0x47c   : > { %v8667_v55 = vpop.permute.xlu0 %8666  ;;  %v8724_v15 = vpop.permute.xlu1 %8723 }
 0x47d   : > { %v8669_v26 = vsel %vm788_vm3, %v8665_v37, %v8667_v55  ;;  %v8726_v42 = vsel %vm925_vm4, %v8722_v0, %v8724_v15  ;;  %v10118_v37 = vld [vmem:[%s12963_s6 + $0x8] sm:$0xf]  ;;  %v10122_v15 = vld [vmem:[%s12963_s6 + $0x10] sm:$0xf] }
 0x47e   : > { %8689 = vmatprep.subr.bf16.mxu0 %v8669_v26  ;;  %8746 = vmatprep.subr.bf16.mxu1 %v8726_v42 }
 0x47f   : > { %8690 = vmatpush1.bf16.msra.mxu0 %v8668_v50 }
 0x480   : > { %v8781_v63 = vpop.permute.xlu0 %8780  ;;  %v8855_v38 = vpop.permute.xlu1 %8854 }
 0x481   : > { %v8783_v25 = vsel %vm1062_vm5, %v8779_v18, %v8781_v63 }
 0x482   : > { %10096 = vmatmul.mubr.msk.bf16.vlgmr.msra.gmra.mxu1 %vm358_vm0, %v10095_v9  ;;  %8803 = vmatprep.subr.bf16.mxu0 %v8783_v25 }
 0x483   : > { %8747 = vmatpush1.bf16.msra.mxu1 %v8725_v62  ;;  %10098 = vmatmul.mubr.msk.bf16.vlgmr.msra.gmra.mxu0 %vm358_vm0, %v10097_v48  ;;  %v10124_v62 = vld [vmem:[%s12963_s6 + $0x14] sm:$0xf] }
 0x484   : > { %8804 = vmatpush1.bf16.msra.mxu0 %v8782_v8  ;;  %v8853_v43 = vpop.permute.xlu0 %8852  ;;  %v8910_v10 = vpop.permute.xlu1 %8909  ;;  %8764 = vmatprep.mubr.bf16.mxu1 %v13052_v56 }
 0x485   : > { %v8857_v33 = vsel %vm1216_vm6, %v8853_v43, %v8855_v38  ;;  %8821 = vmatprep.mubr.bf16.mxu0 %v13052_v56 }
 0x486   : > { %8877 = vmatprep.subr.bf16.mxu1 %v8857_v33 }
 0x488   : > { %v8908_v30 = vpop.permute.xlu1 %8907 }
 0x489   : > { %v8851_v61 = vpop.permute.xlu0 %8850  ;;  %v8913_v13 = vsel %vm1370_vm7, %v8908_v30, %v8910_v10 }
 0x48a   : > { %v8856_v60 = vsel %vm1216_vm6, %v8851_v61, %v8853_v43  ;;  %10100 = vmatmul.mubr.msk.bf16.vlgmr.msra.gmra.mxu1 %vm358_vm0, %v10099_v39 }
 0x48b   : > { %8878 = vmatpush1.bf16.msra.mxu1 %v8856_v60  ;;  %10102 = vmatmul.mubr.msk.bf16.vlgmr.msra.gmra.mxu0 %vm358_vm0, %v10101_v7  ;;  %v10126_v7 = vld [vmem:[%s12963_s6 + $0x18] sm:$0xf] }
 0x48c   : > { %8895 = vmatprep.mubr.bf16.mxu1 %v13052_v56  ;;  %8952 = vmatprep.mubr.bf16.mxu0 %v13052_v56 }
 0x48d   : > { %v8912_v49 = vpop.permute.xlu0 %8911  ;;  %v8969_v29 = vpop.permute.xlu1 %8968 }
 0x48e   : > { %v8914_v32 = vsel %vm1370_vm7, %v8910_v10, %v8912_v49 }
 0x48f   : > { %8934 = vmatprep.subr.bf16.mxu0 %v8914_v32 }
 0x490   : > { %8935 = vmatpush1.bf16.msra.mxu0 %v8913_v13 }
 0x491   : > { %v8967_v12 = vpop.permute.xlu0 %8966  ;;  %v9047_v46 = vpop.permute.xlu1 %9046  ;;  %10308 = vmatprep.subr.bf16.mxu0 %v13016_v31 }
 0x492   : > { %v8971_v14 = vsel %vm1507_vm8, %v8967_v12, %v8969_v29  ;;  %10107 = vmatmul.mubr.msk.bf16.vlgmr.msra.gmra.mxu1 %vm358_vm0, %v10103_v11 }
 0x493   : > { %8991 = vmatprep.subr.bf16.mxu1 %v8971_v14  ;;  %10109 = vmatmul.mubr.msk.bf16.vlgmr.msra.gmra.mxu0 %vm358_vm0, %v10108_v21 }
 0x494   : > { %9009 = vmatprep.mubr.bf16.mxu1 %v13052_v56  ;;  %10310 = vmatprep.mubr.msk.bf16.mxu0 %vm10611_vm9, %v13016_v31  ;;  %v10112_v56 = vld [vmem:[%s12963_s6 + $0x4] sm:$0xf] }
 0x495   : > { %v8965_v59 = vpop.permute.xlu0 %8964  ;;  %v9146_v47 = vpop.permute.xlu1 %9145 }
 0x496   : > { %v8970_v54 = vsel %vm1507_vm8, %v8965_v59, %v8967_v12  ;;  %v10130_v59 = vld [vmem:[%s12963_s6 + $0x1c] sm:$0xf] }
 0x497   : > { %8992 = vmatpush1.bf16.msra.mxu1 %v8970_v54 }
 0x498   : > { %10314 = vmatprep.subr.bf16.mxu1 %v13016_v31 }
 0x499   : > { %v9049_v53 = vpop.permute.xlu0 %9048  ;;  %v9197_v16 = vpop.permute.xlu1 %9196 }
 0x49a   : > { %v9050_v28 = vsel %vm497_vm1, %v9047_v46, %v9049_v53  ;;  %10111 = vmatmul.mubr.msk.bf16.vlgmr.msra.gmra.mxu1 %vm358_vm0, %v10110_v57 }
 0x49b   : > { %10309 = vmatpush3.bf16.msra.mxu0 %v9050_v28  ;;  %10315 = vmatpush3.bf16.msra.mxu1 %v10592_v27 }
 0x49c   : > { %10320 = vmatprep.subr.bf16.mxu0 %v13016_v31  ;;  %10316 = vmatprep.mubr.msk.bf16.mxu1 %vm10611_vm9, %v13016_v31 }
 0x49d   : > { %v9148_v19 = vpop.permute.xlu0 %9147  ;;  %v9248_v23 = vpop.permute.xlu1 %9247  ;;  %10326 = vmatprep.subr.bf16.mxu1 %v13016_v31 }
 0x49e   : > { %v9149_v22 = vsel %vm651_vm2, %v9146_v47, %v9148_v19  ;;  %10311 = vmatmul.mubr.msk.bf16.vlgmr.msra.gmra.mxu0 %vm358_vm0, %v10112_v56 }
 0x49f   : > { %10321 = vmatpush3.bf16.msra.mxu0 %v9149_v22  ;;  %10322 = vmatprep.mubr.msk.bf16.mxu0 %vm10611_vm9, %v13016_v31 }
 0x4a0   : > { %10332 = vmatprep.subr.bf16.mxu0 %v13016_v31 }
 0x4a1   : > { %v9199_v44 = vpop.permute.xlu0 %9198  ;;  %v9299_v41 = vpop.permute.xlu1 %9298 }
 0x4a2   : > { %v9200_v52 = vsel %vm788_vm3, %v9197_v16, %v9199_v44  ;;  %10317 = vmatmul.mubr.msk.bf16.vlgmr.msra.gmra.mxu1 %vm358_vm0, %v9032_v35 }
 0x4a3   : > { %v7457_v2 = vpop.f32.mrf.mxu1  ;;  %10327 = vmatpush3.bf16.msra.mxu1 %v9200_v52  ;;  %10328 = vmatprep.mubr.msk.bf16.mxu1 %vm10611_vm9, %v13016_v31 }
 0x4a4   : > { %10338 = vmatprep.subr.bf16.mxu1 %v13016_v31  ;;  %v7504_v40 = vadd.f32 %v12806_v3, %v7457_v2 }
 0x4a5   : > { %v9250_v4 = vpop.permute.xlu0 %9249  ;;  %v7459_v0 = vpop.f32.mrf.mxu1 }
 0x4a6   : > { %v9251_v18 = vsel %vm925_vm4, %v9248_v23, %v9250_v4  ;;  %10323 = vmatmul.mubr.msk.bf16.vlgmr.msra.gmra.mxu0 %vm358_vm0, %v10118_v37  ;;  %v9360_v5 = vpop.permute.xlu1 %9359  ;;  %v7506_v55 = vadd.f32 %v12808_v36, %v7459_v0 }
 0x4a7   : > { %10333 = vmatpush3.bf16.msra.mxu0 %v9251_v18  ;;  %10334 = vmatprep.mubr.msk.bf16.mxu0 %vm10611_vm9, %v13016_v31  ;;  %v7461_v34 = vpop.f32.mrf.mxu1 }
 0x4a8   : > { %10344 = vmatprep.subr.bf16.mxu0 %v13016_v31  ;;  %v7615_v17 = vpop.f32.mrf.mxu0 }
 0x4a9   : > { %v9301_v58 = vpop.permute.xlu0 %9300  ;;  %v7462_v20 = vpop.f32.mrf.mxu1 }
 0x4aa   : > { %v9302_v51 = vsel %vm1062_vm5, %v9299_v41, %v9301_v58  ;;  %v7617_v24 = vpop.f32.mrf.mxu0  ;;  %10329 = vmatmul.mubr.msk.bf16.vlgmr.msra.gmra.mxu1 %vm358_vm0, %v10120_v1  ;;  %v9411_v38 = vpop.permute.xlu1 %9410 }
 0x4ab   : > { %v7558_v26 = vpop.f32.mrf.mxu1  ;;  %10339 = vmatpush3.bf16.msra.mxu1 %v9302_v51  ;;  %10340 = vmatprep.mubr.msk.bf16.mxu1 %vm10611_vm9, %v13016_v31 }
 0x4ac   : > { %v7619_v42 = vpop.f32.mrf.mxu0  ;;  %v7565_v3 = vadd.f32 %v7558_v26, %v7504_v40  ;;  %10350 = vmatprep.subr.bf16.mxu1 %v13016_v31 }
 0x4ad   : > { %v9362_v50 = vpop.permute.xlu0 %9361  ;;  %v7560_v9 = vpop.f32.mrf.mxu1 }
 0x4ae   : > { %v9363_v63 = vsel %vm1216_vm6, %v9360_v5, %v9362_v50  ;;  %10335 = vmatmul.mubr.msk.bf16.vlgmr.msra.gmra.mxu0 %vm358_vm0, %v10122_v15  ;;  %v7620_v36 = vpop.f32.mrf.mxu0  ;;  %v7566_v48 = vadd.f32 %v7560_v9, %v7506_v55  ;;  %v7622_v43 = vadd.f32 %v7615_v17, %v7565_v3  ;;  %v9462_v29 = vpop.permute.xlu1 %9461 }
 0x4af   : > { %10345 = vmatpush3.bf16.msra.mxu0 %v9363_v63  ;;  %10346 = vmatprep.mubr.msk.bf16.mxu0 %vm10611_vm9, %v13016_v31  ;;  %v7562_v25 = vpop.f32.mrf.mxu1 }
 0x4b0   : > { %10356 = vmatprep.subr.bf16.mxu0 %v13016_v31  ;;  %v7729_v8 = vpop.f32.mrf.mxu0  ;;  %v7623_v30 = vadd.f32 %v7617_v24, %v7566_v48 }
 0x4b1   : > { %v9413_v10 = vpop.permute.xlu0 %9412  ;;  %v7563_v33 = vpop.f32.mrf.mxu1 }
 0x4b2   : > { %v9414_v39 = vsel %vm1370_vm7, %v9411_v38, %v9413_v10  ;;  %v7731_v61 = vpop.f32.mrf.mxu0  ;;  %10341 = vmatmul.mubr.msk.bf16.vlgmr.msra.gmra.mxu1 %vm358_vm0, %v10124_v62 }
 0x4b3   : > { %v7672_v60 = vpop.f32.mrf.mxu1  ;;  %10351 = vmatpush3.bf16.msra.mxu1 %v9414_v39  ;;  %10352 = vmatprep.mubr.msk.bf16.mxu1 %vm10611_vm9, %v13016_v31 }
 0x4b4   : > { %v7733_v49 = vpop.f32.mrf.mxu0  ;;  %v7679_v32 = vadd.f32 %v7672_v60, %v7622_v43 }
 0x4b5   : > { %v9464_v13 = vpop.permute.xlu0 %9463  ;;  %v7674_v11 = vpop.f32.mrf.mxu1 }
 0x4b6   : > { %v9465_v12 = vsel %vm1507_vm8, %v9462_v29, %v9464_v13  ;;  %10347 = vmatmul.mubr.msk.bf16.vlgmr.msra.gmra.mxu0 %vm358_vm0, %v10126_v7  ;;  %v7734_v46 = vpop.f32.mrf.mxu0  ;;  %v7680_v21 = vadd.f32 %v7674_v11, %v7623_v30  ;;  %v7736_v54 = vadd.f32 %v7729_v8, %v7679_v32 }
 0x4b7   : > { %10357 = vmatpush3.bf16.msra.mxu0 %v9465_v12  ;;  %10358 = vmatprep.mubr.msk.bf16.mxu0 %vm10611_vm9, %v13016_v31  ;;  %v7676_v14 = vpop.f32.mrf.mxu1  ;;  %v10132_v31 = vld [vmem:[%s12963_s6 + $0x20] sm:$0xf] }
 0x4b8   : > { %v7860_v47 = vpop.f32.mrf.mxu0  ;;  %v7737_v27 = vadd.f32 %v7731_v61, %v7680_v21 }
 0x4b9   : > { %v7677_v57 = vpop.f32.mrf.mxu1 }
 0x4ba   : > { %v7383_v53 = vpop.permute.xlu1 %7382  ;;  %10353 = vmatmul.mubr.msk.bf16.vlgmr.msra.gmra.mxu1 %vm358_vm0, %v10130_v59  ;;  %v7862_v56 = vpop.f32.mrf.mxu0 }
 0x4bb   : > { %v7385_v16 = vadd.f32 %v7383_v53, %v12801_v45  ;;  %v7386_v28 = vadd.f32 %v7383_v53, %v12804_v6  ;;  %v7803_v19 = vpop.f32.mrf.mxu1 }
 0x4bc   : > { %v7810_v22 = vadd.f32 %v7803_v19, %v7736_v54  ;;  %v7864_v6 = vpop.f32.mrf.mxu0 }
 0x4bd   : > { %v7387_v23 = vmax.f32 %v7385_v16, 0.0  ;;  %v7388_v45 = vmax.f32 %v7386_v28, 0.0  ;;  %v7805_v35 = vpop.f32.mrf.mxu1 }
 0x4be   : > { %10359 = vmatmul.mubr.msk.bf16.vlgmr.msra.gmra.mxu0 %vm358_vm0, %v10132_v31  ;;  %v7811_v44 = vadd.f32 %v7805_v35, %v7737_v27  ;;  %v7865_v52 = vpop.f32.mrf.mxu0  ;;  %v7867_v37 = vadd.f32 %v7860_v47, %v7810_v22 }
 0x4bf   : > { %7389 = vst [vmem:[%s12942_s21] sm:$0xff] %v7387_v23  ;;  %7390 = vst [vmem:[%s12942_s21 + $0x8] sm:$0xff] %v7388_v45  ;;  %v7807_v41 = vpop.f32.mrf.mxu1  ;;  %v8477_v52 = vpop.permute.xlu1 %8476 }
 0x4c0   : > { %v7868_v4 = vadd.f32 %v7862_v56, %v7811_v44 }
 0x4c1   : > { %v7808_v2 = vpop.f32.mrf.mxu1 }
 0x4c2   : > { %v7930_v34 = vpop.permute.xlu0 %7929 }
 0x4c3   : > { %v7917_v0 = vpop.f32.mrf.mxu1 }
 0x4c4   : > { %v7924_v18 = vadd.f32 %v7917_v0, %v7867_v37 }
 0x4c5   : > { %v7919_v1 = vpop.f32.mrf.mxu1 }
 0x4c6   : > { %v7932_v17 = vadd.f32 %v7930_v34, %v7924_v18  ;;  %v7925_v5 = vadd.f32 %v7919_v1, %v7868_v4 }
 0x4c7   : > { %v7921_v40 = vpop.f32.mrf.mxu1 }
 0x4c8   : > { %v7934_v58 = vmax.f32 %v7932_v17, 0.0  ;;  %v7933_v20 = vadd.f32 %v7930_v34, %v7925_v5 }
 0x4c9   : > { %v7922_v51 = vpop.f32.mrf.mxu1 }
 0x4ca   : > { %7936 = vst [vmem:[%s12942_s21 + $0x10] sm:$0xff] %v7934_v58  ;;  %v7935_v24 = vmax.f32 %v7933_v20, 0.0 }
 0x4cb   : > { %v8050_v55 = vpop.f32.mrf.mxu1 }
 0x4cc   : > { %7937 = vst [vmem:[%s12942_s21 + $0x18] sm:$0xff] %v7935_v24 }
 0x4cd   : > { %v8052_v15 = vpop.f32.mrf.mxu1 }
 0x4cf   : > { %v8054_v26 = vpop.f32.mrf.mxu1 }
 0x4d1   : > { %v8055_v42 = vpop.f32.mrf.mxu1 }
 0x4d8   : > { %v8004_v3 = vpop.f32.mrf.mxu0 }
 0x4d9   : > { %v8051_v36 = vadd.f32 %v8050_v55, %v8004_v3 }
 0x4da   : > { %v8006_v50 = vpop.f32.mrf.mxu0 }
 0x4db   : > { %v8053_v25 = vadd.f32 %v8052_v15, %v8006_v50 }
 0x4dc   : > { %v8008_v9 = vpop.f32.mrf.mxu0  ;;  %v8162_v63 = vpop.f32.mrf.mxu1 }
 0x4de   : > { %v8009_v38 = vpop.f32.mrf.mxu0  ;;  %v8164_v48 = vpop.f32.mrf.mxu1 }
 0x4e0   : > { %v8105_v62 = vpop.f32.mrf.mxu0  ;;  %v8166_v8 = vpop.f32.mrf.mxu1 }
 0x4e1   : > { %v8112_v43 = vadd.f32 %v8105_v62, %v8051_v36 }
 0x4e2   : > { %v8107_v10 = vpop.f32.mrf.mxu0  ;;  %v8167_v33 = vpop.f32.mrf.mxu1 }
 0x4e3   : > { %v8113_v39 = vadd.f32 %v8107_v10, %v8053_v25  ;;  %v8169_v7 = vadd.f32 %v8162_v63, %v8112_v43 }
 0x4e4   : > { %v8109_v61 = vpop.f32.mrf.mxu0  ;;  %v8276_v30 = vpop.f32.mrf.mxu1 }
 0x4e5   : > { %v8170_v29 = vadd.f32 %v8164_v48, %v8113_v39 }
 0x4e6   : > { %v8110_v60 = vpop.f32.mrf.mxu0  ;;  %v8278_v49 = vpop.f32.mrf.mxu1 }
 0x4e8   : > { %v8219_v32 = vpop.f32.mrf.mxu0  ;;  %v8280_v13 = vpop.f32.mrf.mxu1 }
 0x4e9   : > { %v8226_v11 = vadd.f32 %v8219_v32, %v8169_v7 }
 0x4ea   : > { %v8221_v12 = vpop.f32.mrf.mxu0  ;;  %v8281_v46 = vpop.f32.mrf.mxu1 }
 0x4eb   : > { %v8227_v21 = vadd.f32 %v8221_v12, %v8170_v29  ;;  %v8283_v47 = vadd.f32 %v8276_v30, %v8226_v11 }
 0x4ec   : > { %v8223_v14 = vpop.f32.mrf.mxu0  ;;  %v8407_v59 = vpop.f32.mrf.mxu1 }
 0x4ed   : > { %v8284_v53 = vadd.f32 %v8278_v49, %v8227_v21 }
 0x4ee   : > { %v8224_v54 = vpop.f32.mrf.mxu0  ;;  %v8409_v57 = vpop.f32.mrf.mxu1 }
 0x4f0   : > { %v8350_v16 = vpop.f32.mrf.mxu0  ;;  %v8411_v28 = vpop.f32.mrf.mxu1 }
 0x4f1   : > { %v8357_v27 = vadd.f32 %v8350_v16, %v8283_v47 }
 0x4f2   : > { %v8352_v31 = vpop.f32.mrf.mxu0  ;;  %v8412_v56 = vpop.f32.mrf.mxu1 }
 0x4f3   : > { %v8358_v19 = vadd.f32 %v8352_v31, %v8284_v53  ;;  %v8414_v45 = vadd.f32 %v8407_v59, %v8357_v27 }
 0x4f4   : > { %v8354_v23 = vpop.f32.mrf.mxu0 }
 0x4f5   : > { %v8415_v6 = vadd.f32 %v8409_v57, %v8358_v19  ;;  %v9024_v19 = vpop.permute.xlu0 %9023 }
 0x4f6   : > { %v8355_v22 = vpop.f32.mrf.mxu0 }
 0x4f8   : > { %v8464_v35 = vpop.f32.mrf.mxu0 }
 0x4f9   : > { %v8471_v44 = vadd.f32 %v8464_v35, %v8414_v45 }
 0x4fa   : > { %v8466_v41 = vpop.f32.mrf.mxu0 }
 0x4fb   : > { %v8479_v37 = vadd.f32 %v8477_v52, %v8471_v44  ;;  %v8472_v2 = vadd.f32 %v8466_v41, %v8415_v6 }
 0x4fc   : > { %v8468_v4 = vpop.f32.mrf.mxu0 }
 0x4fd   : > { %v8481_v0 = vmax.f32 %v8479_v37, 0.0  ;;  %v8480_v18 = vadd.f32 %v8477_v52, %v8472_v2 }
 0x4fe   : > { %v8469_v34 = vpop.f32.mrf.mxu0 }
 0x4ff   : > { %8483 = vst [vmem:[%s12942_s21 + $0x20] sm:$0xff] %v8481_v0  ;;  %v8482_v1 = vmax.f32 %v8480_v18, 0.0 }
 0x500   : > { %v8597_v17 = vpop.f32.mrf.mxu0 }
 0x501   : > { %8484 = vst [vmem:[%s12942_s21 + $0x28] sm:$0xff] %v8482_v1 }
 0x502   : > { %v8599_v5 = vpop.f32.mrf.mxu0 }
 0x504   : > { %v8601_v40 = vpop.f32.mrf.mxu0 }
 0x506   : > { %v8602_v58 = vpop.f32.mrf.mxu0 }
 0x53a   : > { %v8551_v20 = vpop.f32.mrf.mxu1 }
 0x53b   : > { %v8598_v9 = vadd.f32 %v8597_v17, %v8551_v20 }
 0x53c   : > { %v8553_v51 = vpop.f32.mrf.mxu1 }
 0x53d   : > { %v8600_v38 = vadd.f32 %v8599_v5, %v8553_v51 }
 0x53e   : > { %v8555_v24 = vpop.f32.mrf.mxu1 }
 0x540   : > { %v8556_v55 = vpop.f32.mrf.mxu1 }
 0x542   : > { %v8652_v15 = vpop.f32.mrf.mxu1 }
 0x543   : > { %v8709_v26 = vpop.f32.mrf.mxu0  ;;  %v8659_v48 = vadd.f32 %v8652_v15, %v8598_v9 }
 0x544   : > { %v8654_v42 = vpop.f32.mrf.mxu1 }
 0x545   : > { %v8711_v3 = vpop.f32.mrf.mxu0  ;;  %v8660_v8 = vadd.f32 %v8654_v42, %v8600_v38  ;;  %v8716_v33 = vadd.f32 %v8709_v26, %v8659_v48 }
 0x546   : > { %v8656_v50 = vpop.f32.mrf.mxu1 }
 0x547   : > { %v8713_v63 = vpop.f32.mrf.mxu0  ;;  %v8717_v30 = vadd.f32 %v8711_v3, %v8660_v8 }
 0x548   : > { %v8657_v36 = vpop.f32.mrf.mxu1 }
 0x549   : > { %v8714_v25 = vpop.f32.mrf.mxu0 }
 0x54a   : > { %v8766_v62 = vpop.f32.mrf.mxu1 }
 0x54b   : > { %v8823_v43 = vpop.f32.mrf.mxu0  ;;  %v8773_v7 = vadd.f32 %v8766_v62, %v8716_v33 }
 0x54c   : > { %v8768_v10 = vpop.f32.mrf.mxu1 }
 0x54d   : > { %v8825_v39 = vpop.f32.mrf.mxu0  ;;  %v8774_v29 = vadd.f32 %v8768_v10, %v8717_v30  ;;  %v8830_v11 = vadd.f32 %v8823_v43, %v8773_v7 }
 0x54e   : > { %v8770_v61 = vpop.f32.mrf.mxu1 }
 0x54f   : > { %v8827_v60 = vpop.f32.mrf.mxu0  ;;  %v8831_v21 = vadd.f32 %v8825_v39, %v8774_v29 }
 0x550   : > { %v8771_v49 = vpop.f32.mrf.mxu1 }
 0x551   : > { %v8828_v32 = vpop.f32.mrf.mxu0 }
 0x552   : > { %v8897_v13 = vpop.f32.mrf.mxu1 }
 0x553   : > { %v8954_v12 = vpop.f32.mrf.mxu0  ;;  %v8904_v14 = vadd.f32 %v8897_v13, %v8830_v11  ;;  %v9515_v11 = vpop.permute.xlu1 %9514 }
 0x554   : > { %v8899_v46 = vpop.f32.mrf.mxu1 }
 0x555   : > { %v8956_v59 = vpop.f32.mrf.mxu0  ;;  %v8905_v54 = vadd.f32 %v8899_v46, %v8831_v21  ;;  %v8961_v16 = vadd.f32 %v8954_v12, %v8904_v14 }
 0x556   : > { %v8901_v47 = vpop.f32.mrf.mxu1 }
 0x557   : > { %v8958_v57 = vpop.f32.mrf.mxu0  ;;  %v8962_v31 = vadd.f32 %v8956_v59, %v8905_v54 }
 0x558   : > { %v8902_v53 = vpop.f32.mrf.mxu1 }
 0x559   : > { %v8959_v28 = vpop.f32.mrf.mxu0 }
 0x55a   : > { %v9011_v27 = vpop.f32.mrf.mxu1 }
 0x55b   : > { %v9018_v56 = vadd.f32 %v9011_v27, %v8961_v16 }
 0x55c   : > { %v9013_v23 = vpop.f32.mrf.mxu1 }
 0x55d   : > { %v9026_v45 = vadd.f32 %v9024_v19, %v9018_v56  ;;  %v9019_v22 = vadd.f32 %v9013_v23, %v8962_v31 }
 0x55e   : > { %v9089_v6 = vpop.f32.mrf.mxu0  ;;  %v9015_v35 = vpop.f32.mrf.mxu1 }
 0x55f   : > { %v9028_v44 = vmax.f32 %v9026_v45, 0.0  ;;  %v9027_v52 = vadd.f32 %v9024_v19, %v9019_v22 }
 0x560   : > { %v10312_v41 = vpop.f32.mrf.mxu0  ;;  %v9016_v37 = vpop.f32.mrf.mxu1 }
 0x561   : > { %9030 = vst [vmem:[%s12942_s21 + $0x30] sm:$0xff] %v9028_v44  ;;  %v9029_v2 = vmax.f32 %v9027_v52, 0.0 }
 0x562   : > { %v9092_v4 = vpop.f32.mrf.mxu0  ;;  %v9138_v0 = vpop.f32.mrf.mxu1 }
 0x563   : > { %9031 = vst [vmem:[%s12942_s21 + $0x38] sm:$0xff] %v9029_v2  ;;  %v9139_v58 = vadd.f32 %v9138_v0, %v9089_v6 }
 0x564   : > { %v10313_v18 = vpop.f32.mrf.mxu0  ;;  %v10318_v34 = vpop.f32.mrf.mxu1 }
 0x566   : > { %v9188_v1 = vpop.f32.mrf.mxu0  ;;  %v9141_v17 = vpop.f32.mrf.mxu1 }
 0x567   : > { %v9194_v15 = vadd.f32 %v9188_v1, %v9139_v58 }
 0x568   : > { %v10324_v5 = vpop.f32.mrf.mxu0  ;;  %v10319_v40 = vpop.f32.mrf.mxu1 }
 0x56a   : > { %v9191_v20 = vpop.f32.mrf.mxu0  ;;  %v9239_v51 = vpop.f32.mrf.mxu1 }
 0x56b   : > { %v9245_v3 = vadd.f32 %v9239_v51, %v9194_v15 }
 0x56c   : > { %v10325_v24 = vpop.f32.mrf.mxu0  ;;  %v10330_v55 = vpop.f32.mrf.mxu1 }
 0x56e   : > { %v9290_v26 = vpop.f32.mrf.mxu0  ;;  %v9242_v42 = vpop.f32.mrf.mxu1 }
 0x56f   : > { %v9296_v38 = vadd.f32 %v9290_v26, %v9245_v3 }
 0x570   : > { %v10336_v50 = vpop.f32.mrf.mxu0  ;;  %v10331_v9 = vpop.f32.mrf.mxu1 }
 0x572   : > { %v9293_v63 = vpop.f32.mrf.mxu0  ;;  %v9341_v36 = vpop.f32.mrf.mxu1 }
 0x573   : > { %v9347_v62 = vadd.f32 %v9341_v36, %v9296_v38 }
 0x574   : > { %v10337_v48 = vpop.f32.mrf.mxu0  ;;  %v10342_v25 = vpop.f32.mrf.mxu1 }
 0x576   : > { %v9402_v8 = vpop.f32.mrf.mxu0  ;;  %v9344_v43 = vpop.f32.mrf.mxu1 }
 0x577   : > { %v9408_v39 = vadd.f32 %v9402_v8, %v9347_v62 }
 0x578   : > { %v10348_v10 = vpop.f32.mrf.mxu0  ;;  %v10343_v33 = vpop.f32.mrf.mxu1 }
 0x57a   : > { %v9405_v61 = vpop.f32.mrf.mxu0  ;;  %v9453_v30 = vpop.f32.mrf.mxu1 }
 0x57b   : > { %v9459_v7 = vadd.f32 %v9453_v30, %v9408_v39 }
 0x57c   : > { %v10349_v60 = vpop.f32.mrf.mxu0  ;;  %v10354_v49 = vpop.f32.mrf.mxu1 }
 0x57e   : > { %v9504_v29 = vpop.f32.mrf.mxu0  ;;  %v9456_v13 = vpop.f32.mrf.mxu1 }
 0x57f   : > { %v9510_v32 = vadd.f32 %v9504_v29, %v9459_v7 }
 0x580   : > { %v10360_v12 = vpop.f32.mrf.mxu0  ;;  %v10355_v21 = vpop.f32.mrf.mxu1 }
 0x581   : > { %v9517_v46 = vadd.f32 %v9515_v11, %v9510_v32 }
 0x582   : > { %v9507_v14 = vpop.f32.mrf.mxu0 }
 0x583   : > { %v9518_v59 = vmax.f32 %v9517_v46, 0.0 }
 0x584   : > { %v10361_v47 = vpop.f32.mrf.mxu0 }
 0x585   : > { %9519 = vst [vmem:[%s12942_s21 + $0x40] sm:$0xff] %v9518_v59 }
 0x586 PF: > { %s18_s27 = sadd.s32 1, %s10599_s27  }
 0x587   : > { %p15_p4 = scmp.ge.s32.totalorder %s18_s27, 4  }
 0x589   :  { %17 = sbr.rel (!%p15_p4) target bundleno = 1 (0x1), region = 109 }

</bundles_post_ra>
